<compile_context>
chip_gen: v6e
topology: v6e:2x2x1
jax: 0.10.0
libtpu: 0.0.40
codegen_flags: <defaults>
</compile_context>

<pallas_src>
import math

import jax
import jax.numpy as jnp
from jax import lax
from jax.experimental import pallas as pl
from jax.experimental.pallas import tpu as pltpu

# Small, module-consistent sizes.
B, F, V, H, C = 8, 32, 16, 32, 16        # batch, sender feat, vocab, hidden, classes
SENDER_ENTROPY_COEFF = 0.1
RECEIVER_ENTROPY_COEFF = 0.0

LANES = 128
MAX_GPB = 32            # games per grid step -> GPB*B = 256 rows = v6e/v7x MXU M dim

# --- packed parameter slab layout (rows x 128 lanes, fetched once) ---
_WS_R0 = 0              # rows [0, F+1):      [Ws; bs]        (F+1, V)
_WR_R0 = 40             # rows [40, 40+V+1):  [emb @ wr; br]  (V+1, C)  fused receiver
P_ROWS = 64

# --- per-example data row layout (one (B,128) tile per game) ---
_X_L0 = 0               # lanes [0, F):        x
_ONE_L = F              # lane F (=32):        1.0  (bias column folded into matmul)
_GUM_L0 = 64            # lanes [64, 64+V):    gumbel noise
_LBL_L = 96             # lane 96:             label (stored as f32)


def _symbol_game_kernel(scal_ref, param_ref, data_ref, out_ref):
    # Scalars ride the SMEM / scalar path (no (1,1)->(M,.) vreg broadcasts).
    baseline = scal_ref[0]
    s_coeff = scal_ref[1]
    # scal_ref[2] (receiver entropy coeff) is unused: the receiver is a
    # ReinforceDeterministicWrapper, so receiver log_prob = entropy = 0 exactly.

    gpb = out_ref.shape[0]          # games handled by this grid step
    m_rows = data_ref.shape[0]      # = gpb * B example rows
    b = m_rows // gpb

    # ----- packed parameter views (constant block index -> DMA'd once) ------
    ws1 = param_ref[_WS_R0:_WS_R0 + F + 1, 0:V]       # (F+1, V), last row = bs
    wr1 = param_ref[_WR_R0:_WR_R0 + V + 1, 0:C]       # (V+1, C), last row = br

    # ----- per-step data: all games share one (m_rows, 128) tile ------------
    xa = data_ref[:, _X_L0:_X_L0 + F + 1]             # (m, F+1)  x with ones column
    gumbel = data_ref[:, _GUM_L0:_GUM_L0 + V]         # (m, V)
    lbl_i = data_ref[:, _LBL_L:_LBL_L + 1].astype(jnp.int32)   # (m, 1)

    # ----- Sender: Linear (+ folded bias) -> Categorical sample (Gumbel-max) -
    # Kept in f32: bf16 logits can flip the argmax on near-ties and change the
    # sampled message vs. the f32 PyTorch reference.
    logits_s = jnp.dot(xa, ws1, preferred_element_type=jnp.float32)   # (m, V)
    m_s = jnp.max(logits_s, axis=-1, keepdims=True)
    e_s = jnp.exp(logits_s - m_s)
    sum_s = jnp.sum(e_s, axis=-1, keepdims=True)
    lse_s = m_s + jnp.log(sum_s)
    p_s = e_s / sum_s                                   # exact softmax
    # entropy / log-prob without materializing the log-softmax:
    sender_entropy = lse_s - jnp.sum(p_s * logits_s, axis=-1, keepdims=True)

    z = logits_s + gumbel                               # Gumbel-perturbed logits
    z_max = jnp.max(z, axis=-1, keepdims=True)
    iota_v = lax.broadcasted_iota(jnp.int32, (m_rows, V), 1)
    msg_idx = jnp.min(jnp.where(z == z_max, iota_v, V), axis=-1, keepdims=True)
    msg_onehot = (iota_v == msg_idx).astype(jnp.float32)               # (m, V)
    sender_log_prob = jnp.sum(msg_onehot * logits_s, axis=-1, keepdims=True) - lse_s

    # ----- Receiver (ReinforceDeterministicWrapper): fused Embedding+Linear --
    # One-hot extended with an always-on lane V selecting the bias row of wr1.
    iota_v1 = lax.broadcasted_iota(jnp.int32, (m_rows, V + 1), 1)
    ext_onehot = jnp.logical_or(iota_v1 == msg_idx, iota_v1 == V).astype(jnp.float32)
    logits_r = jnp.dot(ext_onehot, wr1, preferred_element_type=jnp.float32)  # (m, C)
    # receiver_log_prob = 0, receiver_entropy = 0 (deterministic wrapper).

    # ----- Loss: per-example cross-entropy + accuracy ------------------------
    m_r = jnp.max(logits_r, axis=-1, keepdims=True)
    lse_r = m_r + jnp.log(jnp.sum(jnp.exp(logits_r - m_r), axis=-1, keepdims=True))
    iota_c = lax.broadcasted_iota(jnp.int32, (m_rows, C), 1)
    label_mask = (iota_c == lbl_i).astype(jnp.float32)
    loss = lse_r - jnp.sum(label_mask * logits_r, axis=-1, keepdims=True)    # (m, 1)

    pred_idx = jnp.min(jnp.where(logits_r == m_r, iota_c, C), axis=-1, keepdims=True)
    acc = (pred_idx == lbl_i).astype(jnp.float32)                            # (m, 1)

    # ----- REINFORCE surrogate: per-example stat columns ---------------------
    adv_lp = (loss - baseline) * sender_log_prob       # policy-loss contribution
    ent_term = -s_coeff * sender_entropy               # entropy-loss contribution
    full_term = loss + adv_lp + ent_term               # full-loss contribution
    zeros = jnp.zeros_like(loss)
    stats = jnp.concatenate(
        [full_term, adv_lp, ent_term, loss, sender_entropy, zeros, acc,
         zeros + baseline], axis=1)                                          # (m, 8)

    # Per-game mean over the B examples of each game on the MXU (one small
    # matmul) instead of a cross-sublane XLU reduce; also collapses the output
    # into ONE (gpb, 8) store per grid step instead of one (1, 8) per game.
    g_iota = lax.broadcasted_iota(jnp.int32, (gpb, m_rows), 0)
    m_iota = lax.broadcasted_iota(jnp.int32, (gpb, m_rows), 1)
    in_group = jnp.logical_and(m_iota >= g_iota * b, m_iota < (g_iota + 1) * b)
    group_mat = in_group.astype(jnp.float32) * (1.0 / b)                     # (gpb, m)
    out_ref[...] = jnp.dot(group_mat, stats, preferred_element_type=jnp.float32)


def symbol_game_reinforce_forward(params, sender_input, labels, gumbel_noise,
                                  *, mean_baseline=0.0, games_per_block=None):
    """Eval-mode forward of SymbolGameReinforce.

    Accepts a single game (sender_input (B,F), labels (B,), gumbel (B,V)) or a
    batch of G games with a leading axis.  Returns (full_loss, rest_info).
    """
    squeeze = sender_input.ndim == 2
    if squeeze:
        sender_input = sender_input[None]
        labels = labels[None]
        gumbel_noise = gumbel_noise[None]
    G = sender_input.shape[0]

    # Games per grid step: fill the MXU M dimension (MAX_GPB*B = 256 rows) but
    # keep the grid length >= 2 so both v7x TensorCores get work.
    if games_per_block is None:
        gpb = min(MAX_GPB, max(1, G // 2)) if G > 1 else 1
    else:
        gpb = int(max(1, min(games_per_block, G)))
    n_steps = (G + gpb - 1) // gpb
    Gp = n_steps * gpb
    m_rows = gpb * B

    # --- one parameter slab, fetched once (constant block index) ------------
    ws1 = jnp.concatenate([params["ws"], params["bs"].reshape(1, V)], axis=0)  # (F+1,V)
    w_recv = jnp.dot(params["emb"], params["wr"])            # fold Embedding @ Linear
    wr1 = jnp.concatenate([w_recv, params["br"].reshape(1, C)], axis=0)        # (V+1,C)
    pslab = jnp.zeros((P_ROWS, LANES), jnp.float32)
    pslab = pslab.at[_WS_R0:_WS_R0 + F + 1, 0:V].set(ws1)
    pslab = pslab.at[_WR_R0:_WR_R0 + V + 1, 0:C].set(wr1)

    # --- scalars live in SMEM (scalar path) ----------------------------------
    scal = jnp.array([mean_baseline, SENDER_ENTROPY_COEFF,
                      RECEIVER_ENTROPY_COEFF, 0.0], jnp.float32)

    # --- per-example data: one (B,128) tile per game, all games stacked ------
    gb = G * B
    dslab = jnp.zeros((Gp * B, LANES), jnp.float32)          # pad games -> zero rows
    dslab = dslab.at[:gb, _X_L0:_X_L0 + F].set(sender_input.reshape(gb, F))
    dslab = dslab.at[:gb, _ONE_L].set(1.0)
    dslab = dslab.at[:gb, _GUM_L0:_GUM_L0 + V].set(gumbel_noise.reshape(gb, V))
    dslab = dslab.at[:gb, _LBL_L].set(labels.reshape(gb).astype(jnp.float32))

    stats = pl.pallas_call(
        _symbol_game_kernel,
        out_shape=jax.ShapeDtypeStruct((n_steps, gpb, 8), jnp.float32),
        grid=(n_steps,),
        in_specs=[
            pl.BlockSpec(memory_space=pltpu.MemorySpace.SMEM),      # scalars
            pl.BlockSpec((P_ROWS, LANES), lambda i: (0, 0)),        # params (one DMA)
            pl.BlockSpec((m_rows, LANES), lambda i: (i, 0)),        # per-step data tile
        ],
        out_specs=pl.BlockSpec((None, gpb, 8), lambda i: (i, 0, 0)),
        compiler_params=pltpu.CompilerParams(
            dimension_semantics=("parallel",)),
    )(scal, pslab, dslab)

    stats = stats.reshape(Gp, 8)[:G]
    full_loss = stats[:, 0]
    rest_info = {
        "acc": stats[:, 6],
        "baseline": stats[:, 7],
        "loss": stats[:, 3],
        "sender_entropy": stats[:, 4],
        "receiver_entropy": stats[:, 5],
        "policy_loss": stats[:, 1],
        "entropy_loss": stats[:, 2],
    }
    if squeeze:
        full_loss = full_loss[0]
        rest_info = {k: v[0] for k, v in rest_info.items()}
    # TODO(synk): training-mode running-mean baseline update (self.mean_baseline /
    # self.n_points) is host-side Python state in the original module; apply it
    # outside the kernel from rest_info["loss"] when training.  PyTorch detaches
    # `loss` in the policy term; forward-only this is identical, but a custom VJP
    # would need stop_gradient on `loss` there.
    return full_loss, rest_info


if __name__ == "__main__":
    key = jax.random.PRNGKey(0)
    ks = jax.random.split(key, 6)
    G = 64  # games; gpb=32 -> 2 grid steps of 256 example rows each (both v7x TCs)

    sender_input = jax.random.normal(ks[0], (G, B, F), jnp.float32)
    labels = jax.random.randint(ks[1], (G, B), 0, C)

    params = {
        "ws": jax.random.normal(ks[2], (F, V), jnp.float32) * (1.0 / math.sqrt(F)),
        "bs": jnp.zeros((1, V), jnp.float32),
        "emb": jax.random.normal(ks[3], (V, H), jnp.float32) * (1.0 / math.sqrt(V)),
        "wr": jax.random.normal(ks[4], (H, C), jnp.float32) * (1.0 / math.sqrt(H)),
        "br": jnp.zeros((1, C), jnp.float32),
    }

    # Precomputed Gumbel noise -> deterministic categorical sampling in-kernel.
    u = jax.random.uniform(ks[5], (G, B, V), jnp.float32,
                           minval=1e-6, maxval=1.0 - 1e-6)
    gumbel_noise = -jnp.log(-jnp.log(u))

    full_loss, rest_info = symbol_game_reinforce_forward(
        params, sender_input, labels, gumbel_noise, mean_baseline=0.0)
    jax.block_until_ready(full_loss)
    jax.block_until_ready(rest_info)
    assert bool(jnp.all(jnp.isfinite(full_loss)))
    print("KERNEL_OK")
</pallas_src>

<mosaic_0001>
module attributes {stable_mosaic.version = 11 : i64} {
  func.func @_symbol_game_kernel(%arg0: i32, %arg1: memref<4xf32, #tpu.memory_space<smem>>, %arg2: memref<64x128xf32, #tpu.memory_space<vmem>>, %arg3: memref<256x128xf32, #tpu.memory_space<vmem>>, %arg4: memref<1x32x8xf32, #tpu.memory_space<vmem>>) attributes {dimension_semantics = [#tpu.dimension_semantics<parallel>], iteration_bounds = array<i64: 2>, scalar_prefetch = 0 : i64, scratch_operands = 0 : i64, tpu.core_type = #tpu.core_type<tc>, window_params = [{transform_indices = @transform_0, window_bounds = array<i64: 4>}, {pipeline_mode = #tpu.pipeline_mode<synchronous>, transform_indices = @transform_1, window_bounds = array<i64: 64, 128>}, {transform_indices = @transform_2, window_bounds = array<i64: 256, 128>}, {transform_indices = @transform_3, window_bounds = array<i64: 1, 32, 8>}]} {
    %c0 = arith.constant 0 : index
    %0 = memref.load %arg1[%c0] : memref<4xf32, #tpu.memory_space<smem>>
    %c1 = arith.constant 1 : index
    %1 = memref.load %arg1[%c1] : memref<4xf32, #tpu.memory_space<smem>>
    %c0_0 = arith.constant 0 : index
    %c0_1 = arith.constant 0 : index
    %2 = vector.load %arg2[%c0_0, %c0_1] : memref<64x128xf32, #tpu.memory_space<vmem>>, vector<33x16xf32>
    %c40 = arith.constant 40 : index
    %c0_2 = arith.constant 0 : index
    %3 = vector.load %arg2[%c40, %c0_2] : memref<64x128xf32, #tpu.memory_space<vmem>>, vector<17x16xf32>
    %c0_3 = arith.constant 0 : index
    %c0_4 = arith.constant 0 : index
    %4 = vector.load %arg3[%c0_3, %c0_4] : memref<256x128xf32, #tpu.memory_space<vmem>>, vector<256x33xf32>
    %c0_5 = arith.constant 0 : index
    %c64 = arith.constant 64 : index
    %5 = vector.load %arg3[%c0_5, %c64] : memref<256x128xf32, #tpu.memory_space<vmem>>, vector<256x16xf32>
    %c0_6 = arith.constant 0 : index
    %c96 = arith.constant 96 : index
    %6 = vector.load %arg3[%c0_6, %c96] : memref<256x128xf32, #tpu.memory_space<vmem>>, vector<256x1xf32>
    %7 = arith.fptosi %6 : vector<256x1xf32> to vector<256x1xi32>
    %cst = arith.constant dense<0.000000e+00> : vector<256x16xf32>
    %8 = tpu.matmul %4, %2, %cst {dimension_numbers = #tpu.dot_dimension_numbers<[1], [0], [0], [1], [0, 0, 1, 1], [], []>} : vector<256x33xf32>, vector<33x16xf32>, vector<256x16xf32> -> vector<256x16xf32>
    %cst_7 = arith.constant dense<0xFF800000> : vector<256xf32>
    %9 = vector.multi_reduction <maximumf>, %8, %cst_7 [1] : vector<256x16xf32> to vector<256xf32>
    %10 = vector.shape_cast %9 : vector<256xf32> to vector<256x1xf32>
    %11 = vector.broadcast %10 : vector<256x1xf32> to vector<256x16xf32>
    %12 = arith.subf %8, %11 : vector<256x16xf32>
    %13 = math.exp %12 : vector<256x16xf32>
    %cst_8 = arith.constant dense<0.000000e+00> : vector<256xf32>
    %14 = vector.multi_reduction <add>, %13, %cst_8 [1] : vector<256x16xf32> to vector<256xf32>
    %15 = vector.shape_cast %14 : vector<256xf32> to vector<256x1xf32>
    %16 = math.log %15 : vector<256x1xf32>
    %17 = arith.addf %10, %16 : vector<256x1xf32>
    %18 = vector.broadcast %15 : vector<256x1xf32> to vector<256x16xf32>
    %19 = arith.divf %13, %18 : vector<256x16xf32>
    %20 = arith.mulf %19, %8 : vector<256x16xf32>
    %cst_9 = arith.constant dense<0.000000e+00> : vector<256xf32>
    %21 = vector.multi_reduction <add>, %20, %cst_9 [1] : vector<256x16xf32> to vector<256xf32>
    %22 = vector.shape_cast %21 : vector<256xf32> to vector<256x1xf32>
    %23 = arith.subf %17, %22 : vector<256x1xf32>
    %24 = arith.addf %8, %5 : vector<256x16xf32>
    %cst_10 = arith.constant dense<0xFF800000> : vector<256xf32>
    %25 = vector.multi_reduction <maximumf>, %24, %cst_10 [1] : vector<256x16xf32> to vector<256xf32>
    %26 = vector.shape_cast %25 : vector<256xf32> to vector<256x1xf32>
    %27 = tpu.iota {dimensions = array<i32: 1>} : vector<256x16xi32>
    %28 = vector.broadcast %26 : vector<256x1xf32> to vector<256x16xf32>
    %29 = arith.cmpf oeq, %24, %28 : vector<256x16xf32>
    %c16_i32 = arith.constant 16 : i32
    %30 = vector.broadcast %c16_i32 : i32 to vector<256x16xi32>
    %31 = arith.select %29, %27, %30 : vector<256x16xi1>, vector<256x16xi32>
    %cst_11 = arith.constant dense<2147483647> : vector<256xi32>
    %32 = vector.multi_reduction <minsi>, %31, %cst_11 [1] : vector<256x16xi32> to vector<256xi32>
    %33 = vector.shape_cast %32 : vector<256xi32> to vector<256x1xi32>
    %34 = vector.broadcast %33 : vector<256x1xi32> to vector<256x16xi32>
    %35 = arith.cmpi eq, %27, %34 : vector<256x16xi32>
    %36 = arith.extui %35 : vector<256x16xi1> to vector<256x16xi32>
    %37 = arith.sitofp %36 : vector<256x16xi32> to vector<256x16xf32>
    %38 = arith.mulf %37, %8 : vector<256x16xf32>
    %cst_12 = arith.constant dense<0.000000e+00> : vector<256xf32>
    %39 = vector.multi_reduction <add>, %38, %cst_12 [1] : vector<256x16xf32> to vector<256xf32>
    %40 = vector.shape_cast %39 : vector<256xf32> to vector<256x1xf32>
    %41 = arith.subf %40, %17 : vector<256x1xf32>
    %42 = tpu.iota {dimensions = array<i32: 1>} : vector<256x17xi32>
    %43 = vector.broadcast %33 : vector<256x1xi32> to vector<256x17xi32>
    %44 = arith.cmpi eq, %42, %43 : vector<256x17xi32>
    %c16_i32_13 = arith.constant 16 : i32
    %45 = vector.broadcast %c16_i32_13 : i32 to vector<256x17xi32>
    %46 = arith.cmpi eq, %42, %45 : vector<256x17xi32>
    %47 = arith.ori %44, %46 : vector<256x17xi1>
    %48 = arith.extui %47 : vector<256x17xi1> to vector<256x17xi32>
    %49 = arith.sitofp %48 : vector<256x17xi32> to vector<256x17xf32>
    %cst_14 = arith.constant dense<0.000000e+00> : vector<256x16xf32>
    %50 = tpu.matmul %49, %3, %cst_14 {dimension_numbers = #tpu.dot_dimension_numbers<[1], [0], [0], [1], [0, 0, 1, 1], [], []>} : vector<256x17xf32>, vector<17x16xf32>, vector<256x16xf32> -> vector<256x16xf32>
    %cst_15 = arith.constant dense<0xFF800000> : vector<256xf32>
    %51 = vector.multi_reduction <maximumf>, %50, %cst_15 [1] : vector<256x16xf32> to vector<256xf32>
    %52 = vector.shape_cast %51 : vector<256xf32> to vector<256x1xf32>
    %53 = vector.broadcast %52 : vector<256x1xf32> to vector<256x16xf32>
    %54 = arith.subf %50, %53 : vector<256x16xf32>
    %55 = math.exp %54 : vector<256x16xf32>
    %cst_16 = arith.constant dense<0.000000e+00> : vector<256xf32>
    %56 = vector.multi_reduction <add>, %55, %cst_16 [1] : vector<256x16xf32> to vector<256xf32>
    %57 = vector.shape_cast %56 : vector<256xf32> to vector<256x1xf32>
    %58 = math.log %57 : vector<256x1xf32>
    %59 = arith.addf %52, %58 : vector<256x1xf32>
    %60 = tpu.iota {dimensions = array<i32: 1>} : vector<256x16xi32>
    %61 = vector.broadcast %7 : vector<256x1xi32> to vector<256x16xi32>
    %62 = arith.cmpi eq, %60, %61 : vector<256x16xi32>
    %63 = arith.extui %62 : vector<256x16xi1> to vector<256x16xi32>
    %64 = arith.sitofp %63 : vector<256x16xi32> to vector<256x16xf32>
    %65 = arith.mulf %64, %50 : vector<256x16xf32>
    %cst_17 = arith.constant dense<0.000000e+00> : vector<256xf32>
    %66 = vector.multi_reduction <add>, %65, %cst_17 [1] : vector<256x16xf32> to vector<256xf32>
    %67 = vector.shape_cast %66 : vector<256xf32> to vector<256x1xf32>
    %68 = arith.subf %59, %67 : vector<256x1xf32>
    %69 = vector.broadcast %52 : vector<256x1xf32> to vector<256x16xf32>
    %70 = arith.cmpf oeq, %50, %69 : vector<256x16xf32>
    %c16_i32_18 = arith.constant 16 : i32
    %71 = vector.broadcast %c16_i32_18 : i32 to vector<256x16xi32>
    %72 = arith.select %70, %60, %71 : vector<256x16xi1>, vector<256x16xi32>
    %cst_19 = arith.constant dense<2147483647> : vector<256xi32>
    %73 = vector.multi_reduction <minsi>, %72, %cst_19 [1] : vector<256x16xi32> to vector<256xi32>
    %74 = vector.shape_cast %73 : vector<256xi32> to vector<256x1xi32>
    %75 = arith.cmpi eq, %74, %7 : vector<256x1xi32>
    %76 = arith.extui %75 : vector<256x1xi1> to vector<256x1xi32>
    %77 = arith.sitofp %76 : vector<256x1xi32> to vector<256x1xf32>
    %78 = vector.broadcast %0 : f32 to vector<256x1xf32>
    %79 = arith.subf %68, %78 : vector<256x1xf32>
    %80 = arith.mulf %79, %41 : vector<256x1xf32>
    %cst_20 = arith.constant 0.000000e+00 : f32
    %81 = arith.subf %cst_20, %1 : f32
    %82 = vector.broadcast %81 : f32 to vector<256x1xf32>
    %83 = arith.mulf %82, %23 : vector<256x1xf32>
    %84 = arith.addf %68, %80 : vector<256x1xf32>
    %85 = arith.addf %84, %83 : vector<256x1xf32>
    %cst_21 = arith.constant 0.000000e+00 : f32
    %86 = vector.broadcast %cst_21 : f32 to vector<256x1xf32>
    %87 = vector.broadcast %0 : f32 to vector<256x1xf32>
    %88 = arith.addf %86, %87 : vector<256x1xf32>
    %89 = tpu.concatenate %85, %80, %83, %68, %23, %86, %77, %88 in 1 : vector<256x1xf32>, vector<256x1xf32>, vector<256x1xf32>, vector<256x1xf32>, vector<256x1xf32>, vector<256x1xf32>, vector<256x1xf32>, vector<256x1xf32> -> vector<256x8xf32>
    %90 = tpu.iota {dimensions = array<i32: 0>} : vector<32x256xi32>
    %91 = tpu.iota {dimensions = array<i32: 1>} : vector<32x256xi32>
    %c8_i32 = arith.constant 8 : i32
    %92 = vector.broadcast %c8_i32 : i32 to vector<32x256xi32>
    %93 = arith.muli %90, %92 : vector<32x256xi32>
    %94 = arith.cmpi sge, %91, %93 : vector<32x256xi32>
    %c1_i32 = arith.constant 1 : i32
    %95 = vector.broadcast %c1_i32 : i32 to vector<32x256xi32>
    %96 = arith.addi %90, %95 : vector<32x256xi32>
    %c8_i32_22 = arith.constant 8 : i32
    %97 = vector.broadcast %c8_i32_22 : i32 to vector<32x256xi32>
    %98 = arith.muli %96, %97 : vector<32x256xi32>
    %99 = arith.cmpi slt, %91, %98 : vector<32x256xi32>
    %100 = arith.andi %94, %99 : vector<32x256xi1>
    %101 = arith.extui %100 : vector<32x256xi1> to vector<32x256xi32>
    %102 = arith.sitofp %101 : vector<32x256xi32> to vector<32x256xf32>
    %cst_23 = arith.constant 1.250000e-01 : f32
    %103 = vector.broadcast %cst_23 : f32 to vector<32x256xf32>
    %104 = arith.mulf %102, %103 : vector<32x256xf32>
    %cst_24 = arith.constant dense<0.000000e+00> : vector<32x8xf32>
    %105 = tpu.matmul %104, %89, %cst_24 {dimension_numbers = #tpu.dot_dimension_numbers<[1], [0], [0], [1], [0, 0, 1, 1], [], []>} : vector<32x256xf32>, vector<256x8xf32>, vector<32x8xf32> -> vector<32x8xf32>
    %c0_25 = arith.constant 0 : index
    %c0_26 = arith.constant 0 : index
    %c0_27 = arith.constant 0 : index
    %106 = vector.load %arg4[%c0_25, %c0_26, %c0_27] : memref<1x32x8xf32, #tpu.memory_space<vmem>>, vector<1x32x8xf32>
    %107 = vector.shape_cast %106 : vector<1x32x8xf32> to vector<32x8xf32>
    %108 = vector.shape_cast %105 : vector<32x8xf32> to vector<1x32x8xf32>
    tpu.vector_store %arg4[%c0_25, %c0_26, %c0_27], %108 {strides = array<i32>} : memref<1x32x8xf32, #tpu.memory_space<vmem>>, vector<1x32x8xf32>,
    return
  }
  func.func @transform_0(%arg0: i32) -> i32 {
    %c0_i32 = arith.constant 0 : i32
    %c0_i32_0 = arith.constant 0 : i32
    return %c0_i32 : i32
  }
  func.func @transform_1(%arg0: i32) -> (i32, i32) {
    %c0_i32 = arith.constant 0 : i32
    %c0_i32_0 = arith.constant 0 : i32
    %c0_i32_1 = arith.constant 0 : i32
    return %c0_i32, %c0_i32_0 : i32, i32
  }
  func.func @transform_2(%arg0: i32) -> (i32, i32) {
    %c0_i32 = arith.constant 0 : i32
    %c0_i32_0 = arith.constant 0 : i32
    return %arg0, %c0_i32 : i32, i32
  }
  func.func @transform_3(%arg0: i32) -> (i32, i32, i32) {
    %c0_i32 = arith.constant 0 : i32
    %c0_i32_0 = arith.constant 0 : i32
    %c0_i32_1 = arith.constant 0 : i32
    return %arg0, %c0_i32, %c0_i32_0 : i32, i32, i32
  }
}

</mosaic_0001>

<bundles_post_ra>
// kernel: tpu_custom_call.1
= control target key start
LH: loop header
LB: loop body
LE: loop exit
PB: predicated region body
PF: predicated region fallthrough
CT: control target
= control target key end

     0   :  { %8 = vsyncpa [#allocation4], 0  ;;  %s11316_s0 = inlined_call_operand.hbm [shape: f32[4], index: 0, kind: input, shape index: {}]   ;;  %s11317_s1 = inlined_call_operand.hbm [shape: f32[64,128], index: 1, kind: input, shape index: {}]   ;;  %s11318_s2 = inlined_call_operand.hbm [shape: f32[512,128], index: 2, kind: input, shape index: {}]   ;;  %s11319_s3 = inlined_call_operand.vmem [shape: f32[2,32,8], index: 3, kind: output, shape index: {}]  }
   0x1   :  { %9 = vsyncpa [#allocation3], 0 }
   0x2   :  { %10 = vsyncpa [#allocation7], 0 }
   0x3   :  { %12 = vsyncpa [#allocation7 + $0x1], 0  ;;  %s5979_s12 = smov 0   ;;  %s5981_s13 = smov 0  }
   0x4   :  { %s5983_s14 = smov 0   ;;  %s5985_s15 = smov 0  }
   0x5 LB: > { %s5998_s16 = sadd.s32 4294967295, %s5948_s15   ;;  %s6001_s17 = sadd.s32 1, %s5948_s15   ;;  %s5948_s15 = sphi %s5985_s15, %s13098_s15   ;;  %s5944_s14 = sphi %s5983_s14, %s13097_s14   ;;  %s5940_s13 = sphi %s5981_s13, %s13096_s13   ;;  %s5936_s12 = sphi %s5979_s12, %s13095_s12  }
   0x6   : > { %s64_s18 = ssub.s32 %s5948_s15, %s6001_s17  ;;  %s67_s19 = sadd.s32 1, %s5944_s14 }
   0x7   : > { %p65_p0 = scmp.eq.s32.totalorder %s64_s18, 0  ;;  %p74_p1 = scmp.ne.s32.totalorder %s5944_s14, %s5940_s13 }
   0x8   : > { %p75_p2 = scmp.eq.s32.totalorder %s5948_s15, 0  ;;  %p80_p3 = scmp.ne.s32.totalorder %s5940_s13, %s5936_s12 }
   0x9   : > { %s6011_s20 = scalar_select %p65_p0, %s5944_s14, %s67_s19  }
   0xa   : > { %p76_p4 = por %p75_p2, %p74_p1  ;;  %p11320_p5 = scmp.eq.s32.totalorder %s5998_s16, 0 }
   0xb   : > { %p4823_p6 = scmp.ge.s32.totalorder %s5948_s15, 1  ;;  %p117_p7 = scmp.lt.s32.totalorder %s5948_s15, 3 }
   0xc   : > { %p6018_p8 = por %p11320_p5, %p80_p3  ;;  %p5364_p10 = scmp.lt.s32.totalorder %s5948_s15, 2 }
   0xd   : > { %p6022_p9 = pnand %p4823_p6, %p117_p7  ;;  %s5950_s24 = smov [#allocation5]  }
   0xe   : > { %s11810_s21 = scalar_select %p6018_p8, 1, 0 }
   0xf   : > { %s11811_s22 = scalar_select %p6022_p9, 1, 0 }
  0x10   : > { %p5351_p11 = pneg %p6022_p9  ;;  %p6029_p12 = pnand %p5364_p10, %p76_p4 }
  0x11   : > { %s138_s25 = sshll.u32 %s5950_s24, 4  ;;  %s5951_s27 = smov [#allocation2]   ;;  %s139_s25 = int_to_ptr.vmem [resolvable:$true] %s138_s25 }
  0x12   : > { %p6035_p13 = pnand %p5351_p11, %p11320_p5  ;;  %s5863_s30 = scalar_lea.vmem %s139_s25, 1024 }
  0x13   : > { %p5864_p1 = scmp.ne.s32.totalorder %s139_s25, %s5863_s30  ;;  %p5871_p4 = scmp.lt.s32.totalorder %s139_s25, %s139_s25 }
  0x14   : > { %5354 = dma.hbm_to_smem (!%p6035_p13), %s11316_s0, 16, %s5951_s27, [#allocation4]  }
  0x15   : > { %p5854_p0 = pneg %p6035_p13  ;;  %p5872_p6 = scmp.lt.s32.totalorder %s5863_s30, %s5863_s30 }
  0x17   : > { %p5866_p2 = pnand %p5864_p1, %p5854_p0  ;;  %p5873_p7 = por %p5872_p6, %p5871_p4 }
  0x19   : > { %p5867_p3 = pneg %p5866_p2 }
  0x1b   : > { %p5874_p10 = pnand %p5873_p7, %p5867_p3 }
  0x1d   : > { %5877 = shalt.err (!%p5874_p10)
}
  0x1e   : > { %s5952_s4 = smov 128   ;;  %s5953_s5 = smov 8  }
  0x1f   : > { %5357 = dma.hbm_to_vmem [thread:$0]  (!%p6035_p13), %s11317_s1, 1024, %s139_s25, [#allocation3], %s5952_s4, %s5952_s4, %s5953_s5  }
  0x20   : > { %s152_s8 = sand.u32 1, %s5944_s14   ;;  %s5041_s9 = sshll.u32 %s5948_s15, 12 }
  0x21   : > { %s4827_s10 = sshll.u32 %s152_s8, 8  ;;  %s6059_s18 = scalar_lea.hbm %s11318_s2, %s5041_s9 }
  0x22   : > { %s156_s19 = scalar_lea.vmem [#allocation6], %s4827_s10  ;;  %s6063_s26 = scalar_lea.sflag [#allocation7], %s152_s8 }
  0x23   : > { %s163_s24 = sshll.u32 %s156_s19, 4  ;;  %s5878_s27 = scalar_lea.hbm %s6059_s18, 4096  ;;  %s6061_s24 = int_to_ptr.vmem [resolvable:$true] %s163_s24 }
  0x24   : > { %p5879_p11 = scmp.ne.s32.totalorder %s6059_s18, %s5878_s27  ;;  %p5880_p13 = pneg %p6029_p12 }
  0x25   : > { %s5883_s28 = scalar_lea.hbm %s11318_s2, 8192  ;;  %p5884_p2 = scmp.lt.s32.totalorder %s6059_s18, %s11318_s2 }
  0x26   : > { %p5881_p0 = pnand %p5880_p13, %p5879_p11  ;;  %p5885_p3 = scmp.lt.s32.totalorder %s5883_s28, %s5878_s27 }
  0x28   : > { %p5882_p1 = pneg %p5881_p0  ;;  %p5886_p4 = por %p5885_p3, %p5884_p2 }
  0x2a   : > { %p5887_p6 = pnand %p5886_p4, %p5882_p1 }
  0x2c   : > { %5890 = shalt.err (!%p5887_p6)
}
  0x2d   : > { %s5891_s6 = scalar_lea.vmem %s6061_s24, 4096  ;;  %s5954_s7 = smov [#allocation6]  }
  0x2e   : > { %p5892_p7 = scmp.ne.s32.totalorder %s6061_s24, %s5891_s6  ;;  %s5896_s8 = sshll.u32 %s5954_s7, 4  ;;  %s5897_s8 = int_to_ptr.vmem [resolvable:$false] %s5896_s8 }
  0x2f   : > { %s5898_s9 = scalar_lea.vmem %s5897_s8, 8192  ;;  %p5899_p0 = scmp.lt.s32.totalorder %s6061_s24, %s5897_s8 }
  0x30   : > { %p5894_p10 = pnand %p5892_p7, %p5880_p13  ;;  %p5900_p5 = scmp.lt.s32.totalorder %s5898_s9, %s5891_s6 }
  0x32   : > { %p5895_p11 = pneg %p5894_p10  ;;  %p5901_p8 = por %p5900_p5, %p5899_p0 }
  0x34   : > { %p5902_p9 = pnand %p5901_p8, %p5895_p11 }
  0x36   : > { %5905 = shalt.err (!%p5902_p9)
}
  0x37   : > { %5361 = dma.hbm_to_vmem [thread:$0]  (!%p6029_p12), %s6059_s18, 4096, %s6061_s24, %s6063_s26, %s5952_s4, %s5952_s4, %s5953_s5  }
  0x38   : > { %p11814_p13 = scmp.ne.s32.totalorder %s11811_s22, 0 }
  0x3a   : > { %175 = sbr.rel (%p11814_p13) target bundleno = 1955 (0x7a3), region = 32 }
  0x3f   : > { %p11815_p1 = scmp.eq.s32.totalorder %s5998_s16, 0 }
  0x41   : > { %5923 = dma.done.wait (%p11815_p1), [#allocation4], 16   ;;  %p11816_p2 = pmov %p11815_p1 }
  0x42   : > { %p11817_p5 = pmov %p11815_p1 }
  0x43   : > { %5925 = vsyncadd (%p11816_p2), [#allocation4], 4294967280 }
  0x44   : > { %5927 = dma.done.wait (%p11817_p5), [#allocation3], 1024   ;;  %p11818_p8 = pmov %p11815_p1 }
  0x45   : > { %s185_s23 = sand.u32 1, %s5940_s13   ;;  %p11819_p9 = scmp.ne.s32.totalorder %s11810_s21, 0 }
  0x46   : > { %5929 = vsyncadd (%p11818_p8), [#allocation3], 4294966272  ;;  %s4833_s10 = sshll.u32 %s185_s23, 8  ;;  %s186_s4 = scalar_lea.sflag [#allocation7], %s185_s23 }
  0x47   : > { %s6098_s5 = scalar_lea.vmem [#allocation6], %s4833_s10 }
  0x48   : > { %5931 = dma.done.wait (%p11819_p9), %s186_s4, 4096  }
  0x49   : > { %5933 = vsyncadd (%p11819_p9), %s186_s4, 4294963200 }
  0x4a   : > { %194 = sfence }
  0x4b   : > { %v225_v0 = vld [vmem:[#allocation5 + $0x20] sm:$0x1]  ;;  %vm390_vm0 = vcmask 1040384   ;;  %v224_v1 = vld [vmem:[#allocation5 + $0x18] sm:$0xff]  ;;  %vm293_vm1 = vcmask 269312   ;;  %v223_v3 = vld [vmem:[#allocation5 + $0x10] sm:$0xff] }
  0x4c   : > { %5159 = vmatprep.subr.msk.mxu0 %vm390_vm0, %v225_v0  ;;  %v6106_v2 = vld [vmem:[%s6098_s5] sm:$0xff]  ;;  %v232_v4 = vld [vmem:[%s6098_s5 + $0x18] sm:$0xff]  ;;  %v231_v5 = vld [vmem:[%s6098_s5 + $0x10] sm:$0xff]  ;;  %s5955_s21 = smov 64   ;;  %vm619_vm2 = vcmask 130048   ;;  %s9475_s22 = sld [smem:[#allocation2 + $0x1]] }
  0x4d   : > { %5160 = vmatpush3.msk.msra.mxu0 %vm390_vm0, %v225_v0  ;;  %5169 = vmatprep.mubr.msk.f32.mxu0 %vm293_vm1, %v6106_v2  ;;  %v222_v6 = vld [vmem:[#allocation5 + $0x8] sm:$0xff]  ;;  %v221_v7 = vld [vmem:[#allocation5] sm:$0xff]  ;;  %v235_v9 = vld [vmem:[%s6098_s5 + $0x30] sm:$0xff]  ;;  %s9887_s12 = sld [smem:[#allocation2]]  ;;  %s5958_s18 = smov 38  }
  0x4e   : > { %5161 = vmatprep.subr.mxu0 %v224_v1  ;;  %1234 = vrot.lane.b32.xlu1 %v232_v4, %s5955_s21  ;;  %v233_v8 = vld [vmem:[%s6098_s5 + $0x20] sm:$0xff]  ;;  %v6119_v10 = vld [vmem:[%s6098_s5 + $0x8] sm:$0xff]  ;;  %v236_v13 = vld [vmem:[%s6098_s5 + $0x38] sm:$0xff]  ;;  %p214_p12 = scmp.lt.s32.totalorder %s5998_s16, 1 }
  0x4f   : > { %5162 = vmatpush3.msra.mxu0 %v224_v1  ;;  %1232 = vrot.lane.b32.xlu0 %v231_v5, %s5955_s21  ;;  %v234_v11 = vld [vmem:[%s6098_s5 + $0x28] sm:$0xff]  ;;  %v237_v12 = vld [vmem:[%s6098_s5 + $0x40] sm:$0xff]  ;;  %v239_v14 = vld [vmem:[%s6098_s5 + $0x50] sm:$0xff] }
  0x50   : > { %5163 = vmatprep.subr.mxu0 %v223_v3  ;;  %v238_v15 = vld [vmem:[%s6098_s5 + $0x48] sm:$0xff]  ;;  %v241_v16 = vld [vmem:[%s6098_s5 + $0x60] sm:$0xff]  ;;  %v240_v17 = vld [vmem:[%s6098_s5 + $0x58] sm:$0xff]  ;;  %s13100_s16 = smov (!%p214_p12, %s5998_s16), 1 }
  0x51   : > { %5164 = vmatpush3.msra.mxu0 %v223_v3  ;;  %v243_v18 = vld [vmem:[%s6098_s5 + $0x70] sm:$0xff]  ;;  %v242_v19 = vld [vmem:[%s6098_s5 + $0x68] sm:$0xff]  ;;  %v245_v20 = vld [vmem:[%s6098_s5 + $0x80] sm:$0xff]  ;;  %s5042_s19 = sshll.u32 %s13100_s16, 5 }
  0x52   : > { %5165 = vmatprep.subr.mxu0 %v222_v6  ;;  %1236 = vrot.lane.b32.xlu1 %v233_v8, %s5955_s21  ;;  %v244_v21 = vld [vmem:[%s6098_s5 + $0x78] sm:$0xff]  ;;  %v247_v22 = vld [vmem:[%s6098_s5 + $0x90] sm:$0xff]  ;;  %v246_v23 = vld [vmem:[%s6098_s5 + $0x88] sm:$0xff]  ;;  %s4117_s11 = ssub.f32 0.0, %s9475_s22  ;;  %s218_s27 = scalar_lea.vmem %s11319_s3, %s5042_s19 }
  0x53   : > { %5166 = vmatpush3.msra.mxu0 %v222_v6  ;;  %1240 = vrot.lane.b32.xlu0 %v235_v9, %s5955_s21  ;;  %v249_v24 = vld [vmem:[%s6098_s5 + $0xa0] sm:$0xff]  ;;  %v248_v25 = vld [vmem:[%s6098_s5 + $0x98] sm:$0xff]  ;;  %v251_v26 = vld [vmem:[%s6098_s5 + $0xb0] sm:$0xff] }
  0x54   : > { %5167 = vmatprep.subr.mxu0 %v221_v7  ;;  %v250_v27 = vld [vmem:[%s6098_s5 + $0xa8] sm:$0xff]  ;;  %v253_v28 = vld [vmem:[%s6098_s5 + $0xc0] sm:$0xff]  ;;  %v252_v29 = vld [vmem:[%s6098_s5 + $0xb8] sm:$0xff] }
  0x55   : > { %5168 = vmatpush3.msra.mxu0 %v221_v7  ;;  %v255_v30 = vld [vmem:[%s6098_s5 + $0xd0] sm:$0xff]  ;;  %v254_v31 = vld [vmem:[%s6098_s5 + $0xc8] sm:$0xff]  ;;  %v257_v32 = vld [vmem:[%s6098_s5 + $0xe0] sm:$0xff] }
  0x56   : > { %5170 = vmatmul.mubr.msk.f32.vlgmr.msra.gmra.mxu0 %vm293_vm1, %v6119_v10  ;;  %1238 = vrot.lane.b32.xlu1 %v234_v11, %s5955_s21  ;;  %v256_v33 = vld [vmem:[%s6098_s5 + $0xd8] sm:$0xff]  ;;  %v259_v34 = vld [vmem:[%s6098_s5 + $0xf0] sm:$0xff]  ;;  %v258_v35 = vld [vmem:[%s6098_s5 + $0xe8] sm:$0xff] }
  0x57   : > { %5172 = vmatprep.mubr.msk.f32.mxu0 %vm293_vm1, %v231_v5  ;;  %1244 = vrot.lane.b32.xlu0 %v237_v12, %s5955_s21  ;;  %v260_v36 = vld [vmem:[%s6098_s5 + $0xf8] sm:$0xff] }
  0x5a   : > { %5173 = vmatmul.mubr.msk.f32.gmra.mxu0 %vm293_vm1, %v232_v4  ;;  %1242 = vrot.lane.b32.xlu1 %v236_v13, %s5955_s21 }
  0x5b   : > { %5175 = vmatprep.mubr.msk.f32.mxu0 %vm293_vm1, %v233_v8  ;;  %1248 = vrot.lane.b32.xlu0 %v239_v14, %s5955_s21 }
  0x5e   : > { %5176 = vmatmul.mubr.msk.f32.gmra.mxu0 %vm293_vm1, %v234_v11  ;;  %1246 = vrot.lane.b32.xlu1 %v238_v15, %s5955_s21 }
  0x5f   : > { %5178 = vmatprep.mubr.msk.f32.mxu0 %vm293_vm1, %v235_v9  ;;  %1252 = vrot.lane.b32.xlu0 %v241_v16, %s5955_s21 }
  0x62   : > { %5179 = vmatmul.mubr.msk.f32.gmra.mxu0 %vm293_vm1, %v236_v13  ;;  %1250 = vrot.lane.b32.xlu1 %v240_v17, %s5955_s21 }
  0x63   : > { %5181 = vmatprep.mubr.msk.f32.mxu0 %vm293_vm1, %v237_v12  ;;  %1256 = vrot.lane.b32.xlu0 %v243_v18, %s5955_s21 }
  0x66   : > { %5182 = vmatmul.mubr.msk.f32.gmra.mxu0 %vm293_vm1, %v238_v15  ;;  %1254 = vrot.lane.b32.xlu1 %v242_v19, %s5955_s21 }
  0x67   : > { %5184 = vmatprep.mubr.msk.f32.mxu0 %vm293_vm1, %v239_v14  ;;  %1260 = vrot.lane.b32.xlu0 %v245_v20, %s5955_s21 }
  0x6a   : > { %5185 = vmatmul.mubr.msk.f32.gmra.mxu0 %vm293_vm1, %v240_v17  ;;  %1258 = vrot.lane.b32.xlu1 %v244_v21, %s5955_s21 }
  0x6b   : > { %5187 = vmatprep.mubr.msk.f32.mxu0 %vm293_vm1, %v241_v16  ;;  %1264 = vrot.lane.b32.xlu0 %v247_v22, %s5955_s21 }
  0x6e   : > { %5188 = vmatmul.mubr.msk.f32.gmra.mxu0 %vm293_vm1, %v242_v19  ;;  %1262 = vrot.lane.b32.xlu1 %v246_v23, %s5955_s21 }
  0x6f   : > { %5190 = vmatprep.mubr.msk.f32.mxu0 %vm293_vm1, %v243_v18  ;;  %1268 = vrot.lane.b32.xlu0 %v249_v24, %s5955_s21 }
  0x72   : > { %5191 = vmatmul.mubr.msk.f32.gmra.mxu0 %vm293_vm1, %v244_v21  ;;  %1266 = vrot.lane.b32.xlu1 %v248_v25, %s5955_s21 }
  0x73   : > { %5193 = vmatprep.mubr.msk.f32.mxu0 %vm293_vm1, %v245_v20  ;;  %1272 = vrot.lane.b32.xlu0 %v251_v26, %s5955_s21 }
  0x76   : > { %5194 = vmatmul.mubr.msk.f32.gmra.mxu0 %vm293_vm1, %v246_v23  ;;  %1270 = vrot.lane.b32.xlu1 %v250_v27, %s5955_s21 }
  0x77   : > { %5196 = vmatprep.mubr.msk.f32.mxu0 %vm293_vm1, %v247_v22  ;;  %1276 = vrot.lane.b32.xlu0 %v253_v28, %s5955_s21 }
  0x7a   : > { %5197 = vmatmul.mubr.msk.f32.gmra.mxu0 %vm293_vm1, %v248_v25  ;;  %1274 = vrot.lane.b32.xlu1 %v252_v29, %s5955_s21 }
  0x7b   : > { %5199 = vmatprep.mubr.msk.f32.mxu0 %vm293_vm1, %v249_v24  ;;  %1280 = vrot.lane.b32.xlu0 %v255_v30, %s5955_s21 }
  0x7e   : > { %5200 = vmatmul.mubr.msk.f32.gmra.mxu0 %vm293_vm1, %v250_v27  ;;  %1278 = vrot.lane.b32.xlu1 %v254_v31, %s5955_s21 }
  0x7f   : > { %5202 = vmatprep.mubr.msk.f32.mxu0 %vm293_vm1, %v251_v26  ;;  %1284 = vrot.lane.b32.xlu0 %v257_v32, %s5955_s21 }
  0x82   : > { %5203 = vmatmul.mubr.msk.f32.gmra.mxu0 %vm293_vm1, %v252_v29  ;;  %1282 = vrot.lane.b32.xlu1 %v256_v33, %s5955_s21 }
  0x83   : > { %5205 = vmatprep.mubr.msk.f32.mxu0 %vm293_vm1, %v253_v28  ;;  %1288 = vrot.lane.b32.xlu0 %v259_v34, %s5955_s21 }
  0x86   : > { %5206 = vmatmul.mubr.msk.f32.gmra.mxu0 %vm293_vm1, %v254_v31  ;;  %1286 = vrot.lane.b32.xlu1 %v258_v35, %s5955_s21 }
  0x87   : > { %5208 = vmatprep.mubr.msk.f32.mxu0 %vm293_vm1, %v255_v30  ;;  %1228 = vrot.lane.b32.xlu0 %v6106_v2, %s5955_s21 }
  0x8a   : > { %5209 = vmatmul.mubr.msk.f32.gmra.mxu0 %vm293_vm1, %v256_v33  ;;  %1290 = vrot.lane.b32.xlu1 %v260_v36, %s5955_s21 }
  0x8b   : > { %5211 = vmatprep.mubr.msk.f32.mxu0 %vm293_vm1, %v257_v32 }
  0x8e   : > { %5212 = vmatmul.mubr.msk.f32.gmra.mxu0 %vm293_vm1, %v258_v35  ;;  %1230 = vrot.lane.b32.xlu1 %v6119_v10, %s5955_s21 }
  0x8f   : > { %5214 = vmatprep.mubr.msk.f32.mxu0 %vm293_vm1, %v259_v34 }
  0x92   : > { %5215 = vmatmul.mubr.msk.f32.gmra.mxu0 %vm293_vm1, %v260_v36 }
  0xc0   : > { %v1235_v37 = vpop.permute.xlu1 %1234 }
  0xc1   : > { %v1233_v40 = vpop.permute.xlu0 %1232 }
  0xc4   : > { %v6210_v38 = vpop.permute.xlu1 %1236 }
  0xc5   : > { %v6216_v42 = vpop.permute.xlu0 %1240 }
  0xc8   : > { %v6212_v39 = vpop.permute.xlu1 %1238 }
  0xc9   : > { %v6220_v44 = vpop.permute.xlu0 %1244 }
  0xcc   : > { %v6214_v41 = vpop.permute.xlu1 %1242 }
  0xcd   : > { %v6224_v46 = vpop.permute.xlu0 %1248 }
  0xd0   : > { %v6218_v43 = vpop.permute.xlu1 %1246 }
  0xd1   : > { %v6228_v48 = vpop.permute.xlu0 %1252 }
  0xd4   : > { %v6222_v45 = vpop.permute.xlu1 %1250 }
  0xd5   : > { %v6232_v50 = vpop.permute.xlu0 %1256 }
  0xd8   : > { %v6226_v47 = vpop.permute.xlu1 %1254 }
  0xd9   : > { %v6236_v52 = vpop.permute.xlu0 %1260 }
  0xdc   : > { %v6230_v49 = vpop.permute.xlu1 %1258 }
  0xdd   : > { %v6240_v54 = vpop.permute.xlu0 %1264 }
  0xe0   : > { %v6234_v51 = vpop.permute.xlu1 %1262 }
  0xe1   : > { %v6244_v56 = vpop.permute.xlu0 %1268 }
  0xe4   : > { %v6238_v53 = vpop.permute.xlu1 %1266 }
  0xe5   : > { %v6248_v58 = vpop.permute.xlu0 %1272 }
  0xe8   : > { %v6242_v55 = vpop.permute.xlu1 %1270 }
  0xe9   : > { %v6252_v60 = vpop.permute.xlu0 %1276 }
  0xec   : > { %v6246_v57 = vpop.permute.xlu1 %1274 }
  0xed   : > { %v6256_v62 = vpop.permute.xlu0 %1280 }
  0xf0   : > { %v6250_v59 = vpop.permute.xlu1 %1278 }
  0xf1   : > { %v6260_v0 = vpop.permute.xlu0 %1284 }
  0xf4   : > { %v6254_v61 = vpop.permute.xlu1 %1282 }
  0xf5   : > { %v6264_v2 = vpop.permute.xlu0 %1288 }
  0xf8   : > { %v6258_v63 = vpop.permute.xlu1 %1286 }
  0xf9   : > { %v1229_v11 = vpop.permute.xlu0 %1228 }
  0xfc   : > { %v6262_v1 = vpop.permute.xlu1 %1290 }
 0x100   : > { %v1231_v5 = vpop.permute.xlu1 %1230 }
 0x116   : > { %v6266_v3 = vpop.f32.mrf.mxu0 }
 0x117   : > { %11820 = vst [vmem:[#allocation11_spill] sm:$0xff] %v6266_v3  ;;  %v623_v4 = vsel %vm619_vm2, %v6266_v3, -inf  ;;  %v6279_v10 = vadd.f32 %v6266_v3, %v1231_v5 }
 0x118   : > { %624 = vmax.xlane.f32.xlu0 %v623_v4  ;;  %v6270_v6 = vpop.f32.mrf.mxu0 }
 0x119   : > { %11821 = vst [vmem:[#allocation12_spill] sm:$0xff] %v6270_v6  ;;  %v620_v8 = vsel %vm619_vm2, %v6270_v6, -inf  ;;  %v1359_v15 = vsel %vm619_vm2, %v6279_v10, -inf  ;;  %v6290_v16 = vadd.f32 %v1229_v11, %v6270_v6 }
 0x11a   : > { %v6272_v7 = vpop.f32.mrf.mxu0 }
 0x11b   : > { %11822 = vst [vmem:[#allocation13_spill] sm:$0xff] %v6272_v7  ;;  %v629_v9 = vsel %vm619_vm2, %v6272_v7, -inf  ;;  %v6293_v17 = vadd.f32 %v6272_v7, %v1235_v37  ;;  %v1356_v20 = vsel %vm619_vm2, %v6290_v16, -inf }
 0x11c   : > { %621 = vmax.xlane.f32.xlu0 %v620_v8  ;;  %630 = vmax.xlane.f32.xlu1 %v629_v9  ;;  %v6281_v12 = vpop.f32.mrf.mxu0 }
 0x11d   : > { %11823 = vst [vmem:[#allocation14_spill] sm:$0xff] %v6281_v12  ;;  %v626_v13 = vsel %vm619_vm2, %v6281_v12, -inf  ;;  %v1365_v21 = vsel %vm619_vm2, %v6293_v17, -inf  ;;  %v6304_v22 = vadd.f32 %v1233_v40, %v6281_v12 }
 0x11e   : > { %v6285_v14 = vpop.f32.mrf.mxu0 }
 0x11f   : > { %11824 = vst [vmem:[#allocation15_spill] sm:$0xff] %v6285_v14  ;;  %v635_v24 = vsel %vm619_vm2, %v6285_v14, -inf  ;;  %v1362_v26 = vsel %vm619_vm2, %v6304_v22, -inf  ;;  %v6324_v31 = vadd.f32 %v6285_v14, %v6212_v39 }
 0x120   : > { %1360 = vmax.xlane.f32.xlu0 %v1359_v15  ;;  %627 = vmax.xlane.f32.xlu1 %v626_v13  ;;  %v6295_v18 = vpop.f32.mrf.mxu0 }
 0x121   : > { %11825 = vst [vmem:[#allocation16_spill] sm:$0xff] %v6295_v18  ;;  %v632_v30 = vsel %vm619_vm2, %v6295_v18, -inf  ;;  %v1371_v34 = vsel %vm619_vm2, %v6324_v31, -inf  ;;  %v6338_v36 = vadd.f32 %v6210_v38, %v6295_v18 }
 0x122   : > { %v6297_v19 = vpop.f32.mrf.mxu0 }
 0x123   : > { %11826 = vst [vmem:[#allocation17_spill] sm:$0xff] %v6297_v19  ;;  %v641_v28 = vsel %vm619_vm2, %v6297_v19, -inf  ;;  %v6328_v32 = vadd.f32 %v6297_v19, %v6214_v41  ;;  %v1368_v40 = vsel %vm619_vm2, %v6338_v36, -inf }
 0x124   : > { %1357 = vmax.xlane.f32.xlu0 %v1356_v20  ;;  %1366 = vmax.xlane.f32.xlu1 %v1365_v21  ;;  %v6306_v23 = vpop.f32.mrf.mxu0 }
 0x125   : > { %11827 = vst [vmem:[#allocation18_spill] sm:$0xff] %v6306_v23  ;;  %v1377_v35 = vsel %vm619_vm2, %v6328_v32, -inf  ;;  %v638_v38 = vsel %vm619_vm2, %v6306_v23, -inf  ;;  %v6358_v8 = vadd.f32 %v6216_v42, %v6306_v23 }
 0x126   : > { %v6310_v25 = vpop.f32.mrf.mxu0 }
 0x127   : > { %11828 = vst [vmem:[#allocation19_spill] sm:$0xff] %v6310_v25  ;;  %v647_v39 = vsel %vm619_vm2, %v6310_v25, -inf  ;;  %v6348_v41 = vadd.f32 %v6310_v25, %v6218_v43  ;;  %v1374_v11 = vsel %vm619_vm2, %v6358_v8, -inf }
 0x128   : > { %1363 = vmax.xlane.f32.xlu0 %v1362_v26  ;;  %636 = vmax.xlane.f32.xlu1 %v635_v24  ;;  %v6314_v27 = vpop.f32.mrf.mxu0 }
 0x129   : > { %11829 = vst [vmem:[#allocation20_spill] sm:$0xff] %v6314_v27  ;;  %v1383_v5 = vsel %vm619_vm2, %v6348_v41, -inf  ;;  %v644_v42 = vsel %vm619_vm2, %v6314_v27, -inf  ;;  %v6378_v21 = vadd.f32 %v6220_v44, %v6314_v27 }
 0x12a   : > { %v6318_v29 = vpop.f32.mrf.mxu0 }
 0x12b   : > { %11830 = vst [vmem:[#allocation21_spill] sm:$0xff] %v6318_v29  ;;  %v653_v43 = vsel %vm619_vm2, %v6318_v29, -inf  ;;  %v6368_v13 = vadd.f32 %v6318_v29, %v6222_v45  ;;  %v1380_v26 = vsel %vm619_vm2, %v6378_v21, -inf }
 0x12c   : > { %633 = vmax.xlane.f32.xlu0 %v632_v30  ;;  %642 = vmax.xlane.f32.xlu1 %v641_v28  ;;  %v6330_v33 = vpop.f32.mrf.mxu0 }
 0x12d   : > { %11831 = vst [vmem:[#allocation22_spill] sm:$0xff] %v6330_v33  ;;  %v1389_v20 = vsel %vm619_vm2, %v6368_v13, -inf  ;;  %v650_v44 = vsel %vm619_vm2, %v6330_v33, -inf }
 0x12e   : > { %v6340_v37 = vpop.f32.mrf.mxu0 }
 0x12f   : > { %11832 = vst [vmem:[#allocation23_spill] sm:$0xff] %v6340_v37  ;;  %v659_v45 = vsel %vm619_vm2, %v6340_v37, -inf  ;;  %v6388_v28 = vadd.f32 %v6340_v37, %v6226_v47 }
 0x130   : > { %1372 = vmax.xlane.f32.xlu0 %v1371_v34  ;;  %1378 = vmax.xlane.f32.xlu1 %v1377_v35  ;;  %v6350_v4 = vpop.f32.mrf.mxu0  ;;  %v6398_v35 = vadd.f32 %v6224_v46, %v6330_v33 }
 0x131   : > { %11833 = vst [vmem:[#allocation24_spill] sm:$0xff] %v6350_v4  ;;  %v1395_v34 = vsel %vm619_vm2, %v6388_v28, -inf  ;;  %v656_v46 = vsel %vm619_vm2, %v6350_v4, -inf }
 0x132   : > { %v6360_v9 = vpop.f32.mrf.mxu0 }
 0x133   : > { %11834 = vst [vmem:[#allocation25_spill] sm:$0xff] %v6360_v9  ;;  %v665_v47 = vsel %vm619_vm2, %v6360_v9, -inf }
 0x134   : > { %1369 = vmax.xlane.f32.xlu0 %v1368_v40  ;;  %648 = vmax.xlane.f32.xlu1 %v647_v39  ;;  %v6370_v15 = vpop.f32.mrf.mxu0  ;;  %v1386_v40 = vsel %vm619_vm2, %v6398_v35, -inf }
 0x135   : > { %11835 = vst [vmem:[#allocation26_spill] sm:$0xff] %v6370_v15 }
 0x136   : > { %v6380_v24 = vpop.f32.mrf.mxu0 }
 0x137   : > { %11836 = vst [vmem:[#allocation27_spill] sm:$0xff] %v6380_v24 }
 0x138   : > { %639 = vmax.xlane.f32.xlu0 %v638_v38  ;;  %1384 = vmax.xlane.f32.xlu1 %v1383_v5  ;;  %v6390_v30 = vpop.f32.mrf.mxu0  ;;  %v6408_v38 = vadd.f32 %v6360_v9, %v6230_v49 }
 0x139   : > { %11837 = vst [vmem:[#allocation28_spill] sm:$0xff] %v6390_v30 }
 0x13a   : > { %v6400_v39 = vpop.f32.mrf.mxu0 }
 0x13b   : > { %11838 = vst [vmem:[#allocation29_spill] sm:$0xff] %v6400_v39 }
 0x13c   : > { %1375 = vmax.xlane.f32.xlu0 %v1374_v11  ;;  %654 = vmax.xlane.f32.xlu1 %v653_v43  ;;  %v6410_v5 = vpop.f32.mrf.mxu0  ;;  %v1401_v43 = vsel %vm619_vm2, %v6408_v38, -inf  ;;  %v6418_v11 = vadd.f32 %v6228_v48, %v6350_v4  ;;  %v671_v48 = vsel %vm619_vm2, %v6380_v24, -inf }
 0x13d   : > { %11839 = vst [vmem:[#allocation30_spill] sm:$0xff] %v6410_v5 }
 0x13e   : > { %v6424_v49 = vpop.f32.mrf.mxu0 }
 0x13f   : > { %11840 = vst [vmem:[#allocation31_spill] sm:$0xff] %v6424_v49 }
 0x140   : > { %645 = vmax.xlane.f32.xlu0 %v644_v42  ;;  %1390 = vmax.xlane.f32.xlu1 %v1389_v20  ;;  %v6422_v42 = vadd.f32 %v6232_v50, %v6370_v15  ;;  %v1392_v20 = vsel %vm619_vm2, %v6418_v11, -inf  ;;  %v662_v50 = vsel %vm619_vm2, %v6370_v15, -inf }
 0x144   : > { %1381 = vmax.xlane.f32.xlu0 %v1380_v26  ;;  %660 = vmax.xlane.f32.xlu1 %v659_v45  ;;  %v1398_v45 = vsel %vm619_vm2, %v6422_v42, -inf  ;;  %v6430_v26 = vpop.f32.mrf.mxu0 }
 0x145   : > { %11841 = vst [vmem:[#allocation32_spill] sm:$0xff] %v6430_v26 }
 0x148   : > { %651 = vmax.xlane.f32.xlu0 %v650_v44  ;;  %1396 = vmax.xlane.f32.xlu1 %v1395_v34  ;;  %v6438_v44 = vadd.f32 %v6380_v24, %v6234_v51  ;;  %v6440_v34 = vpop.f32.mrf.mxu0  ;;  %v668_v51 = vsel %vm619_vm2, %v6390_v30, -inf }
 0x149   : > { %11842 = vst [vmem:[#allocation33_spill] sm:$0xff] %v6440_v34 }
 0x14c   : > { %1387 = vmax.xlane.f32.xlu0 %v1386_v40  ;;  %666 = vmax.xlane.f32.xlu1 %v665_v47  ;;  %v677_v47 = vsel %vm619_vm2, %v6400_v39, -inf  ;;  %v1407_v40 = vsel %vm619_vm2, %v6438_v44, -inf }
 0x150   : > { %657 = vmax.xlane.f32.xlu0 %v656_v46  ;;  %1402 = vmax.xlane.f32.xlu1 %v1401_v43  ;;  %v6448_v46 = vadd.f32 %v6400_v39, %v6238_v53  ;;  %v6450_v43 = vpop.f32.mrf.mxu0  ;;  %v683_v53 = vsel %vm619_vm2, %v6424_v49, -inf }
 0x151   : > { %11843 = vst [vmem:[#allocation34_spill] sm:$0xff] %v6450_v43 }
 0x154   : > { %1393 = vmax.xlane.f32.xlu0 %v1392_v20  ;;  %1399 = vmax.xlane.f32.xlu1 %v1398_v45  ;;  %v1413_v20 = vsel %vm619_vm2, %v6448_v46, -inf  ;;  %v6458_v45 = vadd.f32 %v6236_v52, %v6390_v30  ;;  %v674_v52 = vsel %vm619_vm2, %v6410_v5, -inf }
 0x158   : > { %663 = vmax.xlane.f32.xlu0 %v662_v50  ;;  %672 = vmax.xlane.f32.xlu1 %v671_v48  ;;  %v6460_v48 = vpop.f32.mrf.mxu0  ;;  %v1404_v50 = vsel %vm619_vm2, %v6458_v45, -inf }
 0x159   : > { %11844 = vst [vmem:[#allocation35_spill] sm:$0xff] %v6460_v48 }
 0x15c   : > { %1408 = vmax.xlane.f32.xlu0 %v1407_v40  ;;  %678 = vmax.xlane.f32.xlu1 %v677_v47  ;;  %v6468_v47 = vadd.f32 %v6424_v49, %v6242_v55  ;;  %v6470_v40 = vpop.f32.mrf.mxu0  ;;  %v689_v55 = vsel %vm619_vm2, %v6440_v34, -inf }
 0x15d   : > { %11845 = vst [vmem:[#allocation36_spill] sm:$0xff] %v6470_v40 }
 0x15e   : > { %v6480_v39 = vpop.f32.mrf.mxu0 }
 0x15f   : > { %11846 = vst [vmem:[#allocation37_spill] sm:$0xff] %v6480_v39 }
 0x160   : > { %669 = vmax.xlane.f32.xlu0 %v668_v51  ;;  %1414 = vmax.xlane.f32.xlu1 %v1413_v20  ;;  %v1419_v51 = vsel %vm619_vm2, %v6468_v47, -inf  ;;  %v6478_v20 = vadd.f32 %v6240_v54, %v6410_v5  ;;  %v6490_v49 = vpop.f32.mrf.mxu0  ;;  %v680_v54 = vsel %vm619_vm2, %v6430_v26, -inf  ;;  %v6502_v5 = vadd.f32 %v6460_v48, %v6250_v59 }
 0x161   : > { %11847 = vst [vmem:[#allocation38_spill] sm:$0xff] %v6490_v49  ;;  %v686_v59 = vsel %vm619_vm2, %v6450_v43, -inf }
 0x162   : > { %11848 = vst [vmem:[#allocation39_spill] sm:$0xff] %v6502_v5 }
 0x164   : > { %1405 = vmax.xlane.f32.xlu0 %v1404_v50  ;;  %684 = vmax.xlane.f32.xlu1 %v683_v53  ;;  %v1410_v53 = vsel %vm619_vm2, %v6478_v20, -inf  ;;  %v6488_v50 = vadd.f32 %v6440_v34, %v6246_v57  ;;  %v6504_v57 = vpop.f32.mrf.mxu0  ;;  %v6512_v34 = vadd.f32 %v6480_v39, %v6254_v61 }
 0x165   : > { %11849 = vst [vmem:[#allocation40_spill] sm:$0xff] %v6504_v57 }
 0x166   : > { %11850 = vst [vmem:[#allocation41_spill] sm:$0xff] %v6512_v34 }
 0x168   : > { %675 = vmax.xlane.f32.xlu0 %v674_v52  ;;  %1420 = vmax.xlane.f32.xlu1 %v1419_v51  ;;  %v1425_v52 = vsel %vm619_vm2, %v6488_v50, -inf  ;;  %v6498_v51 = vadd.f32 %v6244_v56, %v6430_v26  ;;  %v6514_v56 = vpop.f32.mrf.mxu0 }
 0x169   : > { %11851 = vst [vmem:[#allocation42_spill] sm:$0xff] %v6514_v56 }
 0x16a   : > { %v6528_v61 = vpop.f32.mrf.mxu0 }
 0x16b   : > { %11852 = vst [vmem:[#allocation43_spill] sm:$0xff] %v6528_v61 }
 0x16c   : > { %1411 = vmax.xlane.f32.xlu0 %v1410_v53  ;;  %690 = vmax.xlane.f32.xlu1 %v689_v55  ;;  %v1416_v55 = vsel %vm619_vm2, %v6498_v51, -inf  ;;  %v1431_v53 = vsel %vm619_vm2, %v6502_v5, -inf  ;;  %v6526_v5 = vadd.f32 %v6504_v57, %v6258_v63 }
 0x170   : > { %681 = vmax.xlane.f32.xlu0 %v680_v54  ;;  %1426 = vmax.xlane.f32.xlu1 %v1425_v52  ;;  %v1437_v54 = vsel %vm619_vm2, %v6512_v34, -inf  ;;  %v6522_v52 = vadd.f32 %v6248_v58, %v6450_v43  ;;  %v6536_v34 = vadd.f32 %v6252_v60, %v6470_v40  ;;  %v6540_v58 = vadd.f32 %v6528_v61, %v6262_v1 }
 0x171   : > { %v695_v1 = vsel %vm619_vm2, %v6460_v48, -inf }
 0x172   : > { %11853 = vst [vmem:[#allocation44_spill] sm:$0xff] %v6540_v58  ;;  %v1428_v63 = vsel %vm619_vm2, %v6536_v34, -inf }
 0x174   : > { %1417 = vmax.xlane.f32.xlu0 %v1416_v55  ;;  %1432 = vmax.xlane.f32.xlu1 %v1431_v53  ;;  %v1422_v55 = vsel %vm619_vm2, %v6522_v52, -inf  ;;  %v1443_v53 = vsel %vm619_vm2, %v6526_v5, -inf }
 0x178   : > { %687 = vmax.xlane.f32.xlu0 %v686_v59  ;;  %1438 = vmax.xlane.f32.xlu1 %v1437_v54  ;;  %v1449_v59 = vsel %vm619_vm2, %v6540_v58, -inf  ;;  %v6548_v54 = vadd.f32 %v6256_v62, %v6490_v49 }
 0x17a   : > { %v1434_v60 = vsel %vm619_vm2, %v6548_v54, -inf }
 0x17c   : > { %1423 = vmax.xlane.f32.xlu0 %v1422_v55  ;;  %1444 = vmax.xlane.f32.xlu1 %v1443_v53  ;;  %v6556_v55 = vadd.f32 %v6260_v0, %v6514_v56  ;;  %v6558_v53 = vpop.f32.mrf.mxu0  ;;  %v707_v0 = vsel %vm619_vm2, %v6504_v57, -inf }
 0x17d   : > { %11854 = vst [vmem:[#allocation45_spill] sm:$0xff] %v6558_v53 }
 0x17e   : > { %v1440_v62 = vsel %vm619_vm2, %v6556_v55, -inf }
 0x180   : > { %1429 = vmax.xlane.f32.xlu0 %v1428_v63  ;;  %1450 = vmax.xlane.f32.xlu1 %v1449_v59  ;;  %v701_v63 = vsel %vm619_vm2, %v6480_v39, -inf  ;;  %v6566_v59 = vadd.f32 %v6264_v2, %v6558_v53  ;;  %v698_v2 = vsel %vm619_vm2, %v6490_v49, -inf }
 0x182   : > { %11855 = vst [vmem:[#allocation46_spill] sm:$0xff] %v6566_v59  ;;  %v1446_v58 = vsel %vm619_vm2, %v6566_v59, -inf }
 0x184   : > { %1435 = vmax.xlane.f32.xlu0 %v1434_v60  ;;  %696 = vmax.xlane.f32.xlu1 %v695_v1  ;;  %v713_v60 = vsel %vm619_vm2, %v6528_v61, -inf  ;;  %v692_v1 = vsel %vm619_vm2, %v6470_v40, -inf }
 0x188   : > { %1441 = vmax.xlane.f32.xlu0 %v1440_v62  ;;  %702 = vmax.xlane.f32.xlu1 %v701_v63  ;;  %v704_v62 = vsel %vm619_vm2, %v6514_v56, -inf  ;;  %v710_v63 = vsel %vm619_vm2, %v6558_v53, -inf }
 0x18c   : > { %708 = vmax.xlane.f32.xlu1 %v707_v0  ;;  %1447 = vmax.xlane.f32.xlu0 %v1446_v58  ;;  %v11345_v0 = vlaneseq }
 0x190   : > { %714 = vmax.xlane.f32.xlu1 %v713_v60  ;;  %693 = vmax.xlane.f32.xlu0 %v692_v1  ;;  %v6589_v60 = vand.u32 127, %v11345_v0 }
 0x192   : > { %11859 = vst [vmem:[#allocation50_spill] sm:$0xff] %v6589_v60 }
 0x194   : > { %699 = vmax.xlane.f32.xlu0 %v698_v2 }
 0x198   : > { %705 = vmax.xlane.f32.xlu0 %v704_v62 }
 0x19c   : > { %711 = vmax.xlane.f32.xlu0 %v710_v63 }
 0x1a1   : > { %v6582_v58 = vpop.xlane.xlu0 %624 }
 0x1a2   : > { %11856 = vst [vmem:[#allocation47_spill] sm:$0xff] %v6582_v58  ;;  %v717_v63 = vsub.f32 %v6266_v3, %v6582_v58 }
 0x1a4   : > { %v750_v40 = vmul.f32 1.442695, %v717_v63 }
 0x1a5   : > { %v6584_v59 = vpop.xlane.xlu0 %621  ;;  %v6586_v61 = vpop.xlane.xlu1 %630 }
 0x1a6   : > { %11857 = vst [vmem:[#allocation48_spill] sm:$0xff] %v6584_v59  ;;  %11858 = vst [vmem:[#allocation49_spill] sm:$0xff] %v6586_v61  ;;  %v716_v58 = vsub.f32 %v6270_v6, %v6584_v59  ;;  %5489 = vpow2.f32 %v750_v40  ;;  %v719_v40 = vsub.f32 %v6272_v7, %v6586_v61 }
 0x1a8   : > { %v748_v63 = vmul.f32 1.442695, %v716_v58 }
 0x1a9   : > { %v1361_v1 = vpop.xlane.xlu0 %1360  ;;  %v6591_v2 = vpop.xlane.xlu1 %627 }
 0x1aa   : > { %11860 = vst [vmem:[#allocation51_spill] sm:$0xff] %v6591_v2  ;;  %vm1455_vm3 = vcmp.eq.f32.partialorder %v6279_v10, %v1361_v1  ;;  %5491 = vpow2.f32 %v748_v63 }
 0x1ab   : > { %v1487_v62 = vsel %vm1455_vm3, %v6589_v60, 16 }
 0x1ac   : > { %v6598_v53 = vsel %vm619_vm2, %v1487_v62, 2147483647 }
 0x1ad   : > { %11861 = vst [vmem:[#allocation52_spill] sm:$0xff] %v6598_v53  ;;  %v1358_v56 = vpop.xlane.xlu0 %1357  ;;  %v1367_v49 = vpop.xlane.xlu1 %1366  ;;  %v1535_v57 = vshra.s32 %v6598_v53, 16 }
 0x1ae   : > { %vm1454_vm4 = vcmp.eq.f32.partialorder %v6290_v16, %v1358_v56  ;;  %vm1457_vm5 = vcmp.eq.f32.partialorder %v6293_v17, %v1367_v49 }
 0x1af   : > { %v1486_v0 = vsel %vm1454_vm4, %v6589_v60, 16  ;;  %v1489_v10 = vsel %vm1457_vm5, %v6589_v60, 16  ;;  %v6605_v1 = vcvt.s32.f32 %v1535_v57 }
 0x1b0   : > { %v6610_v62 = vsel %vm619_vm2, %v1489_v10, 2147483647  ;;  %v6613_v3 = vsel %vm619_vm2, %v1486_v0, 2147483647  ;;  %v718_v0 = vsub.f32 %v6281_v12, %v6591_v2  ;;  %v754_v12 = vmul.f32 1.442695, %v719_v40 }
 0x1b1   : > { %v1364_v53 = vpop.xlane.xlu0 %1363  ;;  %v6615_v16 = vpop.xlane.xlu1 %636  ;;  %1538 = vmin.xlane.f32.xlu1 %v6605_v1  ;;  %v1520_v17 = vshra.s32 %v6613_v3, 16  ;;  %v1565_v56 = vshra.s32 %v6610_v62, 16 }
 0x1b2   : > { %11862 = vst [vmem:[#allocation53_spill] sm:$0xff] %v6615_v16  ;;  %vm1456_vm6 = vcmp.eq.f32.partialorder %v6304_v22, %v1364_v53  ;;  %v752_v58 = vmul.f32 1.442695, %v718_v0 }
 0x1b3   : > { %v1488_v49 = vsel %vm1456_vm6, %v6589_v60, 16  ;;  %v6621_v57 = vcvt.s32.f32 %v1520_v17  ;;  %v6635_v53 = vcvt.s32.f32 %v1565_v56 }
 0x1b4   : > { %v6627_v10 = vsel %vm619_vm2, %v1488_v49, 2147483647  ;;  %5493 = vpow2.f32 %v752_v58 }
 0x1b5   : > { %v6629_v59 = vpop.xlane.xlu0 %633  ;;  %v6631_v6 = vpop.xlane.xlu1 %642  ;;  %1523 = vmin.xlane.f32.xlu1 %v6621_v57  ;;  %v1550_v22 = vshra.s32 %v6627_v10, 16  ;;  %5495 = vpow2.f32 %v754_v12 }
 0x1b6   : > { %11863 = vst [vmem:[#allocation54_spill] sm:$0xff] %v6629_v59  ;;  %11864 = vst [vmem:[#allocation55_spill] sm:$0xff] %v6631_v6  ;;  %v720_v40 = vsub.f32 %v6295_v18, %v6629_v59 }
 0x1b7   : > { %v6637_v17 = vcvt.s32.f32 %v1550_v22 }
 0x1b9   : > { %v1373_v2 = vpop.xlane.xlu0 %1372  ;;  %v1379_v49 = vpop.xlane.xlu1 %1378  ;;  %1568 = vmin.xlane.f32.xlu1 %v6635_v53  ;;  %1553 = vmin.xlane.f32.xlu0 %v6637_v17 }
 0x1ba   : > { %vm1459_vm7 = vcmp.eq.f32.partialorder %v6324_v31, %v1373_v2  ;;  %vm1461_vm8 = vcmp.eq.f32.partialorder %v6328_v32, %v1379_v49  ;;  %v721_v31 = vsub.f32 %v6285_v14, %v6615_v16  ;;  %v756_v14 = vmul.f32 1.442695, %v720_v40 }
 0x1bb   : > { %v1491_v56 = vsel %vm1459_vm7, %v6589_v60, 16  ;;  %v1493_v22 = vsel %vm1461_vm8, %v6589_v60, 16  ;;  %v723_v40 = vsub.f32 %v6297_v19, %v6631_v6 }
 0x1bc   : > { %v6647_v63 = vsel %vm619_vm2, %v1491_v56, 2147483647  ;;  %v6662_v58 = vsel %vm619_vm2, %v1493_v22, 2147483647  ;;  %v6667_v56 = vpop.eup %5489  ;;  %v758_v16 = vmul.f32 1.442695, %v721_v31 }
 0x1bd   : > { %11865 = vst [vmem:[#allocation56_spill] sm:$0xff] %v6647_v63  ;;  %v1370_v0 = vpop.xlane.xlu0 %1369  ;;  %v6650_v61 = vpop.xlane.xlu1 %648  ;;  %v1595_v7 = vshra.s32 %v6647_v63, 16  ;;  %11868 = vst [vmem:[#allocation59_spill] sm:$0xff] %v6662_v58  ;;  %v1625_v59 = vshra.s32 %v6662_v58, 16  ;;  %v815_v22 = vsel %vm619_vm2, %v6667_v56, 0.0  ;;  %v5956_v31 = vmov 96  }
 0x1be   : > { %11866 = vst [vmem:[#allocation57_spill] sm:$0xff] %v6650_v61  ;;  %vm1458_vm9 = vcmp.eq.f32.partialorder %v6338_v36, %v1370_v0  ;;  %11869 = vst [vmem:[#allocation60_spill] sm:$0xff] %v6667_v56  ;;  %5407 = vset.pattern.permute.xlu1 %v5956_v31  ;;  %5408 = vset.pattern.permute.xlu0 %v5956_v31  ;;  %5497 = vpow2.f32 %v758_v16 }
 0x1bf   : > { %v1490_v32 = vsel %vm1458_vm9, %v6589_v60, 16  ;;  %v6657_v2 = vcvt.s32.f32 %v1595_v7  ;;  %v6688_v56 = vcvt.s32.f32 %v1625_v59  ;;  %5499 = vpow2.f32 %v756_v14 }
 0x1c0   : > { %v6665_v49 = vsel %vm619_vm2, %v1490_v32, 2147483647  ;;  %v6678_v32 = vpop.eup %5491  ;;  %v762_v59 = vmul.f32 1.442695, %v723_v40  ;;  %v725_v40 = vsub.f32 %v6310_v25, %v6650_v61 }
 0x1c1   : > { %11867 = vst [vmem:[#allocation58_spill] sm:$0xff] %v6657_v2  ;;  %v6669_v36 = vpop.xlane.xlu0 %639  ;;  %v1385_v0 = vpop.xlane.xlu1 %1384  ;;  %1598 = vmin.xlane.f32.xlu1 %v6657_v2  ;;  %v1580_v7 = vshra.s32 %v6665_v49, 16 }
 0x1c2   : > { %11870 = vst [vmem:[#allocation61_spill] sm:$0xff] %v6669_v36  ;;  %vm1463_vm10 = vcmp.eq.f32.partialorder %v6348_v41, %v1385_v0  ;;  %v6697_v41 = vpop.eup %5493  ;;  %5501 = vpow2.f32 %v762_v59  ;;  %v766_v59 = vmul.f32 1.442695, %v725_v40 }
 0x1c3   : > { %v6673_v12 = vcvt.s32.f32 %v1580_v7  ;;  %11872 = vst [vmem:[#allocation63_spill] sm:$0xff] %v6697_v41  ;;  %v6711_v19 = vpop.eup %5495 }
 0x1c4   : > { %11874 = vst [vmem:[#allocation65_spill] sm:$0xff] %v6711_v19 }
 0x1c5   : > { %v1376_v18 = vpop.xlane.xlu0 %1375  ;;  %v6680_v63 = vpop.xlane.xlu1 %654  ;;  %816 = vadd.xlane.f32.xlu1 %v815_v22  ;;  %1583 = vmin.xlane.f32.xlu0 %v6673_v12  ;;  %v722_v22 = vsub.f32 %v6306_v23, %v6669_v36  ;;  %v818_v36 = vsel %vm619_vm2, %v6697_v41, 0.0 }
 0x1c6   : > { %11871 = vst [vmem:[#allocation62_spill] sm:$0xff] %v6680_v63  ;;  %vm1460_vm11 = vcmp.eq.f32.partialorder %v6358_v8, %v1376_v18  ;;  %v812_v18 = vsel %vm619_vm2, %v6678_v32, 0.0  ;;  %v1495_v8 = vsel %vm1463_vm10, %v6589_v60, 16 }
 0x1c7   : > { %v1492_v7 = vsel %vm1460_vm11, %v6589_v60, 16  ;;  %v6707_v6 = vsel %vm619_vm2, %v1495_v8, 2147483647 }
 0x1c8   : > { %v6693_v58 = vsel %vm619_vm2, %v1492_v7, 2147483647  ;;  %v760_v7 = vmul.f32 1.442695, %v722_v22 }
 0x1c9   : > { %v6700_v16 = vpop.xlane.xlu0 %645  ;;  %v1391_v0 = vpop.xlane.xlu1 %1390  ;;  %1628 = vmin.xlane.f32.xlu1 %v6688_v56  ;;  %813 = vadd.xlane.f32.xlu0 %v812_v18  ;;  %v1610_v14 = vshra.s32 %v6693_v58, 16  ;;  %v1655_v18 = vshra.s32 %v6707_v6, 16 }
 0x1ca   : > { %11873 = vst [vmem:[#allocation64_spill] sm:$0xff] %v6700_v16  ;;  %vm1465_vm12 = vcmp.eq.f32.partialorder %v6368_v13, %v1391_v0  ;;  %5503 = vpow2.f32 %v760_v7  ;;  %v724_v8 = vsub.f32 %v6314_v27, %v6700_v16  ;;  %v821_v13 = vsel %vm619_vm2, %v6711_v19, 0.0 }
 0x1cb   : > { %v6704_v31 = vcvt.s32.f32 %v1610_v14  ;;  %v6733_v61 = vcvt.s32.f32 %v1655_v18  ;;  %v6737_v16 = vpop.eup %5497  ;;  %v727_v19 = vsub.f32 %v6318_v29, %v6680_v63  ;;  %5505 = vpow2.f32 %v766_v59 }
 0x1cc   : > { %11877 = vst [vmem:[#allocation68_spill] sm:$0xff] %v6737_v16  ;;  %v6742_v27 = vpop.eup %5499  ;;  %v827_v18 = vsel %vm619_vm2, %v6737_v16, 0.0 }
 0x1cd   : > { %v1382_v23 = vpop.xlane.xlu0 %1381  ;;  %v6713_v2 = vpop.xlane.xlu1 %660  ;;  %1613 = vmin.xlane.f32.xlu1 %v6704_v31  ;;  %819 = vadd.xlane.f32.xlu0 %v818_v36  ;;  %11878 = vst [vmem:[#allocation69_spill] sm:$0xff] %v6742_v27 }
 0x1ce   : > { %11875 = vst [vmem:[#allocation66_spill] sm:$0xff] %v6713_v2  ;;  %vm1462_vm13 = vcmp.eq.f32.partialorder %v6378_v21, %v1382_v23  ;;  %v1497_v23 = vsel %vm1465_vm12, %v6589_v60, 16 }
 0x1cf   : > { %v1494_v22 = vsel %vm1462_vm13, %v6589_v60, 16  ;;  %v6740_v25 = vsel %vm619_vm2, %v1497_v23, 2147483647 }
 0x1d0   : > { %v6725_v14 = vsel %vm619_vm2, %v1494_v22, 2147483647  ;;  %v764_v22 = vmul.f32 1.442695, %v724_v8  ;;  %v1685_v8 = vshra.s32 %v6740_v25, 16 }
 0x1d1   : > { %v6730_v21 = vpop.xlane.xlu0 %651  ;;  %v1397_v36 = vpop.xlane.xlu1 %1396  ;;  %822 = vadd.xlane.f32.xlu1 %v821_v13  ;;  %v1640_v0 = vshra.s32 %v6725_v14, 16 }
 0x1d2   : > { %11876 = vst [vmem:[#allocation67_spill] sm:$0xff] %v6730_v21  ;;  %vm1467_vm14 = vcmp.eq.f32.partialorder %v6388_v28, %v1397_v36  ;;  %5507 = vpow2.f32 %v764_v22  ;;  %v726_v23 = vsub.f32 %v6330_v33, %v6730_v21  ;;  %v824_v28 = vsel %vm619_vm2, %v6742_v27, 0.0  ;;  %v6771_v21 = vpop.eup %5501 }
 0x1d3   : > { %v6735_v7 = vcvt.s32.f32 %v1640_v0  ;;  %v770_v36 = vmul.f32 1.442695, %v727_v19  ;;  %v6767_v22 = vcvt.s32.f32 %v1685_v8  ;;  %11881 = vst [vmem:[#allocation72_spill] sm:$0xff] %v6771_v21  ;;  %v833_v8 = vsel %vm619_vm2, %v6771_v21, 0.0 }
 0x1d5   : > { %v1388_v41 = vpop.xlane.xlu0 %1387  ;;  %v6746_v13 = vpop.xlane.xlu1 %666  ;;  %1658 = vmin.xlane.f32.xlu1 %v6733_v61  ;;  %1643 = vmin.xlane.f32.xlu0 %v6735_v7  ;;  %5509 = vpow2.f32 %v770_v36 }
 0x1d6   : > { %11879 = vst [vmem:[#allocation70_spill] sm:$0xff] %v6746_v13  ;;  %vm1464_vm15 = vcmp.eq.f32.partialorder %v6398_v35, %v1388_v41  ;;  %v1499_v35 = vsel %vm1467_vm14, %v6589_v60, 16 }
 0x1d7   : > { %v1496_v40 = vsel %vm1464_vm15, %v6589_v60, 16  ;;  %v6774_v33 = vsel %vm619_vm2, %v1499_v35, 2147483647  ;;  %v6776_v19 = vpop.eup %5503 }
 0x1d8   : > { %v6759_v0 = vsel %vm619_vm2, %v1496_v40, 2147483647  ;;  %v768_v40 = vmul.f32 1.442695, %v726_v23  ;;  %11882 = vst [vmem:[#allocation73_spill] sm:$0xff] %v6776_v19  ;;  %v1715_v23 = vshra.s32 %v6774_v33, 16 }
 0x1d9   : > { %v6764_v41 = vpop.xlane.xlu0 %657  ;;  %v1403_v59 = vpop.xlane.xlu1 %1402  ;;  %828 = vadd.xlane.f32.xlu1 %v827_v18  ;;  %825 = vadd.xlane.f32.xlu0 %v824_v28  ;;  %v1670_v63 = vshra.s32 %v6759_v0, 16  ;;  %v729_v18 = vsub.f32 %v6340_v37, %v6713_v2 }
 0x1da   : > { %11880 = vst [vmem:[#allocation71_spill] sm:$0xff] %v6764_v41  ;;  %vm1469_vm1 = vcmp.eq.f32.partialorder %v6408_v38, %v1403_v59  ;;  %5511 = vpow2.f32 %v768_v40  ;;  %v728_v28 = vsub.f32 %v6350_v4, %v6764_v41  ;;  %v830_v38 = vsel %vm619_vm2, %v6776_v19, 0.0  ;;  %v6807_v2 = vpop.eup %5505 }
 0x1db   : > { %v6769_v29 = vcvt.s32.f32 %v1670_v63  ;;  %v774_v59 = vmul.f32 1.442695, %v729_v18  ;;  %v6803_v40 = vcvt.s32.f32 %v1715_v23  ;;  %11885 = vst [vmem:[#allocation76_spill] sm:$0xff] %v6807_v2  ;;  %v731_v18 = vsub.f32 %v6360_v9, %v6746_v13 }
 0x1dc   : > { %v772_v41 = vmul.f32 1.442695, %v728_v28 }
 0x1dd   : > { %v1394_v16 = vpop.xlane.xlu0 %1393  ;;  %v1400_v27 = vpop.xlane.xlu1 %1399  ;;  %1688 = vmin.xlane.f32.xlu1 %v6767_v22  ;;  %1673 = vmin.xlane.f32.xlu0 %v6769_v29  ;;  %5513 = vpow2.f32 %v774_v59  ;;  %v778_v9 = vmul.f32 1.442695, %v731_v18 }
 0x1de   : > { %vm1466_vm3 = vcmp.eq.f32.partialorder %v6418_v11, %v1394_v16  ;;  %vm1468_vm4 = vcmp.eq.f32.partialorder %v6422_v42, %v1400_v27  ;;  %v1501_v11 = vsel %vm1469_vm1, %v6589_v60, 16  ;;  %5515 = vpow2.f32 %v772_v41 }
 0x1df   : > { %v1498_v63 = vsel %vm1466_vm3, %v6589_v60, 16  ;;  %v1500_v27 = vsel %vm1468_vm4, %v6589_v60, 16  ;;  %v6810_v37 = vsel %vm619_vm2, %v1501_v11, 2147483647  ;;  %v6815_v21 = vpop.eup %5507  ;;  %5517 = vpow2.f32 %v778_v9 }
 0x1e0   : > { %v6792_v36 = vsel %vm619_vm2, %v1498_v63, 2147483647  ;;  %11886 = vst [vmem:[#allocation77_spill] sm:$0xff] %v6810_v37  ;;  %v6813_v4 = vsel %vm619_vm2, %v1500_v27, 2147483647  ;;  %11887 = vst [vmem:[#allocation78_spill] sm:$0xff] %v6815_v21 }
 0x1e1   : > { %v6798_v42 = vpop.xlane.xlu0 %663  ;;  %v6800_v16 = vpop.xlane.xlu1 %672  ;;  %834 = vadd.xlane.f32.xlu1 %v833_v8  ;;  %831 = vadd.xlane.f32.xlu0 %v830_v38  ;;  %v1700_v35 = vshra.s32 %v6792_v36, 16  ;;  %v1745_v23 = vshra.s32 %v6810_v37, 16  ;;  %v1730_v28 = vshra.s32 %v6813_v4, 16  ;;  %v839_v27 = vsel %vm619_vm2, %v6807_v2, 0.0 }
 0x1e2   : > { %11883 = vst [vmem:[#allocation74_spill] sm:$0xff] %v6798_v42  ;;  %11884 = vst [vmem:[#allocation75_spill] sm:$0xff] %v6800_v16  ;;  %v730_v11 = vsub.f32 %v6370_v15, %v6798_v42  ;;  %v6835_v13 = vpop.eup %5509 }
 0x1e3   : > { %v6805_v63 = vcvt.s32.f32 %v1700_v35  ;;  %v836_v35 = vsel %vm619_vm2, %v6815_v21, 0.0  ;;  %11890 = vst [vmem:[#allocation81_spill] sm:$0xff] %v6835_v13  ;;  %v6837_v41 = vcvt.s32.f32 %v1745_v23  ;;  %v6839_v19 = vcvt.s32.f32 %v1730_v28 }
 0x1e4   : > { %v776_v42 = vmul.f32 1.442695, %v730_v11  ;;  %v845_v18 = vsel %vm619_vm2, %v6835_v13, 0.0  ;;  %v733_v23 = vsub.f32 %v6380_v24, %v6800_v16 }
 0x1e5   : > { %v1409_v8 = vpop.xlane.xlu0 %1408  ;;  %v6817_v38 = vpop.xlane.xlu1 %678  ;;  %1718 = vmin.xlane.f32.xlu1 %v6803_v40  ;;  %1703 = vmin.xlane.f32.xlu0 %v6805_v63 }
 0x1e6   : > { %11888 = vst [vmem:[#allocation79_spill] sm:$0xff] %v6817_v38  ;;  %vm1471_vm5 = vcmp.eq.f32.partialorder %v6438_v44, %v1409_v8  ;;  %5519 = vpow2.f32 %v776_v42  ;;  %v782_v42 = vmul.f32 1.442695, %v733_v23  ;;  %v11899_v23 = vld [vmem:[#allocation29_spill] sm:$0xff] }
 0x1e7   : > { %v1503_v59 = vsel %vm1471_vm5, %v6589_v60, 16  ;;  %v6844_v2 = vpop.eup %5511 }
 0x1e8   : > { %v6842_v15 = vsel %vm619_vm2, %v1503_v59, 2147483647  ;;  %11891 = vst [vmem:[#allocation82_spill] sm:$0xff] %v6844_v2  ;;  %5521 = vpow2.f32 %v782_v42 }
 0x1e9   : > { %v6833_v44 = vpop.xlane.xlu0 %669  ;;  %v1415_v8 = vpop.xlane.xlu1 %1414  ;;  %840 = vadd.xlane.f32.xlu1 %v839_v27  ;;  %837 = vadd.xlane.f32.xlu0 %v836_v35  ;;  %v1775_v11 = vshra.s32 %v6842_v15, 16 }
 0x1ea   : > { %11889 = vst [vmem:[#allocation80_spill] sm:$0xff] %v6833_v44  ;;  %vm1473_vm6 = vcmp.eq.f32.partialorder %v6448_v46, %v1415_v8  ;;  %v732_v27 = vsub.f32 %v6390_v30, %v6833_v44  ;;  %v842_v46 = vsel %vm619_vm2, %v6844_v2, 0.0  ;;  %v6869_v8 = vpop.eup %5513 }
 0x1eb   : > { %11894 = vst [vmem:[#allocation85_spill] sm:$0xff] %v6869_v8  ;;  %v6871_v16 = vcvt.s32.f32 %v1775_v11  ;;  %v6878_v30 = vpop.eup %5515  ;;  %v735_v11 = vsub.f32 %v11899_v23, %v6817_v38 }
 0x1ec   : > { %11897 = vst [vmem:[#allocation88_spill] sm:$0xff] %v6878_v30 }
 0x1ed   : > { %v1406_v21 = vpop.xlane.xlu0 %1405  ;;  %v6846_v37 = vpop.xlane.xlu1 %684  ;;  %1748 = vmin.xlane.f32.xlu1 %v6837_v41  ;;  %1733 = vmin.xlane.f32.xlu0 %v6839_v19  ;;  %11895 = vst [vmem:[#allocation86_spill] sm:$0xff] %v6871_v16  ;;  %v786_v38 = vmul.f32 1.442695, %v735_v11 }
 0x1ee   : > { %11892 = vst [vmem:[#allocation83_spill] sm:$0xff] %v6846_v37  ;;  %vm1470_vm7 = vcmp.eq.f32.partialorder %v6458_v45, %v1406_v21  ;;  %v1505_v45 = vsel %vm1473_vm6, %v6589_v60, 16 }
 0x1ef   : > { %v1502_v28 = vsel %vm1470_vm7, %v6589_v60, 16  ;;  %v6876_v24 = vsel %vm619_vm2, %v1505_v45, 2147483647  ;;  %v11900_v45 = vld [vmem:[#allocation30_spill] sm:$0xff] }
 0x1f0   : > { %v6861_v35 = vsel %vm619_vm2, %v1502_v28, 2147483647  ;;  %v780_v28 = vmul.f32 1.442695, %v732_v27  ;;  %11896 = vst [vmem:[#allocation87_spill] sm:$0xff] %v6876_v24 }
 0x1f1   : > { %v6866_v9 = vpop.xlane.xlu0 %675  ;;  %v1421_v21 = vpop.xlane.xlu1 %1420  ;;  %846 = vadd.xlane.f32.xlu1 %v845_v18  ;;  %843 = vadd.xlane.f32.xlu0 %v842_v46  ;;  %v1760_v59 = vshra.s32 %v6861_v35, 16  ;;  %v851_v18 = vsel %vm619_vm2, %v6869_v8, 0.0  ;;  %v1805_v46 = vshra.s32 %v6876_v24, 16 }
 0x1f2   : > { %11893 = vst [vmem:[#allocation84_spill] sm:$0xff] %v6866_v9  ;;  %vm1475_vm8 = vcmp.eq.f32.partialorder %v6468_v47, %v1421_v21  ;;  %5523 = vpow2.f32 %v780_v28  ;;  %v848_v47 = vsel %vm619_vm2, %v6878_v30, 0.0 }
 0x1f3   : > { %v6873_v44 = vcvt.s32.f32 %v1760_v59  ;;  %v734_v59 = vsub.f32 %v11900_v45, %v6866_v9  ;;  %v6903_v28 = vcvt.s32.f32 %v1805_v46  ;;  %v6907_v9 = vpop.eup %5517  ;;  %5525 = vpow2.f32 %v786_v38 }
 0x1f4   : > { %11903 = vst [vmem:[#allocation92_spill] sm:$0xff] %v6907_v9  ;;  %v6912_v8 = vpop.eup %5519 }
 0x1f5   : > { %v1412_v13 = vpop.xlane.xlu0 %1411  ;;  %v6880_v2 = vpop.xlane.xlu1 %690  ;;  %1778 = vmin.xlane.f32.xlu1 %v6871_v16  ;;  %1763 = vmin.xlane.f32.xlu0 %v6873_v44  ;;  %11902 = vst [vmem:[#allocation91_spill] sm:$0xff] %v6903_v28  ;;  %11905 = vst [vmem:[#allocation94_spill] sm:$0xff] %v6912_v8 }
 0x1f6   : > { %11898 = vst [vmem:[#allocation89_spill] sm:$0xff] %v6880_v2  ;;  %vm1472_vm9 = vcmp.eq.f32.partialorder %v6478_v20, %v1412_v13  ;;  %v1507_v20 = vsel %vm1475_vm8, %v6589_v60, 16 }
 0x1f7   : > { %v1504_v27 = vsel %vm1472_vm9, %v6589_v60, 16  ;;  %v6910_v45 = vsel %vm619_vm2, %v1507_v20, 2147483647 }
 0x1f8   : > { %v6895_v16 = vsel %vm619_vm2, %v1504_v27, 2147483647  ;;  %v784_v27 = vmul.f32 1.442695, %v734_v59  ;;  %11904 = vst [vmem:[#allocation93_spill] sm:$0xff] %v6910_v45  ;;  %v857_v59 = vsel %vm619_vm2, %v6907_v9, 0.0 }
 0x1f9   : > { %v6900_v13 = vpop.xlane.xlu0 %681  ;;  %v1427_v21 = vpop.xlane.xlu1 %1426  ;;  %852 = vadd.xlane.f32.xlu1 %v851_v18  ;;  %849 = vadd.xlane.f32.xlu0 %v848_v47  ;;  %v1790_v42 = vshra.s32 %v6895_v16, 16  ;;  %v11906_v18 = vld [vmem:[#allocation31_spill] sm:$0xff]  ;;  %v1835_v47 = vshra.s32 %v6910_v45, 16 }
 0x1fa   : > { %11901 = vst [vmem:[#allocation90_spill] sm:$0xff] %v6900_v13  ;;  %v737_v11 = vsub.f32 %v11906_v18, %v6846_v37  ;;  %vm1477_vm10 = vcmp.eq.f32.partialorder %v6488_v50, %v1427_v21  ;;  %5527 = vpow2.f32 %v784_v27  ;;  %v736_v20 = vsub.f32 %v6430_v26, %v6900_v13  ;;  %v6939_v13 = vpop.eup %5521 }
 0x1fb   : > { %v6905_v23 = vcvt.s32.f32 %v1790_v42  ;;  %v854_v50 = vsel %vm619_vm2, %v6912_v8, 0.0  ;;  %v6935_v27 = vcvt.s32.f32 %v1835_v47  ;;  %11910 = vst [vmem:[#allocation98_spill] sm:$0xff] %v6939_v13 }
 0x1fc   : > { %v790_v37 = vmul.f32 1.442695, %v737_v11  ;;  %v11913_v11 = vld [vmem:[#allocation39_spill] sm:$0xff] }
 0x1fd   : > { %v1418_v30 = vpop.xlane.xlu0 %1417  ;;  %v1433_v24 = vpop.xlane.xlu1 %1432  ;;  %1808 = vmin.xlane.f32.xlu1 %v6903_v28  ;;  %1793 = vmin.xlane.f32.xlu0 %v6905_v23  ;;  %11908 = vst [vmem:[#allocation96_spill] sm:$0xff] %v6935_v27 }
 0x1fe   : > { %vm1474_vm11 = vcmp.eq.f32.partialorder %v6498_v51, %v1418_v30  ;;  %v1509_v30 = vsel %vm1477_vm10, %v6589_v60, 16  ;;  %5529 = vpow2.f32 %v790_v37  ;;  %vm1479_vm12 = vcmp.eq.f32.partialorder %v11913_v11, %v1433_v24 }
 0x1ff   : > { %v1506_v46 = vsel %vm1474_vm11, %v6589_v60, 16  ;;  %v6942_v26 = vsel %vm619_vm2, %v1509_v30, 2147483647  ;;  %v6944_v9 = vpop.eup %5523 }
 0x200   : > { %v6927_v42 = vsel %vm619_vm2, %v1506_v46, 2147483647  ;;  %v788_v46 = vmul.f32 1.442695, %v736_v20  ;;  %11911 = vst [vmem:[#allocation99_spill] sm:$0xff] %v6942_v26  ;;  %11912 = vst [vmem:[#allocation100_spill] sm:$0xff] %v6944_v9 }
 0x201   : > { %v6932_v51 = vpop.xlane.xlu0 %687  ;;  %v1439_v38 = vpop.xlane.xlu1 %1438  ;;  %858 = vadd.xlane.f32.xlu1 %v857_v59  ;;  %855 = vadd.xlane.f32.xlu0 %v854_v50  ;;  %v1820_v21 = vshra.s32 %v6927_v42, 16  ;;  %v11914_v59 = vld [vmem:[#allocation33_spill] sm:$0xff]  ;;  %v863_v50 = vsel %vm619_vm2, %v6939_v13, 0.0  ;;  %v1865_v30 = vshra.s32 %v6942_v26, 16  ;;  %v860_v24 = vsel %vm619_vm2, %v6944_v9, 0.0 }
 0x202   : > { %11907 = vst [vmem:[#allocation95_spill] sm:$0xff] %v6932_v51  ;;  %v739_v47 = vsub.f32 %v11914_v59, %v6880_v2  ;;  %5531 = vpow2.f32 %v788_v46 }
 0x203   : > { %v6937_v18 = vcvt.s32.f32 %v1820_v21  ;;  %v738_v21 = vsub.f32 %v6450_v43, %v6932_v51  ;;  %v6971_v59 = vcvt.s32.f32 %v1865_v30  ;;  %v6975_v43 = vpop.eup %5525 }
 0x204   : > { %v794_v46 = vmul.f32 1.442695, %v739_v47  ;;  %11918 = vst [vmem:[#allocation103_spill] sm:$0xff] %v6975_v43 }
 0x205   : > { %11909 = vst [vmem:[#allocation97_spill] sm:$0xff] %v6937_v18  ;;  %v1424_v8 = vpop.xlane.xlu0 %1423  ;;  %v6946_v45 = vpop.xlane.xlu1 %1444  ;;  %1838 = vmin.xlane.f32.xlu1 %v6935_v27  ;;  %1823 = vmin.xlane.f32.xlu0 %v6937_v18  ;;  %11916 = vst [vmem:[#allocation101_spill] sm:$0xff] %v6971_v59  ;;  %v792_v9 = vmul.f32 1.442695, %v738_v21  ;;  %v869_v21 = vsel %vm619_vm2, %v6975_v43, 0.0  ;;  %v1579_v18 = vand.u32 65535, %v6665_v49 }
 0x206   : > { %vm1476_vm13 = vcmp.eq.f32.partialorder %v6522_v52, %v1424_v8  ;;  %v1511_v52 = vsel %vm1479_vm12, %v6589_v60, 16  ;;  %5533 = vpow2.f32 %v794_v46  ;;  %vm1483_vm3 = vcmp.eq.f32.partialorder %v6526_v5, %v6946_v45 }
 0x207   : > { %v1508_v20 = vsel %vm1476_vm13, %v6589_v60, 16  ;;  %v6978_v13 = vsel %vm619_vm2, %v1511_v52, 2147483647  ;;  %5535 = vpow2.f32 %v792_v9 }
 0x208   : > { %v6961_v37 = vsel %vm619_vm2, %v1508_v20, 2147483647  ;;  %11919 = vst [vmem:[#allocation104_spill] sm:$0xff] %v6978_v13  ;;  %v1895_v47 = vshra.s32 %v6978_v13, 16 }
 0x209   : > { %11915 = vst [vmem:[#allocation39_spill] sm:$0xff] %v6961_v37  ;;  %v1430_v8 = vpop.xlane.xlu0 %1429  ;;  %v6966_v11 = vpop.xlane.xlu1 %1450  ;;  %864 = vadd.xlane.f32.xlu1 %v863_v50  ;;  %861 = vadd.xlane.f32.xlu0 %v860_v24  ;;  %v1850_v2 = vshra.s32 %v6961_v37, 16 }
 0x20a   : > { %vm1478_vm14 = vcmp.eq.f32.partialorder %v6536_v34, %v1430_v8  ;;  %v6983_v24 = vpop.eup %5527  ;;  %v7005_v9 = vcvt.s32.f32 %v1895_v47 }
 0x20b   : > { %v1510_v51 = vsel %vm1478_vm14, %v6589_v60, 16  ;;  %v6973_v20 = vcvt.s32.f32 %v1850_v2  ;;  %11921 = vst [vmem:[#allocation106_spill] sm:$0xff] %v6983_v24  ;;  %v11923_v2 = vld [vmem:[#allocation41_spill] sm:$0xff]  ;;  %v866_v52 = vsel %vm619_vm2, %v6983_v24, 0.0  ;;  %v7003_v46 = vpop.eup %5529 }
 0x20c   : > { %v6981_v50 = vsel %vm619_vm2, %v1510_v51, 2147483647  ;;  %vm1481_vm15 = vcmp.eq.f32.partialorder %v11923_v2, %v1439_v38  ;;  %11925 = vst [vmem:[#allocation108_spill] sm:$0xff] %v7003_v46  ;;  %11926 = vst [vmem:[#allocation109_spill] sm:$0xff] %v7005_v9 }
 0x20d   : > { %11917 = vst [vmem:[#allocation102_spill] sm:$0xff] %v6973_v20  ;;  %11920 = vst [vmem:[#allocation105_spill] sm:$0xff] %v6981_v50  ;;  %v1436_v26 = vpop.xlane.xlu0 %1435  ;;  %v6985_v34 = vpop.xlane.xlu1 %696  ;;  %1868 = vmin.xlane.f32.xlu1 %v6971_v59  ;;  %1853 = vmin.xlane.f32.xlu0 %v6973_v20  ;;  %v1880_v30 = vshra.s32 %v6981_v50, 16  ;;  %v1513_v8 = vsel %vm1481_vm15, %v6589_v60, 16 }
 0x20e   : > { %11922 = vst [vmem:[#allocation107_spill] sm:$0xff] %v6985_v34  ;;  %vm1480_vm1 = vcmp.eq.f32.partialorder %v6548_v54, %v1436_v26  ;;  %v741_v51 = vsub.f32 %v6460_v48, %v6985_v34  ;;  %v7010_v34 = vsel %vm619_vm2, %v1513_v8, 2147483647  ;;  %v1515_v8 = vsel %vm1483_vm3, %v6589_v60, 16 }
 0x20f   : > { %v1512_v38 = vsel %vm1480_vm1, %v6589_v60, 16  ;;  %v7007_v2 = vcvt.s32.f32 %v1880_v30  ;;  %11928 = vst [vmem:[#allocation111_spill] sm:$0xff] %v7010_v34  ;;  %v7015_v24 = vpop.eup %5531  ;;  %v875_v30 = vsel %vm619_vm2, %v7003_v46, 0.0 }
 0x210   : > { %v7013_v48 = vsel %vm619_vm2, %v1512_v38, 2147483647  ;;  %v798_v43 = vmul.f32 1.442695, %v741_v51  ;;  %11930 = vst [vmem:[#allocation113_spill] sm:$0xff] %v7015_v24  ;;  %v872_v45 = vsel %vm619_vm2, %v7015_v24, 0.0 }
 0x211   : > { %v1442_v26 = vpop.xlane.xlu0 %1441  ;;  %v7001_v54 = vpop.xlane.xlu1 %702  ;;  %870 = vadd.xlane.f32.xlu1 %v869_v21  ;;  %867 = vadd.xlane.f32.xlu0 %v866_v52  ;;  %11927 = vst [vmem:[#allocation110_spill] sm:$0xff] %v7007_v2  ;;  %11929 = vst [vmem:[#allocation112_spill] sm:$0xff] %v7013_v48  ;;  %v1925_v52 = vshra.s32 %v7010_v34, 16  ;;  %v1910_v51 = vshra.s32 %v7013_v48, 16  ;;  %v7039_v34 = vsel %vm619_vm2, %v1515_v8, 2147483647 }
 0x212   : > { %11924 = vst [vmem:[#allocation41_spill] sm:$0xff] %v7001_v54  ;;  %vm1482_vm4 = vcmp.eq.f32.partialorder %v6556_v55, %v1442_v26  ;;  %5537 = vpow2.f32 %v798_v43  ;;  %v743_v5 = vsub.f32 %v6480_v39, %v7001_v54  ;;  %v11933_v26 = vld [vmem:[#allocation36_spill] sm:$0xff]  ;;  %11934 = vst [vmem:[#allocation116_spill] sm:$0xff] %v7039_v34  ;;  %v11944_v8 = vld [vmem:[#allocation38_spill] sm:$0xff] }
 0x213   : > { %v1514_v55 = vsel %vm1482_vm4, %v6589_v60, 16  ;;  %v7043_v43 = vcvt.s32.f32 %v1910_v51  ;;  %v7045_v54 = vpop.eup %5533  ;;  %v11943_v51 = vld [vmem:[#allocation44_spill] sm:$0xff] }
 0x214   : > { %11937 = vst [vmem:[#allocation119_spill] sm:$0xff] %v7045_v54  ;;  %v7048_v39 = vsel %vm619_vm2, %v1514_v55, 2147483647  ;;  %v802_v24 = vmul.f32 1.442695, %v743_v5  ;;  %v7052_v59 = vpop.eup %5535  ;;  %vm1485_vm5 = vcmp.eq.f32.partialorder %v11943_v51, %v6966_v11  ;;  %v1955_v55 = vshra.s32 %v7039_v34, 16 }
 0x215   : > { %1898 = vmin.xlane.f32.xlu1 %v7005_v9  ;;  %v1448_v21 = vpop.xlane.xlu0 %1447  ;;  %1883 = vmin.xlane.f32.xlu0 %v7007_v2  ;;  %v7022_v47 = vpop.xlane.xlu1 %708  ;;  %v7041_v9 = vcvt.s32.f32 %v1925_v52  ;;  %11936 = vst [vmem:[#allocation118_spill] sm:$0xff] %v7043_v43  ;;  %11938 = vst [vmem:[#allocation120_spill] sm:$0xff] %v7048_v39  ;;  %v1517_v11 = vsel %vm1485_vm5, %v6589_v60, 16  ;;  %v1519_v2 = vand.u32 65535, %v6613_v3  ;;  %v228_v3 = vld [vmem:[#allocation5 + $0x38] sm:$0x1] }
 0x216   : > { %11931 = vst [vmem:[#allocation114_spill] sm:$0xff] %v7022_v47  ;;  %11940 = vst [vmem:[#allocation121_spill] sm:$0xff] %v7052_v59  ;;  %5217 = vmatprep.subr.msk.mxu0 %vm390_vm0, %v228_v3  ;;  %5271 = vmatprep.subr.msk.mxu1 %vm390_vm0, %v228_v3 }
 0x217   : > { %11935 = vst [vmem:[#allocation117_spill] sm:$0xff] %v7041_v9  ;;  %5218 = vmatpush3.msk.msra.mxu0 %vm390_vm0, %v228_v3  ;;  %5274 = vmatpush3.msk.msra.mxu1 %vm390_vm0, %v228_v3  ;;  %v1654_v3 = vand.u32 65535, %v6707_v6  ;;  %v11988_v6 = vld [vmem:[#allocation52_spill] sm:$0xff] }
 0x219   : > { %876 = vadd.xlane.f32.xlu1 %v875_v30  ;;  %v7034_v38 = vpop.xlane.xlu0 %693  ;;  %873 = vadd.xlane.f32.xlu0 %v872_v45  ;;  %v11939_v30 = vld [vmem:[#allocation40_spill] sm:$0xff] }
 0x21a   : > { %11932 = vst [vmem:[#allocation115_spill] sm:$0xff] %v7034_v38  ;;  %v740_v46 = vsub.f32 %v11933_v26, %v7034_v38  ;;  %v745_v13 = vsub.f32 %v11939_v30, %v7022_v47  ;;  %v7054_v38 = vpop.xlane.xlu1 %714  ;;  %v1940_v47 = vshra.s32 %v7048_v39, 16  ;;  %v11945_v26 = vld [vmem:[#allocation43_spill] sm:$0xff] }
 0x21b   : > { %11941 = vst [vmem:[#allocation122_spill] sm:$0xff] %v7054_v38 }
 0x21c   : > { %v796_v45 = vmul.f32 1.442695, %v740_v46  ;;  %v881_v46 = vsel %vm619_vm2, %v7045_v54, 0.0  ;;  %v806_v30 = vmul.f32 1.442695, %v745_v13  ;;  %v7080_v13 = vcvt.s32.f32 %v1940_v47  ;;  %v11954_v47 = vld [vmem:[#allocation45_spill] sm:$0xff] }
 0x21d   : > { %1928 = vmin.xlane.f32.xlu1 %v7041_v9  ;;  %v7057_v52 = vpop.xlane.xlu0 %699  ;;  %1913 = vmin.xlane.f32.xlu0 %v7043_v43  ;;  %v747_v9 = vsub.f32 %v11945_v26, %v7054_v38  ;;  %v878_v43 = vsel %vm619_vm2, %v7052_v59, 0.0  ;;  %v7083_v38 = vsel %vm619_vm2, %v1517_v11, 2147483647 }
 0x21e   : > { %11942 = vst [vmem:[#allocation123_spill] sm:$0xff] %v7057_v52  ;;  %v742_v5 = vsub.f32 %v11944_v8, %v7057_v52  ;;  %5539 = vpow2.f32 %v796_v45  ;;  %v11947_v52 = vld [vmem:[#allocation42_spill] sm:$0xff]  ;;  %11950 = vst [vmem:[#allocation124_spill] sm:$0xff] %v7080_v13 }
 0x21f   : > { %5541 = vpow2.f32 %v802_v24  ;;  %v11948_v8 = vld [vmem:[#allocation46_spill] sm:$0xff]  ;;  %v7078_v24 = vcvt.s32.f32 %v1955_v55  ;;  %11951 = vst [vmem:[#allocation125_spill] sm:$0xff] %v7083_v38  ;;  %v810_v26 = vmul.f32 1.442695, %v747_v9  ;;  %v7085_v59 = vpop.eup %5537 }
 0x220   : > { %v800_v51 = vmul.f32 1.442695, %v742_v5  ;;  %vm1484_vm6 = vcmp.eq.f32.partialorder %v11948_v8, %v1448_v21  ;;  %5543 = vpow2.f32 %v806_v30  ;;  %11952 = vst [vmem:[#allocation126_spill] sm:$0xff] %v7085_v59  ;;  %v887_v9 = vsel %vm619_vm2, %v7085_v59, 0.0 }
 0x221   : > { %882 = vadd.xlane.f32.xlu1 %v881_v46  ;;  %v7073_v45 = vpop.xlane.xlu0 %705  ;;  %879 = vadd.xlane.f32.xlu0 %v878_v43  ;;  %11949 = vst [vmem:[#allocation46_spill] sm:$0xff] %v7078_v24  ;;  %v1516_v21 = vsel %vm1484_vm6, %v6589_v60, 16  ;;  %v1985_v46 = vshra.s32 %v7083_v38, 16 }
 0x222   : > { %11946 = vst [vmem:[#allocation44_spill] sm:$0xff] %v7073_v45  ;;  %v744_v54 = vsub.f32 %v11947_v52, %v7073_v45  ;;  %5545 = vpow2.f32 %v800_v51  ;;  %v7098_v30 = vsel %vm619_vm2, %v1516_v21, 2147483647 }
 0x223   : > { %5547 = vpow2.f32 %v810_v26  ;;  %11955 = vst [vmem:[#allocation128_spill] sm:$0xff] %v7098_v30  ;;  %v7100_v55 = vcvt.s32.f32 %v1985_v46  ;;  %v1970_v51 = vshra.s32 %v7098_v30, 16 }
 0x224   : > { %v804_v5 = vmul.f32 1.442695, %v744_v54 }
 0x225   : > { %1958 = vmin.xlane.f32.xlu1 %v7078_v24  ;;  %1943 = vmin.xlane.f32.xlu0 %v7080_v13  ;;  %v7089_v43 = vpop.xlane.xlu0 %711  ;;  %11956 = vst [vmem:[#allocation129_spill] sm:$0xff] %v7100_v55  ;;  %v7112_v21 = vcvt.s32.f32 %v1970_v51  ;;  %v5814_v24 = vld [vmem:[%s6098_s5 + $0x68] sm:$0xff] }
 0x226   : > { %11953 = vst [vmem:[#allocation127_spill] sm:$0xff] %v7089_v43  ;;  %v746_v8 = vsub.f32 %v11954_v47, %v7089_v43  ;;  %5549 = vpow2.f32 %v804_v5 }
 0x227   : > { %11959 = vst [vmem:[#allocation132_spill] sm:$0xff] %v7112_v21 }
 0x228   : > { %v808_v54 = vmul.f32 1.442695, %v746_v8 }
 0x229   : > { %888 = vadd.xlane.f32.xlu1 %v887_v9 }
 0x22a   : > { %5551 = vpow2.f32 %v808_v54 }
 0x22b   : > { %v7102_v11 = vpop.eup %5539 }
 0x22c   : > { %11957 = vst [vmem:[#allocation130_spill] sm:$0xff] %v7102_v11  ;;  %v7105_v45 = vpop.eup %5541  ;;  %v884_v26 = vsel %vm619_vm2, %v7102_v11, 0.0 }
 0x22d   : > { %11958 = vst [vmem:[#allocation131_spill] sm:$0xff] %v7105_v45  ;;  %1988 = vmin.xlane.f32.xlu1 %v7100_v55  ;;  %885 = vadd.xlane.f32.xlu0 %v884_v26  ;;  %v893_v5 = vsel %vm619_vm2, %v7105_v45, 0.0  ;;  %v7114_v8 = vpop.eup %5543 }
 0x22e   : > { %11960 = vst [vmem:[#allocation133_spill] sm:$0xff] %v7114_v8  ;;  %v899_v9 = vsel %vm619_vm2, %v7114_v8, 0.0 }
 0x22f   : > { %v7116_v46 = vpop.eup %5545 }
 0x230   : > { %11961 = vst [vmem:[#allocation134_spill] sm:$0xff] %v7116_v46  ;;  %v7121_v54 = vpop.eup %5547  ;;  %v890_v26 = vsel %vm619_vm2, %v7116_v46, 0.0 }
 0x231   : > { %894 = vadd.xlane.f32.xlu1 %v893_v5  ;;  %1973 = vmin.xlane.f32.xlu0 %v7112_v21  ;;  %11962 = vst [vmem:[#allocation135_spill] sm:$0xff] %v7121_v54  ;;  %v905_v5 = vsel %vm619_vm2, %v7121_v54, 0.0  ;;  %v5810_v54 = vld [vmem:[%s6098_s5 + $0xf0] sm:$0xff] }
 0x233   : > { %v7125_v51 = vpop.eup %5549 }
 0x234   : > { %11963 = vst [vmem:[#allocation136_spill] sm:$0xff] %v7125_v51  ;;  %v896_v43 = vsel %vm619_vm2, %v7125_v51, 0.0 }
 0x235   : > { %900 = vadd.xlane.f32.xlu1 %v899_v9  ;;  %891 = vadd.xlane.f32.xlu0 %v890_v26  ;;  %v5809_v26 = vld [vmem:[%s6098_s5 + $0xf8] sm:$0xff] }
 0x236   : > { %v5339_v47 = vtrunc.f32 %v5809_v26 }
 0x237   : > { %v7131_v60 = vpop.eup %5551 }
 0x238   : > { %11964 = vst [vmem:[#allocation137_spill] sm:$0xff] %v7131_v60  ;;  %v902_v9 = vsel %vm619_vm2, %v7131_v60, 0.0  ;;  %v7141_v59 = vcvt.f32.s32 %v5339_v47  ;;  %v5812_v60 = vld [vmem:[%s6098_s5 + $0x78] sm:$0xff]  ;;  %v5813_v47 = vld [vmem:[%s6098_s5 + $0xe8] sm:$0xff] }
 0x239   : > { %906 = vadd.xlane.f32.xlu1 %v905_v5  ;;  %897 = vadd.xlane.f32.xlu0 %v896_v43  ;;  %v5337_v5 = vtrunc.f32 %v5810_v54  ;;  %v5811_v43 = vld [vmem:[%s6098_s5 + $0x70] sm:$0xff]  ;;  %v5307_v38 = vtrunc.f32 %v5812_v60  ;;  %v5335_v54 = vtrunc.f32 %v5813_v47 }
 0x23a   : > { %v7133_v8 = vpop.xlane.xlu1 %1538  ;;  %11965 = vst [vmem:[#allocation138_spill] sm:$0xff] %v7141_v59  ;;  %v5305_v51 = vtrunc.f32 %v5811_v43 }
 0x23b   : > { %v7146_v46 = vcvt.f32.s32 %v5337_v5  ;;  %v7162_v43 = vcvt.f32.s32 %v5307_v38  ;;  %v7165_v34 = vcvt.f32.s32 %v5335_v54  ;;  %vm1540_vm12 = vcmp.eq.f32.partialorder %v6605_v1, %v7133_v8 }
 0x23c   : > { %v7154_v26 = vcvt.f32.s32 %v5305_v51 }
 0x23d   : > { %903 = vadd.xlane.f32.xlu0 %v902_v9  ;;  %11966 = vst [vmem:[#allocation139_spill] sm:$0xff] %v7146_v46  ;;  %11969 = vst [vmem:[#allocation142_spill] sm:$0xff] %v7162_v43 }
 0x23e   : > { %v7137_v45 = vpop.xlane.xlu1 %1523  ;;  %11967 = vst [vmem:[#allocation140_spill] sm:$0xff] %v7154_v26  ;;  %11970 = vst [vmem:[#allocation143_spill] sm:$0xff] %v7165_v34 }
 0x23f   : > { %vm1525_vm7 = vcmp.eq.f32.partialorder %v6621_v57, %v7137_v45 }
 0x242   : > { %v7143_v52 = vpop.xlane.xlu1 %1568  ;;  %v7148_v55 = vpop.xlane.xlu0 %1553 }
 0x243   : > { %vm1555_vm8 = vcmp.eq.f32.partialorder %v6637_v17, %v7148_v55  ;;  %v1609_v17 = vand.u32 65535, %v6693_v58  ;;  %v1656_v58 = vcvt.s32.f32 %v1654_v3  ;;  %vm1570_vm14 = vcmp.eq.f32.partialorder %v6635_v53, %v7143_v52 }
 0x24a   : > { %3154 = vperm.xlu1 %5407, %v7141_v59   ;;  %v7151_v9 = vpop.xlane.xlu1 %1598  ;;  %v5303_v59 = vtrunc.f32 %v5814_v24  ;;  %v5816_v24 = vld [vmem:[%s6098_s5 + $0x60] sm:$0xff] }
 0x24b   : > { %v5301_v54 = vtrunc.f32 %v5816_v24 }
 0x24c   : > { %v7173_v47 = vcvt.f32.s32 %v5303_v59  ;;  %v5817_v59 = vld [vmem:[%s6098_s5 + $0xd8] sm:$0xff] }
 0x24d   : > { %v7187_v39 = vcvt.f32.s32 %v5301_v54 }
 0x24e   : > { %3151 = vperm.xlu1 %5407, %v7146_v46   ;;  %v7158_v11 = vpop.xlane.xlu1 %816  ;;  %v7160_v5 = vpop.xlane.xlu0 %1583  ;;  %11972 = vst [vmem:[#allocation145_spill] sm:$0xff] %v7173_v47  ;;  %v5815_v46 = vld [vmem:[%s6098_s5 + $0xe0] sm:$0xff] }
 0x24f   : > { %11968 = vst [vmem:[#allocation141_spill] sm:$0xff] %v7158_v11  ;;  %v5333_v21 = vtrunc.f32 %v5815_v46  ;;  %11976 = vst [vmem:[#allocation149_spill] sm:$0xff] %v7187_v39  ;;  %vm1585_vm9 = vcmp.eq.f32.partialorder %v6673_v12, %v7160_v5 }
 0x251   : > { %v7180_v30 = vcvt.f32.s32 %v5333_v21 }
 0x252   : > { %3103 = vperm.xlu1 %5407, %v7154_v26   ;;  %v7168_v60 = vpop.xlane.xlu1 %1628  ;;  %v7170_v51 = vpop.xlane.xlu0 %813 }
 0x253   : > { %11971 = vst [vmem:[#allocation144_spill] sm:$0xff] %v7170_v51  ;;  %3106 = vperm.xlu0 %5408, %v7162_v43   ;;  %11973 = vst [vmem:[#allocation146_spill] sm:$0xff] %v7180_v30  ;;  %v5331_v43 = vtrunc.f32 %v5817_v59  ;;  %5553 = vrcp.f32 %v7170_v51  ;;  %v1534_v51 = vand.u32 65535, %v11988_v6  ;;  %vm1630_vm3 = vcmp.eq.f32.partialorder %v6688_v56, %v7168_v60 }
 0x255   : > { %v7195_v48 = vcvt.f32.s32 %v5331_v43 }
 0x256   : > { %3148 = vperm.xlu1 %5407, %v7165_v34   ;;  %v7177_v38 = vpop.xlane.xlu1 %1613  ;;  %v7182_v26 = vpop.xlane.xlu0 %819 }
 0x257   : > { %11974 = vst [vmem:[#allocation147_spill] sm:$0xff] %v7182_v26  ;;  %11977 = vst [vmem:[#allocation150_spill] sm:$0xff] %v7195_v48  ;;  %vm1615_vm0 = vcmp.eq.f32.partialorder %v6704_v31, %v7177_v38  ;;  %5555 = vrcp.f32 %v7182_v26  ;;  %v1536_v26 = vcvt.s32.f32 %v1534_v51  ;;  %v227_v51 = vld [vmem:[#allocation5 + $0x30] sm:$0xff] }
 0x258   : > { %5557 = vrcp.f32 %v7158_v11  ;;  %5219 = vmatprep.subr.mxu0 %v227_v51  ;;  %5272 = vmatprep.subr.mxu1 %v227_v51 }
 0x259   : > { %5220 = vmatpush3.msra.mxu0 %v227_v51  ;;  %5275 = vmatpush3.msra.mxu1 %v227_v51 }
 0x25a   : > { %3100 = vperm.xlu1 %5407, %v7173_v47   ;;  %v7185_v13 = vpop.xlane.xlu1 %822 }
 0x25b   : > { %11975 = vst [vmem:[#allocation148_spill] sm:$0xff] %v7185_v13 }
 0x25e   : > { %3145 = vperm.xlu1 %5407, %v7180_v30   ;;  %v7191_v46 = vpop.xlane.xlu1 %1658  ;;  %v7193_v34 = vpop.xlane.xlu0 %1643 }
 0x25f   : > { %vm1660_vm10 = vcmp.eq.f32.partialorder %v6733_v61, %v7191_v46  ;;  %vm1645_vm11 = vcmp.eq.f32.partialorder %v6735_v7, %v7193_v34 }
 0x260   : > { %v1661_v31 = vsel %vm1660_vm10, %v1656_v58, inf  ;;  %v5554_v58 = vpop.eup %5553 }
 0x261   : > { %v1005_v1 = vmul.f32 %v5554_v58, %v6678_v32  ;;  %v11992_v32 = vld [vmem:[#allocation58_spill] sm:$0xff]  ;;  %v11993_v58 = vld [vmem:[#allocation12_spill] sm:$0xff] }
 0x262   : > { %3097 = vperm.xlu1 %5407, %v7187_v39   ;;  %v7198_v21 = vpop.xlane.xlu1 %828  ;;  %v7200_v24 = vpop.xlane.xlu0 %825  ;;  %v1521_v39 = vcvt.s32.f32 %v1519_v2  ;;  %vm1600_vm1 = vcmp.eq.f32.partialorder %v11992_v32, %v7151_v9 }
 0x263   : > { %11978 = vst [vmem:[#allocation151_spill] sm:$0xff] %v7198_v21  ;;  %11979 = vst [vmem:[#allocation152_spill] sm:$0xff] %v7200_v24  ;;  %5559 = vrcp.f32 %v7200_v24 }
 0x264   : > { %v1526_v20 = vsel %vm1525_vm7, %v1521_v39, inf  ;;  %5561 = vrcp.f32 %v7185_v13 }
 0x266   : > { %3142 = vperm.xlu1 %5407, %v7195_v48   ;;  %v7203_v54 = vpop.xlane.xlu1 %1688  ;;  %v7205_v47 = vpop.xlane.xlu0 %1673  ;;  %v1549_v48 = vand.u32 65535, %v6627_v10 }
 0x267   : > { %vm1675_vm13 = vcmp.eq.f32.partialorder %v6769_v29, %v7205_v47  ;;  %vm1690_vm5 = vcmp.eq.f32.partialorder %v6767_v22, %v7203_v54 }
 0x268   : > { %v1551_v37 = vcvt.s32.f32 %v1549_v48  ;;  %v1581_v48 = vcvt.s32.f32 %v1579_v18 }
 0x26a   : > { %v7207_v59 = vpop.xlane.xlu1 %834  ;;  %v7209_v30 = vpop.xlane.xlu0 %831  ;;  %v1556_v39 = vsel %vm1555_vm8, %v1551_v37, inf  ;;  %v1611_v37 = vcvt.s32.f32 %v1609_v17 }
 0x26b   : > { %11980 = vst [vmem:[#allocation153_spill] sm:$0xff] %v7207_v59  ;;  %11981 = vst [vmem:[#allocation154_spill] sm:$0xff] %v7209_v30  ;;  %5563 = vrcp.f32 %v7209_v30 }
 0x26c   : > { %v1616_v12 = vsel %vm1615_vm0, %v1611_v37, inf  ;;  %5565 = vrcp.f32 %v7198_v21  ;;  %v12027_v21 = vld [vmem:[#allocation22_spill] sm:$0xff] }
 0x26e   : > { %v7212_v43 = vpop.xlane.xlu1 %1718  ;;  %v7214_v27 = vpop.xlane.xlu0 %1703 }
 0x26f   : > { %vm1705_vm15 = vcmp.eq.f32.partialorder %v6805_v63, %v7214_v27  ;;  %vm1720_vm6 = vcmp.eq.f32.partialorder %v6803_v40, %v7212_v43 }
 0x272   : > { %v7219_v50 = vpop.xlane.xlu1 %840  ;;  %v7221_v28 = vpop.xlane.xlu0 %837  ;;  %1527 = vmin.xlane.f32.xlu0 %v1526_v20  ;;  %v1586_v20 = vsel %vm1585_vm9, %v1581_v48, inf  ;;  %v1639_v48 = vand.u32 65535, %v6725_v14 }
 0x273   : > { %11982 = vst [vmem:[#allocation155_spill] sm:$0xff] %v7219_v50  ;;  %11983 = vst [vmem:[#allocation156_spill] sm:$0xff] %v7221_v28  ;;  %5567 = vrcp.f32 %v7221_v28 }
 0x274   : > { %v1641_v37 = vcvt.s32.f32 %v1639_v48  ;;  %v1699_v48 = vand.u32 65535, %v6792_v36  ;;  %v11991_v36 = vld [vmem:[#allocation56_spill] sm:$0xff]  ;;  %5569 = vrcp.f32 %v7207_v59 }
 0x276   : > { %v7230_v57 = vpop.xlane.xlu1 %1748  ;;  %v7232_v10 = vpop.xlane.xlu0 %1733  ;;  %1557 = vmin.xlane.f32.xlu0 %v1556_v39  ;;  %v1646_v3 = vsel %vm1645_vm11, %v1641_v37, inf }
 0x277   : > { %vm1735_vm4 = vcmp.eq.f32.partialorder %v6839_v19, %v7232_v10  ;;  %v1714_v19 = vand.u32 65535, %v6774_v33  ;;  %v226_v33 = vld [vmem:[#allocation5 + $0x28] sm:$0xff]  ;;  %vm1750_vm8 = vcmp.eq.f32.partialorder %v6837_v41, %v7230_v57 }
 0x278   : > { %5221 = vmatprep.subr.mxu0 %v226_v33  ;;  %5273 = vmatprep.subr.mxu1 %v226_v33 }
 0x279   : > { %5222 = vmatpush3.msra.mxu0 %v226_v33  ;;  %5276 = vmatpush3.msra.mxu1 %v226_v33 }
 0x27a   : > { %v7238_v49 = vpop.xlane.xlu1 %846  ;;  %v7240_v2 = vpop.xlane.xlu0 %843  ;;  %1587 = vmin.xlane.f32.xlu0 %v1586_v20 }
 0x27b   : > { %11984 = vst [vmem:[#allocation157_spill] sm:$0xff] %v7238_v49  ;;  %11985 = vst [vmem:[#allocation158_spill] sm:$0xff] %v7240_v2  ;;  %5571 = vrcp.f32 %v7240_v2 }
 0x27c   : > { %5573 = vrcp.f32 %v7219_v50 }
 0x27e   : > { %v7245_v39 = vpop.xlane.xlu1 %1778  ;;  %v7247_v18 = vpop.xlane.xlu0 %1763  ;;  %1617 = vmin.xlane.f32.xlu0 %v1616_v12  ;;  %v1669_v12 = vand.u32 65535, %v6759_v0  ;;  %v1541_v0 = vsel %vm1540_vm12, %v1536_v26, inf  ;;  %v1594_v26 = vand.u32 65535, %v11991_v36 }
 0x27f   : > { %vm1765_vm7 = vcmp.eq.f32.partialorder %v6873_v44, %v7247_v18  ;;  %v12004_v44 = vld [vmem:[#allocation77_spill] sm:$0xff] }
 0x280   : > { %v1671_v7 = vcvt.s32.f32 %v1669_v12  ;;  %v1701_v12 = vcvt.s32.f32 %v1699_v48  ;;  %v1596_v63 = vcvt.s32.f32 %v1594_v26  ;;  %v1729_v48 = vand.u32 65535, %v6813_v4 }
 0x281   : > { %v1684_v4 = vand.u32 65535, %v6740_v25  ;;  %v1759_v25 = vand.u32 65535, %v6861_v35 }
 0x282   : > { %v7253_v20 = vpop.xlane.xlu1 %852  ;;  %v7255_v17 = vpop.xlane.xlu0 %849  ;;  %1662 = vmin.xlane.f32.xlu0 %v1661_v31  ;;  %v1564_v31 = vand.u32 65535, %v6610_v62  ;;  %v1676_v6 = vsel %vm1675_vm13, %v1671_v7, inf  ;;  %v1706_v53 = vsel %vm1705_vm15, %v1701_v12, inf  ;;  %v1601_v51 = vsel %vm1600_vm1, %v1596_v63, inf }
 0x283   : > { %11986 = vst [vmem:[#allocation159_spill] sm:$0xff] %v7253_v20  ;;  %11987 = vst [vmem:[#allocation160_spill] sm:$0xff] %v7255_v17  ;;  %v1731_v32 = vcvt.s32.f32 %v1729_v48  ;;  %v1761_v35 = vcvt.s32.f32 %v1759_v25  ;;  %v1744_v25 = vand.u32 65535, %v12004_v44  ;;  %5575 = vrcp.f32 %v7255_v17 }
 0x284   : > { %v1566_v62 = vcvt.s32.f32 %v1564_v31  ;;  %v1068_v31 = vmul.f32 %v1005_v1, %v11993_v58  ;;  %v11996_v1 = vld [vmem:[#allocation63_spill] sm:$0xff]  ;;  %5577 = vrcp.f32 %v7238_v49 }
 0x286   : > { %v7261_v61 = vpop.xlane.xlu1 %1808  ;;  %v7263_v14 = vpop.xlane.xlu0 %1793  ;;  %1647 = vmin.xlane.f32.xlu0 %v1646_v3  ;;  %v1571_v3 = vsel %vm1570_vm14, %v1566_v62, inf  ;;  %v1100_v12 = vsel %vm619_vm2, %v1068_v31, 0.0  ;;  %v11997_v31 = vld [vmem:[#allocation14_spill] sm:$0xff] }
 0x287   : > { %vm1795_vm9 = vcmp.eq.f32.partialorder %v6905_v23, %v7263_v14 }
 0x28a   : > { %1542 = vmin.xlane.f32.xlu1 %v1541_v0  ;;  %v7273_v37 = vpop.xlane.xlu0 %855  ;;  %v7278_v29 = vpop.xlane.xlu1 %858  ;;  %1677 = vmin.xlane.f32.xlu0 %v1676_v6  ;;  %v11994_v6 = vld [vmem:[#allocation59_spill] sm:$0xff] }
 0x28b   : > { %11989 = vst [vmem:[#allocation52_spill] sm:$0xff] %v7273_v37  ;;  %11990 = vst [vmem:[#allocation161_spill] sm:$0xff] %v7278_v29  ;;  %v5556_v0 = vpop.eup %5555  ;;  %v1624_v36 = vand.u32 65535, %v11994_v6  ;;  %5579 = vrcp.f32 %v7273_v37 }
 0x28c   : > { %v1009_v26 = vmul.f32 %v5556_v0, %v11996_v1  ;;  %v5558_v6 = vpop.eup %5557  ;;  %5581 = vrcp.f32 %v7253_v20  ;;  %v12036_v20 = vld [vmem:[#allocation24_spill] sm:$0xff] }
 0x28d   : > { %v5560_v56 = vpop.eup %5559 }
 0x28e   : > { %1572 = vmin.xlane.f32.xlu1 %v1571_v3  ;;  %v7283_v7 = vpop.xlane.xlu0 %1823  ;;  %1707 = vmin.xlane.f32.xlu0 %v1706_v53  ;;  %v7291_v62 = vpop.xlane.xlu1 %1838  ;;  %v1626_v53 = vcvt.s32.f32 %v1624_v36  ;;  %v1070_v30 = vmul.f32 %v1009_v26, %v11997_v31  ;;  %v1686_v36 = vcvt.s32.f32 %v1684_v4  ;;  %v12000_v26 = vld [vmem:[#allocation69_spill] sm:$0xff]  ;;  %v1716_v4 = vcvt.s32.f32 %v1714_v19 }
 0x28f   : > { %v5562_v40 = vpop.eup %5561 }
 0x290   : > { %v1631_v63 = vsel %vm1630_vm3, %v1626_v53, inf  ;;  %v1691_v48 = vsel %vm1690_vm5, %v1686_v36, inf  ;;  %v1106_v22 = vsel %vm619_vm2, %v1070_v30, 0.0  ;;  %v1013_v53 = vmul.f32 %v5560_v56, %v12000_v26  ;;  %v12002_v30 = vld [vmem:[#allocation11_spill] sm:$0xff]  ;;  %v12003_v36 = vld [vmem:[#allocation16_spill] sm:$0xff]  ;;  %v12005_v26 = vld [vmem:[#allocation65_spill] sm:$0xff] }
 0x291   : > { %v1766_v56 = vsel %vm1765_vm7, %v1761_v35, inf }
 0x292   : > { %1602 = vmin.xlane.f32.xlu1 %v1601_v51  ;;  %v7295_v3 = vpop.xlane.xlu0 %861  ;;  %1101 = vadd.xlane.f32.xlu0 %v1100_v12  ;;  %v1736_v51 = vsel %vm1735_vm4, %v1731_v32, inf  ;;  %v7306_v24 = vpop.xlane.xlu1 %864  ;;  %v11999_v12 = vld [vmem:[#allocation60_spill] sm:$0xff]  ;;  %v1072_v19 = vmul.f32 %v1013_v53, %v12003_v36  ;;  %v12006_v53 = vld [vmem:[#allocation73_spill] sm:$0xff] }
 0x293   : > { %11995 = vst [vmem:[#allocation56_spill] sm:$0xff] %v7295_v3  ;;  %11998 = vst [vmem:[#allocation58_spill] sm:$0xff] %v7306_v24  ;;  %v1007_v1 = vmul.f32 %v5558_v6, %v11999_v12  ;;  %v1721_v6 = vsel %vm1720_vm6, %v1716_v4, inf  ;;  %v1789_v12 = vand.u32 65535, %v6895_v16  ;;  %v1011_v4 = vmul.f32 %v5562_v40, %v12005_v26  ;;  %v12009_v26 = vld [vmem:[#allocation18_spill] sm:$0xff] }
 0x294   : > { %v1746_v16 = vcvt.s32.f32 %v1744_v25  ;;  %5583 = vrcp.f32 %v7295_v3 }
 0x295   : > { %5585 = vrcp.f32 %v7278_v29 }
 0x296   : > { %1632 = vmin.xlane.f32.xlu1 %v1631_v63  ;;  %1737 = vmin.xlane.f32.xlu0 %v1736_v51  ;;  %v7308_v0 = vpop.xlane.xlu0 %1853  ;;  %v7321_v32 = vpop.xlane.xlu1 %1868  ;;  %v1069_v51 = vmul.f32 %v12002_v30, %v1007_v1  ;;  %v1112_v1 = vsel %vm619_vm2, %v1072_v19, 0.0  ;;  %v1751_v40 = vsel %vm1750_vm8, %v1746_v16, inf  ;;  %v12013_v16 = vld [vmem:[#allocation86_spill] sm:$0xff] }
 0x297   : > { %vm1780_vm0 = vcmp.eq.f32.partialorder %v12013_v16, %v7245_v39 }
 0x29a   : > { %1692 = vmin.xlane.f32.xlu1 %v1691_v48  ;;  %1107 = vadd.xlane.f32.xlu0 %v1106_v22  ;;  %v7323_v63 = vpop.xlane.xlu0 %867  ;;  %v5564_v48 = vpop.eup %5563  ;;  %v1103_v22 = vsel %vm619_vm2, %v1069_v51, 0.0  ;;  %v1791_v51 = vcvt.s32.f32 %v1789_v12 }
 0x29b   : > { %12001 = vst [vmem:[#allocation12_spill] sm:$0xff] %v7323_v63  ;;  %v1017_v33 = vmul.f32 %v5564_v48, %v12006_v53  ;;  %v7337_v35 = vpop.xlane.xlu1 %870  ;;  %v1774_v48 = vand.u32 65535, %v6842_v15  ;;  %v1819_v53 = vand.u32 65535, %v6927_v42  ;;  %v12014_v15 = vld [vmem:[#allocation78_spill] sm:$0xff]  ;;  %5587 = vrcp.f32 %v7323_v63 }
 0x29c   : > { %12007 = vst [vmem:[#allocation59_spill] sm:$0xff] %v7337_v35  ;;  %v1796_v19 = vsel %vm1795_vm9, %v1791_v51, inf }
 0x29d   : > { %v1074_v41 = vmul.f32 %v1017_v33, %v12009_v26  ;;  %v1776_v51 = vcvt.s32.f32 %v1774_v48 }
 0x29e   : > { %1722 = vmin.xlane.f32.xlu1 %v1721_v6  ;;  %1767 = vmin.xlane.f32.xlu0 %v1766_v56  ;;  %v7339_v6 = vpop.xlane.xlu0 %1883  ;;  %v12008_v56 = vld [vmem:[#allocation13_spill] sm:$0xff] }
 0x29f   : > { %v1071_v44 = vmul.f32 %v12008_v56, %v1011_v4  ;;  %v7348_v25 = vpop.xlane.xlu1 %1898  ;;  %v12012_v4 = vld [vmem:[#allocation68_spill] sm:$0xff]  ;;  %v1118_v33 = vsel %vm619_vm2, %v1074_v41, 0.0  ;;  %v1781_v28 = vsel %vm1780_vm0, %v1776_v51, inf }
 0x2a0   : > { %12010 = vst [vmem:[#allocation63_spill] sm:$0xff] %v7348_v25 }
 0x2a1   : > { %v1109_v12 = vsel %vm619_vm2, %v1071_v44, 0.0  ;;  %v12016_v44 = vld [vmem:[#allocation15_spill] sm:$0xff] }
 0x2a2   : > { %1104 = vadd.xlane.f32.xlu1 %v1103_v22  ;;  %1113 = vadd.xlane.f32.xlu0 %v1112_v1  ;;  %v5566_v22 = vpop.eup %5565  ;;  %v7350_v23 = vpop.xlane.xlu0 %873 }
 0x2a3   : > { %v5568_v2 = vpop.eup %5567  ;;  %12011 = vst [vmem:[#allocation14_spill] sm:$0xff] %v7350_v23  ;;  %v1015_v1 = vmul.f32 %v5566_v22, %v12012_v4  ;;  %v7363_v59 = vpop.xlane.xlu1 %876  ;;  %5589 = vrcp.f32 %v7350_v23 }
 0x2a4   : > { %v1021_v42 = vmul.f32 %v5568_v2, %v12014_v15  ;;  %v5570_v22 = vpop.eup %5569  ;;  %12018 = vst [vmem:[#allocation60_spill] sm:$0xff] %v7363_v59  ;;  %v12019_v2 = vld [vmem:[#allocation87_spill] sm:$0xff]  ;;  %5591 = vrcp.f32 %v7306_v24 }
 0x2a5   : > { %v1073_v50 = vmul.f32 %v12016_v44, %v1015_v1  ;;  %v5572_v41 = vpop.eup %5571  ;;  %v1804_v48 = vand.u32 65535, %v12019_v2  ;;  %v12021_v1 = vld [vmem:[#allocation72_spill] sm:$0xff]  ;;  %v12024_v2 = vld [vmem:[#allocation102_spill] sm:$0xff] }
 0x2a6   : > { %1752 = vmin.xlane.f32.xlu1 %v1751_v40  ;;  %1797 = vmin.xlane.f32.xlu0 %v1796_v19  ;;  %v12015_v40 = vld [vmem:[#allocation97_spill] sm:$0xff]  ;;  %v1821_v19 = vcvt.s32.f32 %v1819_v53  ;;  %v7365_v16 = vpop.xlane.xlu0 %1913  ;;  %v1019_v51 = vmul.f32 %v5570_v22, %v12021_v1  ;;  %vm1855_vm12 = vcmp.eq.f32.partialorder %v12024_v2, %v7308_v0  ;;  %v5574_v37 = vpop.eup %5573  ;;  %v12030_v2 = vld [vmem:[#allocation76_spill] sm:$0xff] }
 0x2a7   : > { %vm1825_vm10 = vcmp.eq.f32.partialorder %v12015_v40, %v7283_v7  ;;  %v1115_v53 = vsel %vm619_vm2, %v1073_v50, 0.0  ;;  %v12023_v40 = vld [vmem:[#allocation82_spill] sm:$0xff]  ;;  %v7379_v49 = vpop.xlane.xlu1 %1928  ;;  %v12026_v1 = vld [vmem:[#allocation17_spill] sm:$0xff]  ;;  %v5576_v13 = vpop.eup %5575  ;;  %v1023_v11 = vmul.f32 %v5574_v37, %v12030_v2  ;;  %v12035_v2 = vld [vmem:[#allocation19_spill] sm:$0xff] }
 0x2a8   : > { %v1826_v4 = vsel %vm1825_vm10, %v1821_v19, inf  ;;  %v1025_v19 = vmul.f32 %v5572_v41, %v12023_v40  ;;  %v12028_v41 = vld [vmem:[#allocation93_spill] sm:$0xff]  ;;  %v5578_v3 = vpop.eup %5577  ;;  %vm2351_vm10 = vcmask 138240  }
 0x2aa   : > { %1110 = vadd.xlane.f32.xlu1 %v1109_v12  ;;  %1119 = vadd.xlane.f32.xlu0 %v1118_v33  ;;  %v12017_v12 = vld [vmem:[#allocation20_spill] sm:$0xff]  ;;  %v12020_v33 = vld [vmem:[#allocation39_spill] sm:$0xff]  ;;  %v7381_v50 = vpop.xlane.xlu0 %879 }
 0x2ab   : > { %v1076_v17 = vmul.f32 %v1021_v42, %v12017_v12  ;;  %v1849_v15 = vand.u32 65535, %v12020_v33  ;;  %v12022_v42 = vld [vmem:[#allocation91_spill] sm:$0xff]  ;;  %12025 = vst [vmem:[#allocation69_spill] sm:$0xff] %v7381_v50  ;;  %5593 = vrcp.f32 %v7381_v50 }
 0x2ac   : > { %vm1810_vm11 = vcmp.eq.f32.partialorder %v12022_v42, %v7261_v61  ;;  %v1078_v42 = vmul.f32 %v1025_v19, %v12027_v21  ;;  %v12032_v19 = vld [vmem:[#allocation88_spill] sm:$0xff] }
 0x2ad   : > { %v1851_v33 = vcvt.s32.f32 %v1849_v15 }
 0x2ae   : > { %1782 = vmin.xlane.f32.xlu1 %v1781_v28  ;;  %1827 = vmin.xlane.f32.xlu0 %v1826_v4  ;;  %v1124_v28 = vsel %vm619_vm2, %v1076_v17, 0.0  ;;  %v1806_v4 = vcvt.s32.f32 %v1804_v48  ;;  %v1834_v48 = vand.u32 65535, %v12028_v41 }
 0x2af   : > { %v1856_v17 = vsel %vm1855_vm12, %v1851_v33, inf  ;;  %v1029_v33 = vmul.f32 %v5576_v13, %v12032_v19  ;;  %v12038_v19 = vld [vmem:[#allocation99_spill] sm:$0xff] }
 0x2b0   : > { %v1811_v22 = vsel %vm1810_vm11, %v1806_v4, inf  ;;  %v12031_v4 = vld [vmem:[#allocation96_spill] sm:$0xff]  ;;  %v1836_v41 = vcvt.s32.f32 %v1834_v48  ;;  %v1864_v44 = vand.u32 65535, %v12038_v19 }
 0x2b1   : > { %vm1840_vm13 = vcmp.eq.f32.partialorder %v12031_v4, %v7291_v62  ;;  %v1080_v4 = vmul.f32 %v1029_v33, %v12036_v20 }
 0x2b2   : > { %1116 = vadd.xlane.f32.xlu1 %v1115_v53  ;;  %1125 = vadd.xlane.f32.xlu0 %v1124_v28  ;;  %v1075_v53 = vmul.f32 %v12026_v1, %v1019_v51  ;;  %v12029_v28 = vld [vmem:[#allocation105_spill] sm:$0xff]  ;;  %v1130_v51 = vsel %vm619_vm2, %v1078_v42, 0.0  ;;  %v5580_v1 = vpop.eup %5579  ;;  %v1866_v19 = vcvt.s32.f32 %v1864_v44  ;;  %v12049_v44 = vld [vmem:[#allocation104_spill] sm:$0xff] }
 0x2b3   : > { %v1879_v40 = vand.u32 65535, %v12029_v28  ;;  %v1841_v28 = vsel %vm1840_vm13, %v1836_v41, inf  ;;  %v1136_v33 = vsel %vm619_vm2, %v1080_v4, 0.0  ;;  %v5582_v63 = vpop.eup %5581 }
 0x2b4   : > { %v1121_v15 = vsel %vm619_vm2, %v1075_v53, 0.0  ;;  %v12034_v53 = vld [vmem:[#allocation110_spill] sm:$0xff]  ;;  %v5584_v56 = vpop.eup %5583 }
 0x2b5   : > { %vm1885_vm14 = vcmp.eq.f32.partialorder %v12034_v53, %v7339_v6  ;;  %v1881_v37 = vcvt.s32.f32 %v1879_v40  ;;  %v5586_v50 = vpop.eup %5585 }
 0x2b6   : > { %1812 = vmin.xlane.f32.xlu1 %v1811_v22  ;;  %1857 = vmin.xlane.f32.xlu0 %v1856_v17  ;;  %v7395_v22 = vpop.xlane.xlu1 %882  ;;  %v7397_v17 = vpop.xlane.xlu0 %1943 }
 0x2b7   : > { %12033 = vst [vmem:[#allocation11_spill] sm:$0xff] %v7395_v22  ;;  %v1886_v42 = vsel %vm1885_vm14, %v1881_v37, inf  ;;  %v12042_v37 = vld [vmem:[#allocation101_spill] sm:$0xff] }
 0x2b8   : > { %vm1870_vm15 = vcmp.eq.f32.partialorder %v12042_v37, %v7321_v32 }
 0x2ba   : > { %1122 = vadd.xlane.f32.xlu1 %v1121_v15  ;;  %1131 = vadd.xlane.f32.xlu0 %v1130_v51  ;;  %v1077_v15 = vmul.f32 %v12035_v2, %v1023_v11  ;;  %v7403_v13 = vpop.xlane.xlu0 %885  ;;  %v12039_v51 = vld [vmem:[#allocation112_spill] sm:$0xff]  ;;  %v7408_v53 = vpop.xlane.xlu1 %1958  ;;  %v12041_v11 = vld [vmem:[#allocation81_spill] sm:$0xff] }
 0x2bb   : > { %12037 = vst [vmem:[#allocation16_spill] sm:$0xff] %v7403_v13  ;;  %v1909_v48 = vand.u32 65535, %v12039_v51  ;;  %12040 = vst [vmem:[#allocation77_spill] sm:$0xff] %v7408_v53  ;;  %v1027_v41 = vmul.f32 %v5578_v3, %v12041_v11  ;;  %v12044_v51 = vld [vmem:[#allocation118_spill] sm:$0xff]  ;;  %v12046_v3 = vld [vmem:[#allocation21_spill] sm:$0xff]  ;;  %5595 = vrcp.f32 %v7403_v13 }
 0x2bc   : > { %v1127_v40 = vsel %vm619_vm2, %v1077_v15, 0.0  ;;  %vm1915_vm1 = vcmp.eq.f32.partialorder %v12044_v51, %v7365_v16  ;;  %v1871_v15 = vsel %vm1870_vm15, %v1866_v19, inf  ;;  %5597 = vrcp.f32 %v7337_v35  ;;  %v12066_v35 = vld [vmem:[#allocation132_spill] sm:$0xff] }
 0x2bd   : > { %v1911_v29 = vcvt.s32.f32 %v1909_v48  ;;  %v1079_v11 = vmul.f32 %v12046_v3, %v1027_v41  ;;  %v12051_v41 = vld [vmem:[#allocation85_spill] sm:$0xff]  ;;  %v12060_v3 = vld [vmem:[#allocation128_spill] sm:$0xff] }
 0x2be   : > { %1842 = vmin.xlane.f32.xlu1 %v1841_v28  ;;  %1887 = vmin.xlane.f32.xlu0 %v1886_v42  ;;  %v12043_v28 = vld [vmem:[#allocation94_spill] sm:$0xff]  ;;  %v7419_v2 = vpop.xlane.xlu0 %1973  ;;  %v1031_v51 = vmul.f32 %v5582_v63, %v12051_v41  ;;  %v12057_v41 = vld [vmem:[#allocation23_spill] sm:$0xff] }
 0x2bf   : > { %v1033_v42 = vmul.f32 %v5580_v1, %v12043_v28  ;;  %12045 = vst [vmem:[#allocation65_spill] sm:$0xff] %v7419_v2  ;;  %v1916_v4 = vsel %vm1915_vm1, %v1911_v29, inf  ;;  %v7424_v1 = vpop.xlane.xlu1 %888  ;;  %v12050_v28 = vld [vmem:[#allocation120_spill] sm:$0xff]  ;;  %v1133_v19 = vsel %vm619_vm2, %v1079_v11, 0.0  ;;  %vm1975_vm6 = vcmp.eq.f32.partialorder %v12066_v35, %v7419_v2 }
 0x2c0   : > { %12048 = vst [vmem:[#allocation73_spill] sm:$0xff] %v7424_v1  ;;  %v1939_v48 = vand.u32 65535, %v12050_v28  ;;  %v12055_v28 = vld [vmem:[#allocation124_spill] sm:$0xff] }
 0x2c1   : > { %vm1945_vm4 = vcmp.eq.f32.partialorder %v12055_v28, %v7397_v17  ;;  %v12071_v35 = vld [vmem:[#allocation116_spill] sm:$0xff] }
 0x2c2   : > { %1128 = vadd.xlane.f32.xlu1 %v1127_v40  ;;  %1137 = vadd.xlane.f32.xlu0 %v1136_v33  ;;  %v12047_v40 = vld [vmem:[#allocation26_spill] sm:$0xff]  ;;  %v1894_v33 = vand.u32 65535, %v12049_v44  ;;  %v7436_v23 = vpop.xlane.xlu0 %891  ;;  %v1941_v11 = vcvt.s32.f32 %v1939_v48 }
 0x2c3   : > { %v1082_v37 = vmul.f32 %v1033_v42, %v12047_v40  ;;  %v12052_v42 = vld [vmem:[#allocation109_spill] sm:$0xff]  ;;  %12054 = vst [vmem:[#allocation18_spill] sm:$0xff] %v7436_v23  ;;  %v7440_v24 = vpop.xlane.xlu1 %1988  ;;  %5599 = vrcp.f32 %v7436_v23 }
 0x2c4   : > { %vm1900_vm3 = vcmp.eq.f32.partialorder %v12052_v42, %v7348_v25  ;;  %v1896_v44 = vcvt.s32.f32 %v1894_v33  ;;  %12056 = vst [vmem:[#allocation68_spill] sm:$0xff] %v7440_v24  ;;  %v12058_v42 = vld [vmem:[#allocation28_spill] sm:$0xff]  ;;  %v1969_v25 = vand.u32 65535, %v12060_v3  ;;  %5601 = vrcp.f32 %v7363_v59  ;;  %v12069_v23 = vld [vmem:[#allocation113_spill] sm:$0xff] }
 0x2c5   : > { %v1142_v29 = vsel %vm619_vm2, %v1082_v37, 0.0  ;;  %v1946_v37 = vsel %vm1945_vm4, %v1941_v11, inf }
 0x2c6   : > { %1872 = vmin.xlane.f32.xlu1 %v1871_v15  ;;  %1917 = vmin.xlane.f32.xlu0 %v1916_v4  ;;  %v12053_v15 = vld [vmem:[#allocation100_spill] sm:$0xff]  ;;  %v1901_v63 = vsel %vm1900_vm3, %v1896_v44, inf  ;;  %v7448_v48 = vpop.xlane.xlu0 %897 }
 0x2c7   : > { %v1037_v4 = vmul.f32 %v5584_v56, %v12053_v15  ;;  %v5588_v15 = vpop.eup %5587  ;;  %12061 = vst [vmem:[#allocation86_spill] sm:$0xff] %v7448_v48  ;;  %v7457_v3 = vpop.xlane.xlu1 %894  ;;  %5603 = vrcp.f32 %v7448_v48  ;;  %v12073_v48 = vld [vmem:[#allocation46_spill] sm:$0xff] }
 0x2c8   : > { %12065 = vst [vmem:[#allocation78_spill] sm:$0xff] %v7457_v3  ;;  %5605 = vrcp.f32 %v7395_v22  ;;  %vm1960_vm7 = vcmp.eq.f32.partialorder %v12073_v48, %v7408_v53 }
 0x2c9   : > { %v1084_v56 = vmul.f32 %v1037_v4, %v12058_v42  ;;  %v12063_v4 = vld [vmem:[#allocation117_spill] sm:$0xff] }
 0x2ca   : > { %1134 = vadd.xlane.f32.xlu1 %v1133_v19  ;;  %1143 = vadd.xlane.f32.xlu0 %v1142_v29  ;;  %v1081_v19 = vmul.f32 %v12057_v41, %v1031_v51  ;;  %v12059_v29 = vld [vmem:[#allocation111_spill] sm:$0xff]  ;;  %v12062_v51 = vld [vmem:[#allocation92_spill] sm:$0xff]  ;;  %vm1930_vm5 = vcmp.eq.f32.partialorder %v12063_v4, %v7379_v49 }
 0x2cb   : > { %v1924_v33 = vand.u32 65535, %v12059_v29  ;;  %v1035_v28 = vmul.f32 %v5586_v50, %v12062_v51  ;;  %v1148_v11 = vsel %vm619_vm2, %v1084_v56, 0.0  ;;  %v5590_v29 = vpop.eup %5589 }
 0x2cc   : > { %v1139_v44 = vsel %vm619_vm2, %v1081_v19, 0.0  ;;  %v1971_v19 = vcvt.s32.f32 %v1969_v25  ;;  %v5592_v56 = vpop.eup %5591  ;;  %v1045_v41 = vmul.f32 %v5590_v29, %v12069_v23  ;;  %v1954_v25 = vand.u32 65535, %v12071_v35 }
 0x2cd   : > { %v1926_v13 = vcvt.s32.f32 %v1924_v33  ;;  %v7466_v33 = vpop.xlane.xlu0 %903 }
 0x2ce   : > { %1902 = vmin.xlane.f32.xlu1 %v1901_v63  ;;  %1947 = vmin.xlane.f32.xlu0 %v1946_v37  ;;  %v12064_v63 = vld [vmem:[#allocation106_spill] sm:$0xff]  ;;  %v1976_v4 = vsel %vm1975_vm6, %v1971_v19, inf  ;;  %12070 = vst [vmem:[#allocation97_spill] sm:$0xff] %v7466_v33  ;;  %5607 = vrcp.f32 %v7466_v33  ;;  %v1956_v22 = vcvt.s32.f32 %v1954_v25  ;;  %v12082_v25 = vld [vmem:[#allocation103_spill] sm:$0xff] }
 0x2cf   : > { %v1041_v37 = vmul.f32 %v5588_v15, %v12064_v63  ;;  %v1931_v50 = vsel %vm1930_vm5, %v1926_v13, inf  ;;  %v12068_v15 = vld [vmem:[#allocation30_spill] sm:$0xff]  ;;  %v7470_v13 = vpop.xlane.xlu1 %900  ;;  %5609 = vrcp.f32 %v7424_v1 }
 0x2d0   : > { %12072 = vst [vmem:[#allocation20_spill] sm:$0xff] %v7470_v13  ;;  %v12074_v19 = vld [vmem:[#allocation98_spill] sm:$0xff]  ;;  %5611 = vrcp.f32 %v7457_v3 }
 0x2d1   : > { %v1086_v63 = vmul.f32 %v1041_v37, %v12068_v15  ;;  %v12075_v37 = vld [vmem:[#allocation32_spill] sm:$0xff]  ;;  %v12079_v33 = vld [vmem:[#allocation130_spill] sm:$0xff]  ;;  %5613 = vrcp.f32 %v7470_v13  ;;  %v12092_v13 = vld [vmem:[#allocation119_spill] sm:$0xff] }
 0x2d2   : > { %1140 = vadd.xlane.f32.xlu1 %v1139_v44  ;;  %1149 = vadd.xlane.f32.xlu0 %v1148_v11  ;;  %v12067_v44 = vld [vmem:[#allocation25_spill] sm:$0xff]  ;;  %v5594_v11 = vpop.eup %5593  ;;  %v1088_v29 = vmul.f32 %v1045_v41, %v12075_v37 }
 0x2d3   : > { %v1083_v51 = vmul.f32 %v12067_v44, %v1035_v28  ;;  %v1154_v23 = vsel %vm619_vm2, %v1086_v63, 0.0  ;;  %v5596_v59 = vpop.eup %5595  ;;  %v12077_v44 = vld [vmem:[#allocation27_spill] sm:$0xff]  ;;  %v7485_v41 = vpop.xlane.xlu1 %906 }
 0x2d4   : > { %v5598_v48 = vpop.eup %5597  ;;  %v1053_v63 = vmul.f32 %v5596_v59, %v12079_v33  ;;  %12080 = vst [vmem:[#allocation87_spill] sm:$0xff] %v7485_v41  ;;  %v12084_v59 = vld [vmem:[#allocation36_spill] sm:$0xff]  ;;  %5615 = vrcp.f32 %v7485_v41 }
 0x2d5   : > { %v1145_v28 = vsel %vm619_vm2, %v1083_v51, 0.0  ;;  %v1961_v51 = vsel %vm1960_vm7, %v1956_v22, inf  ;;  %v5600_v53 = vpop.eup %5599 }
 0x2d6   : > { %1932 = vmin.xlane.f32.xlu1 %v1931_v50  ;;  %1977 = vmin.xlane.f32.xlu0 %v1976_v4  ;;  %v1039_v50 = vmul.f32 %v5592_v56, %v12074_v19  ;;  %v12076_v4 = vld [vmem:[#allocation121_spill] sm:$0xff]  ;;  %v1160_v56 = vsel %vm619_vm2, %v1088_v29, 0.0  ;;  %v12078_v19 = vld [vmem:[#allocation34_spill] sm:$0xff]  ;;  %v1092_v33 = vmul.f32 %v1053_v63, %v12084_v59  ;;  %v12090_v59 = vld [vmem:[#allocation136_spill] sm:$0xff] }
 0x2d7   : > { %v1049_v35 = vmul.f32 %v5594_v11, %v12076_v4  ;;  %v12081_v11 = vld [vmem:[#allocation125_spill] sm:$0xff]  ;;  %v5602_v4 = vpop.eup %5601  ;;  %v7497_v3 = vpop.permute.xlu1 %3154 }
 0x2d8   : > { %v1085_v2 = vmul.f32 %v12077_v44, %v1039_v50  ;;  %v1043_v50 = vmul.f32 %v5598_v48, %v12082_v25  ;;  %12086 = vst [vmem:[#allocation39_spill] sm:$0xff] %v7497_v3  ;;  %v12087_v48 = vld [vmem:[#allocation29_spill] sm:$0xff] }
 0x2da   : > { %1146 = vadd.xlane.f32.xlu1 %v1145_v28  ;;  %1155 = vadd.xlane.f32.xlu0 %v1154_v23  ;;  %v1090_v28 = vmul.f32 %v1049_v35, %v12078_v19  ;;  %v1984_v23 = vand.u32 65535, %v12081_v11  ;;  %v1151_v22 = vsel %vm619_vm2, %v1085_v2, 0.0  ;;  %v12083_v35 = vld [vmem:[#allocation129_spill] sm:$0xff]  ;;  %v1087_v25 = vmul.f32 %v12087_v48, %v1043_v50 }
 0x2db   : > { %vm1990_vm8 = vcmp.eq.f32.partialorder %v12083_v35, %v7440_v24  ;;  %v1172_v35 = vsel %vm619_vm2, %v1092_v33, 0.0  ;;  %v12089_v24 = vld [vmem:[#allocation38_spill] sm:$0xff]  ;;  %v7511_v48 = vpop.permute.xlu1 %3151 }
 0x2dc   : > { %v1166_v29 = vsel %vm619_vm2, %v1090_v28, 0.0  ;;  %v1986_v11 = vcvt.s32.f32 %v1984_v23  ;;  %v1157_v23 = vsel %vm619_vm2, %v1087_v25, 0.0  ;;  %12095 = vst [vmem:[#allocation72_spill] sm:$0xff] %v7511_v48  ;;  %v12097_v25 = vld [vmem:[#allocation126_spill] sm:$0xff] }
 0x2de   : > { %1962 = vmin.xlane.f32.xlu1 %v1961_v51  ;;  %1161 = vadd.xlane.f32.xlu0 %v1160_v56  ;;  %v12085_v51 = vld [vmem:[#allocation134_spill] sm:$0xff]  ;;  %v5604_v56 = vpop.eup %5603  ;;  %v1991_v2 = vsel %vm1990_vm8, %v1986_v11, inf }
 0x2df   : > { %v1057_v1 = vmul.f32 %v5600_v53, %v12085_v51  ;;  %v5606_v28 = vpop.eup %5605  ;;  %v1061_v53 = vmul.f32 %v5604_v56, %v12090_v59  ;;  %v12096_v56 = vld [vmem:[#allocation33_spill] sm:$0xff] }
 0x2e0   : > { %v5608_v51 = vpop.eup %5607  ;;  %v1051_v50 = vmul.f32 %v5606_v28, %v12092_v13  ;;  %v12098_v28 = vld [vmem:[#allocation45_spill] sm:$0xff] }
 0x2e1   : > { %v1094_v63 = vmul.f32 %v1057_v1, %v12089_v24  ;;  %v5610_v3 = vpop.eup %5609 }
 0x2e2   : > { %1152 = vadd.xlane.f32.xlu1 %v1151_v22  ;;  %1167 = vadd.xlane.f32.xlu0 %v1166_v29  ;;  %v12088_v22 = vld [vmem:[#allocation108_spill] sm:$0xff]  ;;  %v12091_v29 = vld [vmem:[#allocation31_spill] sm:$0xff]  ;;  %v1055_v41 = vmul.f32 %v5610_v3, %v12097_v25  ;;  %v12103_v25 = vld [vmem:[#allocation133_spill] sm:$0xff] }
 0x2e3   : > { %v1047_v44 = vmul.f32 %v5602_v4, %v12088_v22  ;;  %v1178_v4 = vsel %vm619_vm2, %v1094_v63, 0.0  ;;  %v12094_v22 = vld [vmem:[#allocation137_spill] sm:$0xff]  ;;  %v7518_v63 = vpop.permute.xlu1 %3103 }
 0x2e4   : > { %v1065_v1 = vmul.f32 %v5608_v51, %v12094_v22  ;;  %12099 = vst [vmem:[#allocation91_spill] sm:$0xff] %v7518_v63  ;;  %v12100_v51 = vld [vmem:[#allocation35_spill] sm:$0xff] }
 0x2e5   : > { %v1089_v11 = vmul.f32 %v12091_v29, %v1047_v44  ;;  %v5612_v44 = vpop.eup %5611  ;;  %v1093_v22 = vmul.f32 %v12100_v51, %v1055_v41  ;;  %v1530_v41 = vcvt.f32.s32 %v7137_v45  ;;  %v1575_v29 = vcvt.f32.s32 %v7143_v52 }
 0x2e6   : > { %1992 = vmin.xlane.f32.xlu1 %v1991_v2  ;;  %1173 = vadd.xlane.f32.xlu0 %v1172_v35  ;;  %v12093_v2 = vld [vmem:[#allocation42_spill] sm:$0xff]  ;;  %v1091_v35 = vmul.f32 %v12096_v56, %v1051_v50  ;;  %v1605_v52 = vcvt.f32.s32 %v7151_v9 }
 0x2e7   : > { %v1096_v33 = vmul.f32 %v1061_v53, %v12093_v2  ;;  %v1163_v59 = vsel %vm619_vm2, %v1089_v11, 0.0  ;;  %v5614_v11 = vpop.eup %5613  ;;  %v1175_v3 = vsel %vm619_vm2, %v1093_v22, 0.0  ;;  %v7527_v63 = vpop.permute.xlu1 %3148 }
 0x2e8   : > { %v1169_v53 = vsel %vm619_vm2, %v1091_v35, 0.0  ;;  %12104 = vst [vmem:[#allocation82_spill] sm:$0xff] %v7527_v63  ;;  %v7529_v35 = vpop.permute.xlu0 %3106 }
 0x2e9   : > { %v1184_v13 = vsel %vm619_vm2, %v1096_v33, 0.0  ;;  %12105 = vst [vmem:[#allocation102_spill] sm:$0xff] %v7529_v35  ;;  %v12109_v35 = vld [vmem:[#allocation43_spill] sm:$0xff] }
 0x2ea   : > { %1158 = vadd.xlane.f32.xlu1 %v1157_v23  ;;  %1179 = vadd.xlane.f32.xlu0 %v1178_v4  ;;  %v1098_v23 = vmul.f32 %v1065_v1, %v12098_v28  ;;  %v12101_v4 = vld [vmem:[#allocation131_spill] sm:$0xff]  ;;  %v1063_v1 = vmul.f32 %v5614_v11, %v12103_v25  ;;  %v1531_v11 = vshll.u32 %v1530_v41, 16 }
 0x2eb   : > { %v1059_v48 = vmul.f32 %v5612_v44, %v12101_v4  ;;  %v12107_v4 = vld [vmem:[#allocation135_spill] sm:$0xff]  ;;  %v7536_v25 = vpop.permute.xlu1 %3100 }
 0x2ec   : > { %v1190_v50 = vsel %vm619_vm2, %v1098_v23, 0.0  ;;  %12108 = vst [vmem:[#allocation22_spill] sm:$0xff] %v7536_v25  ;;  %v5822_v25 = vld [vmem:[%s6098_s5 + $0xb8] sm:$0xff] }
 0x2ee   : > { %1164 = vadd.xlane.f32.xlu1 %v1163_v59  ;;  %1185 = vadd.xlane.f32.xlu0 %v1184_v13  ;;  %v12102_v59 = vld [vmem:[#allocation37_spill] sm:$0xff]  ;;  %v5616_v13 = vpop.eup %5615 }
 0x2ef   : > { %v1095_v33 = vmul.f32 %v12102_v59, %v1059_v48  ;;  %v1560_v48 = vcvt.f32.s32 %v7148_v55  ;;  %v5824_v59 = vld [vmem:[%s6098_s5 + $0xb0] sm:$0xff] }
 0x2f0   : > { %v5321_v51 = vtrunc.f32 %v5824_v59 }
 0x2f1   : > { %v1181_v44 = vsel %vm619_vm2, %v1095_v33, 0.0  ;;  %v12110_v33 = vld [vmem:[#allocation50_spill] sm:$0xff] }
 0x2f2   : > { %1170 = vadd.xlane.f32.xlu1 %v1169_v53  ;;  %1191 = vadd.xlane.f32.xlu0 %v1190_v50  ;;  %v12106_v53 = vld [vmem:[#allocation40_spill] sm:$0xff]  ;;  %v1067_v50 = vmul.f32 %v5616_v13, %v12107_v4  ;;  %vm2254_vm9 = vcmp.eq.s32.totalorder %v12110_v33, 16 }
 0x2f3   : > { %v1097_v23 = vmul.f32 %v12106_v53, %v1063_v1  ;;  %v5818_v1 = vld [vmem:[%s6098_s5 + $0xd0] sm:$0xff]  ;;  %v5323_v53 = vtrunc.f32 %v5822_v25 }
 0x2f4   : > { %v1099_v28 = vmul.f32 %v12109_v35, %v1067_v50  ;;  %v5329_v13 = vtrunc.f32 %v5818_v1  ;;  %v11535_v50 = vmov 0.0  }
 0x2f5   : > { %v1187_v63 = vsel %vm619_vm2, %v1097_v23, 0.0  ;;  %v7593_v25 = vcvt.f32.s32 %v5323_v53 }
 0x2f6   : > { %1176 = vadd.xlane.f32.xlu1 %v1175_v3  ;;  %v1193_v41 = vsel %vm619_vm2, %v1099_v28, 0.0 }
 0x2f7   : > { %12118 = vst [vmem:[#allocation99_spill] sm:$0xff] %v7593_v25 }
 0x2fa   : > { %1182 = vadd.xlane.f32.xlu1 %v1181_v44  ;;  %v1561_v44 = vshll.u32 %v1560_v48, 16 }
 0x2fb   : > { %v1528_v22 = vpop.xlane.xlu0 %1527 }
 0x2fc   : > { %v1529_v3 = vcvt.f32.s32 %v1528_v22  ;;  %v5819_v22 = vld [vmem:[%s6098_s5 + $0xc8] sm:$0xff] }
 0x2fe   : > { %1188 = vadd.xlane.f32.xlu1 %v1187_v63  ;;  %v7540_v45 = vadd.s32 %v1531_v11, %v1529_v3  ;;  %v7552_v63 = vpop.permute.xlu1 %3145  ;;  %v5327_v11 = vtrunc.f32 %v5819_v22  ;;  %v7559_v3 = vcvt.f32.s32 %v5329_v13 }
 0x2ff   : > { %v1558_v4 = vpop.xlane.xlu0 %1557  ;;  %12111 = vst [vmem:[#allocation93_spill] sm:$0xff] %v7552_v63 }
 0x300   : > { %v1559_v55 = vcvt.f32.s32 %v1558_v4  ;;  %vm1998_vm0 = vcmp.eq.s32.totalorder %v12110_v33, %v7540_v45  ;;  %12112 = vst [vmem:[#allocation105_spill] sm:$0xff] %v7559_v3  ;;  %v5820_v4 = vld [vmem:[%s6098_s5 + $0xc0] sm:$0xff] }
 0x301   : > { %vm2255_vm11 = vmor %vm1998_vm0, %vm2254_vm9 }
 0x302   : > { %1194 = vadd.xlane.f32.xlu1 %v1193_v41  ;;  %v7554_v23 = vadd.s32 %v1561_v44, %v1559_v55  ;;  %v4902_v48 = vsel %vm2255_vm11, 1.0, %v11535_v50  ;;  %v5325_v55 = vtrunc.f32 %v5820_v4  ;;  %v7571_v41 = vcvt.f32.s32 %v5327_v11  ;;  %v7573_v13 = vpop.permute.xlu1 %3097 }
 0x303   : > { %5223 = vmatprep.mubr.msk.f32.mxu0 %vm2351_vm10, %v4902_v48  ;;  %v1588_v28 = vpop.xlane.xlu0 %1587  ;;  %12114 = vst [vmem:[#allocation96_spill] sm:$0xff] %v7573_v13  ;;  %v5821_v48 = vld [vmem:[%s6098_s5 + $0x58] sm:$0xff]  ;;  %v1590_v13 = vcvt.f32.s32 %v7160_v5 }
 0x304   : > { %vm2000_vm12 = vcmp.eq.s32.totalorder %v12110_v33, %v7554_v23  ;;  %12113 = vst [vmem:[#allocation76_spill] sm:$0xff] %v7571_v41  ;;  %v5299_v22 = vtrunc.f32 %v5821_v48  ;;  %v1815_v23 = vcvt.f32.s32 %v7261_v61 }
 0x305   : > { %vm2257_vm13 = vmor %vm2000_vm12, %vm2254_vm9  ;;  %v1591_v5 = vshll.u32 %v1590_v13, 16  ;;  %v5827_v13 = vld [vmem:[%s6098_s5 + $0x40] sm:$0xff] }
 0x306   : > { %v4904_v1 = vsel %vm2257_vm13, 1.0, %v11535_v50  ;;  %v7580_v50 = vcvt.f32.s32 %v5325_v55  ;;  %v7584_v11 = vcvt.f32.s32 %v5299_v22  ;;  %v7587_v35 = vpop.permute.xlu1 %3142  ;;  %v1589_v55 = vcvt.f32.s32 %v1588_v28  ;;  %v5826_v28 = vld [vmem:[%s6098_s5 + $0x28] sm:$0xff] }
 0x307   : > { %5226 = vmatprep.mubr.msk.f32.mxu1 %vm2351_vm10, %v4904_v1  ;;  %v1618_v44 = vpop.xlane.xlu0 %1617  ;;  %v5823_v1 = vld [vmem:[%s6098_s5 + $0x50] sm:$0xff]  ;;  %12117 = vst [vmem:[#allocation24_spill] sm:$0xff] %v7587_v35  ;;  %v1620_v35 = vcvt.f32.s32 %v7177_v38  ;;  %v5287_v2 = vtrunc.f32 %v5826_v28  ;;  %v5293_v38 = vtrunc.f32 %v5827_v13 }
 0x308   : > { %3139 = vperm.xlu0 %5408, %v7559_v3   ;;  %12115 = vst [vmem:[#allocation88_spill] sm:$0xff] %v7580_v50  ;;  %v5297_v4 = vtrunc.f32 %v5823_v1  ;;  %12116 = vst [vmem:[#allocation110_spill] sm:$0xff] %v7584_v11  ;;  %v1545_v3 = vcvt.f32.s32 %v7133_v8 }
 0x30a   : > { %v7597_v22 = vcvt.f32.s32 %v5297_v4  ;;  %v1546_v56 = vshll.u32 %v1545_v3, 16  ;;  %v1619_v4 = vcvt.f32.s32 %v1618_v44  ;;  %v1621_v3 = vshll.u32 %v1620_v35, 16 }
 0x30b   : > { %v7577_v63 = vpop.xlane.xlu0 %1662 }
 0x30c   : > { %3136 = vperm.xlu0 %5408, %v7571_v41   ;;  %v5825_v41 = vld [vmem:[%s6098_s5 + $0x48] sm:$0xff]  ;;  %12119 = vst [vmem:[#allocation112_spill] sm:$0xff] %v7597_v22 }
 0x30d   : > { %v5295_v1 = vtrunc.f32 %v5825_v41  ;;  %v7607_v41 = vadd.s32 %v1591_v5, %v1589_v55  ;;  %v1576_v55 = vshll.u32 %v1575_v29, 16  ;;  %v1665_v29 = vcvt.f32.s32 %v7191_v46 }
 0x30e   : > { %v1664_v46 = vcvt.f32.s32 %v7577_v63 }
 0x30f   : > { %v7590_v48 = vpop.xlane.xlu0 %1647  ;;  %vm2002_vm1 = vcmp.eq.s32.totalorder %v12110_v33, %v7607_v41 }
 0x310   : > { %3133 = vperm.xlu0 %5408, %v7580_v50   ;;  %v7605_v50 = vcvt.f32.s32 %v5321_v51  ;;  %vm7656_vm4 = vmor %vm2002_vm1, %vm2254_vm9 }
 0x312   : > { %12120 = vst [vmem:[#allocation81_spill] sm:$0xff] %v7605_v50 }
 0x313   : > { %3094 = vperm.xlu1 %5407, %v7584_v11   ;;  %v1543_v8 = vpop.xlane.xlu1 %1542  ;;  %v7602_v53 = vpop.xlane.xlu0 %1677  ;;  %v7613_v11 = vcvt.f32.s32 %v5295_v1  ;;  %v7624_v1 = vadd.s32 %v1621_v3, %v1619_v4  ;;  %v1606_v4 = vshll.u32 %v1605_v52, 16  ;;  %v1680_v3 = vcvt.f32.s32 %v7205_v47 }
 0x314   : > { %v1544_v59 = vcvt.f32.s32 %v1543_v8  ;;  %3130 = vperm.xlu0 %5408, %v7593_v25   ;;  %v1650_v8 = vcvt.f32.s32 %v7193_v34  ;;  %v5828_v34 = vld [vmem:[%s6098_s5 + $0x38] sm:$0xff]  ;;  %v1679_v63 = vcvt.f32.s32 %v7602_v53  ;;  %v1695_v53 = vcvt.f32.s32 %v7203_v54 }
 0x315   : > { %12121 = vst [vmem:[#allocation101_spill] sm:$0xff] %v7613_v11  ;;  %v5291_v9 = vtrunc.f32 %v5828_v34  ;;  %v1635_v34 = vcvt.f32.s32 %v7168_v60  ;;  %vm2004_vm6 = vcmp.eq.s32.totalorder %v12110_v33, %v7624_v1 }
 0x316   : > { %v7611_v24 = vadd.s32 %v1546_v56, %v1544_v59  ;;  %v7622_v56 = vcvt.f32.s32 %v5287_v2  ;;  %v1649_v59 = vcvt.f32.s32 %v7590_v48  ;;  %v12123_v2 = vmov 0.0   ;;  %vm7694_vm8 = vmor %vm2004_vm6, %vm2254_vm9 }
 0x317   : > { %3091 = vperm.xlu1 %5407, %v7597_v22   ;;  %v1573_v51 = vpop.xlane.xlu1 %1572  ;;  %v7620_v5 = vpop.xlane.xlu0 %1707  ;;  %v7640_v48 = vcvt.f32.s32 %v5293_v38  ;;  %v1651_v13 = vshll.u32 %v1650_v8, 16  ;;  %v5829_v38 = vld [vmem:[%s6098_s5 + $0x30] sm:$0xff]  ;;  %v7672_v8 = vcvt.f32.s32 %v5291_v9  ;;  %v4906_v9 = vsel %vm7656_vm4, 1.0, %v12123_v2 }
 0x318   : > { %vm1999_vm14 = vcmp.eq.s32.totalorder %v12110_v33, %v7611_v24  ;;  %v1574_v44 = vcvt.f32.s32 %v1573_v51  ;;  %12122 = vst [vmem:[#allocation94_spill] sm:$0xff] %v7622_v56  ;;  %3127 = vperm.xlu0 %5408, %v7605_v50   ;;  %v5289_v52 = vtrunc.f32 %v5829_v38 }
 0x319   : > { %vm2256_vm15 = vmor %vm1999_vm14, %vm2254_vm9  ;;  %12124 = vst [vmem:[#allocation118_spill] sm:$0xff] %v7640_v48  ;;  %v7661_v60 = vadd.s32 %v1651_v13, %v1649_v59  ;;  %v1710_v13 = vcvt.f32.s32 %v7214_v27 }
 0x31a   : > { %v4903_v35 = vsel %vm2256_vm15, 1.0, %v12123_v2  ;;  %v7638_v28 = vadd.s32 %v1576_v55, %v1574_v44  ;;  %12128 = vst [vmem:[#allocation104_spill] sm:$0xff] %v7672_v8  ;;  %v1666_v55 = vshll.u32 %v1665_v29, 16  ;;  %v1636_v29 = vshll.u32 %v1635_v34, 16 }
 0x31b   : > { %3088 = vperm.xlu1 %5407, %v7613_v11   ;;  %v1603_v51 = vpop.xlane.xlu1 %1602  ;;  %5224 = vmatmul.mubr.msk.f32.vlgmr.msra.gmra.mxu0 %vm2351_vm10, %v4903_v35  ;;  %v7647_v25 = vpop.xlane.xlu0 %1101  ;;  %v1681_v35 = vshll.u32 %v1680_v3, 16  ;;  %v1709_v3 = vcvt.f32.s32 %v7620_v5  ;;  %vm2006_vm13 = vcmp.eq.s32.totalorder %v12110_v33, %v7661_v60  ;;  %v7708_v34 = vcvt.f32.s32 %v5289_v52 }
 0x31c   : > { %v1604_v50 = vcvt.f32.s32 %v1603_v51  ;;  %12125 = vst [vmem:[#allocation26_spill] sm:$0xff] %v7647_v25  ;;  %vm11549_vm3 = vcmp.eq.s32.totalorder %v12110_v33, %v7638_v28  ;;  %3076 = vperm.xlu0 %5408, %v7622_v56   ;;  %v1740_v5 = vcvt.f32.s32 %v7232_v10  ;;  %v4908_v52 = vsel %vm7694_vm8, 1.0, %v12123_v2  ;;  %vm7731_vm4 = vmor %vm2006_vm13, %vm2254_vm9 }
 0x31d   : > { %vm2258_vm5 = vmor %vm11549_vm3, %vm2254_vm9  ;;  %v7698_v54 = vadd.s32 %v1681_v35, %v1679_v63  ;;  %12131 = vst [vmem:[#allocation120_spill] sm:$0xff] %v7708_v34  ;;  %v1711_v35 = vshll.u32 %v1710_v13, 16  ;;  %v5831_v13 = vld [vmem:[%s6098_s5 + $0xa0] sm:$0xff]  ;;  %v4878_v1 = vsel %vm2006_vm13, 1.0, %v12123_v2 }
 0x31e   : > { %v7674_v44 = vadd.s32 %v1606_v4, %v1604_v50  ;;  %v4905_v59 = vsel %vm2258_vm5, 1.0, %v12123_v2  ;;  %v7684_v50 = vadd.s32 %v1666_v55, %v1664_v46  ;;  %v5830_v46 = vld [vmem:[%s6098_s5 + $0xa8] sm:$0xff]  ;;  %v5317_v27 = vtrunc.f32 %v5831_v13  ;;  %v5832_v13 = vld [vmem:[%s6098_s5 + $0x20] sm:$0xff] }
 0x31f   : > { %3085 = vperm.xlu1 %5407, %v7640_v48   ;;  %v1633_v51 = vpop.xlane.xlu1 %1632  ;;  %5227 = vmatmul.mubr.msk.f32.vlgmr.msra.gmra.mxu1 %vm2351_vm10, %v4905_v59  ;;  %v1738_v38 = vpop.xlane.xlu0 %1737  ;;  %v5319_v47 = vtrunc.f32 %v5830_v46  ;;  %v1696_v59 = vshll.u32 %v1695_v53, 16 }
 0x320   : > { %v1634_v4 = vcvt.f32.s32 %v1633_v51  ;;  %5229 = vmatprep.mubr.msk.f32.mxu1 %vm2351_vm10, %v4906_v9  ;;  %vm11547_vm7 = vcmp.eq.s32.totalorder %v12110_v33, %v7674_v44  ;;  %v1725_v9 = vcvt.f32.s32 %v7212_v43  ;;  %vm11544_vm5 = vcmp.eq.s32.totalorder %v12110_v33, %v7684_v50 }
 0x321   : > { %vm2260_vm11 = vmor %vm11547_vm7, %vm2254_vm9  ;;  %v7737_v43 = vadd.s32 %v1711_v35, %v1709_v3  ;;  %v1739_v53 = vcvt.f32.s32 %v1738_v38  ;;  %v1741_v3 = vshll.u32 %v1740_v5, 16  ;;  %v1770_v38 = vcvt.f32.s32 %v7247_v18 }
 0x322   : > { %v7711_v55 = vadd.s32 %v1636_v29, %v1634_v4  ;;  %v4907_v63 = vsel %vm2260_vm11, 1.0, %v12123_v2  ;;  %vm2008_vm11 = vcmp.eq.s32.totalorder %v12110_v33, %v7698_v54 }
 0x323   : > { %3082 = vperm.xlu1 %5407, %v7672_v8   ;;  %v1693_v51 = vpop.xlane.xlu1 %1692  ;;  %5230 = vmatmul.mubr.msk.f32.gmra.mxu1 %vm2351_vm10, %v4907_v63  ;;  %v7721_v4 = vpop.xlane.xlu0 %1107  ;;  %v7771_v18 = vadd.s32 %v1741_v3, %v1739_v53  ;;  %v1755_v3 = vcvt.f32.s32 %v7230_v57 }
 0x324   : > { %v1694_v29 = vcvt.f32.s32 %v1693_v51  ;;  %12132 = vst [vmem:[#allocation85_spill] sm:$0xff] %v7721_v4  ;;  %5232 = vmatprep.mubr.msk.f32.mxu1 %vm2351_vm10, %v4908_v52  ;;  %vm11543_vm15 = vcmp.eq.s32.totalorder %v12110_v33, %v7711_v55  ;;  %v7750_v51 = vcvt.f32.s32 %v5319_v47  ;;  %v4910_v52 = vsel %vm7731_vm4, 1.0, %v12123_v2 }
 0x325   : > { %vm2262_vm8 = vmor %vm11543_vm15, %vm2254_vm9  ;;  %v1726_v47 = vshll.u32 %v1725_v9, 16 }
 0x326   : > { %v7747_v46 = vadd.s32 %v1696_v59, %v1694_v29  ;;  %v4909_v63 = vsel %vm2262_vm8, 1.0, %v12123_v2  ;;  %12135 = vst [vmem:[#allocation109_spill] sm:$0xff] %v7750_v51  ;;  %vm2264_vm8 = vmor %vm11544_vm5, %vm2254_vm9  ;;  %vm2010_vm5 = vcmp.eq.s32.totalorder %v12110_v33, %v7737_v43 }
 0x327   : > { %3079 = vperm.xlu1 %5407, %v7708_v34   ;;  %v1723_v35 = vpop.xlane.xlu1 %1722  ;;  %5233 = vmatmul.mubr.msk.f32.gmra.mxu1 %vm2351_vm10, %v4909_v63  ;;  %v1768_v5 = vpop.xlane.xlu0 %1767  ;;  %vm2265_vm15 = vmor %vm2008_vm11, %vm2254_vm9  ;;  %v4911_v10 = vsel %vm2264_vm8, 1.0, %v12123_v2  ;;  %v5285_v63 = vtrunc.f32 %v5832_v13  ;;  %v4882_v54 = vsel %vm2010_vm5, 1.0, %v12123_v2 }
 0x328   : > { %v1724_v59 = vcvt.f32.s32 %v1723_v35  ;;  %5235 = vmatprep.mubr.msk.f32.mxu1 %vm2351_vm10, %v4910_v52  ;;  %vm11548_vm4 = vcmp.eq.s32.totalorder %v12110_v33, %v7747_v46  ;;  %v1769_v29 = vcvt.f32.s32 %v1768_v5  ;;  %v7779_v35 = vcvt.f32.s32 %v5317_v27  ;;  %vm2267_vm8 = vmor %vm2010_vm5, %vm2254_vm9 }
 0x329   : > { %v1771_v52 = vshll.u32 %v1770_v38, 16  ;;  %v4912_v53 = vsel %vm2265_vm15, 1.0, %v12123_v2  ;;  %vm2266_vm7 = vmor %vm11548_vm4, %vm2254_vm9  ;;  %vm2012_vm4 = vcmp.eq.s32.totalorder %v12110_v33, %v7771_v18  ;;  %v7807_v38 = vcvt.f32.s32 %v5285_v63 }
 0x32a   : > { %v7775_v9 = vadd.s32 %v1726_v47, %v1724_v59  ;;  %12136 = vst [vmem:[#allocation100_spill] sm:$0xff] %v7779_v35  ;;  %v4913_v57 = vsel %vm2266_vm7, 1.0, %v12123_v2  ;;  %v1800_v59 = vcvt.f32.s32 %v7263_v14  ;;  %vm2269_vm7 = vmor %vm2012_vm4, %vm2254_vm9 }
 0x32b   : > { %3124 = vperm.xlu1 %5407, %v7750_v51   ;;  %v7782_v34 = vpop.xlane.xlu1 %1104  ;;  %5236 = vmatmul.mubr.msk.f32.gmra.mxu1 %vm2351_vm10, %v4911_v10  ;;  %v7792_v47 = vpop.xlane.xlu0 %1113  ;;  %v7802_v27 = vadd.s32 %v1771_v52, %v1769_v29  ;;  %12139 = vst [vmem:[#allocation111_spill] sm:$0xff] %v7807_v38  ;;  %v4914_v10 = vsel %vm2267_vm8, 1.0, %v12123_v2  ;;  %v1756_v29 = vshll.u32 %v1755_v3, 16 }
 0x32c   : > { %12137 = vst [vmem:[#allocation124_spill] sm:$0xff] %v7782_v34  ;;  %12138 = vst [vmem:[#allocation28_spill] sm:$0xff] %v7792_v47  ;;  %5238 = vmatprep.mubr.msk.f32.mxu1 %vm2351_vm10, %v4912_v53  ;;  %vm11551_vm15 = vcmp.eq.s32.totalorder %v12110_v33, %v7775_v9 }
 0x32d   : > { %vm2268_vm3 = vmor %vm11551_vm15, %vm2254_vm9  ;;  %vm2014_vm8 = vcmp.eq.s32.totalorder %v12110_v33, %v7802_v27 }
 0x32e   : > { %v4915_v53 = vsel %vm2268_vm3, 1.0, %v12123_v2  ;;  %vm2271_vm3 = vmor %vm2014_vm8, %vm2254_vm9 }
 0x32f   : > { %3121 = vperm.xlu1 %5407, %v7779_v35   ;;  %v1753_v5 = vpop.xlane.xlu1 %1752  ;;  %5239 = vmatmul.mubr.msk.f32.gmra.mxu1 %vm2351_vm10, %v4913_v57  ;;  %v1798_v52 = vpop.xlane.xlu0 %1797  ;;  %v1801_v57 = vshll.u32 %v1800_v59, 16  ;;  %v4870_v59 = vsel %vm1998_vm0, 1.0, %v12123_v2 }
 0x330   : > { %v1754_v13 = vcvt.f32.s32 %v1753_v5  ;;  %5241 = vmatprep.mubr.msk.f32.mxu1 %vm2351_vm10, %v4914_v10  ;;  %v1799_v14 = vcvt.f32.s32 %v1798_v52  ;;  %v4916_v5 = vsel %vm2269_vm7, 1.0, %v12123_v2  ;;  %v1785_v10 = vcvt.f32.s32 %v7245_v39 }
 0x331   : > { %v2094_v45 = vmul.f32 %v4870_v59, %v11993_v58 }
 0x332   : > { %v7826_v63 = vadd.s32 %v1756_v29, %v1754_v13  ;;  %v7849_v29 = vadd.s32 %v1801_v57, %v1799_v14  ;;  %v1830_v13 = vcvt.f32.s32 %v7283_v7  ;;  %v4872_v14 = vsel %vm2000_vm12, 1.0, %v12123_v2 }
 0x333   : > { %3073 = vperm.xlu1 %5407, %v7807_v38   ;;  %v7830_v3 = vpop.xlane.xlu1 %1110  ;;  %5242 = vmatmul.mubr.msk.f32.gmra.mxu1 %vm2351_vm10, %v4915_v53  ;;  %v7835_v35 = vpop.xlane.xlu0 %1119  ;;  %v4918_v53 = vsel %vm2271_vm3, 1.0, %v12123_v2  ;;  %v2126_v58 = vsel %vm619_vm2, %v2094_v45, 0.0  ;;  %v1816_v45 = vshll.u32 %v1815_v23, 16 }
 0x334   : > { %12140 = vst [vmem:[#allocation128_spill] sm:$0xff] %v7830_v3  ;;  %12141 = vst [vmem:[#allocation92_spill] sm:$0xff] %v7835_v35  ;;  %5244 = vmatprep.mubr.msk.f32.mxu1 %vm2351_vm10, %v4916_v5  ;;  %vm2013_vm15 = vcmp.eq.s32.totalorder %v12110_v33, %v7826_v63  ;;  %v1786_v5 = vshll.u32 %v1785_v10, 16  ;;  %vm2016_vm0 = vcmp.eq.s32.totalorder %v12110_v33, %v7849_v29 }
 0x335   : > { %vm2270_vm7 = vmor %vm2013_vm15, %vm2254_vm9  ;;  %v2096_v10 = vmul.f32 %v4872_v14, %v11997_v31 }
 0x336   : > { %v4917_v39 = vsel %vm2270_vm7, 1.0, %v12123_v2  ;;  %vm2273_vm3 = vmor %vm2016_vm0, %vm2254_vm9 }
 0x337   : > { %v1783_v52 = vpop.xlane.xlu1 %1782  ;;  %5245 = vmatmul.mubr.msk.f32.gmra.mxu1 %vm2351_vm10, %v4917_v39  ;;  %v1828_v38 = vpop.xlane.xlu0 %1827  ;;  %v1831_v39 = vshll.u32 %v1830_v13, 16  ;;  %v1860_v13 = vcvt.f32.s32 %v7308_v0  ;;  %v4920_v41 = vsel %vm2273_vm3, 1.0, %v12123_v2  ;;  %v4876_v0 = vsel %vm2004_vm6, 1.0, %v12123_v2 }
 0x338   : > { %v1784_v57 = vcvt.f32.s32 %v1783_v52  ;;  %5247 = vmatprep.mubr.msk.f32.mxu1 %vm2351_vm10, %v4918_v53  ;;  %v1829_v48 = vcvt.f32.s32 %v1828_v38  ;;  %v4874_v38 = vsel %vm2002_vm1, 1.0, %v12123_v2  ;;  %v2132_v53 = vsel %vm619_vm2, %v2096_v10, 0.0 }
 0x339   : > { %v2100_v23 = vmul.f32 %v4876_v0, %v12009_v26 }
 0x33a   : > { %v7868_v7 = vadd.s32 %v1786_v5, %v1784_v57  ;;  %v7888_v31 = vadd.s32 %v1831_v39, %v1829_v48  ;;  %v2098_v48 = vmul.f32 %v4874_v38, %v12003_v36  ;;  %v1845_v38 = vcvt.f32.s32 %v7291_v62 }
 0x33b   : > { %v7870_v56 = vpop.xlane.xlu1 %1116  ;;  %2127 = vadd.xlane.f32.xlu0 %v2126_v58  ;;  %v7875_v59 = vpop.xlane.xlu0 %1125  ;;  %v1861_v58 = vshll.u32 %v1860_v13, 16  ;;  %v1890_v13 = vcvt.f32.s32 %v7339_v6  ;;  %v4880_v6 = vsel %vm2008_vm11, 1.0, %v12123_v2 }
 0x33c   : > { %12142 = vst [vmem:[#allocation117_spill] sm:$0xff] %v7870_v56  ;;  %12143 = vst [vmem:[#allocation106_spill] sm:$0xff] %v7875_v59  ;;  %vm2015_vm12 = vcmp.eq.s32.totalorder %v12110_v33, %v7868_v7  ;;  %vm2018_vm1 = vcmp.eq.s32.totalorder %v12110_v33, %v7888_v31  ;;  %v2138_v36 = vsel %vm619_vm2, %v2098_v48, 0.0  ;;  %v1846_v48 = vshll.u32 %v1845_v38, 16 }
 0x33d   : > { %vm2272_vm7 = vmor %vm2015_vm12, %vm2254_vm9 }
 0x33e   : > { %v4919_v61 = vsel %vm2272_vm7, 1.0, %v12123_v2  ;;  %vm2275_vm3 = vmor %vm2018_vm1, %vm2254_vm9 }
 0x33f   : > { %v1813_v52 = vpop.xlane.xlu1 %1812  ;;  %5248 = vmatmul.mubr.msk.f32.gmra.mxu1 %vm2351_vm10, %v4919_v61  ;;  %2133 = vadd.xlane.f32.xlu0 %v2132_v53  ;;  %v1858_v14 = vpop.xlane.xlu0 %1857  ;;  %v2144_v53 = vsel %vm619_vm2, %v2100_v23, 0.0  ;;  %v4922_v60 = vsel %vm2275_vm3, 1.0, %v12123_v2  ;;  %v1875_v23 = vcvt.f32.s32 %v7321_v32  ;;  %v1920_v32 = vcvt.f32.s32 %v7365_v16 }
 0x340   : > { %v1814_v5 = vcvt.f32.s32 %v1813_v52  ;;  %5250 = vmatprep.mubr.msk.f32.mxu1 %vm2351_vm10, %v4920_v41  ;;  %v1859_v57 = vcvt.f32.s32 %v1858_v14  ;;  %v2102_v41 = vmul.f32 %v4878_v1, %v12017_v12 }
 0x342   : > { %v7908_v39 = vadd.s32 %v1816_v45, %v1814_v5  ;;  %v7928_v26 = vadd.s32 %v1861_v58, %v1859_v57  ;;  %v1891_v57 = vshll.u32 %v1890_v13, 16  ;;  %v2150_v12 = vsel %vm619_vm2, %v2102_v41, 0.0 }
 0x343   : > { %v7910_v10 = vpop.xlane.xlu1 %1122  ;;  %2139 = vadd.xlane.f32.xlu0 %v2138_v36  ;;  %v7915_v61 = vpop.xlane.xlu0 %1131  ;;  %v2104_v36 = vmul.f32 %v4880_v6, %v12027_v21 }
 0x344   : > { %12144 = vst [vmem:[#allocation132_spill] sm:$0xff] %v7910_v10  ;;  %12145 = vst [vmem:[#allocation30_spill] sm:$0xff] %v7915_v61  ;;  %vm2017_vm6 = vcmp.eq.s32.totalorder %v12110_v33, %v7908_v39  ;;  %vm2020_vm13 = vcmp.eq.s32.totalorder %v12110_v33, %v7928_v26  ;;  %v12257_v10 = vld [vmem:[#allocation72_spill] sm:$0xff] }
 0x345   : > { %vm2274_vm7 = vmor %vm2017_vm6, %vm2254_vm9  ;;  %v2156_v13 = vsel %vm619_vm2, %v2104_v36, 0.0  ;;  %v4889_v7 = vsel %vm2017_vm6, 1.0, %v12123_v2 }
 0x346   : > { %v4921_v62 = vsel %vm2274_vm7, 1.0, %v12123_v2  ;;  %vm2277_vm3 = vmor %vm2020_vm13, %vm2254_vm9 }
 0x347   : > { %v1843_v52 = vpop.xlane.xlu1 %1842  ;;  %5251 = vmatmul.mubr.msk.f32.gmra.mxu1 %vm2351_vm10, %v4921_v62  ;;  %2145 = vadd.xlane.f32.xlu0 %v2144_v53  ;;  %v1888_v5 = vpop.xlane.xlu0 %1887  ;;  %v4924_v43 = vsel %vm2277_vm3, 1.0, %v12123_v2  ;;  %v4871_v53 = vsel %vm1999_vm14, 1.0, %v12123_v2  ;;  %vm12149_vm14 = vcmp.eq.s32.totalorder %v12110_v33, %v7638_v28  ;;  %v1950_v28 = vcvt.f32.s32 %v7397_v17 }
 0x348   : > { %v1844_v45 = vcvt.f32.s32 %v1843_v52  ;;  %5253 = vmatprep.mubr.msk.f32.mxu1 %vm2351_vm10, %v4922_v60  ;;  %v1889_v14 = vcvt.f32.s32 %v1888_v5  ;;  %v2106_v52 = vmul.f32 %v4882_v54, %v12036_v20  ;;  %v1876_v60 = vshll.u32 %v1875_v23, 16 }
 0x349   : > { %v2095_v24 = vmul.f32 %v12002_v30, %v4871_v53  ;;  %v1921_v5 = vshll.u32 %v1920_v32, 16  ;;  %v4873_v18 = vsel %vm12149_vm14, 1.0, %v12123_v2  ;;  %v4886_v30 = vsel %vm2014_vm8, 1.0, %v12123_v2 }
 0x34a   : > { %v7948_v0 = vadd.s32 %v1846_v48, %v1844_v45  ;;  %v7968_v21 = vadd.s32 %v1891_v57, %v1889_v14  ;;  %v4884_v48 = vsel %vm2012_vm4, 1.0, %v12123_v2  ;;  %v2162_v14 = vsel %vm619_vm2, %v2106_v52, 0.0 }
 0x34b   : > { %v7950_v58 = vpop.xlane.xlu1 %1128  ;;  %2151 = vadd.xlane.f32.xlu0 %v2150_v12  ;;  %v7955_v38 = vpop.xlane.xlu0 %1137  ;;  %v2108_v57 = vmul.f32 %v4884_v48, %v12047_v40  ;;  %v12150_v12 = vld [vmem:[#allocation63_spill] sm:$0xff]  ;;  %v2129_v54 = vsel %vm619_vm2, %v2095_v24, 0.0  ;;  %v2110_v52 = vmul.f32 %v4886_v30, %v12058_v42  ;;  %vm12153_vm8 = vcmp.eq.s32.totalorder %v12110_v33, %v7674_v44 }
 0x34c   : > { %12146 = vst [vmem:[#allocation113_spill] sm:$0xff] %v7950_v58  ;;  %12147 = vst [vmem:[#allocation116_spill] sm:$0xff] %v7955_v38  ;;  %vm2019_vm11 = vcmp.eq.s32.totalorder %v12110_v33, %v7948_v0  ;;  %vm2022_vm5 = vcmp.eq.s32.totalorder %v12110_v33, %v7968_v21  ;;  %v1905_v36 = vcvt.f32.s32 %v12150_v12  ;;  %v4875_v17 = vsel %vm12153_vm8, 1.0, %v12123_v2 }
 0x34d   : > { %vm2276_vm7 = vmor %vm2019_vm11, %vm2254_vm9  ;;  %v2168_v27 = vsel %vm619_vm2, %v2108_v57, 0.0  ;;  %v2174_v57 = vsel %vm619_vm2, %v2110_v52, 0.0  ;;  %v1935_v12 = vcvt.f32.s32 %v7379_v49  ;;  %v12158_v49 = vld [vmem:[#allocation65_spill] sm:$0xff]  ;;  %v4891_v39 = vsel %vm2019_vm11, 1.0, %v12123_v2 }
 0x34e   : > { %v4923_v1 = vsel %vm2276_vm7, 1.0, %v12123_v2  ;;  %vm2279_vm3 = vmor %vm2022_vm5, %vm2254_vm9  ;;  %v1906_v53 = vshll.u32 %v1905_v36, 16  ;;  %v1980_v30 = vcvt.f32.s32 %v12158_v49 }
 0x34f   : > { %v1873_v62 = vpop.xlane.xlu1 %1872  ;;  %5254 = vmatmul.mubr.msk.f32.gmra.mxu1 %vm2351_vm10, %v4923_v1  ;;  %2157 = vadd.xlane.f32.xlu0 %v2156_v13  ;;  %v1918_v16 = vpop.xlane.xlu0 %1917  ;;  %v12152_v1 = vld [vmem:[#allocation13_spill] sm:$0xff]  ;;  %v1936_v52 = vshll.u32 %v1935_v12, 16 }
 0x350   : > { %v1874_v41 = vcvt.f32.s32 %v1873_v62  ;;  %5256 = vmatprep.mubr.msk.f32.mxu1 %vm2351_vm10, %v4924_v43  ;;  %v1919_v45 = vcvt.f32.s32 %v1918_v16  ;;  %v2097_v62 = vmul.f32 %v12152_v1, %v4873_v18  ;;  %v4926_v43 = vsel %vm2279_vm3, 1.0, %v12123_v2 }
 0x351   : > { %v4888_v16 = vsel %vm2016_vm0, 1.0, %v12123_v2  ;;  %vm12156_vm0 = vcmp.eq.s32.totalorder %v12110_v33, %v7711_v55 }
 0x352   : > { %v7992_v20 = vadd.s32 %v1876_v60, %v1874_v41  ;;  %v8017_v40 = vadd.s32 %v1921_v5, %v1919_v45  ;;  %v2135_v44 = vsel %vm619_vm2, %v2097_v62, 0.0  ;;  %v12154_v45 = vld [vmem:[#allocation15_spill] sm:$0xff]  ;;  %v1951_v5 = vshll.u32 %v1950_v28, 16 }
 0x353   : > { %v7995_v6 = vpop.xlane.xlu1 %1134  ;;  %2163 = vadd.xlane.f32.xlu0 %v2162_v14  ;;  %v8004_v23 = vpop.xlane.xlu0 %1143  ;;  %v2099_v24 = vmul.f32 %v12154_v45, %v4875_v17  ;;  %v2112_v18 = vmul.f32 %v4888_v16, %v12068_v15  ;;  %v4877_v29 = vsel %vm12156_vm0, 1.0, %v12123_v2  ;;  %v4890_v15 = vsel %vm2018_vm1, 1.0, %v12123_v2  ;;  %v12161_v16 = vld [vmem:[#allocation19_spill] sm:$0xff] }
 0x354   : > { %12148 = vst [vmem:[#allocation46_spill] sm:$0xff] %v7995_v6  ;;  %12151 = vst [vmem:[#allocation98_spill] sm:$0xff] %v8004_v23  ;;  %vm2021_vm4 = vcmp.eq.s32.totalorder %v12110_v33, %v7992_v20  ;;  %vm2024_vm14 = vcmp.eq.s32.totalorder %v12110_v33, %v8017_v40  ;;  %vm12160_vm1 = vcmp.eq.s32.totalorder %v12110_v33, %v7684_v50  ;;  %v4885_v40 = vsel %vm2013_vm15, 1.0, %v12123_v2 }
 0x355   : > { %vm2278_vm7 = vmor %vm2021_vm4, %vm2254_vm9  ;;  %v2141_v28 = vsel %vm619_vm2, %v2099_v24, 0.0  ;;  %v2180_v31 = vsel %vm619_vm2, %v2112_v18, 0.0 }
 0x356   : > { %v4925_v32 = vsel %vm2278_vm7, 1.0, %v12123_v2  ;;  %vm2281_vm7 = vmor %vm2024_vm14, %vm2254_vm9 }
 0x357   : > { %2130 = vadd.xlane.f32.xlu1 %v2129_v54  ;;  %v1903_v13 = vpop.xlane.xlu1 %1902  ;;  %5257 = vmatmul.mubr.msk.f32.gmra.mxu1 %vm2351_vm10, %v4925_v32  ;;  %v1948_v41 = vpop.xlane.xlu0 %1947  ;;  %v12159_v32 = vld [vmem:[#allocation17_spill] sm:$0xff] }
 0x358   : > { %v1904_v60 = vcvt.f32.s32 %v1903_v13  ;;  %2169 = vadd.xlane.f32.xlu0 %v2168_v27  ;;  %5259 = vmatprep.mubr.msk.f32.mxu1 %vm2351_vm10, %v4926_v43  ;;  %v1949_v48 = vcvt.f32.s32 %v1948_v41  ;;  %v2101_v1 = vmul.f32 %v12159_v32, %v4877_v29  ;;  %v4928_v13 = vsel %vm2281_vm7, 1.0, %v12123_v2 }
 0x359   : > { %v2114_v27 = vmul.f32 %v4890_v15, %v12075_v37  ;;  %v4879_v43 = vsel %vm12160_vm1, 1.0, %v12123_v2  ;;  %v12165_v15 = vld [vmem:[#allocation21_spill] sm:$0xff] }
 0x35a   : > { %v8043_v42 = vadd.s32 %v1906_v53, %v1904_v60  ;;  %v8069_v55 = vadd.s32 %v1951_v5, %v1949_v48  ;;  %v4892_v60 = vsel %vm2020_vm13, 1.0, %v12123_v2  ;;  %v2147_v50 = vsel %vm619_vm2, %v2101_v1, 0.0 }
 0x35b   : > { %2136 = vadd.xlane.f32.xlu1 %v2135_v44  ;;  %v8047_v14 = vpop.xlane.xlu1 %1140  ;;  %v8056_v36 = vpop.xlane.xlu0 %1149  ;;  %v2103_v48 = vmul.f32 %v12161_v16, %v4879_v43  ;;  %v1981_v44 = vshll.u32 %v1980_v30, 16  ;;  %v2186_v24 = vsel %vm619_vm2, %v2114_v27, 0.0  ;;  %v2116_v5 = vmul.f32 %v4892_v60, %v12078_v19  ;;  %v12170_v60 = vld [vmem:[#allocation38_spill] sm:$0xff] }
 0x35c   : > { %12155 = vst [vmem:[#allocation32_spill] sm:$0xff] %v8047_v14  ;;  %2175 = vadd.xlane.f32.xlu0 %v2174_v57  ;;  %12157 = vst [vmem:[#allocation121_spill] sm:$0xff] %v8056_v36  ;;  %vm2023_vm3 = vcmp.eq.s32.totalorder %v12110_v33, %v8043_v42  ;;  %vm2026_vm0 = vcmp.eq.s32.totalorder %v12110_v33, %v8069_v55  ;;  %vm12163_vm13 = vcmp.eq.s32.totalorder %v12110_v33, %v7747_v46  ;;  %v12164_v57 = vld [vmem:[#allocation77_spill] sm:$0xff] }
 0x35d   : > { %vm2280_vm8 = vmor %vm2023_vm3, %vm2254_vm9  ;;  %v4881_v26 = vsel %vm12163_vm13, 1.0, %v12123_v2  ;;  %v1965_v18 = vcvt.f32.s32 %v12164_v57  ;;  %v4894_v19 = vsel %vm2022_vm5, 1.0, %v12123_v2  ;;  %v2153_v46 = vsel %vm619_vm2, %v2103_v48, 0.0 }
 0x35e   : > { %v4927_v54 = vsel %vm2280_vm8, 1.0, %v12123_v2  ;;  %vm2283_vm8 = vmor %vm2026_vm0, %vm2254_vm9  ;;  %v2105_v49 = vmul.f32 %v12165_v15, %v4881_v26  ;;  %vm12167_vm5 = vcmp.eq.s32.totalorder %v12110_v33, %v7775_v9  ;;  %v4898_v48 = vsel %vm2026_vm0, 1.0, %v12123_v2 }
 0x35f   : > { %2142 = vadd.xlane.f32.xlu1 %v2141_v28  ;;  %v1933_v62 = vpop.xlane.xlu1 %1932  ;;  %5260 = vmatmul.mubr.msk.f32.gmra.mxu1 %vm2351_vm10, %v4927_v54  ;;  %v1978_v53 = vpop.xlane.xlu0 %1977  ;;  %v2192_v28 = vsel %vm619_vm2, %v2116_v5, 0.0  ;;  %v4930_v21 = vsel %vm2283_vm8, 1.0, %v12123_v2  ;;  %v12166_v54 = vld [vmem:[#allocation36_spill] sm:$0xff]  ;;  %v4883_v1 = vsel %vm12167_vm5, 1.0, %v12123_v2  ;;  %v4895_v0 = vsel %vm2023_vm3, 1.0, %v12123_v2 }
 0x360   : > { %v1934_v17 = vcvt.f32.s32 %v1933_v62  ;;  %2181 = vadd.xlane.f32.xlu0 %v2180_v31  ;;  %5262 = vmatprep.mubr.msk.f32.mxu1 %vm2351_vm10, %v4928_v13  ;;  %v1979_v41 = vcvt.f32.s32 %v1978_v53  ;;  %v2118_v32 = vmul.f32 %v4894_v19, %v12166_v54  ;;  %v1966_v62 = vshll.u32 %v1965_v18, 16  ;;  %v12173_v18 = vld [vmem:[#allocation42_spill] sm:$0xff] }
 0x361   : > { %v4896_v13 = vsel %vm2024_vm14, 1.0, %v12123_v2  ;;  %v2159_v43 = vsel %vm619_vm2, %v2105_v49, 0.0  ;;  %v2122_v19 = vmul.f32 %v4898_v48, %v12173_v18  ;;  %v12178_v48 = vld [vmem:[#allocation35_spill] sm:$0xff] }
 0x362   : > { %v8095_v37 = vadd.s32 %v1936_v52, %v1934_v17  ;;  %v8119_v29 = vadd.s32 %v1981_v44, %v1979_v41  ;;  %v12168_v52 = vld [vmem:[#allocation23_spill] sm:$0xff]  ;;  %v2198_v53 = vsel %vm619_vm2, %v2118_v32, 0.0  ;;  %v2120_v41 = vmul.f32 %v4896_v13, %v12170_v60  ;;  %v12177_v60 = vld [vmem:[#allocation33_spill] sm:$0xff] }
 0x363   : > { %2148 = vadd.xlane.f32.xlu1 %v2147_v50  ;;  %v8099_v45 = vpop.xlane.xlu1 %1146  ;;  %v2107_v9 = vmul.f32 %v12168_v52, %v4883_v1  ;;  %v12171_v50 = vld [vmem:[#allocation68_spill] sm:$0xff]  ;;  %v2210_v54 = vsel %vm619_vm2, %v2122_v19, 0.0 }
 0x364   : > { %12162 = vst [vmem:[#allocation34_spill] sm:$0xff] %v8099_v45  ;;  %2187 = vadd.xlane.f32.xlu0 %v2186_v24  ;;  %vm2025_vm7 = vcmp.eq.s32.totalorder %v12110_v33, %v8095_v37  ;;  %vm2028_vm13 = vcmp.eq.s32.totalorder %v12110_v33, %v8119_v29  ;;  %v1995_v16 = vcvt.f32.s32 %v12171_v50  ;;  %v12172_v24 = vld [vmem:[#allocation25_spill] sm:$0xff]  ;;  %v2204_v57 = vsel %vm619_vm2, %v2120_v41, 0.0 }
 0x365   : > { %vm2282_vm1 = vmor %vm2025_vm7, %vm2254_vm9  ;;  %v2165_v63 = vsel %vm619_vm2, %v2107_v9, 0.0  ;;  %v2109_v5 = vmul.f32 %v12172_v24, %v4885_v40  ;;  %v4893_v9 = vsel %vm2021_vm4, 1.0, %v12123_v2  ;;  %v5833_v40 = vld [vmem:[%s6098_s5 + $0x98] sm:$0xff]  ;;  %v4897_v20 = vsel %vm2025_vm7, 1.0, %v12123_v2  ;;  %v5835_v37 = vld [vmem:[%s6098_s5 + $0x90] sm:$0xff] }
 0x366   : > { %v4929_v12 = vsel %vm2282_vm1, 1.0, %v12123_v2  ;;  %vm2285_vm8 = vmor %vm2028_vm13, %vm2254_vm9  ;;  %v2117_v41 = vmul.f32 %v12177_v60, %v4893_v9  ;;  %v5315_v50 = vtrunc.f32 %v5833_v40  ;;  %v5313_v19 = vtrunc.f32 %v5835_v37  ;;  %v5839_v9 = vld [vmem:[%s6098_s5 + $0x80] sm:$0xff] }
 0x367   : > { %v1963_v30 = vpop.xlane.xlu1 %1962  ;;  %2154 = vadd.xlane.f32.xlu1 %v2153_v46  ;;  %5263 = vmatmul.mubr.msk.f32.gmra.mxu1 %vm2351_vm10, %v4929_v12  ;;  %v4932_v55 = vsel %vm2285_vm8, 1.0, %v12123_v2  ;;  %v4887_v46 = vsel %vm2015_vm12, 1.0, %v12123_v2  ;;  %v1996_v12 = vshll.u32 %v1995_v16, 16  ;;  %v5840_v60 = vld [vmem:[%s6098_s5] sm:$0xff] }
 0x368   : > { %v1964_v31 = vcvt.f32.s32 %v1963_v30  ;;  %2193 = vadd.xlane.f32.xlu0 %v2192_v28  ;;  %5265 = vmatprep.mubr.msk.f32.mxu1 %vm2351_vm10, %v4930_v21  ;;  %v2171_v30 = vsel %vm619_vm2, %v2109_v5, 0.0  ;;  %v12174_v28 = vld [vmem:[#allocation27_spill] sm:$0xff]  ;;  %v2195_v16 = vsel %vm619_vm2, %v2117_v41, 0.0  ;;  %v8229_v5 = vcvt.f32.s32 %v5315_v50 }
 0x369   : > { %v2111_v21 = vmul.f32 %v12174_v28, %v4887_v46  ;;  %v5836_v28 = vld [vmem:[%s6098_s5 + $0x10] sm:$0xff]  ;;  %v8246_v29 = vcvt.f32.s32 %v5313_v19  ;;  %v5277_v41 = vtrunc.f32 %v5840_v60  ;;  %v12199_v19 = vld [vmem:[#allocation40_spill] sm:$0xff] }
 0x36a   : > { %v8144_v27 = vadd.s32 %v1966_v62, %v1964_v31  ;;  %v12175_v62 = vld [vmem:[#allocation29_spill] sm:$0xff]  ;;  %12179 = vst [vmem:[#allocation125_spill] sm:$0xff] %v8229_v5 }
 0x36b   : > { %v8148_v17 = vpop.xlane.xlu1 %1152  ;;  %2160 = vadd.xlane.f32.xlu1 %v2159_v43  ;;  %v2177_v32 = vsel %vm619_vm2, %v2111_v21, 0.0  ;;  %v2113_v31 = vmul.f32 %v12175_v62, %v4889_v7  ;;  %v12176_v43 = vld [vmem:[#allocation31_spill] sm:$0xff]  ;;  %v5281_v21 = vtrunc.f32 %v5836_v28  ;;  %12184 = vst [vmem:[#allocation134_spill] sm:$0xff] %v8246_v29  ;;  %v8272_v50 = vcvt.f32.s32 %v5277_v41 }
 0x36c   : > { %12169 = vst [vmem:[#allocation130_spill] sm:$0xff] %v8148_v17  ;;  %2199 = vadd.xlane.f32.xlu0 %v2198_v53  ;;  %vm2027_vm14 = vcmp.eq.s32.totalorder %v12110_v33, %v8144_v27  ;;  %v2115_v52 = vmul.f32 %v12176_v43, %v4891_v39 }
 0x36d   : > { %vm2284_vm15 = vmor %vm2027_vm14, %vm2254_vm9  ;;  %v2183_v13 = vsel %vm619_vm2, %v2113_v31, 0.0  ;;  %v8250_v7 = vcvt.f32.s32 %v5281_v21  ;;  %v5838_v31 = vld [vmem:[%s6098_s5 + $0x8] sm:$0xff]  ;;  %12192 = vst [vmem:[#allocation135_spill] sm:$0xff] %v8272_v50 }
 0x36e   : > { %v4931_v44 = vsel %vm2284_vm15, 1.0, %v12123_v2  ;;  %v2189_v53 = vsel %vm619_vm2, %v2115_v52, 0.0  ;;  %v5279_v39 = vtrunc.f32 %v5838_v31 }
 0x36f   : > { %v1993_v26 = vpop.xlane.xlu1 %1992  ;;  %2166 = vadd.xlane.f32.xlu1 %v2165_v63  ;;  %5266 = vmatmul.mubr.msk.f32.gmra.mxu1 %vm2351_vm10, %v4931_v44  ;;  %v2119_v63 = vmul.f32 %v12178_v48, %v4895_v0  ;;  %v5834_v44 = vld [vmem:[%s6098_s5 + $0x18] sm:$0xff]  ;;  %12185 = vst [vmem:[#allocation108_spill] sm:$0xff] %v8250_v7 }
 0x370   : > { %v1994_v15 = vcvt.f32.s32 %v1993_v26  ;;  %2205 = vadd.xlane.f32.xlu0 %v2204_v57  ;;  %5268 = vmatprep.mubr.msk.f32.mxu1 %vm2351_vm10, %v4932_v55  ;;  %v5283_v24 = vtrunc.f32 %v5834_v44  ;;  %v12180_v26 = vld [vmem:[#allocation37_spill] sm:$0xff]  ;;  %v4900_v55 = vsel %vm2028_vm13, 1.0, %v12123_v2  ;;  %v8262_v52 = vcvt.f32.s32 %v5279_v39 }
 0x371   : > { %v2201_v42 = vsel %vm619_vm2, %v2119_v63, 0.0  ;;  %v2121_v57 = vmul.f32 %v12180_v26, %v4897_v20  ;;  %v12198_v26 = vld [vmem:[#allocation43_spill] sm:$0xff] }
 0x372   : > { %v8185_v49 = vadd.s32 %v1996_v12, %v1994_v15  ;;  %v8237_v18 = vcvt.f32.s32 %v5283_v24  ;;  %v12182_v12 = vld [vmem:[#allocation45_spill] sm:$0xff]  ;;  %12189 = vst [vmem:[#allocation126_spill] sm:$0xff] %v8262_v52 }
 0x373   : > { %2172 = vadd.xlane.f32.xlu1 %v2171_v30  ;;  %v2207_v46 = vsel %vm619_vm2, %v2121_v57, 0.0  ;;  %v2124_v15 = vmul.f32 %v4900_v55, %v12182_v12  ;;  %v8243_v30 = vpop.xlane.xlu0 %1155  ;;  %v4899_v55 = vsel %vm2027_vm14, 1.0, %v12123_v2  ;;  %vm3186_vm14 = vcmp.eq.s32.totalorder %v12110_v33, %v12257_v10 }
 0x374   : > { %2211 = vadd.xlane.f32.xlu0 %v2210_v54  ;;  %vm2029_vm12 = vcmp.eq.s32.totalorder %v12110_v33, %v8185_v49  ;;  %12181 = vst [vmem:[#allocation103_spill] sm:$0xff] %v8237_v18  ;;  %12183 = vst [vmem:[#allocation129_spill] sm:$0xff] %v8243_v30  ;;  %v8302_v49 = vpop.xlane.xlu1 %1158 }
 0x375   : > { %vm2286_vm0 = vmor %vm2029_vm12, %vm2254_vm9  ;;  %v2216_v54 = vsel %vm619_vm2, %v2124_v15, 0.0  ;;  %v4901_v24 = vsel %vm2029_vm12, 1.0, %v12123_v2  ;;  %12201 = vst [vmem:[#allocation77_spill] sm:$0xff] %v8302_v49 }
 0x376   : > { %v4933_v1 = vsel %vm2286_vm0, 1.0, %v12123_v2  ;;  %v2125_v57 = vmul.f32 %v12198_v26, %v4901_v24 }
 0x377   : > { %2178 = vadd.xlane.f32.xlu1 %v2177_v32  ;;  %5269 = vmatmul.mubr.msk.f32.gmra.mxu1 %vm2351_vm10, %v4933_v1  ;;  %v5837_v32 = vld [vmem:[%s6098_s5 + $0x88] sm:$0xff]  ;;  %v8253_v62 = vpop.xlane.xlu0 %1161 }
 0x378   : > { %v5311_v1 = vtrunc.f32 %v5837_v32  ;;  %12186 = vst [vmem:[#allocation136_spill] sm:$0xff] %v8253_v62  ;;  %v2219_v37 = vsel %vm619_vm2, %v2125_v57, 0.0  ;;  %v8306_v21 = vpop.xlane.xlu1 %1164 }
 0x379   : > { %12203 = vst [vmem:[#allocation36_spill] sm:$0xff] %v8306_v21 }
 0x37b   : > { %2184 = vadd.xlane.f32.xlu1 %v2183_v13  ;;  %v8257_v13 = vcvt.f32.s32 %v5311_v1  ;;  %v8260_v43 = vpop.xlane.xlu0 %1167 }
 0x37c   : > { %12188 = vst [vmem:[#allocation137_spill] sm:$0xff] %v8260_v43  ;;  %v8310_v27 = vpop.xlane.xlu1 %1170 }
 0x37d   : > { %12187 = vst [vmem:[#allocation119_spill] sm:$0xff] %v8257_v13  ;;  %12205 = vst [vmem:[#allocation38_spill] sm:$0xff] %v8310_v27 }
 0x37f   : > { %2190 = vadd.xlane.f32.xlu1 %v2189_v53  ;;  %v5309_v53 = vtrunc.f32 %v5839_v9  ;;  %v8269_v40 = vpop.xlane.xlu0 %1173 }
 0x380   : > { %12191 = vst [vmem:[#allocation133_spill] sm:$0xff] %v8269_v40  ;;  %v8316_v31 = vpop.xlane.xlu1 %1176  ;;  %v12240_v40 = vld [vmem:[#allocation96_spill] sm:$0xff] }
 0x381   : > { %v8267_v0 = vcvt.f32.s32 %v5309_v53  ;;  %12208 = vst [vmem:[#allocation42_spill] sm:$0xff] %v8316_v31  ;;  %vm3168_vm4 = vcmp.eq.s32.totalorder %v12110_v33, %v12240_v40 }
 0x383   : > { %2196 = vadd.xlane.f32.xlu1 %v2195_v16  ;;  %12190 = vst [vmem:[#allocation131_spill] sm:$0xff] %v8267_v0  ;;  %v8275_v16 = vpop.xlane.xlu0 %1179 }
 0x384   : > { %12193 = vst [vmem:[#allocation63_spill] sm:$0xff] %v8275_v16  ;;  %v8330_v26 = vpop.xlane.xlu1 %1182 }
 0x385   : > { %12213 = vst [vmem:[#allocation35_spill] sm:$0xff] %v8330_v26 }
 0x387   : > { %2202 = vadd.xlane.f32.xlu1 %v2201_v42  ;;  %v8278_v48 = vpop.xlane.xlu0 %1185 }
 0x388   : > { %12194 = vst [vmem:[#allocation13_spill] sm:$0xff] %v8278_v48 }
 0x38a   : > { %3118 = vperm.xlu0 %5408, %v8229_v5  }
 0x38b   : > { %2208 = vadd.xlane.f32.xlu1 %v2207_v46  ;;  %v8280_v63 = vpop.xlane.xlu0 %1191  ;;  %v2123_v46 = vmul.f32 %v12199_v19, %v4899_v55 }
 0x38c   : > { %12195 = vst [vmem:[#allocation15_spill] sm:$0xff] %v8280_v63 }
 0x38d   : > { %v2213_v15 = vsel %vm619_vm2, %v2123_v46, 0.0 }
 0x38e   : > { %3070 = vperm.xlu0 %5408, %v8237_v18   ;;  %v12225_v18 = vld [vmem:[#allocation22_spill] sm:$0xff] }
 0x38f   : > { %2217 = vadd.xlane.f32.xlu1 %v2216_v54  ;;  %v8282_v20 = vpop.permute.xlu0 %3139  ;;  %vm3169_vm9 = vcmp.eq.s32.totalorder %v12110_v33, %v12225_v18 }
 0x390   : > { %v4980_v51 = vsel %vm3169_vm9, 1.0, %v12123_v2  ;;  %vm3182_vm1 = vcmp.eq.s32.totalorder %v12110_v33, %v8282_v20 }
 0x392   : > { %3115 = vperm.xlu0 %5408, %v8246_v29  }
 0x393   : > { %v8284_v44 = vpop.permute.xlu0 %3136 }
 0x394   : > { %12196 = vst [vmem:[#allocation65_spill] sm:$0xff] %v8284_v44 }
 0x396   : > { %3067 = vperm.xlu0 %5408, %v8250_v7  }
 0x397   : > { %v8290_v42 = vpop.permute.xlu0 %3133 }
 0x398   : > { %12197 = vst [vmem:[#allocation17_spill] sm:$0xff] %v8290_v42 }
 0x39a   : > { %3112 = vperm.xlu0 %5408, %v8257_v13  }
 0x39b   : > { %v8299_v12 = vpop.permute.xlu0 %3130 }
 0x39c   : > { %12200 = vst [vmem:[#allocation19_spill] sm:$0xff] %v8299_v12 }
 0x39e   : > { %3064 = vperm.xlu0 %5408, %v8262_v52  }
 0x39f   : > { %v8304_v28 = vpop.permute.xlu0 %3127 }
 0x3a0   : > { %12202 = vst [vmem:[#allocation21_spill] sm:$0xff] %v8304_v28 }
 0x3a2   : > { %3109 = vperm.xlu0 %5408, %v8267_v0  }
 0x3a3   : > { %v8308_v54 = vpop.permute.xlu0 %3076 }
 0x3a4   : > { %12204 = vst [vmem:[#allocation23_spill] sm:$0xff] %v8308_v54 }
 0x3a6   : > { %3061 = vperm.xlu0 %5408, %v8272_v50  }
 0x3c4   : > { %v8312_v32 = vpop.xlane.xlu0 %2127 }
 0x3c5   : > { %2220 = vadd.xlane.f32.xlu0 %v2219_v37  ;;  %12206 = vst [vmem:[#allocation68_spill] sm:$0xff] %v8312_v32 }
 0x3c8   : > { %v8318_v39 = vpop.xlane.xlu0 %2133 }
 0x3c9   : > { %2214 = vadd.xlane.f32.xlu0 %v2213_v15  ;;  %12209 = vst [vmem:[#allocation27_spill] sm:$0xff] %v8318_v39  ;;  %v8342_v15 = vpop.xlane.xlu1 %1188 }
 0x3ca   : > { %12218 = vst [vmem:[#allocation162_spill] sm:$0xff] %v8342_v15 }
 0x3cc   : > { %v8332_v57 = vpop.xlane.xlu0 %2139 }
 0x3cd   : > { %12214 = vst [vmem:[#allocation37_spill] sm:$0xff] %v8332_v57 }
 0x3db   : > { %v8314_v1 = vpop.f32.mrf.mxu0 }
 0x3dc   : > { %12207 = vst [vmem:[#allocation25_spill] sm:$0xff] %v8314_v1  ;;  %v2679_v9 = vsel %vm619_vm2, %v8314_v1, -inf }
 0x3dd   : > { %v8322_v53 = vpop.f32.mrf.mxu0  ;;  %2680 = vmax.xlane.f32.xlu0 %v2679_v9  ;;  %v8344_v9 = vpop.xlane.xlu0 %2145 }
 0x3de   : > { %12210 = vst [vmem:[#allocation29_spill] sm:$0xff] %v8322_v53  ;;  %v2676_v41 = vsel %vm619_vm2, %v8322_v53, -inf  ;;  %12219 = vst [vmem:[#allocation163_spill] sm:$0xff] %v8344_v9 }
 0x3df   : > { %v8324_v60 = vpop.f32.mrf.mxu1 }
 0x3e0   : > { %12211 = vst [vmem:[#allocation31_spill] sm:$0xff] %v8324_v60  ;;  %v2685_v37 = vsel %vm619_vm2, %v8324_v60, -inf }
 0x3e1   : > { %v8328_v24 = vpop.f32.mrf.mxu1  ;;  %2677 = vmax.xlane.f32.xlu0 %v2676_v41  ;;  %v8358_v52 = vpop.xlane.xlu0 %2151 }
 0x3e2   : > { %12212 = vst [vmem:[#allocation33_spill] sm:$0xff] %v8328_v24  ;;  %v2682_v41 = vsel %vm619_vm2, %v8328_v24, -inf  ;;  %12224 = vst [vmem:[#allocation168_spill] sm:$0xff] %v8358_v52 }
 0x3e3   : > { %v8334_v55 = vpop.f32.mrf.mxu1 }
 0x3e4   : > { %12215 = vst [vmem:[#allocation45_spill] sm:$0xff] %v8334_v55  ;;  %v2691_v7 = vsel %vm619_vm2, %v8334_v55, -inf }
 0x3e5   : > { %v8338_v19 = vpop.f32.mrf.mxu1  ;;  %2686 = vmax.xlane.f32.xlu0 %v2685_v37  ;;  %v8356_v37 = vpop.xlane.xlu1 %1194 }
 0x3e6   : > { %12216 = vst [vmem:[#allocation43_spill] sm:$0xff] %v8338_v19  ;;  %12223 = vst [vmem:[#allocation167_spill] sm:$0xff] %v8356_v37  ;;  %v8373_v22 = vpop.xlane.xlu0 %2157 }
 0x3e7   : > { %v8340_v46 = vpop.f32.mrf.mxu1  ;;  %12227 = vst [vmem:[#allocation22_spill] sm:$0xff] %v8373_v22 }
 0x3e8   : > { %12217 = vst [vmem:[#allocation40_spill] sm:$0xff] %v8340_v46  ;;  %v2697_v52 = vsel %vm619_vm2, %v8340_v46, -inf }
 0x3e9   : > { %v8348_v50 = vpop.f32.mrf.mxu1  ;;  %2683 = vmax.xlane.f32.xlu0 %v2682_v41  ;;  %v2688_v41 = vsel %vm619_vm2, %v8338_v19, -inf  ;;  %v3095_v8 = vpop.permute.xlu1 %3094 }
 0x3ea   : > { %12220 = vst [vmem:[#allocation164_spill] sm:$0xff] %v8348_v50  ;;  %v8387_v37 = vpop.xlane.xlu0 %2163  ;;  %vm3167_vm6 = vcmp.eq.s32.totalorder %v12110_v33, %v3095_v8 }
 0x3eb   : > { %v8350_v0 = vpop.f32.mrf.mxu1  ;;  %v4978_v31 = vsel %vm3167_vm6, 1.0, %v12123_v2 }
 0x3ec   : > { %12221 = vst [vmem:[#allocation165_spill] sm:$0xff] %v8350_v0 }
 0x3ed   : > { %v8354_v29 = vpop.f32.mrf.mxu1  ;;  %2692 = vmax.xlane.f32.xlu0 %v2691_v7  ;;  %v12226_v7 = vld [vmem:[#allocation102_spill] sm:$0xff]  ;;  %v3092_v32 = vpop.permute.xlu1 %3091 }
 0x3ee   : > { %12222 = vst [vmem:[#allocation166_spill] sm:$0xff] %v8354_v29  ;;  %vm3171_vm10 = vcmp.eq.s32.totalorder %v12110_v33, %v12226_v7  ;;  %v2694_v7 = vsel %vm619_vm2, %v8348_v50, -inf  ;;  %12228 = vst [vmem:[#allocation102_spill] sm:$0xff] %v8387_v37  ;;  %v8398_v26 = vpop.xlane.xlu0 %2169  ;;  %vm3166_vm11 = vcmp.eq.s32.totalorder %v12110_v33, %v3092_v32 }
 0x3ef   : > { %v8360_v13 = vpop.f32.mrf.mxu1  ;;  %v4982_v57 = vsel %vm3171_vm10, 1.0, %v12123_v2  ;;  %12231 = vst [vmem:[#allocation171_spill] sm:$0xff] %v8398_v26  ;;  %v4977_v21 = vsel %vm3166_vm11, 1.0, %v12123_v2 }
 0x3f1   : > { %v8366_v5 = vpop.f32.mrf.mxu1  ;;  %2689 = vmax.xlane.f32.xlu0 %v2688_v41 }
 0x3f2   : > { %v8413_v37 = vpop.xlane.xlu0 %2175  ;;  %v2706_v8 = vsel %vm619_vm2, %v8366_v5, -inf }
 0x3f3   : > { %v8369_v11 = vpop.f32.mrf.mxu1  ;;  %12234 = vst [vmem:[#allocation174_spill] sm:$0xff] %v8413_v37 }
 0x3f4   : > { %v3265_v18 = vmul.f32 %v8369_v11, %v4980_v51  ;;  %v2715_v32 = vsel %vm619_vm2, %v8369_v11, -inf }
 0x3f5   : > { %v8378_v9 = vpop.f32.mrf.mxu1  ;;  %2698 = vmax.xlane.f32.xlu0 %v2697_v52  ;;  %v2703_v52 = vsel %vm619_vm2, %v8350_v0, -inf }
 0x3f6   : > { %v3323_v41 = vsel %vm619_vm2, %v3265_v18, 0.0 }
 0x3f7   : > { %v8382_v39 = vpop.f32.mrf.mxu1  ;;  %3324 = vadd.xlane.f32.xlu1 %v3323_v41  ;;  %v8396_v41 = vpop.permute.xlu1 %3088 }
 0x3f8   : > { %v3267_v22 = vmul.f32 %v8382_v39, %v4982_v57  ;;  %12230 = vst [vmem:[#allocation170_spill] sm:$0xff] %v8396_v41  ;;  %v2700_v57 = vsel %vm619_vm2, %v8354_v29, -inf  ;;  %v2721_v40 = vsel %vm619_vm2, %v8382_v39, -inf }
 0x3f9   : > { %2695 = vmax.xlane.f32.xlu0 %v2694_v7  ;;  %v8392_v18 = vpop.f32.mrf.mxu1 }
 0x3fa   : > { %v3329_v51 = vsel %vm619_vm2, %v3267_v22, 0.0  ;;  %v2718_v36 = vsel %vm619_vm2, %v8392_v18, -inf }
 0x3fb   : > { %3330 = vadd.xlane.f32.xlu1 %v3329_v51  ;;  %v8411_v26 = vpop.permute.xlu1 %3085 }
 0x3fc   : > { %12233 = vst [vmem:[#allocation173_spill] sm:$0xff] %v8411_v26 }
 0x3fd   : > { %2704 = vmax.xlane.f32.xlu0 %v2703_v52  ;;  %v2709_v52 = vsel %vm619_vm2, %v8360_v13, -inf }
 0x3ff   : > { %v8394_v15 = vpop.f32.mrf.mxu1 }
 0x400   : > { %12229 = vst [vmem:[#allocation169_spill] sm:$0xff] %v8394_v15  ;;  %v2727_v7 = vsel %vm619_vm2, %v8394_v15, -inf }
 0x401   : > { %v8404_v22 = vpop.f32.mrf.mxu1  ;;  %2701 = vmax.xlane.f32.xlu0 %v2700_v57  ;;  %2728 = vmax.xlane.f32.xlu1 %v2727_v7  ;;  %v3263_v7 = vmul.f32 %v8360_v13, %v4978_v31 }
 0x402   : > { %12232 = vst [vmem:[#allocation172_spill] sm:$0xff] %v8404_v22  ;;  %v2724_v51 = vsel %vm619_vm2, %v8404_v22, -inf }
 0x403   : > { %v3317_v48 = vsel %vm619_vm2, %v3263_v7, 0.0 }
 0x405   : > { %2725 = vmax.xlane.f32.xlu1 %v2724_v51  ;;  %2710 = vmax.xlane.f32.xlu0 %v2709_v52  ;;  %v8426_v51 = vpop.permute.xlu1 %3082  ;;  %v8428_v52 = vpop.xlane.xlu0 %2181 }
 0x406   : > { %12236 = vst [vmem:[#allocation176_spill] sm:$0xff] %v8426_v51  ;;  %12237 = vst [vmem:[#allocation177_spill] sm:$0xff] %v8428_v52 }
 0x407   : > { %v8416_v63 = vpop.f32.mrf.mxu1 }
 0x408   : > { %v2733_v57 = vsel %vm619_vm2, %v8416_v63, -inf }
 0x409   : > { %v8423_v27 = vpop.f32.mrf.mxu1  ;;  %2734 = vmax.xlane.f32.xlu1 %v2733_v57  ;;  %2707 = vmax.xlane.f32.xlu0 %v2706_v8  ;;  %v3262_v8 = vmul.f32 %v4977_v21, %v8366_v5  ;;  %v8443_v16 = vpop.permute.xlu1 %3079 }
 0x40a   : > { %12235 = vst [vmem:[#allocation175_spill] sm:$0xff] %v8423_v27  ;;  %v2730_v37 = vsel %vm619_vm2, %v8423_v27, -inf  ;;  %12238 = vst [vmem:[#allocation178_spill] sm:$0xff] %v8443_v16 }
 0x40b   : > { %v3314_v7 = vsel %vm619_vm2, %v3262_v8, 0.0  ;;  %v4979_v8 = vsel %vm3168_vm4, 1.0, %v12123_v2 }
 0x40d   : > { %2731 = vmax.xlane.f32.xlu1 %v2730_v37  ;;  %3318 = vadd.xlane.f32.xlu0 %v3317_v48  ;;  %v8445_v37 = vpop.xlane.xlu0 %2187  ;;  %v8454_v21 = vpop.permute.xlu1 %3124 }
 0x40e   : > { %12239 = vst [vmem:[#allocation179_spill] sm:$0xff] %v8445_v37  ;;  %12241 = vst [vmem:[#allocation96_spill] sm:$0xff] %v8454_v21  ;;  %v2712_v37 = vsel %vm619_vm2, %v8378_v9, -inf }
 0x40f   : > { %v8434_v31 = vpop.f32.mrf.mxu1 }
 0x410   : > { %v2739_v57 = vsel %vm619_vm2, %v8434_v31, -inf }
 0x411   : > { %v8441_v52 = vpop.f32.mrf.mxu1  ;;  %2740 = vmax.xlane.f32.xlu1 %v2739_v57  ;;  %2716 = vmax.xlane.f32.xlu0 %v2715_v32  ;;  %v8456_v57 = vpop.xlane.xlu0 %2193 }
 0x412   : > { %v2736_v48 = vsel %vm619_vm2, %v8441_v52, -inf  ;;  %12242 = vst [vmem:[#allocation180_spill] sm:$0xff] %v8456_v57  ;;  %v8470_v57 = vpop.permute.xlu1 %3121 }
 0x413   : > { %12243 = vst [vmem:[#allocation181_spill] sm:$0xff] %v8470_v57 }
 0x415   : > { %2737 = vmax.xlane.f32.xlu1 %v2736_v48  ;;  %3315 = vadd.xlane.f32.xlu0 %v3314_v7  ;;  %v3264_v7 = vmul.f32 %v4979_v8, %v8378_v9  ;;  %v8472_v17 = vpop.xlane.xlu0 %2199 }
 0x416   : > { %12244 = vst [vmem:[#allocation182_spill] sm:$0xff] %v8472_v17 }
 0x417   : > { %v8450_v49 = vpop.f32.mrf.mxu1  ;;  %v3320_v30 = vsel %vm619_vm2, %v3264_v7, 0.0 }
 0x418   : > { %v2745_v32 = vsel %vm619_vm2, %v8450_v49, -inf }
 0x419   : > { %v8462_v43 = vpop.f32.mrf.mxu1  ;;  %2746 = vmax.xlane.f32.xlu1 %v2745_v32  ;;  %2713 = vmax.xlane.f32.xlu0 %v2712_v37  ;;  %v12245_v32 = vld [vmem:[#allocation91_spill] sm:$0xff]  ;;  %v8488_v17 = vpop.xlane.xlu0 %2205 }
 0x41a   : > { %v2742_v48 = vsel %vm619_vm2, %v8462_v43, -inf  ;;  %vm3170_vm3 = vcmp.eq.s32.totalorder %v12110_v33, %v12245_v32 }
 0x41b   : > { %v4981_v8 = vsel %vm3170_vm3, 1.0, %v12123_v2 }
 0x41c   : > { %v3266_v7 = vmul.f32 %v4981_v8, %v8392_v18  ;;  %v4993_v8 = vsel %vm3182_vm1, 1.0, %v12123_v2 }
 0x41d   : > { %2743 = vmax.xlane.f32.xlu1 %v2742_v48  ;;  %2722 = vmax.xlane.f32.xlu0 %v2721_v40  ;;  %v12246_v48 = vld [vmem:[#allocation24_spill] sm:$0xff]  ;;  %v8486_v40 = vpop.permute.xlu1 %3073 }
 0x41e   : > { %vm3183_vm7 = vcmp.eq.s32.totalorder %v12110_v33, %v12246_v48  ;;  %12247 = vst [vmem:[#allocation91_spill] sm:$0xff] %v8486_v40  ;;  %12248 = vst [vmem:[#allocation24_spill] sm:$0xff] %v8488_v17  ;;  %v3326_v14 = vsel %vm619_vm2, %v3266_v7, 0.0  ;;  %v12251_v7 = vld [vmem:[#allocation93_spill] sm:$0xff] }
 0x41f   : > { %v8474_v62 = vpop.f32.mrf.mxu1  ;;  %vm3184_vm5 = vcmp.eq.s32.totalorder %v12110_v33, %v12251_v7 }
 0x420   : > { %v2751_v37 = vsel %vm619_vm2, %v8474_v62, -inf }
 0x421   : > { %v8481_v45 = vpop.f32.mrf.mxu1  ;;  %2752 = vmax.xlane.f32.xlu1 %v2751_v37  ;;  %3321 = vadd.xlane.f32.xlu0 %v3320_v30  ;;  %v4994_v30 = vsel %vm3183_vm7, 1.0, %v12123_v2  ;;  %v8500_v48 = vpop.xlane.xlu1 %2130 }
 0x422   : > { %v2748_v32 = vsel %vm619_vm2, %v8481_v45, -inf  ;;  %12249 = vst [vmem:[#allocation183_spill] sm:$0xff] %v8500_v48 }
 0x425   : > { %2749 = vmax.xlane.f32.xlu1 %v2748_v32  ;;  %2719 = vmax.xlane.f32.xlu0 %v2718_v36  ;;  %v8508_v36 = vpop.xlane.xlu0 %2211 }
 0x426   : > { %12250 = vst [vmem:[#allocation184_spill] sm:$0xff] %v8508_v36  ;;  %v12254_v36 = vld [vmem:[#allocation82_spill] sm:$0xff] }
 0x427   : > { %v8496_v37 = vpop.f32.mrf.mxu1  ;;  %vm3185_vm13 = vcmp.eq.s32.totalorder %v12110_v33, %v12254_v36 }
 0x428   : > { %v2757_v17 = vsel %vm619_vm2, %v8496_v37, -inf  ;;  %v3279_v23 = vmul.f32 %v8496_v37, %v4994_v30  ;;  %v8517_v30 = vpop.xlane.xlu1 %2136  ;;  %v4996_v7 = vsel %vm3185_vm13, 1.0, %v12123_v2 }
 0x429   : > { %v8506_v6 = vpop.f32.mrf.mxu1  ;;  %2758 = vmax.xlane.f32.xlu1 %v2757_v17  ;;  %3327 = vadd.xlane.f32.xlu0 %v3326_v14  ;;  %12252 = vst [vmem:[#allocation93_spill] sm:$0xff] %v8517_v30  ;;  %v8519_v17 = vpop.permute.xlu0 %3118 }
 0x42a   : > { %v2754_v20 = vsel %vm619_vm2, %v8506_v6, -inf  ;;  %v3365_v32 = vsel %vm619_vm2, %v3279_v23, 0.0  ;;  %v3278_v48 = vmul.f32 %v4993_v8, %v8506_v6  ;;  %12253 = vst [vmem:[#allocation185_spill] sm:$0xff] %v8519_v17  ;;  %v4995_v8 = vsel %vm3184_vm5, 1.0, %v12123_v2 }
 0x42c   : > { %v3362_v23 = vsel %vm619_vm2, %v3278_v48, 0.0  ;;  %v8533_v30 = vpop.xlane.xlu1 %2142 }
 0x42d   : > { %2755 = vmax.xlane.f32.xlu1 %v2754_v20  ;;  %3366 = vadd.xlane.f32.xlu0 %v3365_v32  ;;  %12255 = vst [vmem:[#allocation82_spill] sm:$0xff] %v8533_v30  ;;  %v8535_v58 = vpop.permute.xlu0 %3070 }
 0x42e   : > { %12256 = vst [vmem:[#allocation186_spill] sm:$0xff] %v8535_v58 }
 0x42f   : > { %v8521_v14 = vpop.f32.mrf.mxu1 }
 0x430   : > { %v2763_v38 = vsel %vm619_vm2, %v8521_v14, -inf  ;;  %v3281_v48 = vmul.f32 %v8521_v14, %v4996_v7  ;;  %v8549_v59 = vpop.xlane.xlu1 %2148  ;;  %v12260_v7 = vld [vmem:[#allocation39_spill] sm:$0xff] }
 0x431   : > { %v8529_v20 = vpop.f32.mrf.mxu1  ;;  %2764 = vmax.xlane.f32.xlu1 %v2763_v38  ;;  %3363 = vadd.xlane.f32.xlu0 %v3362_v23  ;;  %12258 = vst [vmem:[#allocation72_spill] sm:$0xff] %v8549_v59  ;;  %v8551_v56 = vpop.permute.xlu0 %3115  ;;  %vm3187_vm8 = vcmp.eq.s32.totalorder %v12110_v33, %v12260_v7 }
 0x432   : > { %v3280_v32 = vmul.f32 %v4995_v8, %v8529_v20  ;;  %v2760_v36 = vsel %vm619_vm2, %v8529_v20, -inf  ;;  %v3371_v23 = vsel %vm619_vm2, %v3281_v48, 0.0  ;;  %v4997_v8 = vsel %vm3186_vm14, 1.0, %v12123_v2  ;;  %12259 = vst [vmem:[#allocation187_spill] sm:$0xff] %v8551_v56 }
 0x434   : > { %v3368_v61 = vsel %vm619_vm2, %v3280_v32, 0.0  ;;  %v8560_v48 = vpop.xlane.xlu1 %2154 }
 0x435   : > { %2761 = vmax.xlane.f32.xlu1 %v2760_v36  ;;  %3369 = vadd.xlane.f32.xlu0 %v3368_v61  ;;  %v4998_v36 = vsel %vm3187_vm8, 1.0, %v12123_v2  ;;  %12261 = vst [vmem:[#allocation39_spill] sm:$0xff] %v8560_v48 }
 0x437   : > { %v8543_v38 = vpop.f32.mrf.mxu1 }
 0x438   : > { %v2769_v10 = vsel %vm619_vm2, %v8543_v38, -inf  ;;  %v8568_v35 = vpop.xlane.xlu1 %2160 }
 0x439   : > { %v8547_v30 = vpop.f32.mrf.mxu1  ;;  %3372 = vadd.xlane.f32.xlu1 %v3371_v23  ;;  %v8562_v23 = vpop.permute.xlu0 %3067  ;;  %12263 = vst [vmem:[#allocation189_spill] sm:$0xff] %v8568_v35 }
 0x43a   : > { %v3282_v32 = vmul.f32 %v4997_v8, %v8547_v30  ;;  %12262 = vst [vmem:[#allocation188_spill] sm:$0xff] %v8562_v23  ;;  %v2766_v59 = vsel %vm619_vm2, %v8547_v30, -inf  ;;  %v3283_v8 = vmul.f32 %v8543_v38, %v4998_v36 }
 0x43c   : > { %v3374_v61 = vsel %vm619_vm2, %v3282_v32, 0.0  ;;  %v3377_v7 = vsel %vm619_vm2, %v3283_v8, 0.0 }
 0x43d   : > { %2770 = vmax.xlane.f32.xlu1 %v2769_v10  ;;  %3375 = vadd.xlane.f32.xlu0 %v3374_v61  ;;  %v8570_v32 = vpop.permute.xlu0 %3112  ;;  %v8572_v10 = vpop.xlane.xlu1 %2166 }
 0x43e   : > { %12264 = vst [vmem:[#allocation190_spill] sm:$0xff] %v8570_v32  ;;  %12265 = vst [vmem:[#allocation191_spill] sm:$0xff] %v8572_v10 }
 0x441   : > { %2767 = vmax.xlane.f32.xlu1 %v2766_v59  ;;  %v8574_v61 = vpop.permute.xlu0 %3064  ;;  %v8576_v48 = vpop.xlane.xlu1 %2172 }
 0x442   : > { %12266 = vst [vmem:[#allocation192_spill] sm:$0xff] %v8574_v61  ;;  %12267 = vst [vmem:[#allocation193_spill] sm:$0xff] %v8576_v48 }
 0x445   : > { %3378 = vadd.xlane.f32.xlu1 %v3377_v7  ;;  %v8578_v3 = vpop.permute.xlu0 %3109  ;;  %v8580_v47 = vpop.xlane.xlu1 %2178 }
 0x446   : > { %12268 = vst [vmem:[#allocation194_spill] sm:$0xff] %v8578_v3  ;;  %12269 = vst [vmem:[#allocation195_spill] sm:$0xff] %v8580_v47 }
 0x449   : > { %v8582_v34 = vpop.permute.xlu0 %3061  ;;  %v8586_v36 = vpop.xlane.xlu1 %2184 }
 0x44a   : > { %12270 = vst [vmem:[#allocation196_spill] sm:$0xff] %v8582_v34  ;;  %12272 = vst [vmem:[#allocation198_spill] sm:$0xff] %v8586_v36 }
 0x44d   : > { %v8590_v7 = vpop.xlane.xlu1 %2190 }
 0x44e   : > { %v8584_v59 = vpop.xlane.xlu0 %2220  ;;  %12274 = vst [vmem:[#allocation200_spill] sm:$0xff] %v8590_v7 }
 0x44f   : > { %12271 = vst [vmem:[#allocation197_spill] sm:$0xff] %v8584_v59 }
 0x451   : > { %v8602_v59 = vpop.xlane.xlu1 %2196 }
 0x452   : > { %v8588_v8 = vpop.xlane.xlu0 %2214  ;;  %12276 = vst [vmem:[#allocation202_spill] sm:$0xff] %v8602_v59 }
 0x453   : > { %12273 = vst [vmem:[#allocation199_spill] sm:$0xff] %v8588_v8 }
 0x466   : > { %v8592_v35 = vpop.xlane.xlu0 %2680 }
 0x467   : > { %12275 = vst [vmem:[#allocation201_spill] sm:$0xff] %v8592_v35  ;;  %v2773_v10 = vsub.f32 %v8314_v1, %v8592_v35  ;;  %vm3413_vm15 = vcmp.eq.f32.partialorder %v8314_v1, %v8592_v35 }
 0x468   : > { %v3445_v47 = vsel %vm3413_vm15, %v12110_v33, 16 }
 0x469   : > { %v2806_v48 = vmul.f32 1.442695, %v2773_v10  ;;  %v8600_v4 = vsel %vm619_vm2, %v3445_v47, 2147483647 }
 0x46a   : > { %v8604_v36 = vpop.xlane.xlu0 %2677  ;;  %v3493_v8 = vshra.s32 %v8600_v4, 16 }
 0x46b   : > { %12277 = vst [vmem:[#allocation203_spill] sm:$0xff] %v8604_v36  ;;  %5617 = vpow2.f32 %v2806_v48  ;;  %vm3412_vm12 = vcmp.eq.f32.partialorder %v8322_v53, %v8604_v36  ;;  %v8623_v48 = vpop.xlane.xlu1 %2202 }
 0x46c   : > { %v8609_v7 = vcvt.s32.f32 %v3493_v8  ;;  %v3444_v35 = vsel %vm3412_vm12, %v12110_v33, 16  ;;  %12279 = vst [vmem:[#allocation205_spill] sm:$0xff] %v8623_v48 }
 0x46d   : > { %v8613_v25 = vsel %vm619_vm2, %v3444_v35, 2147483647 }
 0x46e   : > { %3496 = vmin.xlane.f32.xlu0 %v8609_v7  ;;  %v8616_v47 = vpop.xlane.xlu0 %2686  ;;  %v3478_v10 = vshra.s32 %v8613_v25, 16 }
 0x46f   : > { %12278 = vst [vmem:[#allocation204_spill] sm:$0xff] %v8616_v47  ;;  %v2775_v59 = vsub.f32 %v8324_v60, %v8616_v47  ;;  %vm3415_vm0 = vcmp.eq.f32.partialorder %v8324_v60, %v8616_v47  ;;  %v8645_v60 = vpop.xlane.xlu1 %2208 }
 0x470   : > { %v8625_v8 = vcvt.s32.f32 %v3478_v10  ;;  %v3447_v1 = vsel %vm3415_vm0, %v12110_v33, 16  ;;  %12281 = vst [vmem:[#allocation207_spill] sm:$0xff] %v8645_v60 }
 0x471   : > { %v2810_v35 = vmul.f32 1.442695, %v2775_v59  ;;  %v8629_v34 = vsel %vm619_vm2, %v3447_v1, 2147483647 }
 0x472   : > { %3481 = vmin.xlane.f32.xlu0 %v8625_v8  ;;  %v8632_v61 = vpop.xlane.xlu0 %2683  ;;  %v3523_v32 = vshra.s32 %v8629_v34, 16 }
 0x473   : > { %12280 = vst [vmem:[#allocation206_spill] sm:$0xff] %v8632_v61  ;;  %5619 = vpow2.f32 %v2810_v35  ;;  %v2774_v47 = vsub.f32 %v8328_v24, %v8632_v61  ;;  %vm3414_vm9 = vcmp.eq.f32.partialorder %v8328_v24, %v8632_v61 }
 0x474   : > { %v8639_v10 = vcvt.s32.f32 %v3523_v32  ;;  %v3446_v59 = vsel %vm3414_vm9, %v12110_v33, 16 }
 0x475   : > { %v2808_v48 = vmul.f32 1.442695, %v2774_v47  ;;  %v8643_v1 = vsel %vm619_vm2, %v3446_v59, 2147483647 }
 0x476   : > { %3526 = vmin.xlane.f32.xlu0 %v8639_v10  ;;  %v8648_v3 = vpop.xlane.xlu0 %2692  ;;  %v3508_v35 = vshra.s32 %v8643_v1, 16 }
 0x477   : > { %12282 = vst [vmem:[#allocation208_spill] sm:$0xff] %v8648_v3  ;;  %5621 = vpow2.f32 %v2808_v48  ;;  %v2777_v61 = vsub.f32 %v8334_v55, %v8648_v3  ;;  %vm3417_vm10 = vcmp.eq.f32.partialorder %v8334_v55, %v8648_v3 }
 0x478   : > { %v5618_v32 = vpop.eup %5617  ;;  %v8655_v47 = vcvt.s32.f32 %v3508_v35  ;;  %v3449_v59 = vsel %vm3417_vm10, %v12110_v33, 16  ;;  %v8668_v35 = vpop.xlane.xlu1 %2217 }
 0x479   : > { %v2814_v24 = vmul.f32 1.442695, %v2777_v61  ;;  %v2871_v60 = vsel %vm619_vm2, %v5618_v32, 0.0  ;;  %v8660_v23 = vsel %vm619_vm2, %v3449_v59, 2147483647  ;;  %12284 = vst [vmem:[#allocation210_spill] sm:$0xff] %v8668_v35 }
 0x47a   : > { %2872 = vadd.xlane.f32.xlu1 %v2871_v60  ;;  %3511 = vmin.xlane.f32.xlu0 %v8655_v47  ;;  %v8663_v48 = vpop.xlane.xlu0 %2689  ;;  %v3553_v56 = vshra.s32 %v8660_v23, 16 }
 0x47b   : > { %12283 = vst [vmem:[#allocation209_spill] sm:$0xff] %v8663_v48  ;;  %5623 = vpow2.f32 %v2814_v24  ;;  %vm3416_vm6 = vcmp.eq.f32.partialorder %v8338_v19, %v8663_v48 }
 0x47c   : > { %v8670_v3 = vcvt.s32.f32 %v3553_v56  ;;  %v3448_v61 = vsel %vm3416_vm6, %v12110_v33, 16 }
 0x47d   : > { %v8674_v32 = vsel %vm619_vm2, %v3448_v61, 2147483647 }
 0x47e   : > { %3556 = vmin.xlane.f32.xlu0 %v8670_v3  ;;  %v8677_v60 = vpop.xlane.xlu0 %2698  ;;  %v3538_v59 = vshra.s32 %v8674_v32, 16 }
 0x47f   : > { %12285 = vst [vmem:[#allocation211_spill] sm:$0xff] %v8677_v60  ;;  %v2779_v24 = vsub.f32 %v8340_v46, %v8677_v60  ;;  %vm3419_vm11 = vcmp.eq.f32.partialorder %v8340_v46, %v8677_v60 }
 0x480   : > { %v5620_v35 = vpop.eup %5619  ;;  %v8684_v56 = vpop.xlane.xlu1 %3324  ;;  %v8686_v58 = vcvt.s32.f32 %v3538_v59  ;;  %v3451_v61 = vsel %vm3419_vm11, %v12110_v33, 16 }
 0x481   : > { %12286 = vst [vmem:[#allocation212_spill] sm:$0xff] %v8684_v56  ;;  %v2818_v55 = vmul.f32 1.442695, %v2779_v24  ;;  %v2877_v40 = vsel %vm619_vm2, %v5620_v35, 0.0  ;;  %v8691_v17 = vsel %vm619_vm2, %v3451_v61, 2147483647 }
 0x482   : > { %2878 = vadd.xlane.f32.xlu1 %v2877_v40  ;;  %3541 = vmin.xlane.f32.xlu0 %v8686_v58  ;;  %v8694_v57 = vpop.xlane.xlu0 %2695  ;;  %v3583_v60 = vshra.s32 %v8691_v17, 16 }
 0x483   : > { %12287 = vst [vmem:[#allocation213_spill] sm:$0xff] %v8694_v57  ;;  %5625 = vpow2.f32 %v2818_v55  ;;  %vm3418_vm4 = vcmp.eq.f32.partialorder %v8348_v50, %v8694_v57 }
 0x484   : > { %v5622_v59 = vpop.eup %5621  ;;  %v8699_v56 = vcvt.s32.f32 %v3583_v60  ;;  %v3450_v24 = vsel %vm3418_vm4, %v12110_v33, 16  ;;  %v8706_v40 = vpop.xlane.xlu1 %3330  ;;  %v2776_v60 = vsub.f32 %v8338_v19, %v8663_v48 }
 0x485   : > { %v2874_v35 = vsel %vm619_vm2, %v5622_v59, 0.0  ;;  %v8704_v61 = vsel %vm619_vm2, %v3450_v24, 2147483647  ;;  %12288 = vst [vmem:[#allocation214_spill] sm:$0xff] %v8706_v40 }
 0x486   : > { %2875 = vadd.xlane.f32.xlu1 %v2874_v35  ;;  %3586 = vmin.xlane.f32.xlu0 %v8699_v56  ;;  %v8709_v54 = vpop.xlane.xlu0 %2704  ;;  %v3568_v55 = vshra.s32 %v8704_v61, 16  ;;  %v2812_v19 = vmul.f32 1.442695, %v2776_v60 }
 0x487   : > { %12289 = vst [vmem:[#allocation215_spill] sm:$0xff] %v8709_v54  ;;  %v2781_v46 = vsub.f32 %v8350_v0, %v8709_v54  ;;  %vm3421_vm3 = vcmp.eq.f32.partialorder %v8350_v0, %v8709_v54 }
 0x488   : > { %v5624_v59 = vpop.eup %5623  ;;  %v8718_v24 = vcvt.s32.f32 %v3568_v55  ;;  %v3453_v35 = vsel %vm3421_vm3, %v12110_v33, 16 }
 0x489   : > { %v2822_v40 = vmul.f32 1.442695, %v2781_v46  ;;  %v2883_v21 = vsel %vm619_vm2, %v5624_v59, 0.0  ;;  %v8723_v16 = vsel %vm619_vm2, %v3453_v35, 2147483647 }
 0x48a   : > { %v8725_v51 = vpop.xlane.xlu1 %2728  ;;  %2884 = vadd.xlane.f32.xlu1 %v2883_v21  ;;  %3571 = vmin.xlane.f32.xlu0 %v8718_v24  ;;  %v8728_v48 = vpop.xlane.xlu0 %2701  ;;  %v3613_v54 = vshra.s32 %v8723_v16, 16 }
 0x48b   : > { %12290 = vst [vmem:[#allocation216_spill] sm:$0xff] %v8725_v51  ;;  %12291 = vst [vmem:[#allocation217_spill] sm:$0xff] %v8728_v48  ;;  %5627 = vpow2.f32 %v2822_v40  ;;  %v2780_v55 = vsub.f32 %v8354_v29, %v8728_v48  ;;  %vm3420_vm7 = vcmp.eq.f32.partialorder %v8354_v29, %v8728_v48  ;;  %vm3429_vm5 = vcmp.eq.f32.partialorder %v8394_v15, %v8725_v51 }
 0x48c   : > { %v8735_v46 = vcvt.s32.f32 %v3613_v54  ;;  %v3452_v35 = vsel %vm3420_vm7, %v12110_v33, 16  ;;  %5629 = vpow2.f32 %v2812_v19  ;;  %v3461_v42 = vsel %vm3429_vm5, %v12110_v33, 16 }
 0x48d   : > { %v2820_v59 = vmul.f32 1.442695, %v2780_v55  ;;  %v8744_v60 = vsel %vm619_vm2, %v3452_v35, 2147483647 }
 0x48e   : > { %v8738_v21 = vpop.xlane.xlu1 %2725  ;;  %3616 = vmin.xlane.f32.xlu0 %v8735_v46  ;;  %v8741_v28 = vpop.xlane.xlu0 %2710  ;;  %v3598_v54 = vshra.s32 %v8744_v60, 16 }
 0x48f   : > { %12292 = vst [vmem:[#allocation218_spill] sm:$0xff] %v8738_v21  ;;  %12293 = vst [vmem:[#allocation219_spill] sm:$0xff] %v8741_v28  ;;  %v2783_v40 = vsub.f32 %v8360_v13, %v8741_v28  ;;  %5631 = vpow2.f32 %v2820_v59  ;;  %vm3423_vm1 = vcmp.eq.f32.partialorder %v8360_v13, %v8741_v28  ;;  %vm3428_vm14 = vcmp.eq.f32.partialorder %v8404_v22, %v8738_v21 }
 0x490   : > { %v5626_v0 = vpop.eup %5625  ;;  %v3455_v48 = vsel %vm3423_vm1, %v12110_v33, 16  ;;  %v8755_v35 = vcvt.s32.f32 %v3598_v54 }
 0x491   : > { %v2889_v55 = vsel %vm619_vm2, %v5626_v0, 0.0  ;;  %v2826_v29 = vmul.f32 1.442695, %v2783_v40  ;;  %v8760_v12 = vsel %vm619_vm2, %v3455_v48, 2147483647  ;;  %v2778_v0 = vsub.f32 %v8348_v50, %v8694_v57 }
 0x492   : > { %v8753_v26 = vpop.xlane.xlu1 %2734  ;;  %2890 = vadd.xlane.f32.xlu1 %v2889_v55  ;;  %12295 = vst [vmem:[#allocation221_spill] sm:$0xff] %v8755_v35  ;;  %v8757_v19 = vpop.xlane.xlu0 %2707  ;;  %12297 = vst [vmem:[#allocation223_spill] sm:$0xff] %v8760_v12  ;;  %3601 = vmin.xlane.f32.xlu0 %v8755_v35  ;;  %v3643_v13 = vshra.s32 %v8760_v12, 16 }
 0x493   : > { %12294 = vst [vmem:[#allocation220_spill] sm:$0xff] %v8753_v26  ;;  %12296 = vst [vmem:[#allocation222_spill] sm:$0xff] %v8757_v19  ;;  %vm3422_vm13 = vcmp.eq.f32.partialorder %v8366_v5, %v8757_v19  ;;  %5633 = vpow2.f32 %v2826_v29  ;;  %v2782_v48 = vsub.f32 %v8366_v5, %v8757_v19  ;;  %v2816_v29 = vmul.f32 1.442695, %v2778_v0 }
 0x494   : > { %v3454_v59 = vsel %vm3422_vm13, %v12110_v33, 16  ;;  %v8775_v54 = vcvt.s32.f32 %v3643_v13  ;;  %vm3431_vm15 = vcmp.eq.f32.partialorder %v8416_v63, %v8753_v26 }
 0x495   : > { %v8780_v28 = vsel %vm619_vm2, %v3454_v59, 2147483647  ;;  %v2824_v19 = vmul.f32 1.442695, %v2782_v48  ;;  %v8793_v59 = vsel %vm619_vm2, %v3461_v42, 2147483647  ;;  %5635 = vpow2.f32 %v2816_v29 }
 0x496   : > { %v8773_v40 = vpop.xlane.xlu1 %2731  ;;  %12299 = vst [vmem:[#allocation225_spill] sm:$0xff] %v8775_v54  ;;  %v8777_v55 = vpop.xlane.xlu0 %3318  ;;  %12301 = vst [vmem:[#allocation227_spill] sm:$0xff] %v8780_v28  ;;  %v3628_v41 = vshra.s32 %v8780_v28, 16  ;;  %3646 = vmin.xlane.f32.xlu0 %v8775_v54 }
 0x497   : > { %12298 = vst [vmem:[#allocation224_spill] sm:$0xff] %v8773_v40  ;;  %12300 = vst [vmem:[#allocation226_spill] sm:$0xff] %v8777_v55  ;;  %5637 = vpow2.f32 %v2824_v19  ;;  %v3460_v19 = vsel %vm3428_vm14, %v12110_v33, 16  ;;  %vm3430_vm9 = vcmp.eq.f32.partialorder %v8423_v27, %v8773_v40 }
 0x498   : > { %v5628_v57 = vpop.eup %5627  ;;  %v8786_v5 = vcvt.s32.f32 %v3628_v41  ;;  %12305 = vst [vmem:[#allocation231_spill] sm:$0xff] %v8793_v59 }
 0x499   : > { %v2895_v50 = vsel %vm619_vm2, %v5628_v57, 0.0  ;;  %v5630_v2 = vpop.eup %5629  ;;  %v3733_v57 = vshra.s32 %v8793_v59, 16 }
 0x49a   : > { %12302 = vst [vmem:[#allocation228_spill] sm:$0xff] %v8786_v5  ;;  %v8788_v13 = vpop.xlane.xlu1 %2740  ;;  %2896 = vadd.xlane.f32.xlu1 %v2895_v50  ;;  %v8790_v55 = vpop.xlane.xlu0 %2716  ;;  %3631 = vmin.xlane.f32.xlu0 %v8786_v5  ;;  %v2880_v29 = vsel %vm619_vm2, %v5630_v2, 0.0 }
 0x49b   : > { %12303 = vst [vmem:[#allocation229_spill] sm:$0xff] %v8788_v13  ;;  %12304 = vst [vmem:[#allocation230_spill] sm:$0xff] %v8790_v55  ;;  %vm3425_vm8 = vcmp.eq.f32.partialorder %v8369_v11, %v8790_v55  ;;  %v2785_v42 = vsub.f32 %v8369_v11, %v8790_v55  ;;  %v8818_v11 = vcvt.s32.f32 %v3733_v57  ;;  %vm3433_vm6 = vcmp.eq.f32.partialorder %v8434_v31, %v8788_v13 }
 0x49c   : > { %v5632_v41 = vpop.eup %5631  ;;  %v3457_v50 = vsel %vm3425_vm8, %v12110_v33, 16 }
 0x49d   : > { %v2892_v48 = vsel %vm619_vm2, %v5632_v41, 0.0  ;;  %v8810_v53 = vsel %vm619_vm2, %v3457_v50, 2147483647  ;;  %12309 = vst [vmem:[#allocation235_spill] sm:$0xff] %v8818_v11  ;;  %v2830_v41 = vmul.f32 1.442695, %v2785_v42 }
 0x49e   : > { %v8804_v0 = vpop.xlane.xlu1 %2737  ;;  %v8807_v44 = vpop.xlane.xlu0 %3315  ;;  %12308 = vst [vmem:[#allocation234_spill] sm:$0xff] %v8810_v53  ;;  %2893 = vadd.xlane.f32.xlu1 %v2892_v48  ;;  %v3673_v36 = vshra.s32 %v8810_v53, 16  ;;  %2881 = vadd.xlane.f32.xlu0 %v2880_v29  ;;  %v8827_v48 = vsel %vm619_vm2, %v3460_v19, 2147483647 }
 0x49f   : > { %12306 = vst [vmem:[#allocation232_spill] sm:$0xff] %v8804_v0  ;;  %12307 = vst [vmem:[#allocation233_spill] sm:$0xff] %v8807_v44  ;;  %v2792_v59 = vsub.f32 %v8441_v52, %v8804_v0  ;;  %5639 = vpow2.f32 %v2830_v41  ;;  %vm3432_vm11 = vcmp.eq.f32.partialorder %v8441_v52, %v8804_v0 }
 0x4a0   : > { %v8820_v55 = vcvt.s32.f32 %v3673_v36  ;;  %12313 = vst [vmem:[#allocation239_spill] sm:$0xff] %v8827_v48  ;;  %v5634_v2 = vpop.eup %5633  ;;  %v3718_v36 = vshra.s32 %v8827_v48, 16  ;;  %v3463_v48 = vsel %vm3431_vm15, %v12110_v33, 16 }
 0x4a1   : > { %v2901_v19 = vsel %vm619_vm2, %v5634_v2, 0.0 }
 0x4a2   : > { %12310 = vst [vmem:[#allocation236_spill] sm:$0xff] %v8820_v55  ;;  %v8822_v44 = vpop.xlane.xlu1 %2746  ;;  %v8824_v50 = vpop.xlane.xlu0 %2713  ;;  %3736 = vmin.xlane.f32.xlu1 %v8818_v11  ;;  %3676 = vmin.xlane.f32.xlu0 %v8820_v55  ;;  %v2844_v55 = vmul.f32 1.442695, %v2792_v59  ;;  %v8855_v41 = vcvt.s32.f32 %v3718_v36 }
 0x4a3   : > { %12311 = vst [vmem:[#allocation237_spill] sm:$0xff] %v8822_v44  ;;  %12312 = vst [vmem:[#allocation238_spill] sm:$0xff] %v8824_v50  ;;  %vm3424_vm12 = vcmp.eq.f32.partialorder %v8378_v9, %v8824_v50  ;;  %v2784_v42 = vsub.f32 %v8378_v9, %v8824_v50  ;;  %v2795_v5 = vsub.f32 %v8450_v49, %v8822_v44  ;;  %v5636_v50 = vpop.eup %5635 }
 0x4a4   : > { %v3456_v57 = vsel %vm3424_vm12, %v12110_v33, 16  ;;  %12317 = vst [vmem:[#allocation243_spill] sm:$0xff] %v8855_v41  ;;  %v5638_v12 = vpop.eup %5637  ;;  %5641 = vpow2.f32 %v2844_v55  ;;  %vm3435_vm4 = vcmp.eq.f32.partialorder %v8450_v49, %v8822_v44 }
 0x4a5   : > { %v8847_v53 = vsel %vm619_vm2, %v3456_v57, 2147483647  ;;  %v2828_v28 = vmul.f32 1.442695, %v2784_v42  ;;  %v2850_v35 = vmul.f32 1.442695, %v2795_v5 }
 0x4a6   : > { %v8841_v29 = vpop.xlane.xlu1 %2743  ;;  %v8844_v11 = vpop.xlane.xlu0 %2722  ;;  %12316 = vst [vmem:[#allocation242_spill] sm:$0xff] %v8847_v53  ;;  %2902 = vadd.xlane.f32.xlu1 %v2901_v19  ;;  %v3658_v9 = vshra.s32 %v8847_v53, 16  ;;  %v8865_v19 = vsel %vm619_vm2, %v3463_v48, 2147483647  ;;  %v2886_v42 = vsel %vm619_vm2, %v5636_v50, 0.0  ;;  %v3462_v50 = vsel %vm3430_vm9, %v12110_v33, 16 }
 0x4a7   : > { %12314 = vst [vmem:[#allocation240_spill] sm:$0xff] %v8841_v29  ;;  %12315 = vst [vmem:[#allocation241_spill] sm:$0xff] %v8844_v11  ;;  %vm3427_vm0 = vcmp.eq.f32.partialorder %v8382_v39, %v8844_v11  ;;  %v2794_v36 = vsub.f32 %v8462_v43, %v8841_v29  ;;  %v3763_v48 = vshra.s32 %v8865_v19, 16  ;;  %5643 = vpow2.f32 %v2828_v28 }
 0x4a8   : > { %v3459_v2 = vsel %vm3427_vm0, %v12110_v33, 16  ;;  %v8860_v59 = vcvt.s32.f32 %v3658_v9  ;;  %12321 = vst [vmem:[#allocation247_spill] sm:$0xff] %v8865_v19  ;;  %v2787_v55 = vsub.f32 %v8382_v39, %v8844_v11  ;;  %v2898_v9 = vsel %vm619_vm2, %v5638_v12, 0.0 }
 0x4a9   : > { %v8871_v53 = vsel %vm619_vm2, %v3459_v2, 2147483647  ;;  %5645 = vpow2.f32 %v2850_v35  ;;  %v8891_v28 = vcvt.s32.f32 %v3763_v48  ;;  %vm3434_vm3 = vcmp.eq.f32.partialorder %v8462_v43, %v8841_v29 }
 0x4aa   : > { %v8858_v57 = vpop.xlane.xlu1 %2752  ;;  %12319 = vst [vmem:[#allocation245_spill] sm:$0xff] %v8860_v59  ;;  %v8862_v54 = vpop.xlane.xlu0 %3321  ;;  %3721 = vmin.xlane.f32.xlu1 %v8855_v41  ;;  %3661 = vmin.xlane.f32.xlu0 %v8860_v59  ;;  %v3703_v2 = vshra.s32 %v8871_v53, 16  ;;  %v2848_v41 = vmul.f32 1.442695, %v2794_v36  ;;  %v2834_v39 = vmul.f32 1.442695, %v2787_v55 }
 0x4ab   : > { %12318 = vst [vmem:[#allocation244_spill] sm:$0xff] %v8858_v57  ;;  %12320 = vst [vmem:[#allocation246_spill] sm:$0xff] %v8862_v54  ;;  %v2797_v59 = vsub.f32 %v8474_v62, %v8858_v57  ;;  %v8902_v36 = vsel %vm619_vm2, %v3462_v50, 2147483647  ;;  %vm3437_vm7 = vcmp.eq.f32.partialorder %v8474_v62, %v8858_v57 }
 0x4ac   : > { %12324 = vst [vmem:[#allocation250_spill] sm:$0xff] %v8891_v28  ;;  %v8896_v19 = vcvt.s32.f32 %v3703_v2  ;;  %12328 = vst [vmem:[#allocation254_spill] sm:$0xff] %v8902_v36  ;;  %5647 = vpow2.f32 %v2848_v41  ;;  %v3748_v50 = vshra.s32 %v8902_v36, 16 }
 0x4ad   : > { %5649 = vpow2.f32 %v2834_v39 }
 0x4ae   : > { %v8880_v5 = vpop.xlane.xlu1 %2749  ;;  %v8883_v54 = vpop.xlane.xlu0 %2719  ;;  %2899 = vadd.xlane.f32.xlu1 %v2898_v9  ;;  %2887 = vadd.xlane.f32.xlu0 %v2886_v42  ;;  %12326 = vst [vmem:[#allocation252_spill] sm:$0xff] %v8896_v19  ;;  %v2854_v42 = vmul.f32 1.442695, %v2797_v59  ;;  %v8923_v36 = vcvt.s32.f32 %v3748_v50 }
 0x4af   : > { %12322 = vst [vmem:[#allocation248_spill] sm:$0xff] %v8880_v5  ;;  %12323 = vst [vmem:[#allocation249_spill] sm:$0xff] %v8883_v54  ;;  %vm3426_vm10 = vcmp.eq.f32.partialorder %v8392_v18, %v8883_v54  ;;  %v5640_v9 = vpop.eup %5639  ;;  %v2796_v48 = vsub.f32 %v8481_v45, %v8880_v5  ;;  %v2786_v41 = vsub.f32 %v8392_v18, %v8883_v54 }
 0x4b0   : > { %v3458_v12 = vsel %vm3426_vm10, %v12110_v33, 16  ;;  %5651 = vpow2.f32 %v2854_v42  ;;  %12331 = vst [vmem:[#allocation257_spill] sm:$0xff] %v8923_v36  ;;  %vm3436_vm1 = vcmp.eq.f32.partialorder %v8481_v45, %v8880_v5 }
 0x4b1   : > { %v8899_v35 = vsel %vm619_vm2, %v3458_v12, 2147483647  ;;  %v2907_v12 = vsel %vm619_vm2, %v5640_v9, 0.0  ;;  %v2832_v18 = vmul.f32 1.442695, %v2786_v41  ;;  %v2789_v41 = vsub.f32 %v8394_v15, %v8725_v51 }
 0x4b2   : > { %v8894_v11 = vpop.xlane.xlu1 %2758  ;;  %12327 = vst [vmem:[#allocation253_spill] sm:$0xff] %v8899_v35  ;;  %3766 = vmin.xlane.f32.xlu1 %v8891_v28  ;;  %v3688_v55 = vshra.s32 %v8899_v35, 16  ;;  %3706 = vmin.xlane.f32.xlu0 %v8896_v19  ;;  %v2852_v28 = vmul.f32 1.442695, %v2796_v48  ;;  %v3465_v19 = vsel %vm3433_vm6, %v12110_v33, 16 }
 0x4b3   : > { %12325 = vst [vmem:[#allocation251_spill] sm:$0xff] %v8894_v11  ;;  %v2799_v35 = vsub.f32 %v8496_v37, %v8894_v11  ;;  %v8930_v9 = vsel %vm619_vm2, %v3465_v19, 2147483647  ;;  %v2838_v51 = vmul.f32 1.442695, %v2789_v41  ;;  %v2788_v41 = vsub.f32 %v8404_v22, %v8738_v21 }
 0x4b4   : > { %v8911_v2 = vcvt.s32.f32 %v3688_v55  ;;  %v5642_v55 = vpop.eup %5641  ;;  %12333 = vst [vmem:[#allocation259_spill] sm:$0xff] %v8930_v9  ;;  %5653 = vpow2.f32 %v2852_v28  ;;  %vm3439_vm5 = vcmp.eq.f32.partialorder %v8496_v37, %v8894_v11  ;;  %v3522_v11 = vand.u32 65535, %v8629_v34 }
 0x4b5   : > { %v5644_v42 = vpop.eup %5643  ;;  %v2858_v48 = vmul.f32 1.442695, %v2799_v35  ;;  %v2928_v50 = vsel %vm619_vm2, %v5642_v55, 0.0  ;;  %5655 = vpow2.f32 %v2832_v18  ;;  %v3464_v35 = vsel %vm3432_vm11, %v12110_v33, 16 }
 0x4b6   : > { %12329 = vst [vmem:[#allocation255_spill] sm:$0xff] %v8911_v2  ;;  %v8916_v59 = vpop.xlane.xlu1 %2755  ;;  %2908 = vadd.xlane.f32.xlu1 %v2907_v12  ;;  %3691 = vmin.xlane.f32.xlu0 %v8911_v2  ;;  %v5646_v54 = vpop.eup %5645  ;;  %v3793_v2 = vshra.s32 %v8930_v9, 16  ;;  %v2904_v28 = vsel %vm619_vm2, %v5644_v42, 0.0  ;;  %v8954_v42 = vsel %vm619_vm2, %v3464_v35, 2147483647 }
 0x4b7   : > { %12330 = vst [vmem:[#allocation256_spill] sm:$0xff] %v8916_v59  ;;  %v2798_v12 = vsub.f32 %v8506_v6, %v8916_v59  ;;  %5657 = vpow2.f32 %v2858_v48  ;;  %v2836_v44 = vmul.f32 1.442695, %v2788_v41  ;;  %v2791_v41 = vsub.f32 %v8416_v63, %v8753_v26 }
 0x4b8   : > { %v8949_v18 = vcvt.s32.f32 %v3793_v2  ;;  %v3778_v2 = vshra.s32 %v8954_v42, 16  ;;  %vm3438_vm13 = vcmp.eq.f32.partialorder %v8506_v6, %v8916_v59 }
 0x4b9   : > { %v5648_v9 = vpop.eup %5647 }
 0x4ba   : > { %v8927_v39 = vpop.xlane.xlu1 %2764  ;;  %3751 = vmin.xlane.f32.xlu1 %v8923_v36  ;;  %2929 = vadd.xlane.f32.xlu0 %v2928_v50  ;;  %v2856_v36 = vmul.f32 1.442695, %v2798_v12  ;;  %v2937_v50 = vsel %vm619_vm2, %v5646_v54, 0.0  ;;  %v5650_v0 = vpop.eup %5649  ;;  %v2934_v54 = vsel %vm619_vm2, %v5648_v9, 0.0 }
 0x4bb   : > { %12332 = vst [vmem:[#allocation258_spill] sm:$0xff] %v8927_v39  ;;  %v2801_v55 = vsub.f32 %v8521_v14, %v8927_v39  ;;  %v2913_v35 = vsel %vm619_vm2, %v5650_v0, 0.0  ;;  %vm3441_vm14 = vcmp.eq.f32.partialorder %v8521_v14, %v8927_v39 }
 0x4bc   : > { %5659 = vpow2.f32 %v2856_v36  ;;  %v3473_v6 = vsel %vm3441_vm14, %v12110_v33, 16 }
 0x4bd   : > { %v2862_v48 = vmul.f32 1.442695, %v2801_v55  ;;  %5661 = vpow2.f32 %v2838_v51 }
 0x4be   : > { %v8939_v19 = vpop.xlane.xlu1 %2761  ;;  %2905 = vadd.xlane.f32.xlu1 %v2904_v28  ;;  %2938 = vadd.xlane.f32.xlu0 %v2937_v50  ;;  %v5652_v28 = vpop.eup %5651  ;;  %v3467_v50 = vsel %vm3435_vm4, %v12110_v33, 16 }
 0x4bf   : > { %12334 = vst [vmem:[#allocation260_spill] sm:$0xff] %v8939_v19  ;;  %v2800_v12 = vsub.f32 %v8529_v20, %v8939_v19  ;;  %5663 = vpow2.f32 %v2862_v48  ;;  %v2943_v9 = vsel %vm619_vm2, %v5652_v28, 0.0  ;;  %v8975_v21 = vsel %vm619_vm2, %v3467_v50, 2147483647 }
 0x4c0   : > { %vm3440_vm8 = vcmp.eq.f32.partialorder %v8529_v20, %v8939_v19 }
 0x4c1   : > { %v2860_v55 = vmul.f32 1.442695, %v2800_v12 }
 0x4c2   : > { %v8951_v15 = vpop.xlane.xlu1 %3372  ;;  %3796 = vmin.xlane.f32.xlu1 %v8949_v18  ;;  %2935 = vadd.xlane.f32.xlu0 %v2934_v54  ;;  %v8970_v54 = vcvt.s32.f32 %v3778_v2  ;;  %v3823_v2 = vshra.s32 %v8975_v21, 16 }
 0x4c3   : > { %12335 = vst [vmem:[#allocation261_spill] sm:$0xff] %v8951_v15  ;;  %v5654_v15 = vpop.eup %5653  ;;  %5665 = vpow2.f32 %v2860_v55 }
 0x4c4   : > { %v5656_v22 = vpop.eup %5655  ;;  %v2940_v48 = vsel %vm619_vm2, %v5654_v15, 0.0  ;;  %5667 = vpow2.f32 %v2836_v44  ;;  %v3466_v15 = vsel %vm3434_vm3, %v12110_v33, 16  ;;  %v8989_v50 = vcvt.s32.f32 %v3823_v2 }
 0x4c5   : > { %v5658_v12 = vpop.eup %5657 }
 0x4c6   : > { %v8965_v36 = vpop.xlane.xlu1 %2770  ;;  %2914 = vadd.xlane.f32.xlu1 %v2913_v35  ;;  %2944 = vadd.xlane.f32.xlu0 %v2943_v9  ;;  %v2910_v35 = vsel %vm619_vm2, %v5656_v22, 0.0  ;;  %v2949_v55 = vsel %vm619_vm2, %v5658_v12, 0.0 }
 0x4c7   : > { %12336 = vst [vmem:[#allocation262_spill] sm:$0xff] %v8965_v36  ;;  %v2803_v14 = vsub.f32 %v8543_v38, %v8965_v36  ;;  %vm3443_vm15 = vcmp.eq.f32.partialorder %v8543_v38, %v8965_v36 }
 0x4c9   : > { %v5660_v9 = vpop.eup %5659  ;;  %v2866_v39 = vmul.f32 1.442695, %v2803_v14 }
 0x4ca   : > { %v8972_v51 = vpop.xlane.xlu1 %2767  ;;  %3781 = vmin.xlane.f32.xlu1 %v8970_v54  ;;  %2941 = vadd.xlane.f32.xlu0 %v2940_v48  ;;  %v2842_v48 = vmul.f32 1.442695, %v2791_v41  ;;  %v5662_v44 = vpop.eup %5661  ;;  %v2946_v29 = vsel %vm619_vm2, %v5660_v9, 0.0 }
 0x4cb   : > { %12337 = vst [vmem:[#allocation263_spill] sm:$0xff] %v8972_v51  ;;  %v2802_v0 = vsub.f32 %v8547_v30, %v8972_v51  ;;  %v2919_v2 = vsel %vm619_vm2, %v5662_v44, 0.0  ;;  %v9013_v44 = vpop.xlane.xlu0 %3327  ;;  %vm3442_vm12 = vcmp.eq.f32.partialorder %v8547_v30, %v8972_v51 }
 0x4cc   : > { %v5664_v22 = vpop.eup %5663  ;;  %12338 = vst [vmem:[#allocation264_spill] sm:$0xff] %v9013_v44  ;;  %v3474_v36 = vsel %vm3442_vm12, %v12110_v33, 16 }
 0x4cd   : > { %v2864_v28 = vmul.f32 1.442695, %v2802_v0  ;;  %v8992_v0 = vsel %vm619_vm2, %v3466_v15, 2147483647  ;;  %v2955_v41 = vsel %vm619_vm2, %v5664_v22, 0.0 }
 0x4ce   : > { %2911 = vadd.xlane.f32.xlu1 %v2910_v35  ;;  %2950 = vadd.xlane.f32.xlu0 %v2949_v55  ;;  %v3808_v12 = vshra.s32 %v8992_v0, 16  ;;  %v3469_v35 = vsel %vm3437_vm7, %v12110_v33, 16 }
 0x4cf   : > { %5669 = vpow2.f32 %v2864_v28  ;;  %v2790_v28 = vsub.f32 %v8423_v27, %v8773_v40 }
 0x4d0   : > { %5671 = vpow2.f32 %v2842_v48  ;;  %v5666_v55 = vpop.eup %5665  ;;  %v9004_v15 = vcvt.s32.f32 %v3808_v12 }
 0x4d1   : > { %v2840_v9 = vmul.f32 1.442695, %v2790_v28  ;;  %v5668_v26 = vpop.eup %5667  ;;  %v2952_v48 = vsel %vm619_vm2, %v5666_v55, 0.0  ;;  %v2793_v28 = vsub.f32 %v8434_v31, %v8788_v13 }
 0x4d2   : > { %3826 = vmin.xlane.f32.xlu1 %v8989_v50  ;;  %2947 = vadd.xlane.f32.xlu0 %v2946_v29  ;;  %v9007_v29 = vsel %vm619_vm2, %v3469_v35, 2147483647 }
 0x4d3   : > { %v3853_v12 = vshra.s32 %v9007_v29, 16  ;;  %5673 = vpow2.f32 %v2840_v9  ;;  %v2846_v55 = vmul.f32 1.442695, %v2793_v28 }
 0x4d5   : > { %v9021_v35 = vcvt.s32.f32 %v3853_v12  ;;  %5675 = vpow2.f32 %v2846_v55 }
 0x4d6   : > { %2920 = vadd.xlane.f32.xlu1 %v2919_v2  ;;  %2956 = vadd.xlane.f32.xlu0 %v2955_v41  ;;  %v2916_v2 = vsel %vm619_vm2, %v5668_v26, 0.0  ;;  %v3468_v41 = vsel %vm3436_vm1, %v12110_v33, 16  ;;  %5677 = vpow2.f32 %v2866_v39 }
 0x4da   : > { %3811 = vmin.xlane.f32.xlu1 %v9004_v15  ;;  %2953 = vadd.xlane.f32.xlu0 %v2952_v48  ;;  %v9024_v48 = vsel %vm619_vm2, %v3468_v41, 2147483647 }
 0x4db   : > { %v3838_v26 = vshra.s32 %v9024_v48, 16 }
 0x4dc   : > { %v5670_v40 = vpop.eup %5669 }
 0x4dd   : > { %v2958_v22 = vsel %vm619_vm2, %v5670_v40, 0.0  ;;  %v5672_v5 = vpop.eup %5671  ;;  %v9026_v40 = vpop.xlane.xlu0 %3366  ;;  %v9036_v28 = vcvt.s32.f32 %v3838_v26 }
 0x4de   : > { %2917 = vadd.xlane.f32.xlu1 %v2916_v2  ;;  %2959 = vadd.xlane.f32.xlu0 %v2958_v22  ;;  %12339 = vst [vmem:[#allocation265_spill] sm:$0xff] %v9026_v40  ;;  %v2925_v9 = vsel %vm619_vm2, %v5672_v5, 0.0  ;;  %v3471_v22 = vsel %vm3439_vm5, %v12110_v33, 16 }
 0x4df   : > { %v9039_v2 = vsel %vm619_vm2, %v3471_v22, 2147483647 }
 0x4e0   : > { %v5674_v41 = vpop.eup %5673  ;;  %v3883_v37 = vshra.s32 %v9039_v2, 16 }
 0x4e1   : > { %v9034_v12 = vpop.xlane.xlu0 %3363  ;;  %v2922_v5 = vsel %vm619_vm2, %v5674_v41, 0.0 }
 0x4e2   : > { %3856 = vmin.xlane.f32.xlu1 %v9021_v35  ;;  %12340 = vst [vmem:[#allocation266_spill] sm:$0xff] %v9034_v12  ;;  %v9051_v26 = vcvt.s32.f32 %v3883_v37  ;;  %v5676_v13 = vpop.eup %5675 }
 0x4e3   : > { %v2931_v37 = vsel %vm619_vm2, %v5676_v13, 0.0  ;;  %v5678_v12 = vpop.eup %5677 }
 0x4e4   : > { %v2961_v40 = vsel %vm619_vm2, %v5678_v12, 0.0  ;;  %v3524_v12 = vcvt.s32.f32 %v3522_v11 }
 0x4e5   : > { %v9046_v55 = vpop.xlane.xlu0 %3369 }
 0x4e6   : > { %2926 = vadd.xlane.f32.xlu1 %v2925_v9  ;;  %12341 = vst [vmem:[#allocation267_spill] sm:$0xff] %v9046_v55  ;;  %v3470_v9 = vsel %vm3438_vm13, %v12110_v33, 16  ;;  %v3472_v55 = vsel %vm3440_vm8, %v12110_v33, 16 }
 0x4e7   : > { %v9054_v22 = vsel %vm619_vm2, %v3470_v9, 2147483647  ;;  %v9079_v13 = vsel %vm619_vm2, %v3472_v55, 2147483647 }
 0x4e8   : > { %v3868_v41 = vshra.s32 %v9054_v22, 16  ;;  %v3898_v14 = vshra.s32 %v9079_v13, 16 }
 0x4e9   : > { %v9056_v57 = vpop.xlane.xlu0 %3375 }
 0x4ea   : > { %3841 = vmin.xlane.f32.xlu1 %v9036_v28  ;;  %12342 = vst [vmem:[#allocation268_spill] sm:$0xff] %v9056_v57  ;;  %v3477_v57 = vand.u32 65535, %v8613_v25  ;;  %v9075_v20 = vcvt.s32.f32 %v3868_v41  ;;  %v3475_v25 = vsel %vm3443_vm15, %v12110_v33, 16  ;;  %v9099_v30 = vcvt.s32.f32 %v3898_v14 }
 0x4eb   : > { %v9093_v55 = vsel %vm619_vm2, %v3475_v25, 2147483647 }
 0x4ee   : > { %2923 = vadd.xlane.f32.xlu1 %v2922_v5  ;;  %v9067_v5 = vsel %vm619_vm2, %v3473_v6, 2147483647 }
 0x4ef   : > { %v3913_v19 = vshra.s32 %v9067_v5, 16 }
 0x4f1   : > { %v9089_v38 = vcvt.s32.f32 %v3913_v19  ;;  %v9103_v19 = vsel %vm619_vm2, %v3474_v36, 2147483647 }
 0x4f2   : > { %3886 = vmin.xlane.f32.xlu1 %v9051_v26  ;;  %v3928_v25 = vshra.s32 %v9103_v19, 16 }
 0x4f4   : > { %v9116_v14 = vcvt.s32.f32 %v3928_v25 }
 0x4f6   : > { %2932 = vadd.xlane.f32.xlu1 %v2931_v37  ;;  %v3479_v37 = vcvt.s32.f32 %v3477_v57 }
 0x4f7   : > { %v9069_v9 = vpop.xlane.xlu0 %3496 }
 0x4f8   : > { %vm3498_vm9 = vcmp.eq.f32.partialorder %v8609_v7, %v9069_v9 }
 0x4fa   : > { %3871 = vmin.xlane.f32.xlu1 %v9075_v20 }
 0x4fb   : > { %v9082_v6 = vpop.xlane.xlu0 %3481 }
 0x4fc   : > { %12343 = vst [vmem:[#allocation269_spill] sm:$0xff] %v9082_v6  ;;  %vm3483_vm0 = vcmp.eq.f32.partialorder %v8625_v8, %v9082_v6  ;;  %v3943_v8 = vshra.s32 %v9093_v55, 16 }
 0x4fd   : > { %v3484_v41 = vsel %vm3483_vm0, %v3479_v37, inf }
 0x4fe   : > { %3485 = vmin.xlane.f32.xlu0 %v3484_v41  ;;  %3916 = vmin.xlane.f32.xlu1 %v9089_v38  ;;  %v9108_v37 = vcvt.s32.f32 %v3943_v8  ;;  %v9111_v41 = vpop.xlane.xlu1 %3378  ;;  %v3492_v8 = vand.u32 65535, %v8600_v4  ;;  %v3612_v4 = vand.u32 65535, %v8723_v16 }
 0x4ff   : > { %v9096_v57 = vpop.xlane.xlu0 %3526  ;;  %12344 = vst [vmem:[#allocation270_spill] sm:$0xff] %v9111_v41 }
 0x500   : > { %v3494_v25 = vcvt.s32.f32 %v3492_v8  ;;  %vm3528_vm10 = vcmp.eq.f32.partialorder %v8639_v10, %v9096_v57  ;;  %v3614_v34 = vcvt.s32.f32 %v3612_v4  ;;  %v3552_v10 = vand.u32 65535, %v8660_v23 }
 0x501   : > { %v3529_v27 = vsel %vm3528_vm10, %v3524_v12, inf  ;;  %v3537_v8 = vand.u32 65535, %v8674_v32 }
 0x502   : > { %3901 = vmin.xlane.f32.xlu1 %v9099_v30  ;;  %v3499_v6 = vsel %vm3498_vm9, %v3494_v25, inf }
 0x503   : > { %v9106_v39 = vpop.xlane.xlu0 %3511  ;;  %v9118_v59 = vpop.xlane.xlu1 %2872  ;;  %v3539_v23 = vcvt.s32.f32 %v3537_v8 }
 0x504   : > { %12345 = vst [vmem:[#allocation271_spill] sm:$0xff] %v9118_v59  ;;  %vm3513_vm6 = vcmp.eq.f32.partialorder %v8655_v47, %v9106_v39 }
 0x506   : > { %3946 = vmin.xlane.f32.xlu1 %v9108_v37 }
 0x507   : > { %v9114_v51 = vpop.xlane.xlu0 %3556 }
 0x508   : > { %vm3558_vm4 = vcmp.eq.f32.partialorder %v8670_v3, %v9114_v51 }
 0x50a   : > { %3931 = vmin.xlane.f32.xlu1 %v9116_v14 }
 0x50b   : > { %v9121_v36 = vpop.xlane.xlu0 %3541  ;;  %v9125_v44 = vpop.xlane.xlu1 %2878 }
 0x50c   : > { %12346 = vst [vmem:[#allocation272_spill] sm:$0xff] %v9125_v44  ;;  %vm3543_vm3 = vcmp.eq.f32.partialorder %v8686_v58, %v9121_v36 }
 0x50e   : > { %2962 = vadd.xlane.f32.xlu1 %v2961_v40  ;;  %v3507_v40 = vand.u32 65535, %v8643_v1 }
 0x50f   : > { %v9127_v41 = vpop.xlane.xlu0 %3586  ;;  %v9138_v44 = vpop.xlane.xlu1 %2875 }
 0x510   : > { %12347 = vst [vmem:[#allocation273_spill] sm:$0xff] %v9138_v44  ;;  %vm3588_vm7 = vcmp.eq.f32.partialorder %v8699_v56, %v9127_v41  ;;  %v12353_v56 = vld [vmem:[#allocation221_spill] sm:$0xff] }
 0x512   : > { %3500 = vmin.xlane.f32.xlu1 %v3499_v6  ;;  %v3509_v6 = vcvt.s32.f32 %v3507_v40  ;;  %v3544_v40 = vsel %vm3543_vm3, %v3539_v23, inf }
 0x513   : > { %v9132_v59 = vpop.xlane.xlu0 %3571  ;;  %v9147_v1 = vpop.xlane.xlu1 %2884 }
 0x514   : > { %v3514_v11 = vsel %vm3513_vm6, %v3509_v6, inf  ;;  %12348 = vst [vmem:[#allocation274_spill] sm:$0xff] %v9147_v1  ;;  %vm3573_vm1 = vcmp.eq.f32.partialorder %v8718_v24, %v9132_v59  ;;  %v12357_v24 = vld [vmem:[#allocation225_spill] sm:$0xff] }
 0x516   : > { %3530 = vmin.xlane.f32.xlu1 %v3529_v27  ;;  %v3554_v27 = vcvt.s32.f32 %v3552_v10 }
 0x517   : > { %v9140_v7 = vpop.xlane.xlu0 %3616 }
 0x518   : > { %vm3618_vm11 = vcmp.eq.f32.partialorder %v8735_v46, %v9140_v7  ;;  %v3559_v25 = vsel %vm3558_vm4, %v3554_v27, inf  ;;  %v3582_v46 = vand.u32 65535, %v8691_v17 }
 0x519   : > { %v3619_v16 = vsel %vm3618_vm11, %v3614_v34, inf  ;;  %v3567_v34 = vand.u32 65535, %v8704_v61 }
 0x51a   : > { %3620 = vmin.xlane.f32.xlu0 %v3619_v16  ;;  %3515 = vmin.xlane.f32.xlu1 %v3514_v11  ;;  %v3584_v32 = vcvt.s32.f32 %v3582_v46  ;;  %v3597_v16 = vand.u32 65535, %v8744_v60 }
 0x51b   : > { %v9152_v47 = vpop.xlane.xlu0 %3601  ;;  %v9154_v4 = vpop.xlane.xlu1 %2890  ;;  %v3569_v17 = vcvt.s32.f32 %v3567_v34 }
 0x51c   : > { %12349 = vst [vmem:[#allocation275_spill] sm:$0xff] %v9154_v4  ;;  %v3589_v10 = vsel %vm3588_vm7, %v3584_v32, inf  ;;  %vm3603_vm5 = vcmp.eq.f32.partialorder %v12353_v56, %v9152_v47  ;;  %v3599_v8 = vcvt.s32.f32 %v3597_v16  ;;  %v12358_v32 = vld [vmem:[#allocation227_spill] sm:$0xff] }
 0x51d   : > { %v3574_v11 = vsel %vm3573_vm1, %v3569_v17, inf  ;;  %v3627_v34 = vand.u32 65535, %v12358_v32 }
 0x51e   : > { %3560 = vmin.xlane.f32.xlu1 %v3559_v25  ;;  %v12356_v25 = vld [vmem:[#allocation223_spill] sm:$0xff]  ;;  %v3604_v46 = vsel %vm3603_vm5, %v3599_v8, inf  ;;  %v12362_v8 = vld [vmem:[#allocation234_spill] sm:$0xff] }
 0x51f   : > { %v9159_v12 = vpop.xlane.xlu0 %3646  ;;  %v3642_v23 = vand.u32 65535, %v12356_v25  ;;  %v3629_v56 = vcvt.s32.f32 %v3627_v34  ;;  %v3672_v25 = vand.u32 65535, %v12362_v8 }
 0x520   : > { %vm3648_vm13 = vcmp.eq.f32.partialorder %v12357_v24, %v9159_v12  ;;  %v12364_v24 = vld [vmem:[#allocation236_spill] sm:$0xff] }
 0x521   : > { %v3644_v60 = vcvt.s32.f32 %v3642_v23  ;;  %v3674_v32 = vcvt.s32.f32 %v3672_v25  ;;  %v12371_v25 = vld [vmem:[#allocation252_spill] sm:$0xff] }
 0x522   : > { %3545 = vmin.xlane.f32.xlu1 %v3544_v40 }
 0x523   : > { %v9163_v3 = vpop.xlane.xlu1 %2896  ;;  %v9166_v6 = vpop.xlane.xlu0 %3631  ;;  %v3649_v17 = vsel %vm3648_vm13, %v3644_v60, inf  ;;  %v12365_v60 = vld [vmem:[#allocation242_spill] sm:$0xff] }
 0x524   : > { %12350 = vst [vmem:[#allocation276_spill] sm:$0xff] %v9163_v3  ;;  %12351 = vst [vmem:[#allocation277_spill] sm:$0xff] %v9166_v6 }
 0x526   : > { %3590 = vmin.xlane.f32.xlu1 %v3589_v10 }
 0x527   : > { %v9170_v58 = vpop.xlane.xlu1 %2893  ;;  %v9175_v27 = vpop.xlane.xlu0 %2881 }
 0x528   : > { %12352 = vst [vmem:[#allocation278_spill] sm:$0xff] %v9170_v58  ;;  %12354 = vst [vmem:[#allocation221_spill] sm:$0xff] %v9175_v27  ;;  %v3657_v58 = vand.u32 65535, %v12365_v60 }
 0x52a   : > { %3575 = vmin.xlane.f32.xlu1 %v3574_v11  ;;  %v12360_v11 = vld [vmem:[#allocation228_spill] sm:$0xff]  ;;  %v3659_v8 = vcvt.s32.f32 %v3657_v58  ;;  %v12374_v58 = vld [vmem:[#allocation255_spill] sm:$0xff] }
 0x52b   : > { %v9177_v61 = vpop.xlane.xlu1 %3736  ;;  %v9185_v10 = vpop.xlane.xlu0 %3676  ;;  %vm3633_vm14 = vcmp.eq.f32.partialorder %v12360_v11, %v9166_v6  ;;  %v12367_v11 = vld [vmem:[#allocation245_spill] sm:$0xff] }
 0x52c   : > { %12355 = vst [vmem:[#allocation279_spill] sm:$0xff] %v9177_v61  ;;  %12359 = vst [vmem:[#allocation223_spill] sm:$0xff] %v9185_v10  ;;  %vm3678_vm8 = vcmp.eq.f32.partialorder %v12364_v24, %v9185_v10 }
 0x52e   : > { %3605 = vmin.xlane.f32.xlu1 %v3604_v46  ;;  %v3634_v46 = vsel %vm3633_vm14, %v3629_v56, inf  ;;  %v3702_v56 = vand.u32 65535, %v8871_v53 }
 0x52f   : > { %v9182_v40 = vpop.xlane.xlu1 %2902 }
 0x532   : > { %3650 = vmin.xlane.f32.xlu1 %v3649_v17  ;;  %v3679_v17 = vsel %vm3678_vm8, %v3674_v32, inf  ;;  %v3704_v32 = vcvt.s32.f32 %v3702_v56 }
 0x533   : > { %v9189_v16 = vpop.xlane.xlu1 %3721  ;;  %v9192_v27 = vpop.xlane.xlu0 %3661 }
 0x534   : > { %12361 = vst [vmem:[#allocation225_spill] sm:$0xff] %v9189_v16  ;;  %12363 = vst [vmem:[#allocation227_spill] sm:$0xff] %v9192_v27  ;;  %vm3663_vm15 = vcmp.eq.f32.partialorder %v12367_v11, %v9192_v27  ;;  %v12373_v11 = vld [vmem:[#allocation231_spill] sm:$0xff] }
 0x535   : > { %v3664_v10 = vsel %vm3663_vm15, %v3659_v8, inf  ;;  %v3732_v27 = vand.u32 65535, %v12373_v11  ;;  %v12379_v11 = vld [vmem:[#allocation243_spill] sm:$0xff] }
 0x536   : > { %3635 = vmin.xlane.f32.xlu1 %v3634_v46  ;;  %v12370_v46 = vld [vmem:[#allocation253_spill] sm:$0xff]  ;;  %vm3723_vm10 = vcmp.eq.f32.partialorder %v12379_v11, %v9189_v16  ;;  %v12585_v16 = vld [vmem:[#allocation32_spill] sm:$0xff] }
 0x537   : > { %v9196_v23 = vpop.xlane.xlu1 %2899  ;;  %v9199_v3 = vpop.xlane.xlu0 %2887  ;;  %v3687_v24 = vand.u32 65535, %v12370_v46  ;;  %v12376_v46 = vld [vmem:[#allocation235_spill] sm:$0xff] }
 0x538   : > { %12366 = vst [vmem:[#allocation228_spill] sm:$0xff] %v9199_v3  ;;  %vm3738_vm9 = vcmp.eq.f32.partialorder %v12376_v46, %v9177_v61  ;;  %v12587_v61 = vld [vmem:[#allocation121_spill] sm:$0xff] }
 0x53a   : > { %3680 = vmin.xlane.f32.xlu1 %v3679_v17  ;;  %v3689_v17 = vcvt.s32.f32 %v3687_v24 }
 0x53b   : > { %v9203_v34 = vpop.xlane.xlu1 %3766  ;;  %v9206_v4 = vpop.xlane.xlu0 %3706 }
 0x53c   : > { %12368 = vst [vmem:[#allocation234_spill] sm:$0xff] %v9203_v34  ;;  %12369 = vst [vmem:[#allocation236_spill] sm:$0xff] %v9206_v4  ;;  %vm3708_vm12 = vcmp.eq.f32.partialorder %v12371_v25, %v9206_v4  ;;  %v12377_v25 = vld [vmem:[#allocation239_spill] sm:$0xff] }
 0x53d   : > { %v3709_v53 = vsel %vm3708_vm12, %v3704_v32, inf  ;;  %v3717_v56 = vand.u32 65535, %v12377_v25 }
 0x53e   : > { %3665 = vmin.xlane.f32.xlu1 %v3664_v10  ;;  %v3734_v10 = vcvt.s32.f32 %v3732_v27  ;;  %v12383_v27 = vld [vmem:[#allocation250_spill] sm:$0xff] }
 0x53f   : > { %v9211_v60 = vpop.xlane.xlu1 %2908  ;;  %v9213_v3 = vpop.xlane.xlu0 %3691  ;;  %vm3768_vm6 = vcmp.eq.f32.partialorder %v12383_v27, %v9203_v34  ;;  %v12577_v34 = vld [vmem:[#allocation116_spill] sm:$0xff] }
 0x540   : > { %12372 = vst [vmem:[#allocation242_spill] sm:$0xff] %v9213_v3  ;;  %vm3693_vm0 = vcmp.eq.f32.partialorder %v12374_v58, %v9213_v3  ;;  %v3739_v4 = vsel %vm3738_vm9, %v3734_v10, inf  ;;  %v12380_v58 = vld [vmem:[#allocation259_spill] sm:$0xff]  ;;  %v12384_v10 = vld [vmem:[#allocation254_spill] sm:$0xff] }
 0x541   : > { %v3694_v1 = vsel %vm3693_vm0, %v3689_v17, inf  ;;  %v3792_v32 = vand.u32 65535, %v12380_v58  ;;  %v12381_v17 = vld [vmem:[#allocation247_spill] sm:$0xff]  ;;  %v3747_v25 = vand.u32 65535, %v12384_v10 }
 0x542   : > { %3710 = vmin.xlane.f32.xlu1 %v3709_v53  ;;  %3695 = vmin.xlane.f32.xlu0 %v3694_v1  ;;  %v3719_v53 = vcvt.s32.f32 %v3717_v56  ;;  %v3762_v1 = vand.u32 65535, %v12381_v17 }
 0x543   : > { %v9218_v8 = vpop.xlane.xlu1 %3751  ;;  %v3794_v46 = vcvt.s32.f32 %v3792_v32  ;;  %v3777_v32 = vand.u32 65535, %v8954_v42 }
 0x544   : > { %12375 = vst [vmem:[#allocation245_spill] sm:$0xff] %v9218_v8  ;;  %v3724_v3 = vsel %vm3723_vm10, %v3719_v53, inf  ;;  %v3749_v53 = vcvt.s32.f32 %v3747_v25 }
 0x546   : > { %3740 = vmin.xlane.f32.xlu0 %v3739_v4  ;;  %v3764_v4 = vcvt.s32.f32 %v3762_v1 }
 0x547   : > { %v9223_v24 = vpop.xlane.xlu1 %2905 }
 0x548   : > { %12378 = vst [vmem:[#allocation253_spill] sm:$0xff] %v9223_v24  ;;  %v3769_v58 = vsel %vm3768_vm6, %v3764_v4, inf  ;;  %v3822_v4 = vand.u32 65535, %v8975_v21  ;;  %v12522_v24 = vld [vmem:[#allocation80_spill] sm:$0xff] }
 0x54a   : > { %3725 = vmin.xlane.f32.xlu0 %v3724_v3  ;;  %v12386_v3 = vld [vmem:[#allocation257_spill] sm:$0xff] }
 0x54b   : > { %v9229_v6 = vpop.xlane.xlu1 %3796  ;;  %vm3753_vm4 = vcmp.eq.f32.partialorder %v12386_v3, %v9218_v8 }
 0x54c   : > { %12382 = vst [vmem:[#allocation252_spill] sm:$0xff] %v9229_v6  ;;  %vm3798_vm11 = vcmp.eq.f32.partialorder %v8949_v18, %v9229_v6  ;;  %v3754_v17 = vsel %vm3753_vm4, %v3749_v53, inf  ;;  %v3779_v18 = vcvt.s32.f32 %v3777_v32  ;;  %v3852_v53 = vand.u32 65535, %v9007_v29  ;;  %v12518_v6 = vld [vmem:[#allocation74_spill] sm:$0xff] }
 0x54d   : > { %v3799_v11 = vsel %vm3798_vm11, %v3794_v46, inf }
 0x54e   : > { %3800 = vmin.xlane.f32.xlu1 %v3799_v11  ;;  %3770 = vmin.xlane.f32.xlu0 %v3769_v58  ;;  %v3824_v11 = vcvt.s32.f32 %v3822_v4  ;;  %v3807_v58 = vand.u32 65535, %v8992_v0 }
 0x54f   : > { %v9236_v56 = vpop.xlane.xlu1 %2914 }
 0x550   : > { %12385 = vst [vmem:[#allocation231_spill] sm:$0xff] %v9236_v56  ;;  %v12498_v56 = vld [vmem:[#allocation54_spill] sm:$0xff] }
 0x552   : > { %3755 = vmin.xlane.f32.xlu0 %v3754_v17 }
 0x553   : > { %v9241_v27 = vpop.xlane.xlu1 %3781 }
 0x554   : > { %12387 = vst [vmem:[#allocation255_spill] sm:$0xff] %v9241_v27  ;;  %vm3783_vm3 = vcmp.eq.f32.partialorder %v8970_v54, %v9241_v27  ;;  %v3809_v54 = vcvt.s32.f32 %v3807_v58  ;;  %v12397_v58 = vld [vmem:[#allocation203_spill] sm:$0xff] }
 0x555   : > { %v3784_v1 = vsel %vm3783_vm3, %v3779_v18, inf }
 0x556   : > { %3785 = vmin.xlane.f32.xlu0 %v3784_v1  ;;  %v3837_v1 = vand.u32 65535, %v9024_v48 }
 0x557   : > { %v9245_v46 = vpop.xlane.xlu1 %2911 }
 0x558   : > { %12388 = vst [vmem:[#allocation235_spill] sm:$0xff] %v9245_v46 }
 0x55b   : > { %v9248_v10 = vpop.xlane.xlu1 %3826 }
 0x55c   : > { %12389 = vst [vmem:[#allocation239_spill] sm:$0xff] %v9248_v10  ;;  %vm3828_vm7 = vcmp.eq.f32.partialorder %v8989_v50, %v9248_v10  ;;  %v3854_v50 = vcvt.s32.f32 %v3852_v53 }
 0x55d   : > { %v3829_v42 = vsel %vm3828_vm7, %v3824_v11, inf }
 0x55e   : > { %3830 = vmin.xlane.f32.xlu1 %v3829_v42  ;;  %v3882_v42 = vand.u32 65535, %v9039_v2 }
 0x55f   : > { %v9252_v25 = vpop.xlane.xlu1 %2920 }
 0x560   : > { %12390 = vst [vmem:[#allocation243_spill] sm:$0xff] %v9252_v25  ;;  %v3884_v53 = vcvt.s32.f32 %v3882_v42  ;;  %v12477_v25 = vld [vmem:[#allocation16_spill] sm:$0xff] }
 0x563   : > { %v9255_v3 = vpop.xlane.xlu1 %3811 }
 0x564   : > { %12391 = vst [vmem:[#allocation259_spill] sm:$0xff] %v9255_v3  ;;  %vm3813_vm1 = vcmp.eq.f32.partialorder %v9004_v15, %v9255_v3  ;;  %v3839_v15 = vcvt.s32.f32 %v3837_v1 }
 0x565   : > { %v3814_v32 = vsel %vm3813_vm1, %v3809_v54, inf }
 0x566   : > { %3815 = vmin.xlane.f32.xlu1 %v3814_v32 }
 0x567   : > { %v9259_v21 = vpop.xlane.xlu1 %2917 }
 0x568   : > { %12392 = vst [vmem:[#allocation247_spill] sm:$0xff] %v9259_v21  ;;  %v12476_v21 = vld [vmem:[#allocation73_spill] sm:$0xff] }
 0x56b   : > { %v9262_v17 = vpop.xlane.xlu1 %3856 }
 0x56c   : > { %12393 = vst [vmem:[#allocation250_spill] sm:$0xff] %v9262_v17  ;;  %vm3858_vm5 = vcmp.eq.f32.partialorder %v9021_v35, %v9262_v17  ;;  %v12398_v35 = vld [vmem:[#allocation29_spill] sm:$0xff] }
 0x56d   : > { %v3859_v18 = vsel %vm3858_vm5, %v3854_v50, inf  ;;  %v2772_v54 = vsub.f32 %v12398_v35, %v12397_v58 }
 0x56e   : > { %3860 = vmin.xlane.f32.xlu1 %v3859_v18 }
 0x56f   : > { %v9266_v0 = vpop.xlane.xlu1 %2926  ;;  %v2804_v48 = vmul.f32 1.442695, %v2772_v54  ;;  %v3897_v54 = vand.u32 65535, %v9079_v13 }
 0x570   : > { %12394 = vst [vmem:[#allocation254_spill] sm:$0xff] %v9266_v0  ;;  %v12475_v0 = vld [vmem:[#allocation69_spill] sm:$0xff] }
 0x571   : > { %5679 = vpow2.f32 %v2804_v48  ;;  %v3899_v48 = vcvt.s32.f32 %v3897_v54 }
 0x573   : > { %v9269_v4 = vpop.xlane.xlu1 %3841 }
 0x574   : > { %12395 = vst [vmem:[#allocation257_spill] sm:$0xff] %v9269_v4  ;;  %vm3843_vm13 = vcmp.eq.f32.partialorder %v9036_v28, %v9269_v4  ;;  %v3867_v28 = vand.u32 65535, %v9054_v22 }
 0x575   : > { %v3844_v11 = vsel %vm3843_vm13, %v3839_v15, inf  ;;  %v3912_v15 = vand.u32 65535, %v9067_v5  ;;  %v3942_v5 = vand.u32 65535, %v9093_v55  ;;  %v12408_v55 = vld [vmem:[#allocation170_spill] sm:$0xff] }
 0x576   : > { %3845 = vmin.xlane.f32.xlu1 %v3844_v11  ;;  %v3869_v2 = vcvt.s32.f32 %v3867_v28  ;;  %vm3165_vm6 = vcmp.eq.s32.totalorder %v12110_v33, %v12408_v55 }
 0x577   : > { %v9273_v29 = vpop.xlane.xlu1 %2923 }
 0x578   : > { %12396 = vst [vmem:[#allocation280_spill] sm:$0xff] %v9273_v29  ;;  %v12474_v29 = vld [vmem:[#allocation11_spill] sm:$0xff] }
 0x57b   : > { %v9278_v32 = vpop.xlane.xlu1 %3886 }
 0x57c   : > { %12399 = vst [vmem:[#allocation29_spill] sm:$0xff] %v9278_v32  ;;  %vm3888_vm14 = vcmp.eq.f32.partialorder %v9051_v26, %v9278_v32  ;;  %v3914_v26 = vcvt.s32.f32 %v3912_v15  ;;  %v12406_v15 = vmov 0.0  }
 0x57d   : > { %v3889_v50 = vsel %vm3888_vm14, %v3884_v53, inf }
 0x57e   : > { %3890 = vmin.xlane.f32.xlu1 %v3889_v50  ;;  %v5680_v28 = vpop.eup %5679 }
 0x57f   : > { %v9282_v18 = vpop.xlane.xlu1 %2932 }
 0x580   : > { %12400 = vst [vmem:[#allocation281_spill] sm:$0xff] %v9282_v18 }
 0x583   : > { %v9285_v1 = vpop.xlane.xlu1 %3871 }
 0x584   : > { %12401 = vst [vmem:[#allocation282_spill] sm:$0xff] %v9285_v1  ;;  %vm3873_vm8 = vcmp.eq.f32.partialorder %v9075_v20, %v9285_v1  ;;  %v12404_v20 = vld [vmem:[#allocation65_spill] sm:$0xff]  ;;  %v12524_v1 = vld [vmem:[#allocation79_spill] sm:$0xff] }
 0x585   : > { %v3874_v11 = vsel %vm3873_vm8, %v3869_v2, inf  ;;  %vm3181_vm0 = vcmp.eq.s32.totalorder %v12110_v33, %v12404_v20  ;;  %v3944_v2 = vcvt.s32.f32 %v3942_v5  ;;  %v12410_v20 = vld [vmem:[#allocation19_spill] sm:$0xff] }
 0x586   : > { %3875 = vmin.xlane.f32.xlu1 %v3874_v11  ;;  %v4992_v11 = vsel %vm3181_vm0, 1.0, %v12406_v15  ;;  %vm3179_vm11 = vcmp.eq.s32.totalorder %v12110_v33, %v12410_v20  ;;  %v12415_v20 = vld [vmem:[#allocation176_spill] sm:$0xff] }
 0x587   : > { %v9290_v42 = vpop.xlane.xlu1 %3916  ;;  %v4990_v55 = vsel %vm3179_vm11, 1.0, %v12406_v15  ;;  %vm3163_vm1 = vcmp.eq.s32.totalorder %v12110_v33, %v12415_v20  ;;  %v12422_v20 = vld [vmem:[#allocation23_spill] sm:$0xff] }
 0x588   : > { %12402 = vst [vmem:[#allocation283_spill] sm:$0xff] %v9290_v42  ;;  %vm3918_vm15 = vcmp.eq.f32.partialorder %v9089_v38, %v9290_v42  ;;  %v3927_v38 = vand.u32 65535, %v9103_v19  ;;  %vm3161_vm14 = vcmp.eq.s32.totalorder %v12110_v33, %v12422_v20  ;;  %v12428_v20 = vld [vmem:[#allocation45_spill] sm:$0xff] }
 0x589   : > { %v3919_v22 = vsel %vm3918_vm15, %v3914_v26, inf  ;;  %v12407_v26 = vld [vmem:[#allocation17_spill] sm:$0xff] }
 0x58a   : > { %3920 = vmin.xlane.f32.xlu1 %v3919_v22  ;;  %vm3180_vm9 = vcmp.eq.s32.totalorder %v12110_v33, %v12407_v26  ;;  %v3277_v22 = vmul.f32 %v8474_v62, %v4992_v11  ;;  %v3929_v5 = vcvt.s32.f32 %v3927_v38  ;;  %v12412_v11 = vld [vmem:[#allocation165_spill] sm:$0xff] }
 0x58b   : > { %v9295_v53 = vpop.xlane.xlu1 %3901  ;;  %v4991_v19 = vsel %vm3180_vm9, 1.0, %v12406_v15 }
 0x58c   : > { %12403 = vst [vmem:[#allocation284_spill] sm:$0xff] %v9295_v53  ;;  %vm3903_vm12 = vcmp.eq.f32.partialorder %v9099_v30, %v9295_v53  ;;  %v2868_v30 = vsel %vm619_vm2, %v5680_v28, 0.0  ;;  %v3359_v62 = vsel %vm619_vm2, %v3277_v22, 0.0  ;;  %v3275_v22 = vmul.f32 %v8450_v49, %v4990_v55  ;;  %v12420_v55 = vld [vmem:[#allocation40_spill] sm:$0xff] }
 0x58d   : > { %v3904_v50 = vsel %vm3903_vm12, %v3899_v48, inf }
 0x58e   : > { %3905 = vmin.xlane.f32.xlu1 %v3904_v50  ;;  %v12411_v50 = vld [vmem:[#allocation173_spill] sm:$0xff] }
 0x58f   : > { %v9302_v13 = vpop.xlane.xlu1 %3946  ;;  %vm3164_vm4 = vcmp.eq.s32.totalorder %v12110_v33, %v12411_v50 }
 0x590   : > { %12405 = vst [vmem:[#allocation65_spill] sm:$0xff] %v9302_v13  ;;  %vm3948_vm10 = vcmp.eq.f32.partialorder %v9108_v37, %v9302_v13  ;;  %v4976_v37 = vsel %vm3165_vm6, 1.0, %v12406_v15 }
 0x591   : > { %v3949_v54 = vsel %vm3948_vm10, %v3944_v2, inf  ;;  %v3276_v2 = vmul.f32 %v4991_v19, %v8481_v45  ;;  %v3261_v26 = vmul.f32 %v12412_v11, %v4976_v37  ;;  %v12416_v19 = vld [vmem:[#allocation166_spill] sm:$0xff]  ;;  %v12419_v11 = vld [vmem:[#allocation96_spill] sm:$0xff] }
 0x592   : > { %2869 = vadd.xlane.f32.xlu1 %v2868_v30  ;;  %3950 = vmin.xlane.f32.xlu0 %v3949_v54  ;;  %v12414_v30 = vld [vmem:[#allocation21_spill] sm:$0xff]  ;;  %v4975_v54 = vsel %vm3164_vm4, 1.0, %v12406_v15  ;;  %vm3177_vm13 = vcmp.eq.s32.totalorder %v12110_v33, %v12419_v11 }
 0x593   : > { %v9315_v48 = vpop.xlane.xlu1 %3931  ;;  %vm3178_vm7 = vcmp.eq.s32.totalorder %v12110_v33, %v12414_v30  ;;  %v3311_v45 = vsel %vm619_vm2, %v3261_v26, 0.0 }
 0x594   : > { %12409 = vst [vmem:[#allocation17_spill] sm:$0xff] %v9315_v48  ;;  %vm3933_vm3 = vcmp.eq.f32.partialorder %v9116_v14, %v9315_v48  ;;  %v3356_v14 = vsel %vm619_vm2, %v3276_v2, 0.0  ;;  %v4989_v50 = vsel %vm3178_vm7, 1.0, %v12406_v15  ;;  %v3353_v2 = vsel %vm619_vm2, %v3275_v22, 0.0 }
 0x595   : > { %v3934_v28 = vsel %vm3933_vm3, %v3929_v5, inf  ;;  %v3260_v5 = vmul.f32 %v4975_v54, %v12416_v19  ;;  %v3274_v26 = vmul.f32 %v4989_v50, %v8462_v43  ;;  %v12423_v19 = vld [vmem:[#allocation181_spill] sm:$0xff]  ;;  %v12424_v50 = vld [vmem:[#allocation164_spill] sm:$0xff] }
 0x596   : > { %3935 = vmin.xlane.f32.xlu1 %v3934_v28  ;;  %3360 = vadd.xlane.f32.xlu0 %v3359_v62  ;;  %v4974_v28 = vsel %vm3163_vm1, 1.0, %v12406_v15  ;;  %v12418_v62 = vld [vmem:[#allocation178_spill] sm:$0xff]  ;;  %vm3176_vm8 = vcmp.eq.s32.totalorder %v12110_v33, %v12423_v19 }
 0x597   : > { %v9327_v38 = vpop.xlane.xlu1 %2962  ;;  %vm3162_vm5 = vcmp.eq.s32.totalorder %v12110_v33, %v12418_v62  ;;  %v3308_v49 = vsel %vm619_vm2, %v3260_v5, 0.0  ;;  %v3259_v30 = vmul.f32 %v12420_v55, %v4974_v28  ;;  %v3350_v22 = vsel %vm619_vm2, %v3274_v26, 0.0  ;;  %v12425_v62 = vld [vmem:[#allocation185_spill] sm:$0xff]  ;;  %v12427_v55 = vld [vmem:[#allocation91_spill] sm:$0xff]  ;;  %v12429_v19 = vld [vmem:[#allocation186_spill] sm:$0xff] }
 0x598   : > { %12413 = vst [vmem:[#allocation170_spill] sm:$0xff] %v9327_v38  ;;  %vm3175_vm15 = vcmp.eq.s32.totalorder %v12110_v33, %v12425_v62  ;;  %vm3160_vm12 = vcmp.eq.s32.totalorder %v12110_v33, %v12427_v55  ;;  %vm3159_vm0 = vcmp.eq.s32.totalorder %v12110_v33, %v12429_v19  ;;  %v12432_v62 = vld [vmem:[#allocation43_spill] sm:$0xff]  ;;  %v12479_v38 = vld [vmem:[#allocation78_spill] sm:$0xff] }
 0x599   : > { %v3305_v43 = vsel %vm619_vm2, %v3259_v30, 0.0 }
 0x59a   : > { %3357 = vadd.xlane.f32.xlu1 %v3356_v14  ;;  %3312 = vadd.xlane.f32.xlu0 %v3311_v45  ;;  %v4973_v14 = vsel %vm3162_vm5, 1.0, %v12406_v15  ;;  %v4988_v45 = vsel %vm3177_vm13, 1.0, %v12406_v15 }
 0x59b   : > { %v9339_v37 = vpop.xlane.xlu1 %3500  ;;  %v3273_v5 = vmul.f32 %v8434_v31, %v4988_v45  ;;  %v3258_v28 = vmul.f32 %v4973_v14, %v12424_v50  ;;  %v4986_v45 = vsel %vm3175_vm15, 1.0, %v12406_v15 }
 0x59c   : > { %12417 = vst [vmem:[#allocation19_spill] sm:$0xff] %v9339_v37 }
 0x59d   : > { %v3347_v26 = vsel %vm619_vm2, %v3273_v5, 0.0  ;;  %v3302_v31 = vsel %vm619_vm2, %v3258_v28, 0.0  ;;  %v4971_v5 = vsel %vm3160_vm12, 1.0, %v12406_v15  ;;  %v3271_v28 = vmul.f32 %v8416_v63, %v4986_v45  ;;  %v12436_v45 = vld [vmem:[#allocation175_spill] sm:$0xff] }
 0x59e   : > { %3354 = vadd.xlane.f32.xlu1 %v3353_v2  ;;  %3309 = vadd.xlane.f32.xlu0 %v3308_v49  ;;  %v4972_v2 = vsel %vm3161_vm14, 1.0, %v12406_v15  ;;  %v4987_v49 = vsel %vm3176_vm8, 1.0, %v12406_v15 }
 0x59f   : > { %v9351_v54 = vpop.xlane.xlu1 %3530  ;;  %v3272_v30 = vmul.f32 %v4987_v49, %v8441_v52  ;;  %v3257_v14 = vmul.f32 %v12428_v20, %v4972_v2  ;;  %v3256_v2 = vmul.f32 %v4971_v5, %v12432_v62  ;;  %v4970_v49 = vsel %vm3159_vm0, 1.0, %v12406_v15  ;;  %v12438_v62 = vld [vmem:[#allocation190_spill] sm:$0xff] }
 0x5a0   : > { %12421 = vst [vmem:[#allocation173_spill] sm:$0xff] %v9351_v54  ;;  %v3341_v63 = vsel %vm619_vm2, %v3271_v28, 0.0  ;;  %vm3173_vm11 = vcmp.eq.s32.totalorder %v12110_v33, %v12438_v62  ;;  %v3608_v62 = vcvt.f32.s32 %v9152_v47  ;;  %v9425_v47 = vpop.xlane.xlu0 %2929 }
 0x5a1   : > { %v3344_v50 = vsel %vm619_vm2, %v3272_v30, 0.0  ;;  %v3299_v52 = vsel %vm619_vm2, %v3257_v14, 0.0  ;;  %v3593_v30 = vcvt.f32.s32 %v9127_v41  ;;  %v3296_v14 = vsel %vm619_vm2, %v3256_v2, 0.0  ;;  %12448 = vst [vmem:[#allocation96_spill] sm:$0xff] %v9425_v47 }
 0x5a2   : > { %3351 = vadd.xlane.f32.xlu1 %v3350_v22  ;;  %3306 = vadd.xlane.f32.xlu0 %v3305_v43  ;;  %v12430_v22 = vld [vmem:[#allocation187_spill] sm:$0xff]  ;;  %v3578_v41 = vcvt.f32.s32 %v9132_v59  ;;  %v4984_v18 = vsel %vm3173_vm11, 1.0, %v12406_v15 }
 0x5a3   : > { %v9365_v11 = vpop.xlane.xlu1 %3515  ;;  %vm3174_vm9 = vcmp.eq.s32.totalorder %v12110_v33, %v12430_v22  ;;  %v12437_v22 = vld [vmem:[#allocation31_spill] sm:$0xff] }
 0x5a4   : > { %12426 = vst [vmem:[#allocation165_spill] sm:$0xff] %v9365_v11  ;;  %v4985_v55 = vsel %vm3174_vm9, 1.0, %v12406_v15  ;;  %v3255_v5 = vmul.f32 %v12437_v22, %v4970_v49  ;;  %v12440_v22 = vld [vmem:[#allocation33_spill] sm:$0xff]  ;;  %v3579_v59 = vshll.u32 %v3578_v41, 16  ;;  %v12447_v41 = vld [vmem:[#allocation196_spill] sm:$0xff]  ;;  %v12483_v11 = vld [vmem:[#allocation86_spill] sm:$0xff] }
 0x5a5   : > { %v3270_v19 = vmul.f32 %v4985_v55, %v12436_v45  ;;  %v12439_v45 = vld [vmem:[#allocation172_spill] sm:$0xff]  ;;  %vm3156_vm3 = vcmp.eq.s32.totalorder %v12110_v33, %v12447_v41 }
 0x5a6   : > { %3348 = vadd.xlane.f32.xlu1 %v3347_v26  ;;  %3303 = vadd.xlane.f32.xlu0 %v3302_v31  ;;  %v12433_v26 = vld [vmem:[#allocation188_spill] sm:$0xff]  ;;  %v12434_v31 = vld [vmem:[#allocation194_spill] sm:$0xff]  ;;  %v3293_v55 = vsel %vm619_vm2, %v3255_v5, 0.0 }
 0x5a7   : > { %v9380_v43 = vpop.xlane.xlu1 %3560  ;;  %vm3158_vm10 = vcmp.eq.s32.totalorder %v12110_v33, %v12433_v26  ;;  %vm3172_vm6 = vcmp.eq.s32.totalorder %v12110_v33, %v12434_v31  ;;  %v3594_v31 = vshll.u32 %v3593_v30, 16  ;;  %v3338_v2 = vsel %vm619_vm2, %v3270_v19, 0.0 }
 0x5a8   : > { %12431 = vst [vmem:[#allocation21_spill] sm:$0xff] %v9380_v43 }
 0x5aa   : > { %3345 = vadd.xlane.f32.xlu1 %v3344_v50  ;;  %3300 = vadd.xlane.f32.xlu0 %v3299_v52  ;;  %v4969_v50 = vsel %vm3158_vm10, 1.0, %v12406_v15  ;;  %v4983_v52 = vsel %vm3172_vm6, 1.0, %v12406_v15 }
 0x5ab   : > { %v9393_v20 = vpop.xlane.xlu1 %3545  ;;  %v3268_v49 = vmul.f32 %v4983_v52, %v12439_v45  ;;  %v3254_v58 = vmul.f32 %v4969_v50, %v12440_v22  ;;  %v12444_v45 = vld [vmem:[#allocation141_spill] sm:$0xff]  ;;  %v12450_v22 = vld [vmem:[#allocation148_spill] sm:$0xff] }
 0x5ac   : > { %12435 = vst [vmem:[#allocation176_spill] sm:$0xff] %v9393_v20  ;;  %5681 = vlog2.f32 %v12444_v45  ;;  %v12455_v45 = vld [vmem:[#allocation153_spill] sm:$0xff] }
 0x5ad   : > { %v3332_v5 = vsel %vm619_vm2, %v3268_v49, 0.0  ;;  %v3290_v52 = vsel %vm619_vm2, %v3254_v58, 0.0  ;;  %v12449_v49 = vld [vmem:[#allocation147_spill] sm:$0xff]  ;;  %v3609_v58 = vshll.u32 %v3608_v62, 16  ;;  %v9438_v62 = vpop.xlane.xlu0 %2938 }
 0x5ae   : > { %3342 = vadd.xlane.f32.xlu1 %v3341_v63  ;;  %3297 = vadd.xlane.f32.xlu0 %v3296_v14  ;;  %v12442_v14 = vld [vmem:[#allocation192_spill] sm:$0xff]  ;;  %12457 = vst [vmem:[#allocation23_spill] sm:$0xff] %v9438_v62  ;;  %v12481_v62 = vld [vmem:[#allocation18_spill] sm:$0xff] }
 0x5af   : > { %v3591_v26 = vpop.xlane.xlu1 %3590  ;;  %vm3157_vm4 = vcmp.eq.s32.totalorder %v12110_v33, %v12442_v14  ;;  %v12473_v33 = vld [vmem:[#allocation14_spill] sm:$0xff] }
 0x5b0   : > { %v3592_v28 = vcvt.f32.s32 %v3591_v26  ;;  %v12443_v26 = vld [vmem:[#allocation169_spill] sm:$0xff] }
 0x5b1   : > { %v3269_v50 = vmul.f32 %v12443_v26, %v4984_v18  ;;  %v12454_v26 = vld [vmem:[#allocation152_spill] sm:$0xff] }
 0x5b2   : > { %v9410_v63 = vadd.s32 %v3594_v31, %v3592_v28  ;;  %3339 = vadd.xlane.f32.xlu1 %v3338_v2  ;;  %3294 = vadd.xlane.f32.xlu0 %v3293_v55  ;;  %v4968_v31 = vsel %vm3157_vm4, 1.0, %v12406_v15  ;;  %v12446_v2 = vld [vmem:[#allocation144_spill] sm:$0xff] }
 0x5b3   : > { %v3576_v30 = vpop.xlane.xlu1 %3575  ;;  %5683 = vlog2.f32 %v12446_v2  ;;  %v3335_v14 = vsel %vm619_vm2, %v3269_v50, 0.0  ;;  %v12456_v2 = vld [vmem:[#allocation154_spill] sm:$0xff] }
 0x5b4   : > { %12441 = vst [vmem:[#allocation166_spill] sm:$0xff] %v9410_v63  ;;  %v3577_v19 = vcvt.f32.s32 %v3576_v30  ;;  %5685 = vlog2.f32 %v12449_v49  ;;  %v12451_v30 = vld [vmem:[#allocation25_spill] sm:$0xff] }
 0x5b5   : > { %5687 = vlog2.f32 %v12450_v22  ;;  %v12460_v49 = vld [vmem:[#allocation157_spill] sm:$0xff]  ;;  %v12462_v22 = vld [vmem:[#allocation159_spill] sm:$0xff] }
 0x5b6   : > { %v9420_v28 = vadd.s32 %v3579_v59, %v3577_v19  ;;  %3333 = vadd.xlane.f32.xlu1 %v3332_v5  ;;  %3291 = vadd.xlane.f32.xlu0 %v3290_v52  ;;  %v3253_v59 = vmul.f32 %v12451_v30, %v4968_v31  ;;  %v12452_v19 = vld [vmem:[#allocation151_spill] sm:$0xff]  ;;  %v4967_v5 = vsel %vm3156_vm3, 1.0, %v12406_v15  ;;  %v12463_v30 = vld [vmem:[#allocation160_spill] sm:$0xff] }
 0x5b7   : > { %v3606_v55 = vpop.xlane.xlu1 %3605  ;;  %5689 = vlog2.f32 %v12452_v19  ;;  %v3252_v50 = vmul.f32 %v4967_v5, %v12398_v35  ;;  %v12458_v31 = vld [vmem:[#allocation155_spill] sm:$0xff]  ;;  %v12465_v19 = vld [vmem:[#allocation161_spill] sm:$0xff] }
 0x5b8   : > { %12445 = vst [vmem:[#allocation178_spill] sm:$0xff] %v9420_v28  ;;  %v3607_v18 = vcvt.f32.s32 %v3606_v55  ;;  %5691 = vlog2.f32 %v12454_v26  ;;  %v3287_v41 = vsel %vm619_vm2, %v3253_v59, 0.0  ;;  %v12459_v55 = vld [vmem:[#allocation156_spill] sm:$0xff]  ;;  %v9449_v59 = vpop.xlane.xlu0 %2935  ;;  %v12482_v28 = vld [vmem:[#allocation87_spill] sm:$0xff] }
 0x5b9   : > { %5693 = vlog2.f32 %v12455_v45  ;;  %12464 = vst [vmem:[#allocation181_spill] sm:$0xff] %v9449_v59  ;;  %v12466_v26 = vld [vmem:[#allocation52_spill] sm:$0xff] }
 0x5ba   : > { %v9433_v52 = vadd.s32 %v3609_v58, %v3607_v18  ;;  %3336 = vadd.xlane.f32.xlu0 %v3335_v14  ;;  %5695 = vlog2.f32 %v12456_v2  ;;  %v12461_v58 = vld [vmem:[#allocation158_spill] sm:$0xff]  ;;  %v3284_v18 = vsel %vm619_vm2, %v3252_v50, 0.0  ;;  %v5682_v14 = vpop.eup %5681  ;;  %v12480_v59 = vld [vmem:[#allocation20_spill] sm:$0xff] }
 0x5bb   : > { %5697 = vlog2.f32 %v12458_v31  ;;  %v12467_v2 = vld [vmem:[#allocation58_spill] sm:$0xff]  ;;  %v12468_v31 = vld [vmem:[#allocation56_spill] sm:$0xff]  ;;  %v911_v63 = vmul.f32 0.6931472, %v5682_v14  ;;  %v9479_v27 = vpop.xlane.xlu1 %3650 }
 0x5bc   : > { %12453 = vst [vmem:[#allocation40_spill] sm:$0xff] %v9433_v52  ;;  %5699 = vlog2.f32 %v12459_v55  ;;  %v12469_v55 = vld [vmem:[#allocation59_spill] sm:$0xff]  ;;  %v12484_v52 = vld [vmem:[#allocation97_spill] sm:$0xff]  ;;  %12487 = vst [vmem:[#allocation186_spill] sm:$0xff] %v9479_v27 }
 0x5bd   : > { %5701 = vlog2.f32 %v12460_v49 }
 0x5be   : > { %3288 = vadd.xlane.f32.xlu0 %v3287_v41  ;;  %5703 = vlog2.f32 %v12461_v58  ;;  %v12470_v58 = vld [vmem:[#allocation12_spill] sm:$0xff] }
 0x5bf   : > { %5705 = vlog2.f32 %v12462_v22 }
 0x5c0   : > { %5707 = vlog2.f32 %v12463_v30  ;;  %v5684_v35 = vpop.eup %5683  ;;  %v12472_v30 = vld [vmem:[#allocation60_spill] sm:$0xff] }
 0x5c1   : > { %5709 = vlog2.f32 %v12465_v19  ;;  %v5686_v5 = vpop.eup %5685 }
 0x5c2   : > { %3285 = vadd.xlane.f32.xlu0 %v3284_v18  ;;  %5711 = vlog2.f32 %v12466_v26  ;;  %v5688_v45 = vpop.eup %5687  ;;  %v9457_v18 = vpop.xlane.xlu0 %2944  ;;  %v913_v37 = vmul.f32 0.6931472, %v5686_v5  ;;  %v12490_v5 = vld [vmem:[#allocation47_spill] sm:$0xff] }
 0x5c3   : > { %5713 = vlog2.f32 %v12467_v2  ;;  %12471 = vst [vmem:[#allocation164_spill] sm:$0xff] %v9457_v18  ;;  %v915_v3 = vmul.f32 0.6931472, %v5688_v45  ;;  %v9485_v45 = vadd.f32 %v911_v63, %v12490_v5 }
 0x5c4   : > { %v5690_v41 = vpop.eup %5689  ;;  %5715 = vlog2.f32 %v12468_v31 }
 0x5c5   : > { %v5692_v50 = vpop.eup %5691  ;;  %5717 = vlog2.f32 %v12469_v55  ;;  %12491 = vst [vmem:[#allocation43_spill] sm:$0xff] %v9485_v45 }
 0x5c6   : > { %v5694_v49 = vpop.eup %5693  ;;  %5719 = vlog2.f32 %v12470_v58  ;;  %v9465_v58 = vpop.xlane.xlu0 %2941  ;;  %v917_v54 = vmul.f32 0.6931472, %v5692_v50 }
 0x5c7   : > { %v5696_v22 = vpop.eup %5695  ;;  %5721 = vlog2.f32 %v12472_v30  ;;  %12478 = vst [vmem:[#allocation185_spill] sm:$0xff] %v9465_v58 }
 0x5c8   : > { %v5698_v19 = vpop.eup %5697  ;;  %5723 = vlog2.f32 %v12473_v33  ;;  %v921_v46 = vmul.f32 0.6931472, %v5696_v22  ;;  %v12492_v22 = vld [vmem:[#allocation51_spill] sm:$0xff] }
 0x5c9   : > { %v5700_v26 = vpop.eup %5699  ;;  %5725 = vlog2.f32 %v12474_v29  ;;  %v927_v4 = vmul.f32 0.6931472, %v5698_v19  ;;  %v9488_v19 = vadd.f32 %v913_v37, %v12492_v22  ;;  %v12504_v22 = vld [vmem:[#allocation64_spill] sm:$0xff] }
 0x5ca   : > { %v5702_v2 = vpop.eup %5701  ;;  %5727 = vlog2.f32 %v12475_v0 }
 0x5cb   : > { %v5704_v31 = vpop.eup %5703  ;;  %5729 = vlog2.f32 %v12476_v21  ;;  %12493 = vst [vmem:[#allocation188_spill] sm:$0xff] %v9488_v19 }
 0x5cc   : > { %v5706_v55 = vpop.eup %5705  ;;  %5731 = vlog2.f32 %v12477_v25  ;;  %v9473_v25 = vpop.xlane.xlu0 %2950  ;;  %v929_v10 = vmul.f32 0.6931472, %v5704_v31  ;;  %v12496_v31 = vld [vmem:[#allocation53_spill] sm:$0xff] }
 0x5cd   : > { %v5708_v18 = vpop.eup %5707  ;;  %5733 = vlog2.f32 %v12479_v38  ;;  %12485 = vst [vmem:[#allocation91_spill] sm:$0xff] %v9473_v25  ;;  %v931_v25 = vmul.f32 0.6931472, %v5702_v2  ;;  %v935_v50 = vmul.f32 0.6931472, %v5706_v55 }
 0x5ce   : > { %v5710_v30 = vpop.eup %5709  ;;  %5735 = vlog2.f32 %v12480_v59  ;;  %v909_v59 = vmul.f32 0.6931472, %v5684_v35  ;;  %v12488_v35 = vld [vmem:[#allocation48_spill] sm:$0xff] }
 0x5cf   : > { %v5712_v33 = vpop.eup %5711  ;;  %5737 = vlog2.f32 %v12481_v62  ;;  %v939_v27 = vmul.f32 0.6931472, %v5710_v30  ;;  %v12507_v30 = vld [vmem:[#allocation57_spill] sm:$0xff] }
 0x5d0   : > { %v5714_v29 = vpop.eup %5713  ;;  %5739 = vlog2.f32 %v12482_v28  ;;  %v919_v28 = vmul.f32 0.6931472, %v5690_v41  ;;  %v9477_v48 = vpop.xlane.xlu0 %2947  ;;  %v9482_v14 = vadd.f32 %v909_v59, %v12488_v35  ;;  %v933_v41 = vmul.f32 0.6931472, %v5708_v18  ;;  %v12500_v35 = vld [vmem:[#allocation61_spill] sm:$0xff]  ;;  %v12502_v18 = vld [vmem:[#allocation55_spill] sm:$0xff] }
 0x5d1   : > { %v5716_v0 = vpop.eup %5715  ;;  %5741 = vlog2.f32 %v12483_v11  ;;  %v923_v11 = vmul.f32 0.6931472, %v5694_v49  ;;  %12486 = vst [vmem:[#allocation45_spill] sm:$0xff] %v9477_v48  ;;  %v9497_v59 = vadd.f32 %v917_v54, %v12498_v56  ;;  %v9500_v63 = vadd.f32 %v921_v46, %v12500_v35  ;;  %v12509_v56 = vld [vmem:[#allocation62_spill] sm:$0xff]  ;;  %v12510_v35 = vld [vmem:[#allocation71_spill] sm:$0xff] }
 0x5d2   : > { %v5718_v21 = vpop.eup %5717  ;;  %5743 = vlog2.f32 %v12484_v52  ;;  %v925_v52 = vmul.f32 0.6931472, %v5700_v26  ;;  %12489 = vst [vmem:[#allocation187_spill] sm:$0xff] %v9482_v14  ;;  %v12494_v26 = vld [vmem:[#allocation49_spill] sm:$0xff]  ;;  %v9494_v48 = vadd.f32 %v919_v28, %v12496_v31  ;;  %v937_v5 = vmul.f32 0.6931472, %v5712_v33 }
 0x5d3   : > { %v5720_v58 = vpop.eup %5719  ;;  %v9491_v2 = vadd.f32 %v915_v3, %v12494_v26  ;;  %12499 = vst [vmem:[#allocation31_spill] sm:$0xff] %v9497_v59  ;;  %12501 = vst [vmem:[#allocation190_spill] sm:$0xff] %v9500_v63  ;;  %v9503_v55 = vadd.f32 %v923_v11, %v12502_v18  ;;  %v12506_v26 = vld [vmem:[#allocation67_spill] sm:$0xff]  ;;  %v9513_v31 = vadd.f32 %v927_v4, %v12507_v30  ;;  %v12512_v11 = vld [vmem:[#allocation66_spill] sm:$0xff]  ;;  %v941_v18 = vmul.f32 0.6931472, %v5716_v0 }
 0x5d4   : > { %v5722_v20 = vpop.eup %5721  ;;  %12497 = vst [vmem:[#allocation175_spill] sm:$0xff] %v9494_v48  ;;  %v9507_v3 = vadd.f32 %v925_v52, %v12504_v22  ;;  %v9510_v28 = vadd.f32 %v929_v10, %v12506_v26  ;;  %v9516_v54 = vadd.f32 %v931_v25, %v12509_v56  ;;  %v9519_v15 = vadd.f32 %v933_v41, %v12510_v35  ;;  %v12514_v22 = vld [vmem:[#allocation70_spill] sm:$0xff]  ;;  %v9527_v30 = vpop.xlane.xlu0 %2956 }
 0x5d5   : > { %v5724_v38 = vpop.eup %5723  ;;  %12495 = vst [vmem:[#allocation194_spill] sm:$0xff] %v9491_v2  ;;  %12503 = vst [vmem:[#allocation172_spill] sm:$0xff] %v9503_v55  ;;  %v9522_v33 = vadd.f32 %v935_v50, %v12512_v11  ;;  %v943_v53 = vmul.f32 0.6931472, %v5714_v29  ;;  %v9525_v47 = vadd.f32 %v939_v27, %v12514_v22  ;;  %v945_v10 = vmul.f32 0.6931472, %v5720_v58  ;;  %v9529_v25 = vpop.xlane.xlu1 %3635 }
 0x5d6   : > { %v5726_v62 = vpop.eup %5725  ;;  %12505 = vst [vmem:[#allocation33_spill] sm:$0xff] %v9507_v3  ;;  %12508 = vst [vmem:[#allocation192_spill] sm:$0xff] %v9513_v31  ;;  %v947_v26 = vmul.f32 0.6931472, %v5718_v21  ;;  %v951_v4 = vmul.f32 0.6931472, %v5722_v20  ;;  %v9532_v41 = vadd.f32 %v937_v5, %v12518_v6  ;;  %v9534_v0 = vstv %s4117_s11 }
 0x5d7   : > { %v5728_v43 = vpop.eup %5727  ;;  %12511 = vst [vmem:[#allocation169_spill] sm:$0xff] %v9519_v15  ;;  %12513 = vst [vmem:[#allocation141_spill] sm:$0xff] %v9522_v33  ;;  %v949_v35 = vmul.f32 0.6931472, %v5724_v38  ;;  %v955_v11 = vmul.f32 0.6931472, %v5726_v62  ;;  %v9540_v8 = vadd.f32 %v941_v18, %v12522_v24  ;;  %5745 = vlog2.f32 %v9182_v40 }
 0x5d8   : > { %v5730_v17 = vpop.eup %5729  ;;  %12515 = vst [vmem:[#allocation144_spill] sm:$0xff] %v9525_v47  ;;  %12516 = vst [vmem:[#allocation196_spill] sm:$0xff] %v9527_v30  ;;  %v953_v50 = vmul.f32 0.6931472, %v5728_v43  ;;  %v12520_v22 = vld [vmem:[#allocation75_spill] sm:$0xff]  ;;  %v9543_v6 = vadd.f32 %v947_v26, %v12524_v1  ;;  %v12526_v62 = vld [vmem:[#allocation84_spill] sm:$0xff]  ;;  %5747 = vlog2.f32 %v9196_v23 }
 0x5d9   : > { %v5732_v13 = vpop.eup %5731  ;;  %12517 = vst [vmem:[#allocation147_spill] sm:$0xff] %v9529_v25  ;;  %12519 = vst [vmem:[#allocation148_spill] sm:$0xff] %v9532_v41  ;;  %v959_v42 = vmul.f32 0.6931472, %v5730_v17  ;;  %v9537_v58 = vadd.f32 %v943_v53, %v12520_v22  ;;  %v9546_v5 = vadd.f32 %v945_v10, %v12526_v62  ;;  %v12536_v1 = vld [vmem:[#allocation95_spill] sm:$0xff]  ;;  %v12546_v62 = vld [vmem:[#allocation41_spill] sm:$0xff] }
 0x5da   : > { %v5734_v49 = vpop.eup %5733  ;;  %v957_v29 = vmul.f32 0.6931472, %v5732_v13  ;;  %12523 = vst [vmem:[#allocation151_spill] sm:$0xff] %v9540_v8  ;;  %12525 = vst [vmem:[#allocation152_spill] sm:$0xff] %v9543_v6  ;;  %v12528_v13 = vld [vmem:[#allocation90_spill] sm:$0xff]  ;;  %v9562_v18 = vadd.f32 %v953_v50, %v12536_v1  ;;  %v12540_v10 = vld [vmem:[#allocation107_spill] sm:$0xff] }
 0x5db   : > { %v5736_v32 = vpop.eup %5735  ;;  %v963_v27 = vmul.f32 0.6931472, %v5734_v49  ;;  %12521 = vst [vmem:[#allocation25_spill] sm:$0xff] %v9537_v58  ;;  %12527 = vst [vmem:[#allocation153_spill] sm:$0xff] %v9546_v5  ;;  %v9549_v17 = vadd.f32 %v949_v35, %v12528_v13  ;;  %v12530_v49 = vld [vmem:[#allocation83_spill] sm:$0xff]  ;;  %v9570_v35 = vpop.xlane.xlu0 %2953  ;;  %v12550_v50 = vld [vmem:[#allocation122_spill] sm:$0xff] }
 0x5dc   : > { %v5738_v37 = vpop.eup %5737  ;;  %v967_v21 = vmul.f32 0.6931472, %v5736_v32  ;;  %v9552_v53 = vadd.f32 %v951_v4, %v12530_v49  ;;  %12537 = vst [vmem:[#allocation158_spill] sm:$0xff] %v9562_v18  ;;  %12542 = vst [vmem:[#allocation161_spill] sm:$0xff] %v9570_v35  ;;  %v9572_v4 = vpop.xlane.xlu1 %3680  ;;  %v12544_v22 = vld [vmem:[#allocation123_spill] sm:$0xff]  ;;  %v12548_v49 = vld [vmem:[#allocation114_spill] sm:$0xff] }
 0x5dd   : > { %v5740_v46 = vpop.eup %5739  ;;  %v961_v20 = vmul.f32 0.6931472, %v5738_v37  ;;  %12529 = vst [vmem:[#allocation154_spill] sm:$0xff] %v9549_v17  ;;  %v12532_v37 = vld [vmem:[#allocation89_spill] sm:$0xff]  ;;  %12543 = vst [vmem:[#allocation52_spill] sm:$0xff] %v9572_v4  ;;  %v9578_v13 = vadd.f32 %v963_v27, %v12546_v62  ;;  %v12554_v1 = vld [vmem:[#allocation124_spill] sm:$0xff] }
 0x5de   : > { %v5742_v52 = vpop.eup %5741  ;;  %v971_v30 = vmul.f32 0.6931472, %v5740_v46  ;;  %12531 = vst [vmem:[#allocation155_spill] sm:$0xff] %v9552_v53  ;;  %v9555_v32 = vadd.f32 %v955_v11, %v12532_v37  ;;  %v12534_v46 = vld [vmem:[#allocation26_spill] sm:$0xff]  ;;  %v9581_v37 = vadd.f32 %v967_v21, %v12548_v49  ;;  %v12560_v62 = vld [vmem:[#allocation28_spill] sm:$0xff]  ;;  %v12575_v4 = vld [vmem:[#allocation113_spill] sm:$0xff] }
 0x5df   : > { %v5744_v56 = vpop.eup %5743  ;;  %v965_v38 = vmul.f32 0.6931472, %v5742_v52  ;;  %v9559_v24 = vsub.f32 %v9482_v14, %v12534_v46  ;;  %v12538_v52 = vld [vmem:[#allocation115_spill] sm:$0xff]  ;;  %v9575_v11 = vadd.f32 %v961_v20, %v12544_v22  ;;  %12547 = vst [vmem:[#allocation56_spill] sm:$0xff] %v9578_v13  ;;  %v9602_v21 = vsub.f32 %v9497_v59, %v12560_v62  ;;  %v12581_v25 = vld [vmem:[#allocation98_spill] sm:$0xff]  ;;  %v9664_v44 = vpop.xlane.xlu0 %2959 }
 0x5e0   : > { %v969_v43 = vmul.f32 0.6931472, %v5744_v56  ;;  %12533 = vst [vmem:[#allocation156_spill] sm:$0xff] %v9555_v32  ;;  %v9565_v26 = vadd.f32 %v957_v29, %v12538_v52  ;;  %v9568_v56 = vadd.f32 %v959_v42, %v12540_v10  ;;  %12549 = vst [vmem:[#allocation59_spill] sm:$0xff] %v9581_v37  ;;  %v9584_v46 = vadd.f32 %v971_v30, %v12550_v50  ;;  %v12552_v29 = vld [vmem:[#allocation85_spill] sm:$0xff]  ;;  %v12556_v10 = vld [vmem:[#allocation44_spill] sm:$0xff] }
 0x5e1   : > { %12535 = vst [vmem:[#allocation157_spill] sm:$0xff] %v9559_v24  ;;  %12545 = vst [vmem:[#allocation58_spill] sm:$0xff] %v9575_v11  ;;  %v9588_v42 = vsub.f32 %v9488_v19, %v12552_v29  ;;  %v9592_v52 = vsub.f32 %v9485_v45, %v12554_v1  ;;  %v9595_v20 = vadd.f32 %v965_v38, %v12556_v10  ;;  %v12558_v22 = vld [vmem:[#allocation127_spill] sm:$0xff]  ;;  %v12562_v30 = vld [vmem:[#allocation128_spill] sm:$0xff] }
 0x5e2   : > { %12539 = vst [vmem:[#allocation159_spill] sm:$0xff] %v9565_v26  ;;  %12541 = vst [vmem:[#allocation160_spill] sm:$0xff] %v9568_v56  ;;  %v9598_v27 = vadd.f32 %v969_v43, %v12558_v22  ;;  %v9606_v49 = vsub.f32 %v9491_v2, %v12562_v30  ;;  %v12564_v50 = vld [vmem:[#allocation92_spill] sm:$0xff]  ;;  %v12566_v1 = vld [vmem:[#allocation117_spill] sm:$0xff]  ;;  %v9618_v38 = vmul.f32 %v9534_v0, %v9559_v24  ;;  %v3563_v2 = vcvt.f32.s32 %v9114_v51 }
 0x5e3   : > { %12551 = vst [vmem:[#allocation12_spill] sm:$0xff] %v9584_v46  ;;  %12553 = vst [vmem:[#allocation60_spill] sm:$0xff] %v9588_v42  ;;  %v9610_v29 = vsub.f32 %v9500_v63, %v12564_v50  ;;  %v9614_v35 = vsub.f32 %v9494_v48, %v12566_v1  ;;  %v12569_v43 = vld [vmem:[#allocation106_spill] sm:$0xff]  ;;  %v12571_v22 = vld [vmem:[#allocation132_spill] sm:$0xff]  ;;  %v9634_v1 = vsub.f32 %v9513_v31, %v12575_v4 }
 0x5e4   : > { %12555 = vst [vmem:[#allocation14_spill] sm:$0xff] %v9592_v52  ;;  %12557 = vst [vmem:[#allocation11_spill] sm:$0xff] %v9595_v20  ;;  %v9622_v10 = vsub.f32 %v9507_v3, %v12569_v43  ;;  %v9626_v62 = vsub.f32 %v9503_v55, %v12571_v22  ;;  %v12573_v30 = vld [vmem:[#allocation30_spill] sm:$0xff]  ;;  %v9638_v24 = vsub.f32 %v9519_v15, %v12577_v34  ;;  %v12632_v23 = vld [vmem:[#allocation35_spill] sm:$0xff]  ;;  %v3533_v55 = vcvt.f32.s32 %v9096_v57 }
 0x5e5   : > { %12559 = vst [vmem:[#allocation69_spill] sm:$0xff] %v9598_v27  ;;  %12561 = vst [vmem:[#allocation73_spill] sm:$0xff] %v9602_v21  ;;  %v9630_v50 = vsub.f32 %v9510_v28, %v12573_v30  ;;  %v9646_v22 = vsub.f32 %v9532_v41, %v12581_v25  ;;  %v9650_v30 = vmul.f32 %v9534_v0, %v9588_v42  ;;  %v9666_v25 = vpop.xlane.xlu1 %3665  ;;  %v12673_v14 = vld [vmem:[#allocation191_spill] sm:$0xff]  ;;  %v12682_v31 = vld [vmem:[#allocation269_spill] sm:$0xff] }
 0x5e6   : > { %12563 = vst [vmem:[#allocation16_spill] sm:$0xff] %v9606_v49  ;;  %12565 = vst [vmem:[#allocation78_spill] sm:$0xff] %v9610_v29  ;;  %v9654_v4 = vmul.f32 %v9534_v0, %v9592_v52  ;;  %v9658_v34 = vsub.f32 %v9522_v33, %v12585_v16  ;;  %v9670_v42 = vmul.f32 %v9534_v0, %v9602_v21  ;;  %v12688_v45 = vld [vmem:[#allocation272_spill] sm:$0xff] }
 0x5e7   : > { %12567 = vst [vmem:[#allocation20_spill] sm:$0xff] %v9614_v35  ;;  %12568 = vst [vmem:[#allocation18_spill] sm:$0xff] %v9618_v38  ;;  %v12579_v38 = vld [vmem:[#allocation46_spill] sm:$0xff]  ;;  %v9674_v52 = vmul.f32 %v9534_v0, %v9606_v49  ;;  %v9678_v16 = vmul.f32 %v9534_v0, %v9610_v29  ;;  %v9690_v21 = vmul.f32 %v9534_v0, %v9626_v62  ;;  %v12713_v57 = vld [vmem:[#allocation52_spill] sm:$0xff] }
 0x5e8   : > { %12570 = vst [vmem:[#allocation87_spill] sm:$0xff] %v9622_v10  ;;  %12572 = vst [vmem:[#allocation86_spill] sm:$0xff] %v9626_v62  ;;  %v9642_v43 = vsub.f32 %v9516_v54, %v12579_v38  ;;  %v9662_v38 = vsub.f32 %v9540_v8, %v12587_v61  ;;  %v9682_v61 = vmul.f32 %v9534_v0, %v9614_v35  ;;  %v12671_v8 = vld [vmem:[#allocation189_spill] sm:$0xff] }
 0x5e9   : > { %12574 = vst [vmem:[#allocation97_spill] sm:$0xff] %v9630_v50  ;;  %12576 = vst [vmem:[#allocation48_spill] sm:$0xff] %v9634_v1  ;;  %v9694_v49 = vmul.f32 %v9534_v0, %v9630_v50  ;;  %v9699_v29 = vmul.f32 %v9534_v0, %v9634_v1  ;;  %v9703_v35 = vmul.f32 %v9534_v0, %v9638_v24  ;;  %v12608_v1 = vld [vmem:[#allocation136_spill] sm:$0xff]  ;;  %v12623_v50 = vld [vmem:[#allocation13_spill] sm:$0xff] }
 0x5ea   : > { %12578 = vst [vmem:[#allocation47_spill] sm:$0xff] %v9638_v24  ;;  %12580 = vst [vmem:[#allocation51_spill] sm:$0xff] %v9642_v43  ;;  %v9711_v62 = vmul.f32 %v9534_v0, %v9646_v22  ;;  %v9719_v40 = vmul.f32 %v9534_v0, %v9662_v38 }
 0x5eb   : > { %12582 = vst [vmem:[#allocation49_spill] sm:$0xff] %v9646_v22  ;;  %12583 = vst [vmem:[#allocation53_spill] sm:$0xff] %v9650_v30  ;;  %v9707_v30 = vmul.f32 %v9534_v0, %v9642_v43  ;;  %v12625_v43 = vld [vmem:[#allocation38_spill] sm:$0xff] }
 0x5ec   : > { %12584 = vst [vmem:[#allocation54_spill] sm:$0xff] %v9654_v4  ;;  %12586 = vst [vmem:[#allocation61_spill] sm:$0xff] %v9658_v34  ;;  %v9686_v4 = vmul.f32 %v9534_v0, %v9622_v10  ;;  %v9715_v10 = vmul.f32 %v9534_v0, %v9658_v34 }
 0x5ed   : > { %12588 = vst [vmem:[#allocation55_spill] sm:$0xff] %v9662_v38  ;;  %12589 = vst [vmem:[#allocation64_spill] sm:$0xff] %v9664_v44  ;;  %v12612_v38 = vld [vmem:[#allocation137_spill] sm:$0xff]  ;;  %v12629_v44 = vld [vmem:[#allocation271_spill] sm:$0xff] }
 0x5ee   : > { %12590 = vst [vmem:[#allocation67_spill] sm:$0xff] %v9670_v42  ;;  %12591 = vst [vmem:[#allocation57_spill] sm:$0xff] %v9674_v52  ;;  %v12603_v52 = vld [vmem:[#allocation34_spill] sm:$0xff]  ;;  %5749 = vlog2.f32 %v12629_v44 }
 0x5ef   : > { %12592 = vst [vmem:[#allocation62_spill] sm:$0xff] %v9678_v16  ;;  %12593 = vst [vmem:[#allocation71_spill] sm:$0xff] %v9682_v61  ;;  %v9723_v42 = vsub.f32 %v9525_v47, %v12603_v52  ;;  %v12605_v61 = vld [vmem:[#allocation129_spill] sm:$0xff]  ;;  %5751 = vlog2.f32 %v9211_v60 }
 0x5f0   : > { %12594 = vst [vmem:[#allocation66_spill] sm:$0xff] %v9686_v4  ;;  %12595 = vst [vmem:[#allocation70_spill] sm:$0xff] %v9690_v21  ;;  %v9727_v16 = vsub.f32 %v9546_v5, %v12605_v61  ;;  %v9729_v21 = vpop.xlane.xlu0 %3485  ;;  %v9733_v4 = vsub.f32 %v9549_v17, %v12608_v1  ;;  %v12614_v52 = vld [vmem:[#allocation133_spill] sm:$0xff]  ;;  %5753 = vlog2.f32 %v12688_v45 }
 0x5f1   : > { %12596 = vst [vmem:[#allocation74_spill] sm:$0xff] %v9694_v49  ;;  %12597 = vst [vmem:[#allocation75_spill] sm:$0xff] %v9699_v29  ;;  %v12610_v29 = vld [vmem:[#allocation130_spill] sm:$0xff]  ;;  %v9745_v24 = vsub.f32 %v9565_v26, %v12614_v52  ;;  %v12616_v61 = vld [vmem:[#allocation77_spill] sm:$0xff]  ;;  %v9764_v52 = vsub.f32 %v9595_v20, %v12623_v50  ;;  %v9795_v44 = vmul.f32 %v9534_v0, %v9723_v42 }
 0x5f2   : > { %12598 = vst [vmem:[#allocation80_spill] sm:$0xff] %v9703_v35  ;;  %12599 = vst [vmem:[#allocation79_spill] sm:$0xff] %v9707_v30  ;;  %v9737_v22 = vsub.f32 %v9537_v58, %v12610_v29  ;;  %v9749_v34 = vsub.f32 %v9543_v6, %v12616_v61  ;;  %v12620_v35 = vld [vmem:[#allocation36_spill] sm:$0xff]  ;;  %v9768_v61 = vsub.f32 %v9555_v32, %v12625_v43  ;;  %v12634_v50 = vld [vmem:[#allocation162_spill] sm:$0xff]  ;;  %v3518_v6 = vcvt.f32.s32 %v9106_v39 }
 0x5f3   : > { %12600 = vst [vmem:[#allocation84_spill] sm:$0xff] %v9711_v62  ;;  %12601 = vst [vmem:[#allocation90_spill] sm:$0xff] %v9715_v10  ;;  %v12618_v62 = vld [vmem:[#allocation63_spill] sm:$0xff]  ;;  %v9757_v29 = vsub.f32 %v9552_v53, %v12620_v35  ;;  %v12630_v35 = vld [vmem:[#allocation42_spill] sm:$0xff]  ;;  %v9781_v30 = vsub.f32 %v9578_v13, %v12632_v23  ;;  %v9803_v23 = vmul.f32 %v9534_v0, %v9733_v4  ;;  %v3548_v32 = vcvt.f32.s32 %v9121_v36 }
 0x5f4   : > { %12602 = vst [vmem:[#allocation83_spill] sm:$0xff] %v9719_v40  ;;  %12604 = vst [vmem:[#allocation89_spill] sm:$0xff] %v9723_v42  ;;  %v9741_v40 = vsub.f32 %v9562_v18, %v12612_v38  ;;  %v9753_v1 = vsub.f32 %v9575_v11, %v12618_v62  ;;  %v9760_v38 = vpop.xlane.xlu1 %3710  ;;  %v12627_v10 = vld [vmem:[#allocation15_spill] sm:$0xff]  ;;  %v9777_v49 = vsub.f32 %v9568_v56, %v12630_v35  ;;  %v9944_v18 = vstv %s9887_s12  ;;  %v12689_v26 = vld [vmem:[#allocation273_spill] sm:$0xff] }
 0x5f5   : > { %12606 = vst [vmem:[#allocation26_spill] sm:$0xff] %v9727_v16  ;;  %12607 = vst [vmem:[#allocation95_spill] sm:$0xff] %v9729_v21  ;;  %v9772_v62 = vsub.f32 %v9598_v27, %v12627_v10  ;;  %v9785_v21 = vsub.f32 %v9581_v37, %v12634_v50  ;;  %v12636_v43 = vld [vmem:[#allocation167_spill] sm:$0xff]  ;;  %v9791_v10 = vpop.xlane.xlu0 %3620  ;;  %v9799_v35 = vmul.f32 %v9534_v0, %v9727_v16  ;;  %v9950_v53 = vshll.u32 %v3533_v55, 16  ;;  %v12693_v55 = vld [vmem:[#allocation222_spill] sm:$0xff] }
 0x5f6   : > { %12609 = vst [vmem:[#allocation115_spill] sm:$0xff] %v9733_v4  ;;  %12611 = vst [vmem:[#allocation107_spill] sm:$0xff] %v9737_v22  ;;  %v9807_v50 = vmul.f32 %v9534_v0, %v9737_v22  ;;  %v9815_v42 = vmul.f32 %v9534_v0, %v9745_v24  ;;  %v9819_v16 = vmul.f32 %v9534_v0, %v9749_v34  ;;  %v9955_v60 = vshll.u32 %v3518_v6, 16  ;;  %v12694_v6 = vld [vmem:[#allocation274_spill] sm:$0xff]  ;;  %v12696_v45 = vld [vmem:[#allocation201_spill] sm:$0xff] }
 0x5f7   : > { %12613 = vst [vmem:[#allocation123_spill] sm:$0xff] %v9741_v40  ;;  %12615 = vst [vmem:[#allocation41_spill] sm:$0xff] %v9745_v24  ;;  %v9823_v4 = vmul.f32 %v9534_v0, %v9753_v1  ;;  %v9829_v22 = vmul.f32 %v9534_v0, %v9757_v29  ;;  %v9845_v24 = vmul.f32 %v9534_v0, %v9777_v49  ;;  %v3653_v36 = vcvt.f32.s32 %v9159_v12  ;;  %v12704_v27 = vld [vmem:[#allocation278_spill] sm:$0xff] }
 0x5f8   : > { %12617 = vst [vmem:[#allocation114_spill] sm:$0xff] %v9749_v34  ;;  %12619 = vst [vmem:[#allocation122_spill] sm:$0xff] %v9753_v1  ;;  %v9841_v34 = vmul.f32 %v9534_v0, %v9772_v62  ;;  %5755 = vlog2.f32 %v12689_v26  ;;  %v12698_v26 = vld [vmem:[#allocation275_spill] sm:$0xff]  ;;  %v12710_v1 = vld [vmem:[#allocation236_spill] sm:$0xff] }
 0x5f9   : > { %12621 = vst [vmem:[#allocation85_spill] sm:$0xff] %v9757_v29  ;;  %12622 = vst [vmem:[#allocation124_spill] sm:$0xff] %v9760_v38  ;;  %v9789_v38 = vsub.f32 %v9584_v46, %v12636_v43  ;;  %v9811_v43 = vmul.f32 %v9534_v0, %v9741_v40  ;;  %v9833_v40 = vmul.f32 %v9534_v0, %v9764_v52  ;;  %5757 = vlog2.f32 %v12694_v6  ;;  %v12703_v6 = vld [vmem:[#allocation147_spill] sm:$0xff]  ;;  %v12711_v20 = vld [vmem:[#allocation242_spill] sm:$0xff] }
 0x5fa   : > { %12624 = vst [vmem:[#allocation44_spill] sm:$0xff] %v9764_v52  ;;  %12626 = vst [vmem:[#allocation127_spill] sm:$0xff] %v9768_v61  ;;  %v9849_v29 = vmul.f32 %v9534_v0, %v9781_v30  ;;  %5759 = vlog2.f32 %v12698_v26  ;;  %v3637_v5 = vcvt.f32.s32 %v12703_v6  ;;  %v12709_v6 = vld [vmem:[#allocation282_spill] sm:$0xff]  ;;  %v12726_v52 = vmov 0.0  }
 0x5fb   : > { %12628 = vst [vmem:[#allocation28_spill] sm:$0xff] %v9772_v62  ;;  %12631 = vst [vmem:[#allocation128_spill] sm:$0xff] %v9777_v49  ;;  %v3488_v62 = vcvt.f32.s32 %v12682_v31  ;;  %v12712_v49 = vld [vmem:[#allocation228_spill] sm:$0xff] }
 0x5fc   : > { %12633 = vst [vmem:[#allocation92_spill] sm:$0xff] %v9781_v30  ;;  %12635 = vst [vmem:[#allocation117_spill] sm:$0xff] %v9785_v21 }
 0x5fd   : > { %12637 = vst [vmem:[#allocation106_spill] sm:$0xff] %v9789_v38  ;;  %12638 = vst [vmem:[#allocation132_spill] sm:$0xff] %v9795_v44  ;;  %v9948_v51 = vshll.u32 %v3488_v62, 16  ;;  %v12691_v62 = vld [vmem:[#allocation226_spill] sm:$0xff] }
 0x5fe   : > { %12639 = vst [vmem:[#allocation30_spill] sm:$0xff] %v9799_v35  ;;  %12640 = vst [vmem:[#allocation113_spill] sm:$0xff] %v9803_v23  ;;  %v9825_v35 = vpop.xlane.xlu1 %3800  ;;  %v9859_v23 = vpop.xlane.xlu0 %3695 }
 0x5ff   : > { %12641 = vst [vmem:[#allocation116_spill] sm:$0xff] %v9807_v50  ;;  %12642 = vst [vmem:[#allocation46_spill] sm:$0xff] %v9811_v43  ;;  %v9837_v50 = vmul.f32 %v9534_v0, %v9768_v61  ;;  %v9857_v61 = vmul.f32 %v9534_v0, %v9789_v38  ;;  %v12686_v38 = vld [vmem:[#allocation219_spill] sm:$0xff] }
 0x600   : > { %12643 = vst [vmem:[#allocation98_spill] sm:$0xff] %v9815_v42  ;;  %12644 = vst [vmem:[#allocation32_spill] sm:$0xff] %v9819_v16  ;;  %v9853_v16 = vmul.f32 %v9534_v0, %v9785_v21  ;;  %v12659_v0 = vld [vmem:[#allocation22_spill] sm:$0xff]  ;;  %v3503_v21 = vcvt.f32.s32 %v9069_v9 }
 0x601   : > { %12645 = vst [vmem:[#allocation121_spill] sm:$0xff] %v9823_v4  ;;  %12646 = vst [vmem:[#allocation34_spill] sm:$0xff] %v9829_v22  ;;  %v3713_v4 = vcvt.f32.s32 %v12710_v1 }
 0x602   : > { %12647 = vst [vmem:[#allocation129_spill] sm:$0xff] %v9833_v40  ;;  %12648 = vst [vmem:[#allocation136_spill] sm:$0xff] %v9837_v50  ;;  %v9877_v22 = vpop.xlane.xlu1 %3830  ;;  %v5746_v50 = vpop.eup %5745  ;;  %v9946_v48 = vshll.u32 %v3503_v21, 16 }
 0x603   : > { %12649 = vst [vmem:[#allocation130_spill] sm:$0xff] %v9841_v34  ;;  %12650 = vst [vmem:[#allocation137_spill] sm:$0xff] %v9845_v24  ;;  %v2987_v17 = vmul.f32 0.6931472, %v5746_v50  ;;  %v9911_v59 = vpop.xlane.xlu0 %3740  ;;  %v5748_v42 = vpop.eup %5747  ;;  %v9969_v50 = vshll.u32 %v3548_v32, 16  ;;  %v12702_v32 = vld [vmem:[#allocation227_spill] sm:$0xff] }
 0x604   : > { %12651 = vst [vmem:[#allocation133_spill] sm:$0xff] %v9849_v29  ;;  %12652 = vst [vmem:[#allocation77_spill] sm:$0xff] %v9853_v16  ;;  %v5750_v3 = vpop.eup %5749  ;;  %v2985_v9 = vmul.f32 0.6931472, %v5748_v42  ;;  %v3668_v46 = vcvt.f32.s32 %v12702_v32  ;;  %v3682_v29 = vcvt.f32.s32 %v12713_v57  ;;  %v3714_v11 = vshll.u32 %v3713_v4, 16 }
 0x605   : > { %12653 = vst [vmem:[#allocation63_spill] sm:$0xff] %v9857_v61  ;;  %v3039_v61 = vadd.f32 %v2987_v17, %v12686_v38  ;;  %v2967_v39 = vmul.f32 0.6931472, %v5750_v3  ;;  %v3623_v17 = vcvt.f32.s32 %v9140_v7  ;;  %v9957_v38 = vshll.u32 %v3563_v2, 16  ;;  %v12690_v3 = vld [vmem:[#allocation277_spill] sm:$0xff]  ;;  %v12695_v2 = vld [vmem:[#allocation279_spill] sm:$0xff] }
 0x606   : > { %v9913_v63 = vpop.xlane.xlu1 %3815  ;;  %v3638_v21 = vcvt.f32.s32 %v12690_v3  ;;  %v3038_v56 = vadd.f32 %v2985_v9, %v12693_v55  ;;  %v3743_v34 = vcvt.f32.s32 %v12695_v2  ;;  %v12699_v3 = vld [vmem:[#allocation223_spill] sm:$0xff]  ;;  %v9981_v9 = vshll.u32 %v3653_v36, 16  ;;  %v12701_v55 = vld [vmem:[#allocation276_spill] sm:$0xff]  ;;  %v12707_v36 = vld [vmem:[#allocation221_spill] sm:$0xff] }
 0x607   : > { %v9953_v42 = vpop.xlane.xlu0 %3725  ;;  %v9964_v24 = vsub.f32 %v3039_v61, %v12691_v62  ;;  %v9974_v40 = vadd.f32 %v2967_v39, %v12696_v45  ;;  %v9976_v12 = vshll.u32 %v3623_v17, 16  ;;  %v3683_v61 = vcvt.f32.s32 %v12699_v3  ;;  %v12700_v62 = vld [vmem:[#allocation225_spill] sm:$0xff] }
 0x608   : > { %v3728_v16 = vcvt.f32.s32 %v12700_v62  ;;  %5761 = vlog2.f32 %v12701_v55  ;;  %v3639_v2 = vshll.u32 %v3638_v21, 16  ;;  %v12705_v17 = vld [vmem:[#allocation233_spill] sm:$0xff]  ;;  %v9997_v62 = vshll.u32 %v3743_v34, 16  ;;  %v12708_v55 = vld [vmem:[#allocation234_spill] sm:$0xff] }
 0x609   : > { %12692 = vst [vmem:[#allocation36_spill] sm:$0xff] %v9964_v24  ;;  %12697 = vst [vmem:[#allocation13_spill] sm:$0xff] %v9974_v40  ;;  %5763 = vlog2.f32 %v12704_v27  ;;  %v4064_v39 = vsub.f32 %v9964_v24, %v9944_v18  ;;  %v9990_v45 = vsub.f32 %v3038_v56, %v12705_v17  ;;  %v3773_v32 = vcvt.f32.s32 %v12708_v55 }
 0x60a   : > { %v9938_v31 = vpop.xlane.xlu1 %3860  ;;  %5765 = vlog2.f32 %v12707_v36  ;;  %v3878_v21 = vcvt.f32.s32 %v12709_v6  ;;  %v3684_v40 = vshll.u32 %v3683_v61, 16  ;;  %v10001_v27 = vshll.u32 %v3728_v16, 16  ;;  %v12715_v16 = vld [vmem:[#allocation245_spill] sm:$0xff] }
 0x60b   : > { %12706 = vst [vmem:[#allocation38_spill] sm:$0xff] %v9990_v45  ;;  %v9992_v26 = vpop.xlane.xlu0 %3770  ;;  %v3698_v56 = vcvt.f32.s32 %v12711_v20  ;;  %v3669_v17 = vshll.u32 %v3668_v46, 16  ;;  %5767 = vlog2.f32 %v12712_v49  ;;  %v3640_v37 = vadd.s32 %v3639_v2, %v3637_v5  ;;  %v12716_v6 = vld [vmem:[#allocation253_spill] sm:$0xff]  ;;  %v5752_v20 = vpop.eup %5751  ;;  %v12717_v5 = vld [vmem:[#allocation283_spill] sm:$0xff] }
 0x60c   : > { %v12714_v34 = vsub.f32 %v12671_v8, %v9516_v54  ;;  %v4063_v61 = vsub.f32 %v9990_v45, %v9944_v18  ;;  %v3758_v55 = vcvt.f32.s32 %v12715_v16  ;;  %5769 = vlog2.f32 %v12716_v6  ;;  %v12718_v8 = vld [vmem:[#allocation252_spill] sm:$0xff]  ;;  %v10027_v13 = vpop.eup %5753 }
 0x60d   : > { %v10016_v46 = vshll.u32 %v3773_v32, 16  ;;  %v3879_v49 = vshll.u32 %v3878_v21, 16  ;;  %v3923_v2 = vcvt.f32.s32 %v12717_v5  ;;  %v10019_v43 = vshll.u32 %v3698_v56, 16  ;;  %v12719_v16 = vld [vmem:[#allocation96_spill] sm:$0xff] }
 0x60e   : > { %v9967_v7 = vpop.xlane.xlu1 %3845  ;;  %v10010_v36 = vmul.f32 %v4064_v39, %v12714_v34  ;;  %v3803_v54 = vcvt.f32.s32 %v12718_v8  ;;  %v3667_v39 = vcvt.f32.s32 %v9666_v25  ;;  %5771 = vlog2.f32 %v12719_v16  ;;  %v12720_v6 = vld [vmem:[#allocation112_spill] sm:$0xff]  ;;  %v10040_v8 = vpop.eup %5755 }
 0x60f   : > { %v10023_v34 = vpop.xlane.xlu0 %3755  ;;  %vm3966_vm2 = vcmp.eq.s32.totalorder %v3640_v37, %v12720_v6  ;;  %v3685_v44 = vadd.s32 %v3684_v40, %v3682_v29  ;;  %v12721_v4 = vsub.f32 %v12659_v0, %v9510_v28  ;;  %v2991_v25 = vmul.f32 0.6931472, %v5752_v20  ;;  %12722 = vst [vmem:[#allocation15_spill] sm:$0xff] %v10040_v8  ;;  %v12723_v40 = vld [vmem:[#allocation284_spill] sm:$0xff]  ;;  %v10044_v58 = vpop.eup %5757  ;;  %v12728_v20 = vld [vmem:[#allocation145_spill] sm:$0xff]  ;;  %v12732_v6 = vld [vmem:[#allocation231_spill] sm:$0xff] }
 0x610   : > { %v10031_v21 = vadd.f32 %v10010_v36, %v9964_v24  ;;  %v3924_v16 = vshll.u32 %v3923_v2, 16  ;;  %v3908_v29 = vcvt.f32.s32 %v12723_v40  ;;  %12725 = vst [vmem:[#allocation271_spill] sm:$0xff] %v10044_v58  ;;  %v10046_v41 = vshll.u32 %v3803_v54, 16  ;;  %v12729_v2 = vld [vmem:[#allocation124_spill] sm:$0xff]  ;;  %v12733_v40 = vld [vmem:[#allocation29_spill] sm:$0xff] }
 0x611   : > { %v10036_v56 = vmul.f32 %v4063_v61, %v12721_v4  ;;  %v10051_v28 = vsel %vm3966_vm2, 1.0, %v12726_v52  ;;  %v3670_v0 = vadd.s32 %v3669_v17, %v3667_v39  ;;  %vm3969_vm1 = vcmp.eq.s32.totalorder %v3685_v44, %v12728_v20  ;;  %v12731_v17 = vld [vmem:[#allocation230_spill] sm:$0xff]  ;;  %v12735_v4 = vld [vmem:[#allocation65_spill] sm:$0xff] }
 0x612   : > { %v9994_v3 = vpop.xlane.xlu1 %3890  ;;  %v3041_v39 = vadd.f32 %v2991_v25, %v12731_v17  ;;  %5773 = vlog2.f32 %v12732_v6  ;;  %v3909_v19 = vshll.u32 %v3908_v29, 16  ;;  %v5012_v25 = vsel %vm3969_vm1, 1.0, %v12726_v52  ;;  %v12738_v17 = vld [vmem:[#allocation149_spill] sm:$0xff]  ;;  %v12741_v20 = vld [vmem:[#allocation186_spill] sm:$0xff] }
 0x613   : > { %v10066_v37 = vadd.f32 %v10036_v56, %v9990_v45  ;;  %v10071_v24 = vpop.xlane.xlu0 %3785  ;;  %vm3968_vm13 = vcmp.eq.s32.totalorder %v3670_v0, %v12738_v17  ;;  %v3892_v6 = vcvt.f32.s32 %v9994_v3  ;;  %v3697_v29 = vcvt.f32.s32 %v9859_v23  ;;  %v12743_v23 = vld [vmem:[#allocation146_spill] sm:$0xff] }
 0x614   : > { %v12746_v0 = vld [vmem:[#allocation250_spill] sm:$0xff] }
 0x615   : > { %v3863_v17 = vcvt.f32.s32 %v12746_v0 }
 0x616   : > { %v3876_v1 = vpop.xlane.xlu1 %3875 }
 0x617   : > { %v3877_v57 = vcvt.f32.s32 %v3876_v1  ;;  %v10038_v1 = vshll.u32 %v3758_v55, 16  ;;  %v10056_v55 = vpop.eup %5759 }
 0x618   : > { %12727 = vst [vmem:[#allocation42_spill] sm:$0xff] %v10056_v55  ;;  %v3652_v55 = vcvt.f32.s32 %v12741_v20 }
 0x619   : > { %v3880_v32 = vadd.s32 %v3879_v49, %v3877_v57  ;;  %v12724_v49 = vld [vmem:[#allocation105_spill] sm:$0xff] }
 0x61a   : > { %v3921_v5 = vpop.xlane.xlu1 %3920 }
 0x61b   : > { %vm3982_vm7 = vcmp.eq.s32.totalorder %v3880_v32, %v12724_v49  ;;  %v3922_v57 = vcvt.f32.s32 %v3921_v5  ;;  %v3712_v32 = vcvt.f32.s32 %v12729_v2  ;;  %v10062_v5 = vpop.eup %5761  ;;  %v3893_v49 = vcvt.f32.s32 %v12733_v40  ;;  %v3951_v3 = vpop.xlane.xlu0 %3950 }
 0x61c   : > { %v10054_v61 = vsel %vm3982_vm7, 1.0, %v12726_v52  ;;  %12730 = vst [vmem:[#allocation35_spill] sm:$0xff] %v10062_v5  ;;  %v10073_v2 = vpop.eup %5763 }
 0x61d   : > { %v3925_v54 = vadd.s32 %v3924_v16, %v3922_v57  ;;  %12734 = vst [vmem:[#allocation162_spill] sm:$0xff] %v10073_v2  ;;  %v3953_v16 = vcvt.f32.s32 %v12735_v4  ;;  %v12736_v57 = vld [vmem:[#allocation143_spill] sm:$0xff]  ;;  %v10077_v15 = vpop.eup %5765  ;;  %v3715_v45 = vadd.s32 %v3714_v11, %v3712_v32  ;;  %v3894_v44 = vshll.u32 %v3893_v49, 16  ;;  %v12742_v11 = vld [vmem:[#allocation17_spill] sm:$0xff] }
 0x61e   : > { %v3906_v47 = vpop.xlane.xlu1 %3905  ;;  %12737 = vst [vmem:[#allocation167_spill] sm:$0xff] %v10077_v15  ;;  %v10086_v30 = vpop.eup %5767  ;;  %v3938_v32 = vcvt.f32.s32 %v12742_v11  ;;  %v10102_v49 = vsel %vm3968_vm13, 1.0, %v12726_v52 }
 0x61f   : > { %vm3985_vm5 = vcmp.eq.s32.totalorder %v3925_v54, %v12736_v57  ;;  %v3907_v5 = vcvt.f32.s32 %v3906_v47  ;;  %v12739_v47 = vld [vmem:[#allocation212_spill] sm:$0xff]  ;;  %v12740_v57 = vld [vmem:[#allocation255_spill] sm:$0xff]  ;;  %v5770_v58 = vpop.eup %5769  ;;  %v3954_v33 = vshll.u32 %v3953_v16, 16  ;;  %v12745_v16 = vld [vmem:[#allocation142_spill] sm:$0xff] }
 0x620   : > { %v5028_v40 = vsel %vm3985_vm5, 1.0, %v12726_v52  ;;  %v10089_v54 = vsub.f32 %v3041_v39, %v12739_v47  ;;  %v3788_v15 = vcvt.f32.s32 %v12740_v57  ;;  %vm3971_vm8 = vcmp.eq.s32.totalorder %v3715_v45, %v12745_v16 }
 0x621   : > { %v5409_v2 = vpack.i.bf16 %v5012_v25, %v5028_v40  ;;  %v3910_v4 = vadd.s32 %v3909_v19, %v3907_v5  ;;  %v3952_v19 = vcvt.f32.s32 %v3951_v3  ;;  %v12744_v5 = vld [vmem:[#allocation239_spill] sm:$0xff]  ;;  %v3895_v25 = vadd.s32 %v3894_v44, %v3892_v6 }
 0x622   : > { %v10093_v8 = vpop.xlane.xlu1 %2869  ;;  %v3833_v39 = vcvt.f32.s32 %v12744_v5  ;;  %v3700_v47 = vadd.s32 %v10019_v43, %v3697_v29  ;;  %v10113_v20 = vmul.f32 0.6931472, %v5770_v58  ;;  %v10115_v3 = vshll.u32 %v3788_v15, 16  ;;  %v12749_v5 = vld [vmem:[#allocation140_spill] sm:$0xff] }
 0x623   : > { %vm3984_vm14 = vcmp.eq.s32.totalorder %v3910_v4, %v12743_v23  ;;  %5410 = vrot.lane.b32.xlu1 %v5409_v2, %s5958_s18  ;;  %v3955_v57 = vadd.s32 %v3954_v33, %v3952_v19  ;;  %v10111_v2 = vpop.eup %5771  ;;  %v3655_v6 = vadd.s32 %v9981_v9, %v3652_v55  ;;  %v3939_v11 = vshll.u32 %v3938_v32, 16  ;;  %v12747_v23 = vld [vmem:[#allocation138_spill] sm:$0xff]  ;;  %v12750_v32 = vld [vmem:[#allocation257_spill] sm:$0xff] }
 0x624   : > { %v10105_v40 = vsel %vm3984_vm14, 1.0, %v12726_v52  ;;  %v3832_v45 = vcvt.f32.s32 %v9877_v22  ;;  %v5014_v29 = vsel %vm3971_vm8, 1.0, %v12726_v52  ;;  %v3862_v33 = vcvt.f32.s32 %v9938_v31  ;;  %v12748_v19 = vld [vmem:[#allocation150_spill] sm:$0xff] }
 0x625   : > { %v5424_v4 = vpack.i.bf16 %v10102_v49, %v10105_v40  ;;  %vm3987_vm15 = vcmp.eq.s32.totalorder %v3955_v57, %v12747_v23  ;;  %vm3983_vm12 = vcmp.eq.s32.totalorder %v3895_v25, %v12748_v19  ;;  %v3834_v58 = vshll.u32 %v3833_v39, 16  ;;  %v12751_v57 = vld [vmem:[#allocation110_spill] sm:$0xff]  ;;  %v12752_v19 = vld [vmem:[#allocation139_spill] sm:$0xff]  ;;  %v12770_v40 = vld [vmem:[#allocation176_spill] sm:$0xff] }
 0x626   : > { %v3936_v44 = vpop.xlane.xlu1 %3935  ;;  %v5030_v15 = vsel %vm3987_vm15, 1.0, %v12726_v52  ;;  %vm3970_vm0 = vcmp.eq.s32.totalorder %v3700_v47, %v12749_v5  ;;  %v3864_v55 = vshll.u32 %v3863_v17, 16  ;;  %v3848_v0 = vcvt.f32.s32 %v12750_v32  ;;  %v12758_v32 = vld [vmem:[#allocation45_spill] sm:$0xff] }
 0x627   : > { %v3937_v43 = vcvt.f32.s32 %v3936_v44  ;;  %v5414_v16 = vpack.i.bf16 %v5014_v29, %v5030_v15  ;;  %v3622_v22 = vcvt.f32.s32 %v9791_v10  ;;  %vm3967_vm9 = vcmp.eq.s32.totalorder %v3655_v6, %v12751_v57  ;;  %v10129_v44 = vpop.eup %5773  ;;  %v12754_v6 = vld [vmem:[#allocation21_spill] sm:$0xff]  ;;  %v12755_v29 = vld [vmem:[#allocation259_spill] sm:$0xff] }
 0x628   : > { %v3802_v31 = vcvt.f32.s32 %v9825_v35  ;;  %v3835_v23 = vadd.s32 %v3834_v58, %v3832_v45  ;;  %v5026_v25 = vsel %vm3983_vm12, 1.0, %v12726_v52  ;;  %v5013_v39 = vsel %vm3970_vm0, 1.0, %v12726_v52 }
 0x629   : > { %v3940_v9 = vadd.s32 %v3939_v11, %v3937_v43  ;;  %5415 = vrot.lane.b32.xlu1 %v5414_v16, %s5958_s18  ;;  %v3865_v47 = vadd.s32 %v3864_v55, %v3862_v33  ;;  %v3847_v17 = vcvt.f32.s32 %v9967_v7  ;;  %v12753_v11 = vld [vmem:[#allocation235_spill] sm:$0xff]  ;;  %v3562_v43 = vcvt.f32.s32 %v12754_v6 }
 0x62a   : > { %5775 = vlog2.f32 %v12753_v11  ;;  %v5010_v35 = vsel %vm3967_vm9, 1.0, %v12726_v52  ;;  %v3818_v15 = vcvt.f32.s32 %v12755_v29  ;;  %v3849_v58 = vshll.u32 %v3848_v0, 16  ;;  %v12757_v55 = vld [vmem:[#allocation99_spill] sm:$0xff]  ;;  %v12765_v11 = vld [vmem:[#allocation101_spill] sm:$0xff]  ;;  %v12767_v29 = vld [vmem:[#allocation88_spill] sm:$0xff] }
 0x62b   : > { %vm3986_vm10 = vcmp.eq.s32.totalorder %v3940_v9, %v12752_v19  ;;  %v3625_v5 = vadd.s32 %v9976_v12, %v3622_v22  ;;  %v5429_v16 = vpack.i.bf16 %v5010_v35, %v5026_v25  ;;  %v12756_v9 = vld [vmem:[#allocation91_spill] sm:$0xff]  ;;  %v3805_v33 = vadd.s32 %v10046_v41, %v3802_v31  ;;  %v12759_v19 = vld [vmem:[#allocation76_spill] sm:$0xff]  ;;  %v12761_v22 = vld [vmem:[#allocation173_spill] sm:$0xff] }
 0x62c   : > { %v5029_v10 = vsel %vm3986_vm10, 1.0, %v12726_v52  ;;  %5777 = vlog2.f32 %v12756_v9  ;;  %v3772_v7 = vcvt.f32.s32 %v9992_v26  ;;  %vm3979_vm6 = vcmp.eq.s32.totalorder %v3835_v23, %v12757_v55  ;;  %v12760_v12 = vld [vmem:[#allocation196_spill] sm:$0xff]  ;;  %v12763_v31 = vld [vmem:[#allocation166_spill] sm:$0xff] }
 0x62d   : > { %v5419_v45 = vpack.i.bf16 %v5013_v39, %v5029_v10  ;;  %5779 = vlog2.f32 %v12758_v32  ;;  %v3817_v57 = vcvt.f32.s32 %v9913_v63  ;;  %vm3981_vm11 = vcmp.eq.s32.totalorder %v3865_v47, %v12759_v19  ;;  %5430 = vrot.lane.b32.xlu1 %v5429_v16, %s5958_s18  ;;  %v12762_v26 = vld [vmem:[#allocation104_spill] sm:$0xff]  ;;  %v12764_v39 = vld [vmem:[#allocation19_spill] sm:$0xff] }
 0x62e   : > { %v3850_v0 = vadd.s32 %v3849_v58, %v3847_v17  ;;  %5781 = vlog2.f32 %v12760_v12  ;;  %v3532_v25 = vcvt.f32.s32 %v12761_v22  ;;  %v3565_v41 = vadd.s32 %v9957_v38, %v3562_v43  ;;  %v12766_v17 = vld [vmem:[#allocation109_spill] sm:$0xff]  ;;  %v12769_v58 = vld [vmem:[#allocation94_spill] sm:$0xff]  ;;  %v12772_v16 = vld [vmem:[#allocation40_spill] sm:$0xff] }
 0x62f   : > { %5420 = vrot.lane.b32.xlu0 %v5419_v45, %s5958_s18  ;;  %vm3963_vm4 = vcmp.eq.s32.totalorder %v12763_v31, %v12762_v26  ;;  %v3819_v23 = vshll.u32 %v3818_v15, 16  ;;  %v3502_v10 = vcvt.f32.s32 %v12764_v39  ;;  %vm3965_vm3 = vcmp.eq.s32.totalorder %v3625_v5, %v12765_v11  ;;  %v12771_v5 = vld [vmem:[#allocation118_spill] sm:$0xff]  ;;  %v12775_v19 = vld [vmem:[#allocation103_spill] sm:$0xff] }
 0x630   : > { %v5022_v63 = vsel %vm3979_vm6, 1.0, %v12726_v52  ;;  %v3742_v47 = vcvt.f32.s32 %v9911_v59  ;;  %vm3977_vm2 = vcmp.eq.s32.totalorder %v3805_v33, %v12766_v17  ;;  %v3775_v6 = vadd.s32 %v10016_v46, %v3772_v7  ;;  %v12778_v26 = vld [vmem:[#allocation178_spill] sm:$0xff]  ;;  %v12780_v39 = vld [vmem:[#allocation119_spill] sm:$0xff]  ;;  %v12781_v17 = vld [vmem:[#allocation100_spill] sm:$0xff] }
 0x631   : > { %v5024_v35 = vsel %vm3981_vm11, 1.0, %v12726_v52  ;;  %v5006_v38 = vsel %vm3963_vm4, 1.0, %v12726_v52  ;;  %v3787_v43 = vcvt.f32.s32 %v10071_v24  ;;  %v3820_v45 = vadd.s32 %v3819_v23, %v3817_v57  ;;  %v12774_v57 = vld [vmem:[#allocation81_spill] sm:$0xff] }
 0x632   : > { %vm3980_vm7 = vcmp.eq.s32.totalorder %v3850_v0, %v12767_v29  ;;  %v12768_v59 = vpack.i.bf16 %v10051_v28, %v10054_v61  ;;  %v3535_v46 = vadd.s32 %v9950_v53, %v3532_v25  ;;  %v5008_v15 = vsel %vm3965_vm3, 1.0, %v12726_v52  ;;  %v12773_v61 = vld [vmem:[#allocation125_spill] sm:$0xff] }
 0x633   : > { %5425 = vrot.lane.b32.xlu0 %v5424_v4, %s5958_s18  ;;  %vm3961_vm1 = vcmp.eq.s32.totalorder %v3565_v41, %v12769_v58  ;;  %v5449_v49 = vpack.i.bf16 %v5006_v38, %v5022_v63  ;;  %v3547_v4 = vcvt.f32.s32 %v12770_v40  ;;  %vm3964_vm5 = vcmp.eq.s32.totalorder %v12772_v16, %v12771_v5  ;;  %v12777_v41 = vld [vmem:[#allocation120_spill] sm:$0xff]  ;;  %v12779_v23 = vld [vmem:[#allocation161_spill] sm:$0xff]  ;;  %v12783_v38 = vld [vmem:[#allocation126_spill] sm:$0xff] }
 0x634   : > { %5435 = vrot.lane.b32.xlu1 %v12768_v59, %s5958_s18  ;;  %v5020_v24 = vsel %vm3977_vm2, 1.0, %v12726_v52  ;;  %v5439_v9 = vpack.i.bf16 %v5008_v15, %v5024_v35  ;;  %v3505_v33 = vadd.s32 %v9946_v48, %v3502_v10  ;;  %v3745_v28 = vadd.s32 %v9997_v62, %v3742_v47  ;;  %v12776_v48 = vld [vmem:[#allocation165_spill] sm:$0xff]  ;;  %v12785_v15 = vld [vmem:[#allocation79_spill] sm:$0xff] }
 0x635   : > { %vm3975_vm13 = vcmp.eq.s32.totalorder %v3775_v6, %v12773_v61  ;;  %v5023_v53 = vsel %vm3980_vm7, 1.0, %v12726_v52  ;;  %v5004_v7 = vsel %vm3961_vm1, 1.0, %v12726_v52  ;;  %v3757_v55 = vcvt.f32.s32 %v10023_v34  ;;  %v12782_v6 = vld [vmem:[#allocation95_spill] sm:$0xff] }
 0x636   : > { %v3790_v32 = vadd.s32 %v10115_v3, %v3787_v43  ;;  %vm3978_vm14 = vcmp.eq.s32.totalorder %v3820_v45, %v12774_v57  ;;  %vm3959_vm8 = vcmp.eq.s32.totalorder %v3535_v46, %v12775_v19  ;;  %v3517_v62 = vcvt.f32.s32 %v12776_v48  ;;  %v12792_v57 = vld [vmem:[#allocation246_spill] sm:$0xff] }
 0x637   : > { %5450 = vrot.lane.b32.xlu0 %v5449_v49, %s5958_s18  ;;  %v5007_v0 = vsel %vm3964_vm5, 1.0, %v12726_v52  ;;  %v5459_v12 = vpack.i.bf16 %v5004_v7, %v5020_v24  ;;  %v5776_v22 = vpop.eup %5775  ;;  %v3550_v25 = vadd.s32 %v9969_v50, %v3547_v4  ;;  %vm3962_vm15 = vcmp.eq.s32.totalorder %v12778_v26, %v12777_v41  ;;  %v12786_v49 = vld [vmem:[#allocation238_spill] sm:$0xff]  ;;  %v12787_v4 = vld [vmem:[#allocation241_spill] sm:$0xff]  ;;  %v12796_v41 = vld [vmem:[#allocation131_spill] sm:$0xff] }
 0x638   : > { %5440 = vrot.lane.b32.xlu1 %v5439_v9, %s5958_s18  ;;  %v5018_v34 = vsel %vm3975_vm13, 1.0, %v12726_v52  ;;  %v5444_v3 = vpack.i.bf16 %v5007_v0, %v5023_v53  ;;  %vm4344_vm12 = vcmask 7168   ;;  %v2995_v31 = vmul.f32 0.6931472, %v10129_v44  ;;  %v12793_v0 = vld [vmem:[#allocation23_spill] sm:$0xff]  ;;  %v12797_v26 = vld [vmem:[#allocation181_spill] sm:$0xff] }
 0x639   : > { %5783 = vlog2.f32 %v12779_v23  ;;  %vm3973_vm0 = vcmp.eq.s32.totalorder %v3745_v28, %v12780_v39  ;;  %v5021_v10 = vsel %vm3978_vm14, 1.0, %v12726_v52  ;;  %v5778_v11 = vpop.eup %5777  ;;  %v5002_v50 = vsel %vm3959_vm8, 1.0, %v12726_v52 }
 0x63a   : > { %v3727_v63 = vcvt.f32.s32 %v9953_v42  ;;  %v3760_v47 = vadd.s32 %v10038_v1, %v3757_v55  ;;  %vm3976_vm9 = vcmp.eq.s32.totalorder %v3790_v32, %v12781_v17  ;;  %v5780_v44 = vpop.eup %5779  ;;  %v3487_v35 = vcvt.f32.s32 %v12782_v6  ;;  %v12784_v1 = vld [vmem:[#allocation111_spill] sm:$0xff] }
 0x63b   : > { %5460 = vrot.lane.b32.xlu0 %v5459_v12, %s5958_s18  ;;  %vm3957_vm10 = vcmp.eq.s32.totalorder %v3505_v33, %v12783_v38  ;;  %v5005_v43 = vsel %vm3962_vm15, 1.0, %v12726_v52  ;;  %v5469_v45 = vpack.i.bf16 %v5002_v50, %v5018_v34  ;;  %v10217_v29 = vpop.eup %5781  ;;  %v3520_v42 = vadd.s32 %v9955_v60, %v3517_v62  ;;  %v12788_v33 = vld [vmem:[#allocation134_spill] sm:$0xff]  ;;  %v12804_v38 = vld [vmem:[#allocation264_spill] sm:$0xff] }
 0x63c   : > { %5445 = vrot.lane.b32.xlu1 %v5444_v3, %s5958_s18  ;;  %vm3960_vm6 = vcmp.eq.s32.totalorder %v3550_v25, %v12784_v1  ;;  %v5016_v59 = vsel %vm3973_vm0, 1.0, %v12726_v52  ;;  %v5454_v46 = vpack.i.bf16 %v5005_v43, %v5021_v10  ;;  %v4194_v58 = vadd.f32 %v10031_v21, %v12785_v15  ;;  %v12789_v21 = vld [vmem:[#allocation74_spill] sm:$0xff]  ;;  %v12800_v10 = vld [vmem:[#allocation135_spill] sm:$0xff]  ;;  %v12806_v1 = vld [vmem:[#allocation185_spill] sm:$0xff] }
 0x63d   : > { %v3040_v40 = vadd.f32 %v10113_v20, %v12786_v49  ;;  %v3043_v5 = vadd.f32 %v2995_v31, %v12787_v4  ;;  %v5019_v16 = vsel %vm3976_vm9, 1.0, %v12726_v52  ;;  %vm4377_vm11 = vcmask 15360   ;;  %v12790_v20 = vld [vmem:[#allocation64_spill] sm:$0xff]  ;;  %v12794_v12 = vld [vmem:[#allocation214_spill] sm:$0xff]  ;;  %v12798_v31 = vld [vmem:[#allocation141_spill] sm:$0xff] }
 0x63e   : > { %v2993_v60 = vmul.f32 0.6931472, %v5776_v22  ;;  %v5000_v24 = vsel %vm3957_vm10, 1.0, %v12726_v52  ;;  %v3730_v9 = vadd.s32 %v10001_v27, %v3727_v63  ;;  %vm3974_vm4 = vcmp.eq.s32.totalorder %v3760_v47, %v12788_v33  ;;  %v12791_v27 = vld [vmem:[#allocation108_spill] sm:$0xff]  ;;  %v12802_v47 = vld [vmem:[#allocation251_spill] sm:$0xff]  ;;  %v12809_v4 = vld [vmem:[#allocation42_spill] sm:$0xff] }
 0x63f   : > { %5470 = vrot.lane.b32.xlu0 %v5469_v45, %s5958_s18  ;;  %v4193_v28 = vadd.f32 %v10066_v37, %v12789_v21  ;;  %5785 = vlog2.f32 %v12790_v20  ;;  %v5003_v61 = vsel %vm3960_vm6, 1.0, %v12726_v52  ;;  %v5479_v53 = vpack.i.bf16 %v5000_v24, %v5016_v59  ;;  %v12805_v45 = vld [vmem:[#allocation204_spill] sm:$0xff]  ;;  %v12807_v59 = vld [vmem:[#allocation271_spill] sm:$0xff]  ;;  %v12811_v33 = vld [vmem:[#allocation169_spill] sm:$0xff] }
 0x640   : > { %5455 = vrot.lane.b32.xlu1 %v5454_v46, %s5958_s18  ;;  %v4066_v7 = vsub.f32 %v10089_v54, %v9944_v18  ;;  %v3490_v55 = vadd.s32 %v9948_v51, %v3487_v35  ;;  %vm3958_vm3 = vcmp.eq.s32.totalorder %v3520_v42, %v12791_v27  ;;  %v5464_v32 = vpack.i.bf16 %v5003_v61, %v5019_v16  ;;  %v12795_v51 = vld [vmem:[#allocation249_spill] sm:$0xff]  ;;  %v12803_v35 = vld [vmem:[#allocation164_spill] sm:$0xff] }
 0x641   : > { %v10246_v19 = vsub.f32 %v3040_v40, %v12792_v57  ;;  %v3019_v48 = vmul.f32 0.6931472, %v5778_v11  ;;  %v5017_v37 = vsel %vm3974_vm4, 1.0, %v12726_v52  ;;  %vm4410_vm2 = vcmask 23552   ;;  %v12801_v11 = vld [vmem:[#allocation170_spill] sm:$0xff]  ;;  %v12813_v61 = vld [vmem:[#allocation265_spill] sm:$0xff] }
 0x642   : > { %v2971_v62 = vmul.f32 0.6931472, %v10027_v13  ;;  %5787 = vlog2.f32 %v12793_v0  ;;  %v10253_v22 = vsub.f32 %v3043_v5, %v12794_v12  ;;  %v3042_v25 = vadd.f32 %v2993_v60, %v12795_v51  ;;  %v12815_v27 = vld [vmem:[#allocation193_spill] sm:$0xff]  ;;  %v12819_v12 = vld [vmem:[#allocation162_spill] sm:$0xff] }
 0x643   : > { %5480 = vrot.lane.b32.xlu0 %v5479_v53, %s5958_s18  ;;  %vm3972_vm7 = vcmp.eq.s32.totalorder %v3730_v9, %v12796_v41  ;;  %5789 = vlog2.f32 %v12797_v26  ;;  %v5001_v34 = vsel %vm3958_vm3, 1.0, %v12726_v52  ;;  %v4356_v13 = vsel %vm4344_vm12, %v4194_v58, %v10010_v36  ;;  %v12808_v58 = vld [vmem:[#allocation15_spill] sm:$0xff]  ;;  %v12810_v9 = vld [vmem:[#allocation102_spill] sm:$0xff] }
 0x644   : > { %5465 = vrot.lane.b32.xlu1 %v5464_v32, %s5958_s18  ;;  %v4355_v3 = vsel %vm4344_vm12, %v4193_v28, %v10036_v56  ;;  %v12799_v23 = vsub.f32 %v12673_v14, %v12798_v31  ;;  %vm3956_vm1 = vcmp.eq.s32.totalorder %v3490_v55, %v12800_v10  ;;  %5791 = vlog2.f32 %v12801_v11  ;;  %v12816_v32 = vld [vmem:[#allocation144_spill] sm:$0xff]  ;;  %v12821_v26 = vld [vmem:[#allocation206_spill] sm:$0xff] }
 0x645   : > { %v5474_v50 = vpack.i.bf16 %v5001_v34, %v5017_v37  ;;  %v4065_v63 = vsub.f32 %v10246_v19, %v9944_v18  ;;  %v3055_v17 = vadd.f32 %v3019_v48, %v12802_v47  ;;  %v3017_v6 = vmul.f32 0.6931472, %v5780_v44  ;;  %v12827_v47 = vld [vmem:[#allocation90_spill] sm:$0xff] }
 0x646   : > { %v10267_v39 = vmul.f32 %v4066_v7, %v12799_v23  ;;  %v5015_v36 = vsel %vm3972_vm7, 1.0, %v12726_v52  ;;  %vm4443_vm5 = vcmask 31744   ;;  %v5784_v56 = vpop.eup %5783  ;;  %v4068_v14 = vsub.f32 %v10253_v22, %v9944_v18  ;;  %v12814_v7 = vld [vmem:[#allocation256_spill] sm:$0xff]  ;;  %v12824_v23 = vld [vmem:[#allocation211_spill] sm:$0xff] }
 0x647   : > { %5793 = vlog2.f32 %v12803_v35  ;;  %v10279_v43 = vsub.f32 %v3042_v25, %v12804_v38  ;;  %v10282_v42 = vadd.f32 %v2971_v62, %v12805_v45  ;;  %v4999_v44 = vsel %vm3956_vm1, 1.0, %v12726_v52  ;;  %v12818_v62 = vld [vmem:[#allocation35_spill] sm:$0xff]  ;;  %v12820_v25 = vld [vmem:[#allocation208_spill] sm:$0xff] }
 0x648   : > { %5475 = vrot.lane.b32.xlu1 %v5474_v50, %s5958_s18  ;;  %5795 = vlog2.f32 %v12806_v1  ;;  %v2975_v46 = vmul.f32 0.6931472, %v12807_v59  ;;  %v2969_v49 = vmul.f32 0.6931472, %v12808_v58  ;;  %v5484_v40 = vpack.i.bf16 %v4999_v44, %v5015_v36  ;;  %v12826_v50 = vld [vmem:[#allocation38_spill] sm:$0xff]  ;;  %v12829_v38 = vld [vmem:[#allocation171_spill] sm:$0xff] }
 0x649   : > { %v2979_v5 = vmul.f32 0.6931472, %v12809_v4  ;;  %vm4476_vm13 = vcmask 39936   ;;  %v4389_v16 = vsel %vm4377_vm11, %v4356_v13, %v12785_v15  ;;  %v4388_v60 = vsel %vm4377_vm11, %v4355_v3, %v12789_v21  ;;  %v12823_v3 = vld [vmem:[#allocation167_spill] sm:$0xff]  ;;  %v12830_v45 = vld [vmem:[#allocation148_spill] sm:$0xff]  ;;  %v12832_v59 = vld [vmem:[#allocation258_spill] sm:$0xff] }
 0x64a   : > { %v4164_v24 = vadd.f32 %v10267_v39, %v10089_v54  ;;  %v12812_v28 = vsub.f32 %v12810_v9, %v12811_v33  ;;  %v10300_v53 = vsub.f32 %v3055_v17, %v12813_v61  ;;  %v3054_v55 = vadd.f32 %v3017_v6, %v12814_v7  ;;  %v12833_v58 = vld [vmem:[#allocation260_spill] sm:$0xff]  ;;  %v10347_v61 = vpop.xlane.xlu0 %3360  ;;  %v12836_v7 = vld [vmem:[#allocation209_spill] sm:$0xff] }
 0x64b   : > { %v12817_v57 = vsub.f32 %v12815_v27, %v12816_v32  ;;  %v4067_v15 = vsub.f32 %v10279_v43, %v9944_v18  ;;  %v3023_v21 = vmul.f32 0.6931472, %v10217_v29  ;;  %v3021_v37 = vmul.f32 0.6931472, %v5784_v56  ;;  %v12825_v29 = vld [vmem:[#allocation36_spill] sm:$0xff]  ;;  %v12828_v56 = vld [vmem:[#allocation266_spill] sm:$0xff] }
 0x64c   : > { %v4097_v20 = vmul.f32 %v4065_v63, %v12812_v28  ;;  %5485 = vrot.lane.b32.xlu1 %v5484_v40, %s5958_s18  ;;  %v2983_v0 = vmul.f32 0.6931472, %v12818_v62  ;;  %v2981_v51 = vmul.f32 0.6931472, %v12819_v12  ;;  %v10313_v41 = vadd.f32 %v2975_v46, %v12820_v25  ;;  %v5786_v13 = vpop.eup %5785  ;;  %v12837_v27 = vld [vmem:[#allocation51_spill] sm:$0xff] }
 0x64d   : > { %v4100_v48 = vmul.f32 %v4068_v14, %v12817_v57  ;;  %v10316_v34 = vadd.f32 %v2969_v49, %v12821_v26  ;;  %v2973_v31 = vmul.f32 0.6931472, %v12823_v3  ;;  %v10320_v10 = vadd.f32 %v2979_v5, %v12824_v23  ;;  %v12838_v57 = vld [vmem:[#allocation97_spill] sm:$0xff]  ;;  %v12840_v62 = vld [vmem:[#allocation207_spill] sm:$0xff]  ;;  %v12843_v26 = vld [vmem:[#allocation132_spill] sm:$0xff] }
 0x64e   : > { %v4422_v11 = vsel %vm4410_vm2, %v4389_v16, %v12825_v29  ;;  %v4421_v63 = vsel %vm4410_vm2, %v4388_v60, %v12826_v50  ;;  %v4196_v17 = vadd.f32 %v4164_v24, %v12827_v47  ;;  %v4163_v6 = vadd.f32 %v4097_v20, %v10246_v19  ;;  %v12834_v16 = vld [vmem:[#allocation215_spill] sm:$0xff]  ;;  %v12835_v24 = vld [vmem:[#allocation217_spill] sm:$0xff] }
 0x64f   : > { %12822 = vst [vmem:[#allocation22_spill] sm:$0xff] %v10316_v34  ;;  %v4080_v36 = vsub.f32 %v10300_v53, %v9944_v18  ;;  %v10331_v14 = vsub.f32 %v3054_v55, %v12828_v56  ;;  %v4166_v35 = vadd.f32 %v4100_v48, %v10253_v22  ;;  %v12831_v1 = vsub.f32 %v12829_v38, %v12830_v45  ;;  %v5788_v40 = vpop.eup %5787  ;;  %v12845_v29 = vld [vmem:[#allocation267_spill] sm:$0xff]  ;;  %v12847_v56 = vld [vmem:[#allocation213_spill] sm:$0xff] }
 0x650   : > { %v3057_v46 = vadd.f32 %v3023_v21, %v12832_v59  ;;  %v3056_v49 = vadd.f32 %v3021_v37, %v12833_v58  ;;  %v2977_v4 = vmul.f32 0.6931472, %v10086_v30  ;;  %v3025_v5 = vmul.f32 0.6931472, %v5786_v13  ;;  %v5790_v33 = vpop.eup %5789  ;;  %v12839_v21 = vld [vmem:[#allocation80_spill] sm:$0xff]  ;;  %v12924_v34 = vld [vmem:[#allocation47_spill] sm:$0xff] }
 0x651   : > { %v4099_v44 = vmul.f32 %v4067_v15, %v12831_v1  ;;  %v10341_v60 = vadd.f32 %v2983_v0, %v12834_v16  ;;  %v10344_v9 = vadd.f32 %v2981_v51, %v12835_v24  ;;  %v3005_v28 = vmul.f32 0.6931472, %v10111_v2  ;;  %v5792_v15 = vpop.eup %5791  ;;  %v12841_v0 = vld [vmem:[#allocation56_spill] sm:$0xff] }
 0x652   : > { %v10350_v55 = vadd.f32 %v2973_v31, %v12836_v7  ;;  %v4455_v32 = vsel %vm4443_vm5, %v4422_v11, %v12837_v27  ;;  %v4454_v30 = vsel %vm4443_vm5, %v4421_v63, %v12838_v57  ;;  %v4195_v37 = vadd.f32 %v4163_v6, %v12839_v21  ;;  %v12844_v31 = vld [vmem:[#allocation261_spill] sm:$0xff]  ;;  %v12846_v6 = vld [vmem:[#allocation263_spill] sm:$0xff]  ;;  %v12849_v1 = vld [vmem:[#allocation232_spill] sm:$0xff] }
 0x653   : > { %v12842_v12 = vsub.f32 %v12840_v62, %v12841_v0  ;;  %v4079_v2 = vsub.f32 %v10331_v14, %v9944_v18  ;;  %v4358_v25 = vsel %vm4344_vm12, %v4196_v17, %v10267_v39  ;;  %v4198_v13 = vadd.f32 %v4166_v35, %v12843_v26  ;;  %v12855_v62 = vld [vmem:[#allocation268_spill] sm:$0xff] }
 0x654   : > { %v4165_v3 = vadd.f32 %v4099_v44, %v10279_v43  ;;  %v10367_v23 = vsub.f32 %v3057_v46, %v12844_v31  ;;  %v10370_v11 = vsub.f32 %v3056_v49, %v12845_v29  ;;  %v5794_v50 = vpop.eup %5793  ;;  %v3011_v63 = vmul.f32 0.6931472, %v5788_v40  ;;  %v12851_v49 = vld [vmem:[#allocation24_spill] sm:$0xff]  ;;  %v12852_v40 = vld [vmem:[#allocation58_spill] sm:$0xff]  ;;  %v12860_v29 = vld [vmem:[#allocation133_spill] sm:$0xff] }
 0x655   : > { %v4112_v51 = vmul.f32 %v4080_v36, %v12842_v12  ;;  %v3058_v36 = vadd.f32 %v3025_v5, %v12846_v6  ;;  %v10374_v38 = vadd.f32 %v2977_v4, %v12847_v56  ;;  %v10377_v45 = vsel %vm4476_vm13, %v4455_v32, 0.0  ;;  %v5796_v39 = vpop.eup %5795  ;;  %v10399_v32 = vpop.xlane.xlu0 %3312  ;;  %v12862_v56 = vld [vmem:[#allocation59_spill] sm:$0xff] }
 0x656   : > { %12848 = vst [vmem:[#allocation189_spill] sm:$0xff] %v10377_v45  ;;  %v3009_v17 = vmul.f32 0.6931472, %v5790_v33  ;;  %v3027_v35 = vmul.f32 0.6931472, %v5792_v15  ;;  %v10380_v59 = vadd.f32 %v3005_v28, %v12849_v1  ;;  %v10383_v46 = vsel %vm4476_vm13, %v4454_v30, 0.0 }
 0x657   : > { %12850 = vst [vmem:[#allocation191_spill] sm:$0xff] %v10383_v46  ;;  %v4178_v58 = vadd.f32 %v4112_v51, %v10300_v53  ;;  %v12853_v5 = vsub.f32 %v12851_v49, %v12852_v40  ;;  %v4391_v4 = vsel %vm4377_vm11, %v4358_v25, %v12827_v47  ;;  %v4357_v24 = vsel %vm4344_vm12, %v4195_v37, %v4097_v20  ;;  %v12854_v33 = vld [vmem:[#allocation84_spill] sm:$0xff]  ;;  %v12856_v47 = vld [vmem:[#allocation237_spill] sm:$0xff]  ;;  %v12857_v20 = vld [vmem:[#allocation243_spill] sm:$0xff] }
 0x658   : > { %v4197_v7 = vadd.f32 %v4165_v3, %v12854_v33  ;;  %v4082_v28 = vsub.f32 %v10367_v23, %v9944_v18  ;;  %v4081_v27 = vsub.f32 %v10370_v11, %v9944_v18  ;;  %v4360_v57 = vsel %vm4344_vm12, %v4198_v13, %v4100_v48  ;;  %v12858_v37 = vld [vmem:[#allocation262_spill] sm:$0xff]  ;;  %v12859_v25 = vld [vmem:[#allocation240_spill] sm:$0xff]  ;;  %v12865_v1 = vld [vmem:[#allocation11_spill] sm:$0xff] }
 0x659   : > { %v10389_v16 = vmul.f32 %v4079_v2, %v12853_v5  ;;  %v3015_v30 = vmul.f32 0.6931472, %v5794_v50  ;;  %v3013_v15 = vmul.f32 0.6931472, %v5796_v39  ;;  %v10403_v0 = vsub.f32 %v3058_v36, %v12855_v62  ;;  %v3358_v50 = vpop.xlane.xlu1 %3357  ;;  %v12861_v36 = vld [vmem:[#allocation199_spill] sm:$0xff]  ;;  %v12868_v5 = vld [vmem:[#allocation244_spill] sm:$0xff] }
 0x65a   : > { %v10406_v12 = vadd.f32 %v3011_v63, %v12856_v47  ;;  %5797 = vlog2.f32 %v12857_v20  ;;  %v3059_v2 = vadd.f32 %v3027_v35, %v12858_v37  ;;  %v10411_v3 = vadd.f32 %v3009_v17, %v12859_v25  ;;  %v12864_v35 = vld [vmem:[#allocation184_spill] sm:$0xff]  ;;  %v12871_v62 = vld [vmem:[#allocation254_spill] sm:$0xff]  ;;  %v12873_v37 = vld [vmem:[#allocation121_spill] sm:$0xff] }
 0x65b   : > { %v4424_v31 = vsel %vm4410_vm2, %v4391_v4, %v10089_v54  ;;  %v4210_v48 = vadd.f32 %v4178_v58, %v12860_v29  ;;  %v4177_v13 = vadd.f32 %v10389_v16, %v10331_v14  ;;  %v4393_v63 = vsel %vm4377_vm11, %v4360_v57, %v12843_v26  ;;  %v12867_v58 = vld [vmem:[#allocation247_spill] sm:$0xff]  ;;  %v12870_v57 = vld [vmem:[#allocation61_spill] sm:$0xff]  ;;  %v12872_v47 = vld [vmem:[#allocation270_spill] sm:$0xff] }
 0x65c   : > { %v4390_v6 = vsel %vm4377_vm11, %v4357_v24, %v12839_v21  ;;  %v12863_v39 = vsub.f32 %v12861_v36, %v12862_v56  ;;  %v12866_v54 = vsub.f32 %v12864_v35, %v12865_v1  ;;  %5799 = vlog2.f32 %v12867_v58  ;;  %v12869_v21 = vld [vmem:[#allocation248_spill] sm:$0xff]  ;;  %v12878_v56 = vld [vmem:[#allocation69_spill] sm:$0xff] }
 0x65d   : > { %v4359_v40 = vsel %vm4344_vm12, %v4197_v7, %v4099_v44  ;;  %v4083_v26 = vsub.f32 %v10403_v0, %v9944_v18  ;;  %v3053_v4 = vadd.f32 %v3015_v30, %v12868_v5  ;;  %v3052_v24 = vadd.f32 %v3013_v15, %v12869_v21  ;;  %v10472_v35 = vpop.xlane.xlu1 %3354  ;;  %v12905_v45 = vld [vmem:[#allocation77_spill] sm:$0xff] }
 0x65e   : > { %v10425_v17 = vmul.f32 %v4082_v28, %v12863_v39  ;;  %v10430_v49 = vmul.f32 %v4081_v27, %v12866_v54  ;;  %v4457_v28 = vsel %vm4443_vm5, %v4424_v31, %v12870_v57  ;;  %5801 = vlog2.f32 %v12871_v62  ;;  %v10444_v27 = vpop.xlane.xlu0 %3309 }
 0x65f   : > { %v10442_v20 = vsub.f32 %v3059_v2, %v12872_v47  ;;  %v4426_v44 = vsel %vm4410_vm2, %v4393_v63, %v10253_v22  ;;  %v4423_v7 = vsel %vm4410_vm2, %v4390_v6, %v10246_v19  ;;  %v10451_v30 = vadd.f32 %v4177_v13, %v12873_v37  ;;  %v12875_v63 = vld [vmem:[#allocation280_spill] sm:$0xff]  ;;  %v12876_v19 = vld [vmem:[#allocation50_spill] sm:$0xff] }
 0x660   : > { %v10455_v15 = vsel %vm4377_vm11, %v4359_v40, %v12854_v33  ;;  %v10458_v25 = vsel %vm4344_vm12, %v4210_v48, %v4112_v51  ;;  %v12874_v2 = vlaneseq  ;;  %v4180_v36 = vadd.f32 %v10425_v17, %v10367_v23  ;;  %v12877_v6 = vld [vmem:[#allocation210_spill] sm:$0xff] }
 0x661   : > { %v4179_v22 = vadd.f32 %v10430_v49, %v10370_v11  ;;  %5803 = vlog2.f32 %v12875_v63  ;;  %v4580_v13 = vadd.s32 128, %v12876_v19  ;;  %v12879_v39 = vsub.f32 %v12877_v6, %v12878_v56 }
 0x662   : > { %v4576_v31 = vshrl.u32 %v12874_v2, 7  ;;  %v4084_v54 = vsub.f32 %v10442_v20, %v9944_v18  ;;  %v10479_v58 = vsub.f32 %v3053_v4, %v10347_v61  ;;  %v10495_v47 = vpop.xlane.xlu0 %3306  ;;  %v12890_v6 = vmov 0 }
 0x663   : > { %v10470_v33 = vmul.f32 %v4083_v26, %v12879_v39  ;;  %v12883_v26 = vmov 0  ;;  %v12895_v39 = vmov 0  ;;  %v12913_v21 = vmov 0 }
 0x664   : > { %v4581_v51 = vmul.u32 8, %v4576_v31  ;;  %v4593_v48 = vadd.s32 1, %v4576_v31  ;;  %v10474_v1 = vadd.s32 8, %v4576_v31  ;;  %v10481_v40 = vadd.s32 16, %v4576_v31 }
 0x665   : > { %v10483_v5 = vadd.s32 24, %v4576_v31  ;;  %v4181_v63 = vadd.f32 %v10470_v33, %v10403_v0  ;;  %vm4542_vm1 = vcmask 56320  }
 0x666   : > { %12880 = vst [vmem:[#allocation269_spill] sm:$0xff] %v10474_v1  ;;  %12881 = vst [vmem:[#allocation219_spill] sm:$0xff] %v10481_v40  ;;  %vm10486_vm14 = vcmp.ge.s32.totalorder %v12876_v19, %v4581_v51  ;;  %vm10490_vm8 = vcmp.ge.s32.totalorder %v4580_v13, %v4581_v51  ;;  %v4597_v57 = vmul.u32 8, %v4593_v48  ;;  %v11795_v62 = vmul.u32 8, %v10474_v1  ;;  %v12898_v51 = vld [vmem:[#allocation197_spill] sm:$0xff]  ;;  %v12899_v48 = vld [vmem:[#allocation12_spill] sm:$0xff] }
 0x667   : > { %12882 = vst [vmem:[#allocation272_spill] sm:$0xff] %v10483_v5  ;;  %v12884_v26 = vsel %vm10486_vm14, 4294967295, %v12883_v26  ;;  %v10498_v61 = vadd.s32 1, %v10474_v1  ;;  %v10502_v2 = vadd.s32 1, %v10481_v40  ;;  %v12900_v31 = vsub.f32 %v12898_v51, %v12899_v48  ;;  %v5798_v46 = vpop.eup %5797 }
 0x668   : > { %12885 = vst [vmem:[#allocation273_spill] sm:$0xff] %v12884_v26  ;;  %vm10508_vm15 = vcmp.lt.s32.totalorder %v12876_v19, %v4597_v57  ;;  %vm10512_vm0 = vcmp.lt.s32.totalorder %v4580_v13, %v4597_v57  ;;  %vm10518_vm9 = vcmp.ge.s32.totalorder %v4580_v13, %v11795_v62  ;;  %v12901_v19 = vmul.u32 8, %v10481_v40 }
 0x669   : > { %12888 = vst [vmem:[#allocation277_spill] sm:$0xff] %v10498_v61  ;;  %12889 = vst [vmem:[#allocation226_spill] sm:$0xff] %v10502_v2  ;;  %v12891_v6 = vsel %vm10508_vm15, 4294967295, %v12890_v6  ;;  %v12896_v39 = vsel %vm10518_vm9, 4294967295, %v12895_v39  ;;  %v10525_v4 = vmul.f32 %v4084_v54, %v12900_v31  ;;  %v12902_v1 = vmov 0  ;;  %v12906_v54 = vld [vmem:[#allocation281_spill] sm:$0xff]  ;;  %v10541_v31 = vpop.xlane.xlu1 %3351 }
 0x66a   : > { %12892 = vst [vmem:[#allocation222_spill] sm:$0xff] %v12891_v6  ;;  %12897 = vst [vmem:[#allocation274_spill] sm:$0xff] %v12896_v39  ;;  %vm10534_vm6 = vcmp.ge.s32.totalorder %v4580_v13, %v12901_v19  ;;  %v4212_v51 = vadd.f32 %v4180_v36, %v12905_v45  ;;  %5805 = vlog2.f32 %v12906_v54  ;;  %v12907_v48 = vmul.u32 8, %v10483_v5  ;;  %v12920_v6 = vld [vmem:[#allocation129_spill] sm:$0xff] }
 0x66b   : > { %vm4609_vm10 = vmand %vm10486_vm14, %vm10508_vm15  ;;  %v12903_v1 = vsel %vm10534_vm6, 4294967295, %v12902_v1  ;;  %v12908_v19 = vmov 0  ;;  %v10554_v62 = vadd.s32 1, %v10483_v5  ;;  %v4078_v36 = vsub.f32 %v10479_v58, %v9944_v18 }
 0x66c   : > { %12904 = vst [vmem:[#allocation279_spill] sm:$0xff] %v12903_v1  ;;  %vm4610_vm4 = vmand %vm10490_vm8, %vm10512_vm0  ;;  %vm10549_vm3 = vcmp.ge.s32.totalorder %v4580_v13, %v12907_v48  ;;  %v10558_v54 = vsub.f32 %v3052_v24, %v3358_v50  ;;  %v12912_v56 = vmul.u32 8, %v10498_v61  ;;  %v5800_v48 = vpop.eup %5799  ;;  %v10569_v40 = vsub.f32 %v10341_v60, %v10399_v32  ;;  %v10586_v32 = vpop.xlane.xlu0 %3303 }
 0x66d   : > { %v12909_v19 = vsel %vm10549_vm3, 4294967295, %v12908_v19  ;;  %12911 = vst [vmem:[#allocation275_spill] sm:$0xff] %v10554_v62  ;;  %v5032_v57 = vsel %vm4610_vm4, 1.0, %v12726_v52  ;;  %v12916_v50 = vmul.u32 8, %v10502_v2  ;;  %v12917_v24 = vmov 0  ;;  %v12921_v52 = vld [vmem:[#allocation130_spill] sm:$0xff] }
 0x66e   : > { %12910 = vst [vmem:[#allocation201_spill] sm:$0xff] %v12909_v19  ;;  %vm10563_vm7 = vcmp.lt.s32.totalorder %v4580_v13, %v12912_v56  ;;  %v4634_v5 = vmul.f32 0.125, %v5032_v57  ;;  %v4211_v26 = vadd.f32 %v4179_v22, %v12920_v6  ;;  %v4213_v61 = vadd.f32 %v4181_v63, %v12921_v52  ;;  %v12987_v19 = vld [vmem:[#allocation22_spill] sm:$0xff] }
 0x66f   : > { %v12914_v21 = vsel %vm10563_vm7, 4294967295, %v12913_v21  ;;  %vm10577_vm8 = vcmp.lt.s32.totalorder %v4580_v13, %v12916_v50  ;;  %v4182_v60 = vadd.f32 %v10525_v4, %v10442_v20  ;;  %v10589_v57 = vsel %vm4476_vm13, %v4457_v28, 0.0  ;;  %v12923_v50 = vld [vmem:[#allocation89_spill] sm:$0xff] }
 0x670   : > { %12915 = vst [vmem:[#allocation223_spill] sm:$0xff] %v12914_v21  ;;  %v12918_v24 = vsel %vm10577_vm8, 4294967295, %v12917_v24  ;;  %12922 = vst [vmem:[#allocation276_spill] sm:$0xff] %v10589_v57  ;;  %v5802_v21 = vpop.eup %5801  ;;  %v2999_v2 = vmul.f32 0.6931472, %v5798_v46  ;;  %v4459_v39 = vsel %vm4443_vm5, %v4426_v44, %v12923_v50  ;;  %v4456_v56 = vsel %vm4443_vm5, %v4423_v7, %v12924_v34  ;;  %4705 = vmatprep.mubr.f32.mxu1 %v4634_v5  ;;  %v12929_v5 = vld [vmem:[#allocation205_spill] sm:$0xff] }
 0x671   : > { %12919 = vst [vmem:[#allocation225_spill] sm:$0xff] %v12918_v24  ;;  %v12925_v22 = vmul.u32 8, %v10554_v62  ;;  %v12926_v63 = vmov 0  ;;  %v4077_v46 = vsub.f32 %v10558_v54, %v9944_v18  ;;  %v2997_v28 = vmul.f32 0.6931472, %v5800_v48  ;;  %v5804_v7 = vpop.eup %5803  ;;  %v12930_v50 = vld [vmem:[#allocation160_spill] sm:$0xff]  ;;  %v10618_v24 = vpop.xlane.xlu1 %3348 }
 0x672   : > { %v4425_v34 = vsel %vm4410_vm2, %v10455_v15, %v10279_v43  ;;  %v4405_v44 = vsel %vm4377_vm11, %v10458_v25, %v12860_v29  ;;  %v12931_v62 = vsub.f32 %v12929_v5, %v12930_v50  ;;  %v4374_v48 = vsel %vm4344_vm12, %v4212_v51, %v10425_v17  ;;  %v12932_v29 = vld [vmem:[#allocation63_spill] sm:$0xff]  ;;  %v12933_v17 = vld [vmem:[#allocation216_spill] sm:$0xff] }
 0x673   : > { %vm10601_vm4 = vcmp.lt.s32.totalorder %v4580_v13, %v12925_v22  ;;  %v4062_v22 = vsub.f32 %v10569_v40, %v9944_v18  ;;  %v4371_v43 = vsel %vm4344_vm12, %v10451_v30, %v10389_v16  ;;  %v4214_v15 = vadd.f32 %v4182_v60, %v12932_v29  ;;  %v12935_v60 = vld [vmem:[#allocation182_spill] sm:$0xff] }
 0x674   : > { %v12927_v63 = vsel %vm10601_vm4, 4294967295, %v12926_v63  ;;  %v4110_v13 = vmul.f32 %v4078_v36, %v12931_v62  ;;  %5807 = vlog2.f32 %v10093_v8  ;;  %v4375_v25 = vsel %vm4344_vm12, %v4213_v61, %v10470_v33  ;;  %v12936_v8 = vld [vmem:[#allocation159_spill] sm:$0xff]  ;;  %v10649_v33 = vpop.xlane.xlu0 %3300  ;;  %v12938_v61 = vld [vmem:[#allocation49_spill] sm:$0xff] }
 0x675   : > { %12928 = vst [vmem:[#allocation227_spill] sm:$0xff] %v12927_v63  ;;  %v4373_v62 = vsel %vm4344_vm12, %v4211_v26, %v10430_v49  ;;  %v10636_v51 = vadd.f32 %v2999_v2, %v12933_v17  ;;  %v10639_v16 = vsel %vm4476_vm13, %v4459_v39, 0.0  ;;  %v10642_v30 = vsel %vm4476_vm13, %v4456_v56, 0.0  ;;  %v12939_v56 = vld [vmem:[#allocation39_spill] sm:$0xff]  ;;  %v12940_v17 = vld [vmem:[#allocation192_spill] sm:$0xff] }
 0x676   : > { %12934 = vst [vmem:[#allocation147_spill] sm:$0xff] %v10642_v30  ;;  %v4438_v36 = vsel %vm4410_vm2, %v4405_v44, %v10300_v53  ;;  %v12937_v5 = vsub.f32 %v12935_v60, %v12936_v8  ;;  %v4458_v49 = vsel %vm4443_vm5, %v4425_v34, %v12938_v61  ;;  %v4407_v26 = vsel %vm4377_vm11, %v4374_v48, %v12905_v45  ;;  %v12942_v34 = vld [vmem:[#allocation218_spill] sm:$0xff]  ;;  %v12946_v61 = vld [vmem:[#allocation220_spill] sm:$0xff] }
 0x677   : > { %v4404_v2 = vsel %vm4377_vm11, %v4371_v43, %v12873_v37  ;;  %v4176_v39 = vadd.f32 %v4110_v13, %v10479_v58  ;;  %v12941_v53 = vsub.f32 %v12939_v56, %v12940_v17  ;;  %v4406_v60 = vsel %vm4377_vm11, %v4373_v62, %v12920_v6  ;;  %v12943_v37 = vld [vmem:[#allocation92_spill] sm:$0xff] }
 0x678   : > { %v4109_v50 = vmul.f32 %v4077_v46, %v12937_v5  ;;  %v4408_v46 = vsel %vm4377_vm11, %v4375_v25, %v12921_v52  ;;  %v3003_v8 = vmul.f32 0.6931472, %v5802_v21  ;;  %v10666_v5 = vadd.f32 %v2997_v28, %v12942_v34  ;;  %v5806_v28 = vpop.eup %5805  ;;  %v12944_v25 = vld [vmem:[#allocation137_spill] sm:$0xff]  ;;  %v12949_v17 = vld [vmem:[#allocation28_spill] sm:$0xff] }
 0x679   : > { %v4094_v44 = vmul.f32 %v4062_v22, %v12941_v53  ;;  %v4376_v45 = vsel %vm4344_vm12, %v4214_v15, %v10525_v4  ;;  %v4471_v48 = vsel %vm4443_vm5, %v4438_v36, %v12943_v37  ;;  %v10674_v43 = vsub.f32 %v10406_v12, %v10472_v35  ;;  %v3346_v22 = vpop.xlane.xlu1 %3345  ;;  %v12950_v53 = vld [vmem:[#allocation44_spill] sm:$0xff] }
 0x67a   : > { %v10677_v52 = vsel %vm4476_vm13, %v4458_v49, 0.0  ;;  %v4440_v6 = vsel %vm4410_vm2, %v4407_v26, %v10367_v23  ;;  %v4437_v21 = vsel %vm4410_vm2, %v4404_v2, %v10331_v14  ;;  %v4175_v4 = vadd.f32 %v4109_v50, %v10558_v54  ;;  %v12947_v26 = vld [vmem:[#allocation117_spill] sm:$0xff]  ;;  %v12948_v2 = vld [vmem:[#allocation122_spill] sm:$0xff] }
 0x67b   : > { %v10686_v15 = vsub.f32 %v10344_v9, %v10444_v27  ;;  %v4441_v12 = vsel %vm4410_vm2, %v4408_v46, %v10403_v0  ;;  %v4439_v35 = vsel %vm4410_vm2, %v4406_v60, %v10370_v11  ;;  %v4208_v62 = vadd.f32 %v4176_v39, %v12944_v25  ;;  %v3298_v9 = vpop.xlane.xlu0 %3297  ;;  %v12951_v60 = vld [vmem:[#allocation98_spill] sm:$0xff] }
 0x67c   : > { %v4160_v23 = vadd.f32 %v4094_v44, %v10569_v40  ;;  %v4409_v14 = vsel %vm4377_vm11, %v4376_v45, %v12932_v29  ;;  %v10697_v36 = vsel %vm4476_vm13, %v4471_v48, 0.0  ;;  %v3047_v49 = vadd.f32 %v3003_v8, %v12946_v61  ;;  %v12952_v48 = vld [vmem:[#allocation75_spill] sm:$0xff] }
 0x67d   : > { %12945 = vst [vmem:[#allocation278_spill] sm:$0xff] %v10697_v36  ;;  %v3001_v27 = vmul.f32 0.6931472, %v5804_v7  ;;  %v4473_v0 = vsel %vm4443_vm5, %v4440_v6, %v12947_v26  ;;  %v4470_v11 = vsel %vm4443_vm5, %v4437_v21, %v12948_v2  ;;  %v3007_v56 = vmul.f32 0.6931472, %v5806_v28  ;;  %v3343_v28 = vpop.xlane.xlu1 %3342  ;;  %v12961_v26 = vld [vmem:[#allocation106_spill] sm:$0xff] }
 0x67e   : > { %v4076_v39 = vsub.f32 %v10674_v43, %v9944_v18  ;;  %v4474_v29 = vsel %vm4443_vm5, %v4441_v12, %v12949_v17  ;;  %v4472_v46 = vsel %vm4443_vm5, %v4439_v35, %v12950_v53  ;;  %v4207_v8 = vadd.f32 %v4175_v4, %v12951_v60 }
 0x67f   : > { %v4061_v7 = vsub.f32 %v10686_v15, %v9944_v18  ;;  %v10715_v34 = vsub.f32 %v10411_v3, %v10541_v31  ;;  %v4442_v45 = vsel %vm4410_vm2, %v4409_v14, %v10442_v20  ;;  %v4370_v37 = vsel %vm4344_vm12, %v4208_v62, %v4110_v13  ;;  %v12954_v3 = vld [vmem:[#allocation224_spill] sm:$0xff]  ;;  %v12957_v62 = vld [vmem:[#allocation202_spill] sm:$0xff]  ;;  %v12960_v14 = vld [vmem:[#allocation229_spill] sm:$0xff] }
 0x680   : > { %v4192_v6 = vadd.f32 %v4160_v23, %v12952_v48  ;;  %v10723_v21 = vsub.f32 %v10320_v10, %v10495_v47  ;;  %v10726_v4 = vsel %vm4476_vm13, %v4470_v11, 0.0  ;;  %v10730_v12 = vsub.f32 %v10374_v38, %v10586_v32  ;;  %v12958_v10 = vld [vmem:[#allocation156_spill] sm:$0xff]  ;;  %v12963_v11 = vld [vmem:[#allocation33_spill] sm:$0xff] }
 0x681   : > { %12953 = vst [vmem:[#allocation233_spill] sm:$0xff] %v10726_v4  ;;  %v3046_v31 = vadd.f32 %v3001_v27, %v12954_v3  ;;  %v10734_v20 = vsel %vm4476_vm13, %v4473_v0, 0.0  ;;  %v10737_v13 = vsel %vm4476_vm13, %v4472_v46, 0.0  ;;  %v5808_v35 = vpop.eup %5807  ;;  %v12959_v47 = vsub.f32 %v12957_v62, %v12958_v10  ;;  %v12962_v0 = vld [vmem:[#allocation168_spill] sm:$0xff]  ;;  %v3295_v46 = vpop.xlane.xlu0 %3294  ;;  %v12995_v4 = vld [vmem:[#allocation194_spill] sm:$0xff] }
 0x682   : > { %12955 = vst [vmem:[#allocation221_spill] sm:$0xff] %v10734_v20  ;;  %12956 = vst [vmem:[#allocation234_spill] sm:$0xff] %v10737_v13  ;;  %v3049_v61 = vadd.f32 %v3007_v56, %v12960_v14  ;;  %v4475_v2 = vsel %vm4443_vm5, %v4442_v45, %v12961_v26  ;;  %v10746_v38 = vsel %vm4476_vm13, %v4474_v29, 0.0  ;;  %v4403_v32 = vsel %vm4377_vm11, %v4370_v37, %v12944_v25  ;;  %v12971_v26 = vld [vmem:[#allocation163_spill] sm:$0xff]  ;;  %v13017_v13 = vld [vmem:[#allocation32_spill] sm:$0xff] }
 0x683   : > { %v4108_v23 = vmul.f32 %v4076_v39, %v12959_v47  ;;  %v4369_v27 = vsel %vm4344_vm12, %v4207_v8, %v4109_v50  ;;  %v12964_v17 = vsub.f32 %v12962_v0, %v12963_v11  ;;  %v4075_v39 = vsub.f32 %v10715_v34, %v9944_v18  ;;  %v12968_v47 = vld [vmem:[#allocation72_spill] sm:$0xff] }
 0x684   : > { %v4354_v56 = vsel %vm4344_vm12, %v4192_v6, %v4094_v44  ;;  %v4060_v45 = vsub.f32 %v10723_v21, %v9944_v18  ;;  %v10760_v29 = vsub.f32 %v3049_v61, %v10618_v24  ;;  %v10763_v25 = vsub.f32 %v10380_v59, %v3346_v22  ;;  %v3340_v6 = vpop.xlane.xlu1 %3339 }
 0x685   : > { %v4093_v53 = vmul.f32 %v4061_v7, %v12964_v17  ;;  %v2965_v50 = vmul.f32 0.6931472, %v5808_v35  ;;  %v4059_v8 = vsub.f32 %v10730_v12, %v9944_v18  ;;  %v10769_v7 = vsub.f32 %v10313_v41, %v10649_v33  ;;  %v12965_v33 = vld [vmem:[#allocation180_spill] sm:$0xff]  ;;  %v12966_v35 = vld [vmem:[#allocation158_spill] sm:$0xff]  ;;  %v3292_v11 = vpop.xlane.xlu0 %3291  ;;  %v12974_v17 = vld [vmem:[#allocation203_spill] sm:$0xff] }
 0x686   : > { %v10772_v37 = vsel %vm4476_vm13, %v4475_v2, 0.0  ;;  %v4436_v44 = vsel %vm4410_vm2, %v4403_v32, %v10479_v58  ;;  %v4402_v24 = vsel %vm4377_vm11, %v4369_v27, %v12951_v60  ;;  %v4174_v59 = vadd.f32 %v4108_v23, %v10674_v43  ;;  %v12969_v60 = vld [vmem:[#allocation172_spill] sm:$0xff]  ;;  %v12972_v2 = vld [vmem:[#allocation190_spill] sm:$0xff] }
 0x687   : > { %v10780_v22 = vsub.f32 %v10350_v55, %v3298_v9  ;;  %v4387_v3 = vsel %vm4377_vm11, %v4354_v56, %v12952_v48  ;;  %v4159_v41 = vadd.f32 %v4093_v53, %v10686_v15  ;;  %v12967_v62 = vsub.f32 %v12965_v33, %v12966_v35  ;;  %v12975_v56 = vld [vmem:[#allocation136_spill] sm:$0xff] }
 0x688   : > { %v10789_v58 = vsub.f32 %v10282_v42, %v3295_v46  ;;  %v12970_v14 = vsub.f32 %v12968_v47, %v12969_v60  ;;  %v4074_v55 = vsub.f32 %v10760_v29, %v9944_v18  ;;  %v4073_v9 = vsub.f32 %v10763_v25, %v9944_v18  ;;  %v12981_v60 = vld [vmem:[#allocation179_spill] sm:$0xff] }
 0x689   : > { %v4107_v10 = vmul.f32 %v4075_v39, %v12967_v62  ;;  %v10798_v48 = vsub.f32 %v3047_v49, %v3343_v28  ;;  %v12973_v32 = vsub.f32 %v12971_v26, %v12972_v2  ;;  %v4058_v42 = vsub.f32 %v10769_v7, %v9944_v18  ;;  %v12984_v2 = vld [vmem:[#allocation82_spill] sm:$0xff] }
 0x68a   : > { %v4092_v61 = vmul.f32 %v4060_v45, %v12970_v14  ;;  %v10805_v0 = vsub.f32 %v3046_v31, %v3340_v6  ;;  %v10808_v39 = vadd.f32 %v2965_v50, %v12974_v17  ;;  %v10812_v46 = vsel %vm4410_vm2, %v4402_v24, %v10558_v54  ;;  %v12976_v45 = vld [vmem:[#allocation128_spill] sm:$0xff]  ;;  %v12977_v6 = vld [vmem:[#allocation66_spill] sm:$0xff] }
 0x68b   : > { %v4091_v27 = vmul.f32 %v4059_v8, %v12973_v32  ;;  %v4206_v49 = vadd.f32 %v4174_v59, %v12975_v56  ;;  %v4057_v28 = vsub.f32 %v10780_v22, %v9944_v18  ;;  %v4469_v8 = vsel %vm4443_vm5, %v4436_v44, %v12976_v45  ;;  %v12978_v24 = vld [vmem:[#allocation200_spill] sm:$0xff]  ;;  %v12979_v59 = vld [vmem:[#allocation155_spill] sm:$0xff]  ;;  %v12982_v14 = vld [vmem:[#allocation154_spill] sm:$0xff] }
 0x68c   : > { %v4420_v31 = vsel %vm4410_vm2, %v4387_v3, %v10569_v40  ;;  %v4191_v33 = vadd.f32 %v4159_v41, %v12977_v6  ;;  %v4173_v50 = vadd.f32 %v4107_v10, %v10715_v34  ;;  %v4056_v35 = vsub.f32 %v10789_v58, %v9944_v18  ;;  %v3334_v3 = vpop.xlane.xlu1 %3333  ;;  %v12985_v32 = vld [vmem:[#allocation175_spill] sm:$0xff] }
 0x68d   : > { %v4158_v54 = vadd.f32 %v4092_v61, %v10723_v21  ;;  %v12980_v62 = vsub.f32 %v12978_v24, %v12979_v59  ;;  %v12983_v26 = vsub.f32 %v12981_v60, %v12982_v14  ;;  %v4072_v40 = vsub.f32 %v10798_v48, %v9944_v18  ;;  %v12990_v60 = vld [vmem:[#allocation31_spill] sm:$0xff] }
 0x68e   : > { %v4157_v41 = vadd.f32 %v4091_v27, %v10730_v12  ;;  %v12986_v17 = vsub.f32 %v12984_v2, %v12985_v32  ;;  %v4071_v63 = vsub.f32 %v10805_v0, %v9944_v18  ;;  %v10841_v24 = vsub.f32 %v12987_v19, %v3292_v11  ;;  %v12993_v2 = vld [vmem:[#allocation46_spill] sm:$0xff] }
 0x68f   : > { %v4106_v47 = vmul.f32 %v4074_v55, %v12980_v62  ;;  %v4105_v44 = vmul.f32 %v4073_v9, %v12983_v26  ;;  %v12988_v55 = vld [vmem:[#allocation48_spill] sm:$0xff]  ;;  %v4368_v9 = vsel %vm4344_vm12, %v4206_v49, %v4108_v23  ;;  %v12989_v62 = vld [vmem:[#allocation37_spill] sm:$0xff]  ;;  %v10850_v1 = vsel %vm4476_vm13, %v4469_v8, 0.0  ;;  %v12997_v23 = vld [vmem:[#allocation70_spill] sm:$0xff] }
 0x690   : > { %v4090_v45 = vmul.f32 %v4058_v42, %v12986_v17  ;;  %v4453_v59 = vsel %vm4443_vm5, %v4420_v31, %v12988_v55  ;;  %v12991_v14 = vsub.f32 %v12989_v62, %v12990_v60  ;;  %12992 = vst [vmem:[#allocation282_spill] sm:$0xff] %v10850_v1  ;;  %v4353_v42 = vsel %vm4344_vm12, %v4191_v33, %v4093_v53  ;;  %v12994_v17 = vld [vmem:[#allocation93_spill] sm:$0xff]  ;;  %v3337_v31 = vpop.xlane.xlu0 %3336  ;;  %v12998_v8 = vld [vmem:[#allocation198_spill] sm:$0xff]  ;;  %v12999_v62 = vld [vmem:[#allocation152_spill] sm:$0xff] }
 0x691   : > { %v4205_v32 = vadd.f32 %v4173_v50, %v12993_v2  ;;  %v12996_v19 = vsub.f32 %v12994_v17, %v12995_v4  ;;  %v10858_v36 = vsub.f32 %v10666_v5, %v3334_v3  ;;  %v4190_v49 = vadd.f32 %v4158_v54, %v12997_v23  ;;  %v13001_v33 = vld [vmem:[#allocation62_spill] sm:$0xff]  ;;  %v13002_v4 = vld [vmem:[#allocation177_spill] sm:$0xff] }
 0x692   : > { %v4089_v26 = vmul.f32 %v4057_v28, %v12991_v14  ;;  %v4172_v55 = vadd.f32 %v4106_v47, %v10760_v29  ;;  %v4171_v28 = vadd.f32 %v4105_v44, %v10763_v25  ;;  %v13000_v60 = vsub.f32 %v12998_v8, %v12999_v62 }
 0x693   : > { %v4088_v11 = vmul.f32 %v4056_v35, %v12996_v19  ;;  %v4189_v50 = vadd.f32 %v4157_v41, %v13001_v33  ;;  %v4156_v14 = vadd.f32 %v4090_v45, %v10769_v7  ;;  %v13003_v35 = vld [vmem:[#allocation153_spill] sm:$0xff]  ;;  %v4055_v3 = vsub.f32 %v10841_v24, %v9944_v18 }
 0x694   : > { %v4104_v53 = vmul.f32 %v4072_v40, %v13000_v60  ;;  %v13004_v17 = vsub.f32 %v13002_v4, %v13003_v35  ;;  %v4401_v54 = vsel %vm4377_vm11, %v4368_v9, %v12975_v56  ;;  %v4155_v19 = vadd.f32 %v4089_v26, %v10780_v22  ;;  %v13006_v9 = vld [vmem:[#allocation34_spill] sm:$0xff]  ;;  %v13007_v4 = vld [vmem:[#allocation113_spill] sm:$0xff]  ;;  %v13008_v35 = vld [vmem:[#allocation71_spill] sm:$0xff] }
 0x695   : > { %v10877_v1 = vsub.f32 %v10636_v51, %v3337_v31  ;;  %v10880_v40 = vsel %vm4476_vm13, %v4453_v59, 0.0  ;;  %v4386_v41 = vsel %vm4377_vm11, %v4353_v42, %v12977_v6  ;;  %v4367_v8 = vsel %vm4344_vm12, %v4205_v32, %v4107_v10  ;;  %v13009_v10 = vld [vmem:[#allocation27_spill] sm:$0xff]  ;;  %v13010_v42 = vld [vmem:[#allocation188_spill] sm:$0xff] }
 0x696   : > { %v4103_v5 = vmul.f32 %v4071_v63, %v13004_v17  ;;  %13005 = vst [vmem:[#allocation236_spill] sm:$0xff] %v10880_v40  ;;  %v4154_v63 = vadd.f32 %v4088_v11, %v10789_v58  ;;  %v4069_v62 = vsub.f32 %v10858_v36, %v9944_v18  ;;  %v4352_v56 = vsel %vm4344_vm12, %v4190_v49, %v4092_v61  ;;  %v13012_v49 = vld [vmem:[#allocation67_spill] sm:$0xff] }
 0x697   : > { %v4204_v60 = vadd.f32 %v4172_v55, %v13006_v9  ;;  %v4203_v51 = vadd.f32 %v4171_v28, %v13007_v4  ;;  %v4170_v31 = vadd.f32 %v4104_v53, %v10798_v48  ;;  %v4351_v59 = vsel %vm4344_vm12, %v4189_v50, %v4091_v27  ;;  %v3289_v27 = vpop.xlane.xlu0 %3288 }
 0x698   : > { %v4188_v17 = vadd.f32 %v4156_v14, %v13008_v35  ;;  %v4169_v6 = vadd.f32 %v4103_v5, %v10805_v0  ;;  %v13011_v32 = vsub.f32 %v13009_v10, %v13010_v42  ;;  %v4434_v30 = vsel %vm4410_vm2, %v4401_v54, %v10674_v43  ;;  %v13013_v10 = vld [vmem:[#allocation57_spill] sm:$0xff]  ;;  %v13014_v42 = vld [vmem:[#allocation174_spill] sm:$0xff] }
 0x699   : > { %v4419_v61 = vsel %vm4410_vm2, %v4386_v41, %v10686_v15  ;;  %v4187_v55 = vadd.f32 %v4155_v19, %v13012_v49  ;;  %v4070_v28 = vsub.f32 %v10877_v1, %v9944_v18  ;;  %v4400_v50 = vsel %vm4377_vm11, %v4367_v8, %v12993_v2  ;;  %v13018_v8 = vld [vmem:[#allocation30_spill] sm:$0xff] }
 0x69a   : > { %v4087_v40 = vmul.f32 %v4055_v3, %v13011_v32  ;;  %v4385_v14 = vsel %vm4377_vm11, %v4352_v56, %v12997_v23  ;;  %v4186_v3 = vadd.f32 %v4154_v63, %v13013_v10  ;;  %v13015_v32 = vld [vmem:[#allocation151_spill] sm:$0xff]  ;;  %v4366_v15 = vsel %vm4344_vm12, %v4204_v60, %v4106_v47  ;;  %v13019_v63 = vld [vmem:[#allocation13_spill] sm:$0xff] }
 0x69b   : > { %v13016_v43 = vsub.f32 %v13014_v42, %v13015_v32  ;;  %v4384_v19 = vsel %vm4377_vm11, %v4351_v59, %v13001_v33  ;;  %v4365_v41 = vsel %vm4344_vm12, %v4203_v51, %v4105_v44  ;;  %v4202_v57 = vadd.f32 %v4170_v31, %v13017_v13  ;;  %v13020_v42 = vld [vmem:[#allocation87_spill] sm:$0xff]  ;;  %v13022_v60 = vld [vmem:[#allocation25_spill] sm:$0xff]  ;;  %v3286_v32 = vpop.xlane.xlu0 %3285 }
 0x69c   : > { %v4350_v2 = vsel %vm4344_vm12, %v4188_v17, %v4090_v45  ;;  %v4201_v20 = vadd.f32 %v4169_v6, %v13018_v8  ;;  %v4153_v23 = vadd.f32 %v4087_v40, %v10841_v24  ;;  %v10922_v56 = vsub.f32 %v13019_v63, %v3289_v27  ;;  %v13021_v44 = vld [vmem:[#allocation195_spill] sm:$0xff] }
 0x69d   : > { %v4101_v54 = vmul.f32 %v4069_v62, %v13016_v43  ;;  %v4452_v62 = vsel %vm4443_vm5, %v4419_v61, %v13020_v42  ;;  %v4433_v47 = vsel %vm4410_vm2, %v4400_v50, %v10715_v34  ;;  %v4349_v33 = vsel %vm4344_vm12, %v4187_v55, %v4089_v26  ;;  %v13025_v50 = vld [vmem:[#allocation86_spill] sm:$0xff]  ;;  %v13032_v42 = vld [vmem:[#allocation127_spill] sm:$0xff] }
 0x69e   : > { %v13023_v51 = vsub.f32 %v13021_v44, %v13022_v60  ;;  %v4418_v45 = vsel %vm4410_vm2, %v4385_v14, %v10723_v21  ;;  %v4399_v59 = vsel %vm4377_vm11, %v4366_v15, %v13006_v9  ;;  %v4348_v17 = vsel %vm4344_vm12, %v4186_v3, %v4088_v11  ;;  %v13027_v14 = vld [vmem:[#allocation83_spill] sm:$0xff]  ;;  %v5411_v15 = vpop.permute.xlu1 %5410 }
 0x69f   : > { %v4167_v6 = vadd.f32 %v4101_v54, %v10858_v36  ;;  %v4417_v61 = vsel %vm4410_vm2, %v4384_v19, %v10730_v12  ;;  %v4398_v34 = vsel %vm4377_vm11, %v4365_v41, %v13007_v4  ;;  %v4383_v26 = vsel %vm4377_vm11, %v4350_v2, %v13008_v35  ;;  %v13026_v35 = vld [vmem:[#allocation78_spill] sm:$0xff]  ;;  %v13028_v19 = vld [vmem:[#allocation41_spill] sm:$0xff]  ;;  %v13029_v2 = vld [vmem:[#allocation183_spill] sm:$0xff] }
 0x6a0   : > { %v4102_v31 = vmul.f32 %v4070_v28, %v13023_v51  ;;  %v4364_v55 = vsel %vm4344_vm12, %v4202_v57, %v4104_v53  ;;  %v4382_v21 = vsel %vm4377_vm11, %v4349_v33, %v13012_v49  ;;  %v4363_v9 = vsel %vm4344_vm12, %v4201_v20, %v4103_v5  ;;  %v13024_v28 = vld [vmem:[#allocation53_spill] sm:$0xff]  ;;  %v13033_v33 = vld [vmem:[#allocation20_spill] sm:$0xff] }
 0x6a1   : > { %v4185_v11 = vadd.f32 %v4153_v23, %v13024_v28  ;;  %v4054_v27 = vsub.f32 %v10922_v56, %v9944_v18  ;;  %v4451_v12 = vsel %vm4443_vm5, %v4418_v45, %v13025_v50  ;;  %v10955_v4 = vsel %vm4410_vm2, %v4399_v59, %v10760_v29  ;;  %v13030_v23 = vld [vmem:[#allocation43_spill] sm:$0xff] }
 0x6a2   : > { %v4381_v57 = vsel %vm4377_vm11, %v4348_v17, %v13013_v10  ;;  %v4168_v53 = vadd.f32 %v4102_v31, %v10877_v1  ;;  %vm4509_vm0 = vcmask 48128   ;;  %v4450_v20 = vsel %vm4443_vm5, %v4417_v61, %v13026_v35  ;;  %v5421_v35 = vpop.permute.xlu0 %5420 }
 0x6a3   : > { %v4416_v5 = vsel %vm4410_vm2, %v4383_v26, %v10769_v7  ;;  %v4397_v49 = vsel %vm4377_vm11, %v4364_v55, %v13017_v13  ;;  %v4199_v3 = vadd.f32 %v4167_v6, %v13027_v14  ;;  %v10969_v29 = vsel %vm4410_vm2, %v4398_v34, %v10763_v25  ;;  %v5416_v6 = vpop.permute.xlu1 %5415  ;;  %v13037_v55 = vld [vmem:[#allocation123_spill] sm:$0xff] }
 0x6a4   : > { %v4415_v10 = vsel %vm4410_vm2, %v4382_v21, %v10780_v22  ;;  %v4396_v43 = vsel %vm4377_vm11, %v4363_v9, %v13018_v8  ;;  %v4468_v7 = vsel %vm4443_vm5, %v10812_v46, %v13028_v19  ;;  %v4414_v13 = vsel %vm4410_vm2, %v4381_v57, %v10789_v58  ;;  %v13034_v46 = vld [vmem:[#allocation116_spill] sm:$0xff]  ;;  %v13041_v19 = vld [vmem:[#allocation187_spill] sm:$0xff] }
 0x6a5   : > { %v4347_v41 = vsel %vm4344_vm12, %v4185_v11, %v4087_v40  ;;  %v13031_v25 = vsub.f32 %v13029_v2, %v13030_v23  ;;  %v4467_v22 = vsel %vm4443_vm5, %v4434_v30, %v13032_v42  ;;  %v10988_v8 = vsel %vm4443_vm5, %v4416_v5, %v13033_v33  ;;  %v13035_v40 = vld [vmem:[#allocation73_spill] sm:$0xff] }
 0x6a6   : > { %v10992_v44 = vsel %vm4410_vm2, %v4397_v49, %v10798_v48  ;;  %v4200_v60 = vadd.f32 %v4168_v53, %v13034_v46  ;;  %v10996_v58 = vsub.f32 %v10808_v39, %v3286_v32  ;;  %v11000_v51 = vsel %vm4443_vm5, %v4415_v10, %v13035_v40  ;;  %v13036_v48 = vld [vmem:[#allocation16_spill] sm:$0xff]  ;;  %v13038_v49 = vld [vmem:[#allocation54_spill] sm:$0xff]  ;;  %v5426_v33 = vpop.permute.xlu0 %5425 }
 0x6a7   : > { %v4086_v63 = vmul.f32 %v4054_v27, %v13031_v25  ;;  %v11004_v30 = vsel %vm4410_vm2, %v4396_v43, %v10805_v0  ;;  %v4361_v45 = vsel %vm4344_vm12, %v4199_v3, %v4101_v54  ;;  %v11008_v59 = vsel %vm4476_vm13, %v4468_v7, 0.0  ;;  %v13039_v32 = vld [vmem:[#allocation60_spill] sm:$0xff]  ;;  %v13043_v25 = vld [vmem:[#allocation221_spill] sm:$0xff] }
 0x6a8   : > { %v11012_v17 = vsel %vm4443_vm5, %v4414_v13, %v13036_v48  ;;  %v4380_v39 = vsel %vm4377_vm11, %v4347_v41, %v13024_v28  ;;  %v11017_v61 = vsel %vm4476_vm13, %v4452_v62, 0.0  ;;  %v11020_v34 = vsel %vm4476_vm13, %v4467_v22, 0.0 }
 0x6a9   : > { %v4152_v0 = vadd.f32 %v4086_v63, %v10922_v56  ;;  %v5418_v54 = vunpack.i.h.bf16 %v5416_v6  ;;  %v5417_v26 = vunpack.i.l.bf16 %v5416_v6  ;;  %v4466_v21 = vsel %vm4443_vm5, %v4433_v47, %v13037_v55 }
 0x6aa   : > { %v4394_v9 = vsel %vm4377_vm11, %v4361_v45, %v13027_v14  ;;  %v4362_v11 = vsel %vm4344_vm12, %v4200_v60, %v4102_v31  ;;  %v4053_v28 = vsub.f32 %v10996_v58, %v9944_v18  ;;  %v11031_v62 = vsel %vm4476_vm13, %v4451_v12, 0.0  ;;  %v5431_v14 = vpop.permute.xlu1 %5430 }
 0x6ab   : > { %v4413_v27 = vsel %vm4410_vm2, %v4380_v39, %v10841_v24  ;;  %v5412_v50 = vunpack.i.l.bf16 %v5411_v15  ;;  %v4541_v57 = vsel %vm4509_vm0, %v10772_v37, %v5417_v26  ;;  %v4525_v47 = vsel %vm4509_vm0, %v10639_v16, %v5418_v54 }
 0x6ac   : > { %v5413_v53 = vunpack.i.h.bf16 %v5411_v15  ;;  %v4574_v31 = vsel %vm4542_vm1, %v4541_v57, %v9944_v18  ;;  %v4558_v5 = vsel %vm4542_vm1, %v4525_v47, %v9944_v18  ;;  %v11044_v12 = vsel %vm4476_vm13, %v4466_v21, 0.0  ;;  %v13040_v15 = vld [vmem:[#allocation68_spill] sm:$0xff]  ;;  %v13046_v21 = vld [vmem:[#allocation234_spill] sm:$0xff]  ;;  %v5451_v57 = vpop.permute.xlu0 %5450 }
 0x6ad   : > { %v11048_v24 = vsel %vm4410_vm2, %v4394_v9, %v10858_v36  ;;  %v4184_v37 = vadd.f32 %v4152_v0, %v13038_v49  ;;  %v5423_v3 = vunpack.i.h.bf16 %v5421_v35  ;;  %v5422_v16 = vunpack.i.l.bf16 %v5421_v35  ;;  %5115 = vmatprep.subr.mxu1 %v4574_v31  ;;  %v13049_v35 = vld [vmem:[#allocation189_spill] sm:$0xff] }
 0x6ae   : > { %v11053_v10 = vsel %vm4443_vm5, %v4413_v27, %v13039_v32  ;;  %v4395_v43 = vsel %vm4377_vm11, %v4362_v11, %v13034_v46  ;;  %v13042_v7 = vsub.f32 %v13040_v15, %v13041_v19  ;;  %5116 = vmatpush3.msra.mxu1 %v4558_v5  ;;  %v11063_v36 = vsel %vm4476_vm13, %v4450_v20, 0.0  ;;  %v13044_v20 = vld [vmem:[#allocation276_spill] sm:$0xff]  ;;  %v13047_v11 = vld [vmem:[#allocation147_spill] sm:$0xff] }
 0x6af   : > { %v5432_v41 = vunpack.i.l.bf16 %v5431_v14  ;;  %v4540_v2 = vsel %vm4509_vm0, %v10746_v38, %v5422_v16  ;;  %v4524_v23 = vsel %vm4509_vm0, %v10677_v52, %v5423_v3  ;;  %v4539_v42 = vsel %vm4509_vm0, %v13043_v25, %v5412_v50  ;;  %v5436_v38 = vpop.permute.xlu1 %5435  ;;  %v13045_v52 = vld [vmem:[#allocation85_spill] sm:$0xff] }
 0x6b0   : > { %v11060_v13 = vmul.f32 %v4053_v28, %v13042_v7  ;;  %v5433_v22 = vunpack.i.h.bf16 %v5431_v14  ;;  %v4573_v46 = vsel %vm4542_vm1, %v4540_v2, %v9944_v18  ;;  %v4557_v60 = vsel %vm4542_vm1, %v4524_v23, %v9944_v18  ;;  %v13050_v14 = vld [vmem:[#allocation233_spill] sm:$0xff]  ;;  %v13051_v7 = vld [vmem:[#allocation191_spill] sm:$0xff] }
 0x6b1   : > { %v4523_v40 = vsel %vm4509_vm0, %v13044_v20, %v5413_v53  ;;  %v4346_v45 = vsel %vm4344_vm12, %v4184_v37, %v4086_v63  ;;  %v5428_v48 = vunpack.i.h.bf16 %v5426_v33  ;;  %v5427_v39 = vunpack.i.l.bf16 %v5426_v33  ;;  %5117 = vmatprep.subr.mxu1 %v4573_v46  ;;  %v13053_v33 = vld [vmem:[#allocation282_spill] sm:$0xff] }
 0x6b2   : > { %v4465_v6 = vsel %vm4443_vm5, %v10955_v4, %v13045_v52  ;;  %v4151_v0 = vadd.f32 %v11060_v13, %v10996_v58  ;;  %v5438_v54 = vunpack.i.h.bf16 %v5436_v38  ;;  %v5437_v26 = vunpack.i.l.bf16 %v5436_v38  ;;  %5118 = vmatpush3.msra.mxu1 %v4557_v60  ;;  %v13048_v4 = vld [vmem:[#allocation278_spill] sm:$0xff]  ;;  %v13054_v60 = vld [vmem:[#allocation236_spill] sm:$0xff] }
 0x6b3   : > { %v4572_v55 = vsel %vm4542_vm1, %v4539_v42, %v9944_v18  ;;  %v4556_v63 = vsel %vm4542_vm1, %v4523_v40, %v9944_v18  ;;  %v4538_v9 = vsel %vm4509_vm0, %v13046_v21, %v5427_v39  ;;  %v4522_v28 = vsel %vm4509_vm0, %v13047_v11, %v5428_v48  ;;  %v5441_v37 = vpop.permute.xlu1 %5440  ;;  %v5461_v42 = vpop.permute.xlu0 %5460  ;;  %v13056_v39 = vld [vmem:[#allocation114_spill] sm:$0xff] }
 0x6b4   : > { %5119 = vmatprep.subr.mxu1 %v4572_v55  ;;  %v4537_v27 = vsel %vm4509_vm0, %v13048_v4, %v5432_v41  ;;  %v4379_v50 = vsel %vm4377_vm11, %v4346_v45, %v13038_v49  ;;  %v4571_v47 = vsel %vm4542_vm1, %v4538_v9, %v9944_v18  ;;  %v4555_v53 = vsel %vm4542_vm1, %v4522_v28, %v9944_v18  ;;  %v13052_v41 = vld [vmem:[#allocation18_spill] sm:$0xff]  ;;  %v13055_v45 = vld [vmem:[#allocation115_spill] sm:$0xff] }
 0x6b5   : > { %5120 = vmatpush3.msra.mxu1 %v4556_v63  ;;  %v4521_v31 = vsel %vm4509_vm0, %v13049_v35, %v5433_v22  ;;  %v11103_v5 = vsel %vm4410_vm2, %v4395_v43, %v10877_v1  ;;  %v4536_v49 = vsel %vm4509_vm0, %v13050_v14, %v5437_v26  ;;  %v4498_v3 = vsel %vm4476_vm13, %v4465_v6, 0.0  ;;  %v13057_v6 = vld [vmem:[#allocation14_spill] sm:$0xff] }
 0x6b6   : > { %5121 = vmatprep.subr.mxu1 %v4571_v47  ;;  %v4482_v16 = vsel %vm4476_vm13, %v10988_v8, 0.0  ;;  %v5443_v32 = vunpack.i.h.bf16 %v5441_v37  ;;  %v5442_v15 = vunpack.i.l.bf16 %v5441_v37  ;;  %v4570_v19 = vsel %vm4542_vm1, %v4537_v27, %v9944_v18 }
 0x6b7   : > { %5122 = vmatpush3.msra.mxu1 %v4555_v53  ;;  %v4520_v1 = vsel %vm4509_vm0, %v13051_v7, %v5438_v54  ;;  %v4412_v43 = vsel %vm4410_vm2, %v4379_v50, %v10922_v56  ;;  %v4183_v2 = vadd.f32 %v4151_v0, %v13052_v41  ;;  %v5452_v23 = vunpack.i.l.bf16 %v5451_v57  ;;  %v5446_v56 = vpop.permute.xlu1 %5445  ;;  %v5471_v9 = vpop.permute.xlu0 %5470 }
 0x6b8   : > { %5123 = vmatprep.subr.mxu1 %v4570_v19  ;;  %v4554_v25 = vsel %vm4542_vm1, %v4521_v31, %v9944_v18  ;;  %v5453_v8 = vunpack.i.h.bf16 %v5451_v57  ;;  %v4569_v22 = vsel %vm4542_vm1, %v4536_v49, %v9944_v18  ;;  %v4535_v46 = vsel %vm4509_vm0, %v13053_v33, %v5442_v15 }
 0x6b9   : > { %5124 = vmatpush3.msra.mxu1 %v4554_v25  ;;  %v4519_v20 = vsel %vm4509_vm0, %v13054_v60, %v5443_v32  ;;  %v4553_v40 = vsel %vm4542_vm1, %v4520_v1, %v9944_v18  ;;  %v4464_v38 = vsel %vm4443_vm5, %v10969_v29, %v13055_v45  ;;  %v4481_v48 = vsel %vm4476_vm13, %v11000_v51, 0.0 }
 0x6ba   : > { %5125 = vmatprep.subr.mxu1 %v4569_v22  ;;  %v4463_v52 = vsel %vm4443_vm5, %v10992_v44, %v13056_v39  ;;  %v4445_v0 = vsel %vm4443_vm5, %v4412_v43, %v13057_v6  ;;  %v5448_v54 = vunpack.i.h.bf16 %v5446_v56  ;;  %v5447_v26 = vunpack.i.l.bf16 %v5446_v56  ;;  %v13060_v39 = vld [vmem:[#allocation55_spill] sm:$0xff] }
 0x6bb   : > { %5126 = vmatpush3.msra.mxu1 %v4553_v40  ;;  %v4568_v55 = vsel %vm4542_vm1, %v4535_v46, %v9944_v18  ;;  %v4345_v63 = vsel %vm4344_vm12, %v4183_v2, %v11060_v13  ;;  %v5462_v29 = vunpack.i.l.bf16 %v5461_v42  ;;  %v4552_v51 = vsel %vm4542_vm1, %v4519_v20, %v9944_v18  ;;  %v5456_v4 = vpop.permute.xlu1 %5455  ;;  %v5481_v1 = vpop.permute.xlu0 %5480 }
 0x6bc   : > { %5127 = vmatprep.subr.mxu1 %v4568_v55  ;;  %v4533_v44 = vsel %vm4509_vm0, %v11020_v34, %v5452_v23  ;;  %v5463_v21 = vunpack.i.h.bf16 %v5461_v42  ;;  %v4534_v11 = vsel %vm4509_vm0, %v11008_v59, %v5447_v26  ;;  %v4518_v28 = vsel %vm4509_vm0, %v11017_v61, %v5448_v54  ;;  %v13058_v61 = vld [vmem:[#allocation26_spill] sm:$0xff]  ;;  %v13059_v42 = vld [vmem:[#allocation107_spill] sm:$0xff]  ;;  %v13062_v54 = vld [vmem:[#allocation269_spill] sm:$0xff] }
 0x6bd   : > { %5128 = vmatpush3.msra.mxu1 %v4552_v51  ;;  %v4517_v13 = vsel %vm4509_vm0, %v11031_v62, %v5453_v8  ;;  %v4567_v27 = vsel %vm4542_vm1, %v4534_v11, %v9944_v18  ;;  %v4551_v50 = vsel %vm4542_vm1, %v4518_v28, %v9944_v18  ;;  %v4497_v34 = vsel %vm4476_vm13, %v4464_v38, 0.0  ;;  %v13064_v55 = vld [vmem:[#allocation50_spill] sm:$0xff] }
 0x6be   : > { %v4496_v57 = vsel %vm4476_vm13, %v4463_v52, 0.0  ;;  %v5458_v47 = vunpack.i.h.bf16 %v5456_v4  ;;  %v5457_v53 = vunpack.i.l.bf16 %v5456_v4  ;;  %5129 = vmatprep.subr.mxu1 %v4567_v27  ;;  %v4478_v59 = vsel %vm4476_vm13, %v4445_v0, 0.0  ;;  %v13061_v52 = vld [vmem:[#allocation157_spill] sm:$0xff] }
 0x6bf   : > { %v4462_v62 = vsel %vm4443_vm5, %v11004_v30, %v13058_v61  ;;  %v4378_v35 = vsel %vm4377_vm11, %v4345_v63, %v13052_v41  ;;  %5130 = vmatpush3.msra.mxu1 %v4551_v50  ;;  %v4566_v31 = vsel %vm4542_vm1, %v4533_v44, %v9944_v18  ;;  %v4550_v37 = vsel %vm4542_vm1, %v4517_v13, %v9944_v18  ;;  %v5466_v7 = vpop.permute.xlu1 %5465 }
 0x6c0   : > { %v4531_v14 = vsel %vm4509_vm0, %v4498_v3, %v5462_v29  ;;  %v5472_v49 = vunpack.i.l.bf16 %v5471_v9  ;;  %5131 = vmatprep.subr.mxu1 %v4566_v31  ;;  %v4532_v32 = vsel %vm4509_vm0, %v11044_v12, %v5457_v53  ;;  %v4516_v30 = vsel %vm4509_vm0, %v11063_v36, %v5458_v47  ;;  %v13067_v29 = vld [vmem:[#allocation277_spill] sm:$0xff] }
 0x6c1   : > { %v4515_v15 = vsel %vm4509_vm0, %v4482_v16, %v5463_v21  ;;  %v5473_v19 = vunpack.i.h.bf16 %v5471_v9  ;;  %5132 = vmatpush3.msra.mxu1 %v4550_v37  ;;  %v4565_v43 = vsel %vm4542_vm1, %v4532_v32, %v9944_v18  ;;  %v4549_v3 = vsel %vm4542_vm1, %v4516_v30, %v9944_v18 }
 0x6c2   : > { %v4480_v41 = vsel %vm4476_vm13, %v11012_v17, 0.0  ;;  %v5468_v2 = vunpack.i.h.bf16 %v5466_v7  ;;  %v5467_v12 = vunpack.i.l.bf16 %v5466_v7  ;;  %5133 = vmatprep.subr.mxu1 %v4565_v43  ;;  %v4495_v36 = vsel %vm4476_vm13, %v4462_v62, 0.0 }
 0x6c3   : > { %v4479_v16 = vsel %vm4476_vm13, %v11053_v10, 0.0  ;;  %v4411_v23 = vsel %vm4410_vm2, %v4378_v35, %v10996_v58  ;;  %5134 = vmatpush3.msra.mxu1 %v4549_v3  ;;  %v4564_v25 = vsel %vm4542_vm1, %v4531_v14, %v9944_v18  ;;  %v4548_v8 = vsel %vm4542_vm1, %v4515_v15, %v9944_v18  ;;  %v5476_v60 = vpop.permute.xlu1 %5475  ;;  %vm13076_vm2 = vmand %vm10518_vm9, %vm10563_vm7  ;;  %v13081_v15 = vld [vmem:[#allocation226_spill] sm:$0xff] }
 0x6c4   : > { %v4461_v17 = vsel %vm4443_vm5, %v11103_v5, %v13059_v42  ;;  %v5482_v22 = vunpack.i.l.bf16 %v5481_v1  ;;  %5135 = vmatprep.subr.mxu1 %v4564_v25  ;;  %v4530_v33 = vsel %vm4509_vm0, %v4497_v34, %v5467_v12  ;;  %v4514_v10 = vsel %vm4509_vm0, %v4481_v48, %v5468_v2  ;;  %v13088_v42 = vld [vmem:[#allocation272_spill] sm:$0xff] }
 0x6c5   : > { %v4529_v46 = vsel %vm4509_vm0, %v4496_v57, %v5472_v49  ;;  %v5483_v58 = vunpack.i.h.bf16 %v5481_v1  ;;  %5136 = vmatpush3.msra.mxu1 %v4548_v8  ;;  %v4563_v20 = vsel %vm4542_vm1, %v4530_v33, %v9944_v18  ;;  %v4547_v56 = vsel %vm4542_vm1, %v4514_v10, %v9944_v18  ;;  %v13077_v49 = vld [vmem:[#allocation219_spill] sm:$0xff] }
 0x6c6   : > { %v4513_v40 = vsel %vm4509_vm0, %v4480_v41, %v5473_v19  ;;  %v5478_v5 = vunpack.i.h.bf16 %v5476_v60  ;;  %v5477_v45 = vunpack.i.l.bf16 %v5476_v60  ;;  %5137 = vmatprep.subr.mxu1 %v4563_v20  ;;  %v4494_v38 = vsel %vm4476_vm13, %v4461_v17, 0.0 }
 0x6c7   : > { %v4460_v48 = vsel %vm4443_vm5, %v11048_v24, %v13060_v39  ;;  %v4444_v6 = vsel %vm4443_vm5, %v4411_v23, %v13061_v52  ;;  %5138 = vmatpush3.msra.mxu1 %v4547_v56  ;;  %v4562_v0 = vsel %vm4542_vm1, %v4529_v46, %v9944_v18  ;;  %v13063_v26 = vmul.u32 8, %v13062_v54  ;;  %v5486_v13 = vpop.permute.xlu1 %5485 }
 0x6c8   : > { %v13068_v51 = vmul.u32 8, %v13067_v29  ;;  %5139 = vmatprep.subr.mxu1 %v4562_v0  ;;  %v4546_v24 = vsel %vm4542_vm1, %v4513_v40, %v9944_v18  ;;  %v4528_v21 = vsel %vm4509_vm0, %v4495_v36, %v5477_v45  ;;  %v4512_v9 = vsel %vm4509_vm0, %v4479_v16, %v5478_v5 }
 0x6c9   : > { %vm11210_vm12 = vcmp.ge.s32.totalorder %v13064_v55, %v13063_v26  ;;  %v4527_v11 = vsel %vm4509_vm0, %v4494_v38, %v5482_v22  ;;  %v4511_v28 = vsel %vm4509_vm0, %v4478_v59, %v5483_v58  ;;  %5140 = vmatpush3.msra.mxu1 %v4546_v24  ;;  %v4561_v4 = vsel %vm4542_vm1, %v4528_v21, %v9944_v18 }
 0x6ca   : > { %vm11217_vm11 = vcmp.lt.s32.totalorder %v13064_v55, %v13068_v51  ;;  %v4545_v27 = vsel %vm4542_vm1, %v4512_v9, %v9944_v18  ;;  %v13071_v50 = vmov 0.0   ;;  %v5488_v53 = vunpack.i.h.bf16 %v5486_v13  ;;  %5141 = vmatprep.subr.mxu1 %v4561_v4 }
 0x6cb   : > { %v5031_v47 = vsel %vm4609_vm10, 1.0, %v13071_v50  ;;  %v5487_v61 = vunpack.i.l.bf16 %v5486_v13  ;;  %v4493_v59 = vsel %vm4476_vm13, %v4460_v48, 0.0  ;;  %v5034_v31 = vsel %vm13076_vm2, 1.0, %v13071_v50  ;;  %vm4611_vm5 = vmand %vm11210_vm12, %vm11217_vm11  ;;  %5142 = vmatpush3.msra.mxu1 %v4545_v27 }
 0x6cc   : > { %v4477_v37 = vsel %vm4476_vm13, %v4444_v6, 0.0  ;;  %v4560_v14 = vsel %vm4542_vm1, %v4527_v11, %v9944_v18  ;;  %v13078_v32 = vmul.u32 8, %v13077_v49  ;;  %v13082_v19 = vmul.u32 8, %v13081_v15  ;;  %vm13087_vm13 = vmand %vm10534_vm6, %vm10577_vm8 }
 0x6cd   : > { %v4510_v1 = vsel %vm4509_vm0, %v4477_v37, %v5488_v53  ;;  %5143 = vmatprep.subr.mxu1 %v4560_v14  ;;  %v4544_v43 = vsel %vm4542_vm1, %v4511_v28, %v9944_v18  ;;  %v4526_v3 = vsel %vm4509_vm0, %v4493_v59, %v5487_v61  ;;  %v4633_v41 = vmul.f32 0.125, %v5031_v47  ;;  %vm13094_vm6 = vmand %vm10549_vm3, %vm10601_vm4 }
 0x6ce   : > { %vm11254_vm14 = vcmp.ge.s32.totalorder %v13064_v55, %v13078_v32  ;;  %vm11261_vm15 = vcmp.lt.s32.totalorder %v13064_v55, %v13082_v19  ;;  %5144 = vmatpush3.msra.mxu1 %v4544_v43  ;;  %v4559_v2 = vsel %vm4542_vm1, %v4526_v3, %v9944_v18  ;;  %v4543_v12 = vsel %vm4542_vm1, %v4510_v1, %v9944_v18  ;;  %v13090_v18 = vld [vmem:[#allocation275_spill] sm:$0xff] }
 0x6cf   : > { %v4636_v36 = vmul.f32 0.125, %v5034_v31  ;;  %v5033_v16 = vsel %vm4611_vm5, 1.0, %v13071_v50  ;;  %5145 = vmatprep.subr.mxu1 %v4559_v2  ;;  %v5036_v8 = vsel %vm13087_vm13, 1.0, %v13071_v50  ;;  %vm4613_vm9 = vmand %vm11254_vm14, %vm11261_vm15  ;;  %v13089_v17 = vmul.u32 8, %v13088_v42 }
 0x6d0   : > { %5146 = vmatpush3.msra.mxu1 %v4543_v12  ;;  %v13091_v22 = vmul.u32 8, %v13090_v18  ;;  %v4635_v33 = vmul.f32 0.125, %v5033_v16  ;;  %v4638_v10 = vmul.f32 0.125, %v5036_v8  ;;  %v5035_v46 = vsel %vm4613_vm9, 1.0, %v13071_v50 }
 0x6d1   : > { %vm4591_vm10 = vcmp.ge.s32.totalorder %v13064_v55, %v13089_v17  ;;  %4706 = vmatmul.mubr.f32.vlgmr.msra.gmra.mxu1 %v4633_v41  ;;  %v5038_v20 = vsel %vm13094_vm6, 1.0, %v13071_v50  ;;  %v4637_v56 = vmul.f32 0.125, %v5035_v46  ;;  %vm4726_vm3 = vcmask 64512  }
 0x6d2   : > { %vm4607_vm7 = vcmp.lt.s32.totalorder %v13064_v55, %v13091_v22  ;;  %4710 = vmatprep.mubr.f32.mxu1 %v4636_v36  ;;  %v4640_v40 = vmul.f32 0.125, %v5038_v20 }
 0x6d3   : > { %vm4615_vm1 = vmand %vm4591_vm10, %vm4607_vm7 }
 0x6d4   : > { %v5037_v5 = vsel %vm4615_vm1, 1.0, %v13071_v50 }
 0x6d5   : > { %4711 = vmatmul.mubr.f32.gmra.mxu1 %v4635_v33  ;;  %v4639_v45 = vmul.f32 0.125, %v5037_v5 }
 0x6d6   : > { %4715 = vmatprep.mubr.f32.mxu1 %v4638_v10 }
 0x6d9   : > { %4716 = vmatmul.mubr.f32.gmra.mxu1 %v4637_v56 }
 0x6da   : > { %4720 = vmatprep.mubr.f32.mxu1 %v4640_v40 }
 0x6dd   : > { %4721 = vmatmul.mubr.f32.gmra.mxu1 %v4639_v45 }
 0x791   : > { %v5147_v38 = vpop.f32.mrf.mxu1 }
 0x793   : > { %v5148_v39 = vpop.f32.mrf.mxu1 }
 0x794   : > { %v5149_v48 = vadd.f32 %v5148_v39, %v5147_v38 }
 0x795   : > { %v5150_v52 = vpop.f32.mrf.mxu1 }
 0x796   : > { %4727 = vst.msk [vmem:[%s218_s27] sm:$0xff] %vm4726_vm3, %v5149_v48 }
 0x797   : > { %v5151_v6 = vpop.f32.mrf.mxu1 }
 0x798   : > { %v5152_v0 = vadd.f32 %v5151_v6, %v5150_v52 }
 0x799   : > { %v5153_v54 = vpop.f32.mrf.mxu1 }
 0x79a   : > { %4728 = vst.msk [vmem:[%s218_s27 + $0x8] sm:$0xff] %vm4726_vm3, %v5152_v0 }
 0x79b   : > { %v5154_v26 = vpop.f32.mrf.mxu1 }
 0x79c   : > { %v5155_v55 = vadd.f32 %v5154_v26, %v5153_v54 }
 0x79d   : > { %v5156_v63 = vpop.f32.mrf.mxu1 }
 0x79e   : > { %4729 = vst.msk [vmem:[%s218_s27 + $0x10] sm:$0xff] %vm4726_vm3, %v5155_v55 }
 0x79f   : > { %v5157_v29 = vpop.f32.mrf.mxu1 }
 0x7a0   : > { %v5158_v51 = vadd.f32 %v5157_v29, %v5156_v63 }
 0x7a2   : > { %4730 = vst.msk [vmem:[%s218_s27 + $0x18] sm:$0xff] %vm4726_vm3, %v5158_v51 }
 0x7a3 PF: > { %p15_p3 = scmp.ge.s32.totalorder %s6001_s17, 4   ;;  %s13095_s12 = smov %s5940_s13 }
 0x7a4   : > { %s13096_s13 = smov %s5944_s14  ;;  %s13097_s14 = smov %s6011_s20 }
 0x7a5   : > { %s13098_s15 = smov %s6001_s17  ;;  %17 = sbr.rel (!%p15_p3) target bundleno = 5 (0x5), region = 82 }
 0x7aa   :  { %4752 = vsyncpa [#allocation3], 1 }
 0x7ab   :  { %4754 = vsyncpa [#allocation3 + $0x1], 1 }
 0x7ac   :  { %4755 = vsyncpa [#allocation7], 1 }
 0x7ad   :  { %4757 = vsyncpa [#allocation7 + $0x1], 1 }
 0x7ae   :  { %4758 = vsyncpa [#allocation4], 1 }
 0x7af   :  { %4760 = vsyncpa [#allocation4 + $0x1], 1 }

</bundles_post_ra>
